<compile_context>
chip_gen: v6e
topology: v6e:2x2x1
jax: 0.10.0
libtpu: 0.0.40
codegen_flags: <defaults>
</compile_context>

<pallas_src>
import functools

import jax
import jax.numpy as jnp
from jax.experimental import pallas as pl
from jax.experimental.pallas import tpu as pltpu


LANE = 128
VMEM_LIMIT = 32 * 1024 * 1024      # <= scoped default on v5e/v6e/v7x (v7x: 64 MiB physical)
IMG_C_PAD = 8                      # small pad of the 3-channel image for clean bf16 packing


def _round_up(x, m):
    return ((x + m - 1) // m) * m


# --------------------------------------------------------------------------
# Kernel 1: tiled MXU matmul with fused BN-shift / residual / ReLU epilogue.
#   Used by every 1x1 conv, the downsample shortcuts and the final FC.
# --------------------------------------------------------------------------

def _mm_kernel(x_ref, w_ref, shift_ref, o_ref, acc_ref, *, relu):
    k = pl.program_id(2)

    @pl.when(k == 0)
    def _init():
        acc_ref[...] = jnp.zeros_like(acc_ref)

    acc_ref[...] += jnp.dot(x_ref[...], w_ref[...],
                            preferred_element_type=jnp.float32)

    @pl.when(k == pl.num_programs(2) - 1)
    def _epilogue():
        y = acc_ref[...] + shift_ref[...]
        if relu:
            y = jnp.maximum(y, 0.0)
        o_ref[...] = y.astype(o_ref.dtype)


def _mm_res_kernel(x_ref, w_ref, shift_ref, r_ref, o_ref, acc_ref, *, relu):
    k = pl.program_id(2)

    @pl.when(k == 0)
    def _init():
        acc_ref[...] = jnp.zeros_like(acc_ref)

    acc_ref[...] += jnp.dot(x_ref[...], w_ref[...],
                            preferred_element_type=jnp.float32)

    @pl.when(k == pl.num_programs(2) - 1)
    def _epilogue():
        y = acc_ref[...] + shift_ref[...] + r_ref[...].astype(jnp.float32)
        if relu:
            y = jnp.maximum(y, 0.0)
        o_ref[...] = y.astype(o_ref.dtype)


def matmul_fused(x, w, shift, residual=None, relu=False, out_dtype=jnp.bfloat16):
    """maybe_relu(x @ w + shift [+ residual]).

    x: (M, K), cast to bf16.   w: (K, Np) bf16 (BN scale pre-folded, Np % 128 == 0).
    shift: (1, Np) f32.   residual: (M, Np) or None.   Returns (M, Np) in out_dtype.
    """
    M, K = x.shape
    Kw, Np = w.shape
    assert K == Kw and Np % LANE == 0

    TM = 256 if M >= 256 else _round_up(M, 8)
    TN = 256 if (Np >= 256 and Np % 256 == 0) else LANE
    TK = K if K <= 512 else 512
    Mp = _round_up(M, TM)
    Kp = _round_up(K, TK)

    xb = x.astype(jnp.bfloat16)
    if (Mp, Kp) != (M, K):
        xb = jnp.pad(xb, ((0, Mp - M), (0, Kp - K)))
    wb = w if Kp == K else jnp.pad(w, ((0, Kp - K), (0, 0)))

    in_specs = [
        pl.BlockSpec((TM, TK), lambda i, j, k: (i, k)),
        pl.BlockSpec((TK, TN), lambda i, j, k: (k, j)),
        pl.BlockSpec((1, TN), lambda i, j, k: (0, j)),
    ]
    args = [xb, wb, shift]
    if residual is not None:
        rb = residual.astype(jnp.bfloat16)
        if Mp != M:
            rb = jnp.pad(rb, ((0, Mp - M), (0, 0)))
        in_specs.append(pl.BlockSpec((TM, TN), lambda i, j, k: (i, j)))
        args.append(rb)
        kernel = functools.partial(_mm_res_kernel, relu=relu)
    else:
        kernel = functools.partial(_mm_kernel, relu=relu)

    out_bytes = Mp * Np * jnp.dtype(out_dtype).itemsize
    cost = pl.CostEstimate(
        flops=2 * Mp * Np * Kp,
        transcendentals=0,
        bytes_accessed=2 * (Mp * Kp + Kp * Np) + 4 * Np + out_bytes
                       + (2 * Mp * Np if residual is not None else 0))

    out = pl.pallas_call(
        kernel,
        out_shape=jax.ShapeDtypeStruct((Mp, Np), out_dtype),
        grid=(Mp // TM, Np // TN, Kp // TK),
        in_specs=in_specs,
        out_specs=pl.BlockSpec((TM, TN), lambda i, j, k: (i, j)),
        scratch_shapes=[pltpu.VMEM((TM, TN), jnp.float32)],
        compiler_params=pltpu.CompilerParams(
            dimension_semantics=("parallel", "parallel", "arbitrary"),
            vmem_limit_bytes=VMEM_LIMIT),
        cost_estimate=cost,
    )(*args)
    return out[:M] if Mp != M else out


# --------------------------------------------------------------------------
# Kernel 2: direct spatial conv (7x7 / 3x3), no im2col in HBM.
#   grid = (batch, output_row); the ki row shift lives in the index_map, the
#   kj column shift is a contiguous in-kernel slice of the stride-phase rows.
# --------------------------------------------------------------------------

def _conv_rows_kernel(*refs, kh, kw, stride, ow, relu):
    nin = kh * stride
    x_refs = refs[:nin]
    w_ref, shift_ref, o_ref = refs[nin], refs[nin + 1], refs[nin + 2]
    coutp = o_ref.shape[-1]
    acc = jnp.zeros((ow, coutp), jnp.float32)
    for ki in range(kh):
        for kj in range(kw):
            ph, c0 = kj % stride, kj // stride
            lhs = x_refs[ki * stride + ph][0, 0, c0:c0 + ow, :]
            acc = acc + jnp.dot(lhs, w_ref[ki, kj],
                                preferred_element_type=jnp.float32)
    y = acc + shift_ref[...]
    if relu:
        y = jnp.maximum(y, 0.0)
    o_ref[0, 0] = y.astype(o_ref.dtype)


def conv_spatial(x, w4, shift, stride, pad, relu):
    """kh x kw conv with fused BN shift + ReLU.

    x: (N, H, W, Cin) bf16.  w4: (kh, kw, Cin, Coutp) bf16 (BN scale folded).
    shift: (1, Coutp) f32.   Returns (N, OH, OW, Coutp) bf16.
    """
    N, H, W, Cin = x.shape
    kh, kw, _, coutp = w4.shape
    if pad:
        x = jnp.pad(x, ((0, 0), (pad, pad), (pad, pad), (0, 0)))
    Hp, Wp = H + 2 * pad, W + 2 * pad
    oh = (Hp - kh) // stride + 1
    ow = (Wp - kw) // stride + 1
    # Split the width into `stride` phases so every in-kernel column slice is
    # contiguous; only kh rows per output row are ever DMA'd from HBM.
    phases = [x[:, :, p::stride, :] for p in range(stride)]

    in_arrays, in_specs = [], []
    for ki in range(kh):
        for ph in range(stride):
            arr = phases[ph]
            in_arrays.append(arr)
            in_specs.append(pl.BlockSpec(
                (1, 1, arr.shape[2], Cin),
                lambda n, oy, ki=ki: (n, oy * stride + ki, 0, 0)))
    in_specs.append(pl.BlockSpec((kh, kw, Cin, coutp), lambda n, oy: (0, 0, 0, 0)))
    in_specs.append(pl.BlockSpec((1, coutp), lambda n, oy: (0, 0)))

    cost = pl.CostEstimate(
        flops=2 * N * oh * ow * kh * kw * Cin * coutp,
        transcendentals=0,
        bytes_accessed=2 * (N * Hp * Wp * Cin * kh + kh * kw * Cin * coutp
                            + N * oh * ow * coutp))

    return pl.pallas_call(
        functools.partial(_conv_rows_kernel, kh=kh, kw=kw, stride=stride,
                          ow=ow, relu=relu),
        out_shape=jax.ShapeDtypeStruct((N, oh, ow, coutp), jnp.bfloat16),
        grid=(N, oh),
        in_specs=in_specs,
        out_specs=pl.BlockSpec((1, 1, ow, coutp), lambda n, oy: (n, oy, 0, 0)),
        compiler_params=pltpu.CompilerParams(
            dimension_semantics=("parallel", "parallel"),
            vmem_limit_bytes=VMEM_LIMIT),
        cost_estimate=cost,
    )(*in_arrays, w4, shift)


# --------------------------------------------------------------------------
# Kernel 3: 3x3 / stride-2 / pad-1 max pool (running in-kernel max).
# --------------------------------------------------------------------------

def _maxpool_rows_kernel(*refs, kh, kw, stride, ow):
    nin = kh * stride
    x_refs = refs[:nin]
    o_ref = refs[nin]
    best = None
    for ki in range(kh):
        for kj in range(kw):
            ph, c0 = kj % stride, kj // stride
            v = x_refs[ki * stride + ph][0, 0, c0:c0 + ow, :]
            best = v if best is None else jnp.maximum(best, v)
    o_ref[0, 0] = best


def maxpool_3x3_s2(x):
    N, H, W, C = x.shape
    kh = kw = 3
    stride, pad = 2, 1
    xp = jnp.pad(x, ((0, 0), (pad, pad), (pad, pad), (0, 0)),
                 constant_values=-jnp.inf)
    Hp, Wp = H + 2, W + 2
    oh = (Hp - kh) // stride + 1
    ow = (Wp - kw) // stride + 1
    phases = [xp[:, :, p::stride, :] for p in range(stride)]

    in_arrays, in_specs = [], []
    for ki in range(kh):
        for ph in range(stride):
            arr = phases[ph]
            in_arrays.append(arr)
            in_specs.append(pl.BlockSpec(
                (1, 1, arr.shape[2], C),
                lambda n, oy, ki=ki: (n, oy * stride + ki, 0, 0)))

    return pl.pallas_call(
        functools.partial(_maxpool_rows_kernel, kh=kh, kw=kw, stride=stride, ow=ow),
        out_shape=jax.ShapeDtypeStruct((N, oh, ow, C), x.dtype),
        grid=(N, oh),
        in_specs=in_specs,
        out_specs=pl.BlockSpec((1, 1, ow, C), lambda n, oy: (n, oy, 0, 0)),
        compiler_params=pltpu.CompilerParams(
            dimension_semantics=("parallel", "parallel"),
            vmem_limit_bytes=VMEM_LIMIT),
    )(*in_arrays)


# --------------------------------------------------------------------------
# Kernel 4: global average pool, tiled over HW with a VMEM accumulator.
# --------------------------------------------------------------------------

def _avgpool_kernel(x_ref, o_ref, acc_ref, *, inv_hw):
    t = pl.program_id(0)

    @pl.when(t == 0)
    def _init():
        acc_ref[...] = jnp.zeros_like(acc_ref)

    acc_ref[...] += jnp.sum(x_ref[...].astype(jnp.float32), axis=1)

    @pl.when(t == pl.num_programs(0) - 1)
    def _fin():
        o_ref[...] = acc_ref[...] * inv_hw


def global_avgpool(x):
    N, H, W, C = x.shape
    HW = H * W
    x3 = x.reshape(N, HW, C)
    THW = min(512, _round_up(HW, 8))
    HWp = _round_up(HW, THW)
    if HWp != HW:
        x3 = jnp.pad(x3, ((0, 0), (0, HWp - HW), (0, 0)))
    return pl.pallas_call(
        functools.partial(_avgpool_kernel, inv_hw=1.0 / HW),
        out_shape=jax.ShapeDtypeStruct((N, C), jnp.float32),
        grid=(HWp // THW,),
        in_specs=[pl.BlockSpec((N, THW, C), lambda t: (0, t, 0))],
        out_specs=pl.BlockSpec((N, C), lambda t: (0, 0)),
        scratch_shapes=[pltpu.VMEM((N, C), jnp.float32)],
        compiler_params=pltpu.CompilerParams(
            dimension_semantics=("arbitrary",),
            vmem_limit_bytes=VMEM_LIMIT),
    )(x3)


# --------------------------------------------------------------------------
# Model glue (plain JAX reshapes / strided phase views, all under jit).
# --------------------------------------------------------------------------

def conv1x1_bn(x, w, shift, stride=1, relu=True, residual=None):
    if stride > 1:
        x = x[:, ::stride, ::stride, :]
    N, H, W, C = x.shape
    r2 = residual.reshape(N * H * W, -1) if residual is not None else None
    out = matmul_fused(x.reshape(N * H * W, C), w, shift, residual=r2, relu=relu)
    return out.reshape(N, H, W, w.shape[1])


def bottleneck(x, q, stride):
    out = conv1x1_bn(x, q['w1'], q['b1'], relu=True)
    out = conv_spatial(out, q['w2'], q['b2'], stride=stride, pad=1, relu=True)
    if 'wd' in q:
        identity = conv1x1_bn(x, q['wd'], q['bd'], stride=stride, relu=False)
    else:
        identity = x
    # conv3 (1x1) with the residual add + final ReLU fused into its epilogue.
    return conv1x1_bn(out, q['w3'], q['b3'], relu=True, residual=identity)


def tsn_forward(x_nchw, params, *, strides, num_class):
    """TSN.forward(input) == base_model(input)."""
    x = jnp.transpose(x_nchw, (0, 2, 3, 1)).astype(jnp.bfloat16)   # NCHW -> NHWC
    x = jnp.pad(x, ((0, 0), (0, 0), (0, 0), (0, IMG_C_PAD - x.shape[-1])))
    x = conv_spatial(x, params['stem_w'], params['stem_b'],
                     stride=2, pad=3, relu=True)
    x = maxpool_3x3_s2(x)
    for q, s in zip(params['blocks'], strides):
        x = bottleneck(x, q, s)
    feats = global_avgpool(x)                                      # (N, Cp) f32
    logits = matmul_fused(feats, params['fc_w'], params['fc_b'],
                          relu=False, out_dtype=jnp.float32)
    return logits[:, :num_class]


# --------------------------------------------------------------------------
# Deterministic synthetic parameters (PyTorch-style layout) + one-time prepack.
# --------------------------------------------------------------------------

def _fold_bn(gamma, beta, mean, var, eps=1e-5):
    scale = gamma / jnp.sqrt(var + eps)
    return scale, beta - mean * scale


def _init_bn(key, c):
    k1, k2, k3, k4 = jax.random.split(key, 4)
    gamma = 1.0 + 0.1 * jax.random.normal(k1, (c,), jnp.float32)
    beta = 0.1 * jax.random.normal(k2, (c,), jnp.float32)
    mean = 0.05 * jax.random.normal(k3, (c,), jnp.float32)
    var = 1.0 + 0.1 * jax.random.uniform(k4, (c,), jnp.float32)
    return _fold_bn(gamma, beta, mean, var)


def _init_conv(key, cout, cin, kh, kw):
    fan_in = cin * kh * kw
    return jax.random.normal(key, (cout, cin, kh, kw), jnp.float32) * (2.0 / fan_in) ** 0.5


def init_raw_params(key, num_class, stem_width=16, widths=(8, 16, 32, 64),
                    blocks=(1, 1, 1, 1), expansion=4):
    keys = iter(jax.random.split(key, 256))
    raw = {'stem_w': _init_conv(next(keys), stem_width, 3, 7, 7)}
    raw['stem_s'], raw['stem_b'] = _init_bn(next(keys), stem_width)
    inplanes = stem_width
    stages = []
    for si, (w, nb) in enumerate(zip(widths, blocks)):
        stage_stride = 1 if si == 0 else 2
        blks = []
        for bi in range(nb):
            s = stage_stride if bi == 0 else 1
            outc = w * expansion
            p = {'w1': _init_conv(next(keys), w, inplanes, 1, 1)}
            p['s1'], p['b1'] = _init_bn(next(keys), w)
            p['w2'] = _init_conv(next(keys), w, w, 3, 3)
            p['s2'], p['b2'] = _init_bn(next(keys), w)
            p['w3'] = _init_conv(next(keys), outc, w, 1, 1)
            p['s3'], p['b3'] = _init_bn(next(keys), outc)
            if s != 1 or inplanes != outc:
                p['wd'] = _init_conv(next(keys), outc, inplanes, 1, 1)
                p['sd'], p['bd'] = _init_bn(next(keys), outc)
            blks.append((p, s))
            inplanes = outc
        stages.append(blks)
    raw['stages'] = stages
    # TSN replaces base_model.fc with nn.Linear(in_features, num_class).
    raw['fc_w'] = 0.001 * jax.random.normal(next(keys), (num_class, inplanes), jnp.float32)
    raw['fc_b'] = jnp.zeros((num_class,), jnp.float32)
    return raw


def _prepack_1x1(w, scale, shift, cin_pad):
    cout, cin = w.shape[:2]
    coutp = _round_up(cout, LANE)
    wm = (w[:, :, 0, 0] * scale[:, None]).T                       # (cin, cout), scale folded
    wm = jnp.pad(wm, ((0, cin_pad - cin), (0, coutp - cout)))
    sh = jnp.pad(shift, (0, coutp - cout)).reshape(1, coutp).astype(jnp.float32)
    return wm.astype(jnp.bfloat16), sh


def _prepack_spatial(w, scale, shift, cin_pad):
    cout, cin, kh, kw = w.shape
    coutp = _round_up(cout, LANE)
    w4 = jnp.transpose(w * scale[:, None, None, None], (2, 3, 1, 0))   # (kh,kw,cin,cout)
    w4 = jnp.pad(w4, ((0, 0), (0, 0), (0, cin_pad - cin), (0, coutp - cout)))
    sh = jnp.pad(shift, (0, coutp - cout)).reshape(1, coutp).astype(jnp.float32)
    return w4.astype(jnp.bfloat16), sh


def _prepack_fc(w, b, cin_pad):
    nc, cin = w.shape
    ncp = _round_up(nc, LANE)
    wm = jnp.pad(w.T, ((0, cin_pad - cin), (0, ncp - nc)))
    bb = jnp.pad(b, (0, ncp - nc)).reshape(1, ncp).astype(jnp.float32)
    return wm.astype(jnp.bfloat16), bb


def prepack_params(raw):
    """One-time weight packing (outside the per-forward path): BN scale folded
    into conv weight columns, weights transposed to kernel layouts, channel
    dims zero-padded to multiples of 128 (lane-dense), cast to bf16."""
    pk = {}
    pk['stem_w'], pk['stem_b'] = _prepack_spatial(
        raw['stem_w'], raw['stem_s'], raw['stem_b'], IMG_C_PAD)
    cur = _round_up(raw['stem_w'].shape[0], LANE)
    blocks, strides = [], []
    for blks in raw['stages']:
        for p, s in blks:
            q = {}
            q['w1'], q['b1'] = _prepack_1x1(p['w1'], p['s1'], p['b1'], cur)
            c1 = _round_up(p['w1'].shape[0], LANE)
            q['w2'], q['b2'] = _prepack_spatial(p['w2'], p['s2'], p['b2'], c1)
            c2 = _round_up(p['w2'].shape[0], LANE)
            q['w3'], q['b3'] = _prepack_1x1(p['w3'], p['s3'], p['b3'], c2)
            if 'wd' in p:
                q['wd'], q['bd'] = _prepack_1x1(p['wd'], p['sd'], p['bd'], cur)
            blocks.append(q)
            strides.append(s)
            cur = _round_up(p['w3'].shape[0], LANE)
    pk['blocks'] = blocks
    pk['fc_w'], pk['fc_b'] = _prepack_fc(raw['fc_w'], raw['fc_b'], cur)
    return pk, tuple(strides)


if __name__ == "__main__":
    key = jax.random.PRNGKey(0)
    kx, kp = jax.random.split(key)
    num_class = 10
    # Small-shape stand-in for the (B, 3, 224, 224) RGB TSN input.
    x = jax.random.normal(kx, (2, 3, 32, 32), jnp.float32)
    raw = init_raw_params(kp, num_class)
    params, strides = prepack_params(raw)

    fwd = jax.jit(functools.partial(tsn_forward, strides=strides,
                                    num_class=num_class))
    logits = fwd(x, params)
    jax.block_until_ready(logits)
    assert logits.shape == (2, num_class), logits.shape
    assert bool(jnp.all(jnp.isfinite(logits)))
    print("KERNEL_OK")
</pallas_src>

<mosaic_0001>
module attributes {stable_mosaic.version = 11 : i64} {
  func.func @_conv_rows_kernel(%arg0: i32, %arg1: i32, %arg2: memref<1x1x19x8xbf16, #tpu.memory_space<vmem>>, %arg3: memref<1x1x19x8xbf16, #tpu.memory_space<vmem>>, %arg4: memref<1x1x19x8xbf16, #tpu.memory_space<vmem>>, %arg5: memref<1x1x19x8xbf16, #tpu.memory_space<vmem>>, %arg6: memref<1x1x19x8xbf16, #tpu.memory_space<vmem>>, %arg7: memref<1x1x19x8xbf16, #tpu.memory_space<vmem>>, %arg8: memref<1x1x19x8xbf16, #tpu.memory_space<vmem>>, %arg9: memref<1x1x19x8xbf16, #tpu.memory_space<vmem>>, %arg10: memref<1x1x19x8xbf16, #tpu.memory_space<vmem>>, %arg11: memref<1x1x19x8xbf16, #tpu.memory_space<vmem>>, %arg12: memref<1x1x19x8xbf16, #tpu.memory_space<vmem>>, %arg13: memref<1x1x19x8xbf16, #tpu.memory_space<vmem>>, %arg14: memref<1x1x19x8xbf16, #tpu.memory_space<vmem>>, %arg15: memref<1x1x19x8xbf16, #tpu.memory_space<vmem>>, %arg16: memref<7x7x8x128xbf16, #tpu.memory_space<vmem>>, %arg17: memref<1x128xf32, #tpu.memory_space<vmem>>, %arg18: memref<1x1x16x128xbf16, #tpu.memory_space<vmem>>) attributes {dimension_semantics = [#tpu.dimension_semantics<parallel>, #tpu.dimension_semantics<parallel>], iteration_bounds = array<i64: 2, 16>, scalar_prefetch = 0 : i64, scratch_operands = 0 : i64, tpu.core_type = #tpu.core_type<tc>, window_params = [{transform_indices = @transform_0, window_bounds = array<i64: 1, 1, 19, 8>}, {transform_indices = @transform_1, window_bounds = array<i64: 1, 1, 19, 8>}, {transform_indices = @transform_2, window_bounds = array<i64: 1, 1, 19, 8>}, {transform_indices = @transform_3, window_bounds = array<i64: 1, 1, 19, 8>}, {transform_indices = @transform_4, window_bounds = array<i64: 1, 1, 19, 8>}, {transform_indices = @transform_5, window_bounds = array<i64: 1, 1, 19, 8>}, {transform_indices = @transform_6, window_bounds = array<i64: 1, 1, 19, 8>}, {transform_indices = @transform_7, window_bounds = array<i64: 1, 1, 19, 8>}, {transform_indices = @transform_8, window_bounds = array<i64: 1, 1, 19, 8>}, {transform_indices = @transform_9, window_bounds = array<i64: 1, 1, 19, 8>}, {transform_indices = @transform_10, window_bounds = array<i64: 1, 1, 19, 8>}, {transform_indices = @transform_11, window_bounds = array<i64: 1, 1, 19, 8>}, {transform_indices = @transform_12, window_bounds = array<i64: 1, 1, 19, 8>}, {transform_indices = @transform_13, window_bounds = array<i64: 1, 1, 19, 8>}, {pipeline_mode = #tpu.pipeline_mode<synchronous>, transform_indices = @transform_14, window_bounds = array<i64: 7, 7, 8, 128>}, {pipeline_mode = #tpu.pipeline_mode<synchronous>, transform_indices = @transform_15, window_bounds = array<i64: 1, 128>}, {transform_indices = @transform_16, window_bounds = array<i64: 1, 1, 16, 128>}]} {
    %cst = arith.constant 0.000000e+00 : f32
    %0 = vector.broadcast %cst : f32 to vector<16x128xf32>
    %c0 = arith.constant 0 : index
    %c0_0 = arith.constant 0 : index
    %c0_1 = arith.constant 0 : index
    %c0_2 = arith.constant 0 : index
    %1 = vector.load %arg2[%c0, %c0_0, %c0_1, %c0_2] : memref<1x1x19x8xbf16, #tpu.memory_space<vmem>>, vector<1x1x16x8xbf16>
    %2 = vector.shape_cast %1 : vector<1x1x16x8xbf16> to vector<16x8xbf16>
    %c0_3 = arith.constant 0 : index
    %c0_4 = arith.constant 0 : index
    %c0_5 = arith.constant 0 : index
    %c0_6 = arith.constant 0 : index
    %3 = vector.load %arg16[%c0_3, %c0_4, %c0_5, %c0_6] : memref<7x7x8x128xbf16, #tpu.memory_space<vmem>>, vector<1x1x8x128xbf16>
    %4 = vector.shape_cast %3 : vector<1x1x8x128xbf16> to vector<8x128xbf16>
    %cst_7 = arith.constant dense<0.000000e+00> : vector<16x128xf32>
    %5 = tpu.matmul %2, %4, %cst_7 {dimension_numbers = #tpu.dot_dimension_numbers<[1], [0], [0], [1], [0, 0, 1, 1], [], []>} : vector<16x8xbf16>, vector<8x128xbf16>, vector<16x128xf32> -> vector<16x128xf32>
    %6 = arith.addf %0, %5 : vector<16x128xf32>
    %c0_8 = arith.constant 0 : index
    %c0_9 = arith.constant 0 : index
    %c0_10 = arith.constant 0 : index
    %c0_11 = arith.constant 0 : index
    %7 = vector.load %arg3[%c0_8, %c0_9, %c0_10, %c0_11] : memref<1x1x19x8xbf16, #tpu.memory_space<vmem>>, vector<1x1x16x8xbf16>
    %8 = vector.shape_cast %7 : vector<1x1x16x8xbf16> to vector<16x8xbf16>
    %c0_12 = arith.constant 0 : index
    %c1 = arith.constant 1 : index
    %c0_13 = arith.constant 0 : index
    %c0_14 = arith.constant 0 : index
    %9 = vector.load %arg16[%c0_12, %c1, %c0_13, %c0_14] : memref<7x7x8x128xbf16, #tpu.memory_space<vmem>>, vector<1x1x8x128xbf16>
    %10 = vector.shape_cast %9 : vector<1x1x8x128xbf16> to vector<8x128xbf16>
    %cst_15 = arith.constant dense<0.000000e+00> : vector<16x128xf32>
    %11 = tpu.matmul %8, %10, %cst_15 {dimension_numbers = #tpu.dot_dimension_numbers<[1], [0], [0], [1], [0, 0, 1, 1], [], []>} : vector<16x8xbf16>, vector<8x128xbf16>, vector<16x128xf32> -> vector<16x128xf32>
    %12 = arith.addf %6, %11 : vector<16x128xf32>
    %c0_16 = arith.constant 0 : index
    %c0_17 = arith.constant 0 : index
    %c1_18 = arith.constant 1 : index
    %c0_19 = arith.constant 0 : index
    %13 = vector.load %arg2[%c0_16, %c0_17, %c1_18, %c0_19] : memref<1x1x19x8xbf16, #tpu.memory_space<vmem>>, vector<1x1x16x8xbf16>
    %14 = vector.shape_cast %13 : vector<1x1x16x8xbf16> to vector<16x8xbf16>
    %c0_20 = arith.constant 0 : index
    %c2 = arith.constant 2 : index
    %c0_21 = arith.constant 0 : index
    %c0_22 = arith.constant 0 : index
    %15 = vector.load %arg16[%c0_20, %c2, %c0_21, %c0_22] : memref<7x7x8x128xbf16, #tpu.memory_space<vmem>>, vector<1x1x8x128xbf16>
    %16 = vector.shape_cast %15 : vector<1x1x8x128xbf16> to vector<8x128xbf16>
    %cst_23 = arith.constant dense<0.000000e+00> : vector<16x128xf32>
    %17 = tpu.matmul %14, %16, %cst_23 {dimension_numbers = #tpu.dot_dimension_numbers<[1], [0], [0], [1], [0, 0, 1, 1], [], []>} : vector<16x8xbf16>, vector<8x128xbf16>, vector<16x128xf32> -> vector<16x128xf32>
    %18 = arith.addf %12, %17 : vector<16x128xf32>
    %c0_24 = arith.constant 0 : index
    %c0_25 = arith.constant 0 : index
    %c1_26 = arith.constant 1 : index
    %c0_27 = arith.constant 0 : index
    %19 = vector.load %arg3[%c0_24, %c0_25, %c1_26, %c0_27] : memref<1x1x19x8xbf16, #tpu.memory_space<vmem>>, vector<1x1x16x8xbf16>
    %20 = vector.shape_cast %19 : vector<1x1x16x8xbf16> to vector<16x8xbf16>
    %c0_28 = arith.constant 0 : index
    %c3 = arith.constant 3 : index
    %c0_29 = arith.constant 0 : index
    %c0_30 = arith.constant 0 : index
    %21 = vector.load %arg16[%c0_28, %c3, %c0_29, %c0_30] : memref<7x7x8x128xbf16, #tpu.memory_space<vmem>>, vector<1x1x8x128xbf16>
    %22 = vector.shape_cast %21 : vector<1x1x8x128xbf16> to vector<8x128xbf16>
    %cst_31 = arith.constant dense<0.000000e+00> : vector<16x128xf32>
    %23 = tpu.matmul %20, %22, %cst_31 {dimension_numbers = #tpu.dot_dimension_numbers<[1], [0], [0], [1], [0, 0, 1, 1], [], []>} : vector<16x8xbf16>, vector<8x128xbf16>, vector<16x128xf32> -> vector<16x128xf32>
    %24 = arith.addf %18, %23 : vector<16x128xf32>
    %c0_32 = arith.constant 0 : index
    %c0_33 = arith.constant 0 : index
    %c2_34 = arith.constant 2 : index
    %c0_35 = arith.constant 0 : index
    %25 = vector.load %arg2[%c0_32, %c0_33, %c2_34, %c0_35] : memref<1x1x19x8xbf16, #tpu.memory_space<vmem>>, vector<1x1x16x8xbf16>
    %26 = vector.shape_cast %25 : vector<1x1x16x8xbf16> to vector<16x8xbf16>
    %c0_36 = arith.constant 0 : index
    %c4 = arith.constant 4 : index
    %c0_37 = arith.constant 0 : index
    %c0_38 = arith.constant 0 : index
    %27 = vector.load %arg16[%c0_36, %c4, %c0_37, %c0_38] : memref<7x7x8x128xbf16, #tpu.memory_space<vmem>>, vector<1x1x8x128xbf16>
    %28 = vector.shape_cast %27 : vector<1x1x8x128xbf16> to vector<8x128xbf16>
    %cst_39 = arith.constant dense<0.000000e+00> : vector<16x128xf32>
    %29 = tpu.matmul %26, %28, %cst_39 {dimension_numbers = #tpu.dot_dimension_numbers<[1], [0], [0], [1], [0, 0, 1, 1], [], []>} : vector<16x8xbf16>, vector<8x128xbf16>, vector<16x128xf32> -> vector<16x128xf32>
    %30 = arith.addf %24, %29 : vector<16x128xf32>
    %c0_40 = arith.constant 0 : index
    %c0_41 = arith.constant 0 : index
    %c2_42 = arith.constant 2 : index
    %c0_43 = arith.constant 0 : index
    %31 = vector.load %arg3[%c0_40, %c0_41, %c2_42, %c0_43] : memref<1x1x19x8xbf16, #tpu.memory_space<vmem>>, vector<1x1x16x8xbf16>
    %32 = vector.shape_cast %31 : vector<1x1x16x8xbf16> to vector<16x8xbf16>
    %c0_44 = arith.constant 0 : index
    %c5 = arith.constant 5 : index
    %c0_45 = arith.constant 0 : index
    %c0_46 = arith.constant 0 : index
    %33 = vector.load %arg16[%c0_44, %c5, %c0_45, %c0_46] : memref<7x7x8x128xbf16, #tpu.memory_space<vmem>>, vector<1x1x8x128xbf16>
    %34 = vector.shape_cast %33 : vector<1x1x8x128xbf16> to vector<8x128xbf16>
    %cst_47 = arith.constant dense<0.000000e+00> : vector<16x128xf32>
    %35 = tpu.matmul %32, %34, %cst_47 {dimension_numbers = #tpu.dot_dimension_numbers<[1], [0], [0], [1], [0, 0, 1, 1], [], []>} : vector<16x8xbf16>, vector<8x128xbf16>, vector<16x128xf32> -> vector<16x128xf32>
    %36 = arith.addf %30, %35 : vector<16x128xf32>
    %c0_48 = arith.constant 0 : index
    %c0_49 = arith.constant 0 : index
    %c3_50 = arith.constant 3 : index
    %c0_51 = arith.constant 0 : index
    %37 = vector.load %arg2[%c0_48, %c0_49, %c3_50, %c0_51] : memref<1x1x19x8xbf16, #tpu.memory_space<vmem>>, vector<1x1x16x8xbf16>
    %38 = vector.shape_cast %37 : vector<1x1x16x8xbf16> to vector<16x8xbf16>
    %c0_52 = arith.constant 0 : index
    %c6 = arith.constant 6 : index
    %c0_53 = arith.constant 0 : index
    %c0_54 = arith.constant 0 : index
    %39 = vector.load %arg16[%c0_52, %c6, %c0_53, %c0_54] : memref<7x7x8x128xbf16, #tpu.memory_space<vmem>>, vector<1x1x8x128xbf16>
    %40 = vector.shape_cast %39 : vector<1x1x8x128xbf16> to vector<8x128xbf16>
    %cst_55 = arith.constant dense<0.000000e+00> : vector<16x128xf32>
    %41 = tpu.matmul %38, %40, %cst_55 {dimension_numbers = #tpu.dot_dimension_numbers<[1], [0], [0], [1], [0, 0, 1, 1], [], []>} : vector<16x8xbf16>, vector<8x128xbf16>, vector<16x128xf32> -> vector<16x128xf32>
    %42 = arith.addf %36, %41 : vector<16x128xf32>
    %c0_56 = arith.constant 0 : index
    %c0_57 = arith.constant 0 : index
    %c0_58 = arith.constant 0 : index
    %c0_59 = arith.constant 0 : index
    %43 = vector.load %arg4[%c0_56, %c0_57, %c0_58, %c0_59] : memref<1x1x19x8xbf16, #tpu.memory_space<vmem>>, vector<1x1x16x8xbf16>
    %44 = vector.shape_cast %43 : vector<1x1x16x8xbf16> to vector<16x8xbf16>
    %c1_60 = arith.constant 1 : index
    %c0_61 = arith.constant 0 : index
    %c0_62 = arith.constant 0 : index
    %c0_63 = arith.constant 0 : index
    %45 = vector.load %arg16[%c1_60, %c0_61, %c0_62, %c0_63] : memref<7x7x8x128xbf16, #tpu.memory_space<vmem>>, vector<1x1x8x128xbf16>
    %46 = vector.shape_cast %45 : vector<1x1x8x128xbf16> to vector<8x128xbf16>
    %cst_64 = arith.constant dense<0.000000e+00> : vector<16x128xf32>
    %47 = tpu.matmul %44, %46, %cst_64 {dimension_numbers = #tpu.dot_dimension_numbers<[1], [0], [0], [1], [0, 0, 1, 1], [], []>} : vector<16x8xbf16>, vector<8x128xbf16>, vector<16x128xf32> -> vector<16x128xf32>
    %48 = arith.addf %42, %47 : vector<16x128xf32>
    %c0_65 = arith.constant 0 : index
    %c0_66 = arith.constant 0 : index
    %c0_67 = arith.constant 0 : index
    %c0_68 = arith.constant 0 : index
    %49 = vector.load %arg5[%c0_65, %c0_66, %c0_67, %c0_68] : memref<1x1x19x8xbf16, #tpu.memory_space<vmem>>, vector<1x1x16x8xbf16>
    %50 = vector.shape_cast %49 : vector<1x1x16x8xbf16> to vector<16x8xbf16>
    %c1_69 = arith.constant 1 : index
    %c1_70 = arith.constant 1 : index
    %c0_71 = arith.constant 0 : index
    %c0_72 = arith.constant 0 : index
    %51 = vector.load %arg16[%c1_69, %c1_70, %c0_71, %c0_72] : memref<7x7x8x128xbf16, #tpu.memory_space<vmem>>, vector<1x1x8x128xbf16>
    %52 = vector.shape_cast %51 : vector<1x1x8x128xbf16> to vector<8x128xbf16>
    %cst_73 = arith.constant dense<0.000000e+00> : vector<16x128xf32>
    %53 = tpu.matmul %50, %52, %cst_73 {dimension_numbers = #tpu.dot_dimension_numbers<[1], [0], [0], [1], [0, 0, 1, 1], [], []>} : vector<16x8xbf16>, vector<8x128xbf16>, vector<16x128xf32> -> vector<16x128xf32>
    %54 = arith.addf %48, %53 : vector<16x128xf32>
    %c0_74 = arith.constant 0 : index
    %c0_75 = arith.constant 0 : index
    %c1_76 = arith.constant 1 : index
    %c0_77 = arith.constant 0 : index
    %55 = vector.load %arg4[%c0_74, %c0_75, %c1_76, %c0_77] : memref<1x1x19x8xbf16, #tpu.memory_space<vmem>>, vector<1x1x16x8xbf16>
    %56 = vector.shape_cast %55 : vector<1x1x16x8xbf16> to vector<16x8xbf16>
    %c1_78 = arith.constant 1 : index
    %c2_79 = arith.constant 2 : index
    %c0_80 = arith.constant 0 : index
    %c0_81 = arith.constant 0 : index
    %57 = vector.load %arg16[%c1_78, %c2_79, %c0_80, %c0_81] : memref<7x7x8x128xbf16, #tpu.memory_space<vmem>>, vector<1x1x8x128xbf16>
    %58 = vector.shape_cast %57 : vector<1x1x8x128xbf16> to vector<8x128xbf16>
    %cst_82 = arith.constant dense<0.000000e+00> : vector<16x128xf32>
    %59 = tpu.matmul %56, %58, %cst_82 {dimension_numbers = #tpu.dot_dimension_numbers<[1], [0], [0], [1], [0, 0, 1, 1], [], []>} : vector<16x8xbf16>, vector<8x128xbf16>, vector<16x128xf32> -> vector<16x128xf32>
    %60 = arith.addf %54, %59 : vector<16x128xf32>
    %c0_83 = arith.constant 0 : index
    %c0_84 = arith.constant 0 : index
    %c1_85 = arith.constant 1 : index
    %c0_86 = arith.constant 0 : index
    %61 = vector.load %arg5[%c0_83, %c0_84, %c1_85, %c0_86] : memref<1x1x19x8xbf16, #tpu.memory_space<vmem>>, vector<1x1x16x8xbf16>
    %62 = vector.shape_cast %61 : vector<1x1x16x8xbf16> to vector<16x8xbf16>
    %c1_87 = arith.constant 1 : index
    %c3_88 = arith.constant 3 : index
    %c0_89 = arith.constant 0 : index
    %c0_90 = arith.constant 0 : index
    %63 = vector.load %arg16[%c1_87, %c3_88, %c0_89, %c0_90] : memref<7x7x8x128xbf16, #tpu.memory_space<vmem>>, vector<1x1x8x128xbf16>
    %64 = vector.shape_cast %63 : vector<1x1x8x128xbf16> to vector<8x128xbf16>
    %cst_91 = arith.constant dense<0.000000e+00> : vector<16x128xf32>
    %65 = tpu.matmul %62, %64, %cst_91 {dimension_numbers = #tpu.dot_dimension_numbers<[1], [0], [0], [1], [0, 0, 1, 1], [], []>} : vector<16x8xbf16>, vector<8x128xbf16>, vector<16x128xf32> -> vector<16x128xf32>
    %66 = arith.addf %60, %65 : vector<16x128xf32>
    %c0_92 = arith.constant 0 : index
    %c0_93 = arith.constant 0 : index
    %c2_94 = arith.constant 2 : index
    %c0_95 = arith.constant 0 : index
    %67 = vector.load %arg4[%c0_92, %c0_93, %c2_94, %c0_95] : memref<1x1x19x8xbf16, #tpu.memory_space<vmem>>, vector<1x1x16x8xbf16>
    %68 = vector.shape_cast %67 : vector<1x1x16x8xbf16> to vector<16x8xbf16>
    %c1_96 = arith.constant 1 : index
    %c4_97 = arith.constant 4 : index
    %c0_98 = arith.constant 0 : index
    %c0_99 = arith.constant 0 : index
    %69 = vector.load %arg16[%c1_96, %c4_97, %c0_98, %c0_99] : memref<7x7x8x128xbf16, #tpu.memory_space<vmem>>, vector<1x1x8x128xbf16>
    %70 = vector.shape_cast %69 : vector<1x1x8x128xbf16> to vector<8x128xbf16>
    %cst_100 = arith.constant dense<0.000000e+00> : vector<16x128xf32>
    %71 = tpu.matmul %68, %70, %cst_100 {dimension_numbers = #tpu.dot_dimension_numbers<[1], [0], [0], [1], [0, 0, 1, 1], [], []>} : vector<16x8xbf16>, vector<8x128xbf16>, vector<16x128xf32> -> vector<16x128xf32>
    %72 = arith.addf %66, %71 : vector<16x128xf32>
    %c0_101 = arith.constant 0 : index
    %c0_102 = arith.constant 0 : index
    %c2_103 = arith.constant 2 : index
    %c0_104 = arith.constant 0 : index
    %73 = vector.load %arg5[%c0_101, %c0_102, %c2_103, %c0_104] : memref<1x1x19x8xbf16, #tpu.memory_space<vmem>>, vector<1x1x16x8xbf16>
    %74 = vector.shape_cast %73 : vector<1x1x16x8xbf16> to vector<16x8xbf16>
    %c1_105 = arith.constant 1 : index
    %c5_106 = arith.constant 5 : index
    %c0_107 = arith.constant 0 : index
    %c0_108 = arith.constant 0 : index
    %75 = vector.load %arg16[%c1_105, %c5_106, %c0_107, %c0_108] : memref<7x7x8x128xbf16, #tpu.memory_space<vmem>>, vector<1x1x8x128xbf16>
    %76 = vector.shape_cast %75 : vector<1x1x8x128xbf16> to vector<8x128xbf16>
    %cst_109 = arith.constant dense<0.000000e+00> : vector<16x128xf32>
    %77 = tpu.matmul %74, %76, %cst_109 {dimension_numbers = #tpu.dot_dimension_numbers<[1], [0], [0], [1], [0, 0, 1, 1], [], []>} : vector<16x8xbf16>, vector<8x128xbf16>, vector<16x128xf32> -> vector<16x128xf32>
    %78 = arith.addf %72, %77 : vector<16x128xf32>
    %c0_110 = arith.constant 0 : index
    %c0_111 = arith.constant 0 : index
    %c3_112 = arith.constant 3 : index
    %c0_113 = arith.constant 0 : index
    %79 = vector.load %arg4[%c0_110, %c0_111, %c3_112, %c0_113] : memref<1x1x19x8xbf16, #tpu.memory_space<vmem>>, vector<1x1x16x8xbf16>
    %80 = vector.shape_cast %79 : vector<1x1x16x8xbf16> to vector<16x8xbf16>
    %c1_114 = arith.constant 1 : index
    %c6_115 = arith.constant 6 : index
    %c0_116 = arith.constant 0 : index
    %c0_117 = arith.constant 0 : index
    %81 = vector.load %arg16[%c1_114, %c6_115, %c0_116, %c0_117] : memref<7x7x8x128xbf16, #tpu.memory_space<vmem>>, vector<1x1x8x128xbf16>
    %82 = vector.shape_cast %81 : vector<1x1x8x128xbf16> to vector<8x128xbf16>
    %cst_118 = arith.constant dense<0.000000e+00> : vector<16x128xf32>
    %83 = tpu.matmul %80, %82, %cst_118 {dimension_numbers = #tpu.dot_dimension_numbers<[1], [0], [0], [1], [0, 0, 1, 1], [], []>} : vector<16x8xbf16>, vector<8x128xbf16>, vector<16x128xf32> -> vector<16x128xf32>
    %84 = arith.addf %78, %83 : vector<16x128xf32>
    %c0_119 = arith.constant 0 : index
    %c0_120 = arith.constant 0 : index
    %c0_121 = arith.constant 0 : index
    %c0_122 = arith.constant 0 : index
    %85 = vector.load %arg6[%c0_119, %c0_120, %c0_121, %c0_122] : memref<1x1x19x8xbf16, #tpu.memory_space<vmem>>, vector<1x1x16x8xbf16>
    %86 = vector.shape_cast %85 : vector<1x1x16x8xbf16> to vector<16x8xbf16>
    %c2_123 = arith.constant 2 : index
    %c0_124 = arith.constant 0 : index
    %c0_125 = arith.constant 0 : index
    %c0_126 = arith.constant 0 : index
    %87 = vector.load %arg16[%c2_123, %c0_124, %c0_125, %c0_126] : memref<7x7x8x128xbf16, #tpu.memory_space<vmem>>, vector<1x1x8x128xbf16>
    %88 = vector.shape_cast %87 : vector<1x1x8x128xbf16> to vector<8x128xbf16>
    %cst_127 = arith.constant dense<0.000000e+00> : vector<16x128xf32>
    %89 = tpu.matmul %86, %88, %cst_127 {dimension_numbers = #tpu.dot_dimension_numbers<[1], [0], [0], [1], [0, 0, 1, 1], [], []>} : vector<16x8xbf16>, vector<8x128xbf16>, vector<16x128xf32> -> vector<16x128xf32>
    %90 = arith.addf %84, %89 : vector<16x128xf32>
    %c0_128 = arith.constant 0 : index
    %c0_129 = arith.constant 0 : index
    %c0_130 = arith.constant 0 : index
    %c0_131 = arith.constant 0 : index
    %91 = vector.load %arg7[%c0_128, %c0_129, %c0_130, %c0_131] : memref<1x1x19x8xbf16, #tpu.memory_space<vmem>>, vector<1x1x16x8xbf16>
    %92 = vector.shape_cast %91 : vector<1x1x16x8xbf16> to vector<16x8xbf16>
    %c2_132 = arith.constant 2 : index
    %c1_133 = arith.constant 1 : index
    %c0_134 = arith.constant 0 : index
    %c0_135 = arith.constant 0 : index
    %93 = vector.load %arg16[%c2_132, %c1_133, %c0_134, %c0_135] : memref<7x7x8x128xbf16, #tpu.memory_space<vmem>>, vector<1x1x8x128xbf16>
    %94 = vector.shape_cast %93 : vector<1x1x8x128xbf16> to vector<8x128xbf16>
    %cst_136 = arith.constant dense<0.000000e+00> : vector<16x128xf32>
    %95 = tpu.matmul %92, %94, %cst_136 {dimension_numbers = #tpu.dot_dimension_numbers<[1], [0], [0], [1], [0, 0, 1, 1], [], []>} : vector<16x8xbf16>, vector<8x128xbf16>, vector<16x128xf32> -> vector<16x128xf32>
    %96 = arith.addf %90, %95 : vector<16x128xf32>
    %c0_137 = arith.constant 0 : index
    %c0_138 = arith.constant 0 : index
    %c1_139 = arith.constant 1 : index
    %c0_140 = arith.constant 0 : index
    %97 = vector.load %arg6[%c0_137, %c0_138, %c1_139, %c0_140] : memref<1x1x19x8xbf16, #tpu.memory_space<vmem>>, vector<1x1x16x8xbf16>
    %98 = vector.shape_cast %97 : vector<1x1x16x8xbf16> to vector<16x8xbf16>
    %c2_141 = arith.constant 2 : index
    %c2_142 = arith.constant 2 : index
    %c0_143 = arith.constant 0 : index
    %c0_144 = arith.constant 0 : index
    %99 = vector.load %arg16[%c2_141, %c2_142, %c0_143, %c0_144] : memref<7x7x8x128xbf16, #tpu.memory_space<vmem>>, vector<1x1x8x128xbf16>
    %100 = vector.shape_cast %99 : vector<1x1x8x128xbf16> to vector<8x128xbf16>
    %cst_145 = arith.constant dense<0.000000e+00> : vector<16x128xf32>
    %101 = tpu.matmul %98, %100, %cst_145 {dimension_numbers = #tpu.dot_dimension_numbers<[1], [0], [0], [1], [0, 0, 1, 1], [], []>} : vector<16x8xbf16>, vector<8x128xbf16>, vector<16x128xf32> -> vector<16x128xf32>
    %102 = arith.addf %96, %101 : vector<16x128xf32>
    %c0_146 = arith.constant 0 : index
    %c0_147 = arith.constant 0 : index
    %c1_148 = arith.constant 1 : index
    %c0_149 = arith.constant 0 : index
    %103 = vector.load %arg7[%c0_146, %c0_147, %c1_148, %c0_149] : memref<1x1x19x8xbf16, #tpu.memory_space<vmem>>, vector<1x1x16x8xbf16>
    %104 = vector.shape_cast %103 : vector<1x1x16x8xbf16> to vector<16x8xbf16>
    %c2_150 = arith.constant 2 : index
    %c3_151 = arith.constant 3 : index
    %c0_152 = arith.constant 0 : index
    %c0_153 = arith.constant 0 : index
    %105 = vector.load %arg16[%c2_150, %c3_151, %c0_152, %c0_153] : memref<7x7x8x128xbf16, #tpu.memory_space<vmem>>, vector<1x1x8x128xbf16>
    %106 = vector.shape_cast %105 : vector<1x1x8x128xbf16> to vector<8x128xbf16>
    %cst_154 = arith.constant dense<0.000000e+00> : vector<16x128xf32>
    %107 = tpu.matmul %104, %106, %cst_154 {dimension_numbers = #tpu.dot_dimension_numbers<[1], [0], [0], [1], [0, 0, 1, 1], [], []>} : vector<16x8xbf16>, vector<8x128xbf16>, vector<16x128xf32> -> vector<16x128xf32>
    %108 = arith.addf %102, %107 : vector<16x128xf32>
    %c0_155 = arith.constant 0 : index
    %c0_156 = arith.constant 0 : index
    %c2_157 = arith.constant 2 : index
    %c0_158 = arith.constant 0 : index
    %109 = vector.load %arg6[%c0_155, %c0_156, %c2_157, %c0_158] : memref<1x1x19x8xbf16, #tpu.memory_space<vmem>>, vector<1x1x16x8xbf16>
    %110 = vector.shape_cast %109 : vector<1x1x16x8xbf16> to vector<16x8xbf16>
    %c2_159 = arith.constant 2 : index
    %c4_160 = arith.constant 4 : index
    %c0_161 = arith.constant 0 : index
    %c0_162 = arith.constant 0 : index
    %111 = vector.load %arg16[%c2_159, %c4_160, %c0_161, %c0_162] : memref<7x7x8x128xbf16, #tpu.memory_space<vmem>>, vector<1x1x8x128xbf16>
    %112 = vector.shape_cast %111 : vector<1x1x8x128xbf16> to vector<8x128xbf16>
    %cst_163 = arith.constant dense<0.000000e+00> : vector<16x128xf32>
    %113 = tpu.matmul %110, %112, %cst_163 {dimension_numbers = #tpu.dot_dimension_numbers<[1], [0], [0], [1], [0, 0, 1, 1], [], []>} : vector<16x8xbf16>, vector<8x128xbf16>, vector<16x128xf32> -> vector<16x128xf32>
    %114 = arith.addf %108, %113 : vector<16x128xf32>
    %c0_164 = arith.constant 0 : index
    %c0_165 = arith.constant 0 : index
    %c2_166 = arith.constant 2 : index
    %c0_167 = arith.constant 0 : index
    %115 = vector.load %arg7[%c0_164, %c0_165, %c2_166, %c0_167] : memref<1x1x19x8xbf16, #tpu.memory_space<vmem>>, vector<1x1x16x8xbf16>
    %116 = vector.shape_cast %115 : vector<1x1x16x8xbf16> to vector<16x8xbf16>
    %c2_168 = arith.constant 2 : index
    %c5_169 = arith.constant 5 : index
    %c0_170 = arith.constant 0 : index
    %c0_171 = arith.constant 0 : index
    %117 = vector.load %arg16[%c2_168, %c5_169, %c0_170, %c0_171] : memref<7x7x8x128xbf16, #tpu.memory_space<vmem>>, vector<1x1x8x128xbf16>
    %118 = vector.shape_cast %117 : vector<1x1x8x128xbf16> to vector<8x128xbf16>
    %cst_172 = arith.constant dense<0.000000e+00> : vector<16x128xf32>
    %119 = tpu.matmul %116, %118, %cst_172 {dimension_numbers = #tpu.dot_dimension_numbers<[1], [0], [0], [1], [0, 0, 1, 1], [], []>} : vector<16x8xbf16>, vector<8x128xbf16>, vector<16x128xf32> -> vector<16x128xf32>
    %120 = arith.addf %114, %119 : vector<16x128xf32>
    %c0_173 = arith.constant 0 : index
    %c0_174 = arith.constant 0 : index
    %c3_175 = arith.constant 3 : index
    %c0_176 = arith.constant 0 : index
    %121 = vector.load %arg6[%c0_173, %c0_174, %c3_175, %c0_176] : memref<1x1x19x8xbf16, #tpu.memory_space<vmem>>, vector<1x1x16x8xbf16>
    %122 = vector.shape_cast %121 : vector<1x1x16x8xbf16> to vector<16x8xbf16>
    %c2_177 = arith.constant 2 : index
    %c6_178 = arith.constant 6 : index
    %c0_179 = arith.constant 0 : index
    %c0_180 = arith.constant 0 : index
    %123 = vector.load %arg16[%c2_177, %c6_178, %c0_179, %c0_180] : memref<7x7x8x128xbf16, #tpu.memory_space<vmem>>, vector<1x1x8x128xbf16>
    %124 = vector.shape_cast %123 : vector<1x1x8x128xbf16> to vector<8x128xbf16>
    %cst_181 = arith.constant dense<0.000000e+00> : vector<16x128xf32>
    %125 = tpu.matmul %122, %124, %cst_181 {dimension_numbers = #tpu.dot_dimension_numbers<[1], [0], [0], [1], [0, 0, 1, 1], [], []>} : vector<16x8xbf16>, vector<8x128xbf16>, vector<16x128xf32> -> vector<16x128xf32>
    %126 = arith.addf %120, %125 : vector<16x128xf32>
    %c0_182 = arith.constant 0 : index
    %c0_183 = arith.constant 0 : index
    %c0_184 = arith.constant 0 : index
    %c0_185 = arith.constant 0 : index
    %127 = vector.load %arg8[%c0_182, %c0_183, %c0_184, %c0_185] : memref<1x1x19x8xbf16, #tpu.memory_space<vmem>>, vector<1x1x16x8xbf16>
    %128 = vector.shape_cast %127 : vector<1x1x16x8xbf16> to vector<16x8xbf16>
    %c3_186 = arith.constant 3 : index
    %c0_187 = arith.constant 0 : index
    %c0_188 = arith.constant 0 : index
    %c0_189 = arith.constant 0 : index
    %129 = vector.load %arg16[%c3_186, %c0_187, %c0_188, %c0_189] : memref<7x7x8x128xbf16, #tpu.memory_space<vmem>>, vector<1x1x8x128xbf16>
    %130 = vector.shape_cast %129 : vector<1x1x8x128xbf16> to vector<8x128xbf16>
    %cst_190 = arith.constant dense<0.000000e+00> : vector<16x128xf32>
    %131 = tpu.matmul %128, %130, %cst_190 {dimension_numbers = #tpu.dot_dimension_numbers<[1], [0], [0], [1], [0, 0, 1, 1], [], []>} : vector<16x8xbf16>, vector<8x128xbf16>, vector<16x128xf32> -> vector<16x128xf32>
    %132 = arith.addf %126, %131 : vector<16x128xf32>
    %c0_191 = arith.constant 0 : index
    %c0_192 = arith.constant 0 : index
    %c0_193 = arith.constant 0 : index
    %c0_194 = arith.constant 0 : index
    %133 = vector.load %arg9[%c0_191, %c0_192, %c0_193, %c0_194] : memref<1x1x19x8xbf16, #tpu.memory_space<vmem>>, vector<1x1x16x8xbf16>
    %134 = vector.shape_cast %133 : vector<1x1x16x8xbf16> to vector<16x8xbf16>
    %c3_195 = arith.constant 3 : index
    %c1_196 = arith.constant 1 : index
    %c0_197 = arith.constant 0 : index
    %c0_198 = arith.constant 0 : index
    %135 = vector.load %arg16[%c3_195, %c1_196, %c0_197, %c0_198] : memref<7x7x8x128xbf16, #tpu.memory_space<vmem>>, vector<1x1x8x128xbf16>
    %136 = vector.shape_cast %135 : vector<1x1x8x128xbf16> to vector<8x128xbf16>
    %cst_199 = arith.constant dense<0.000000e+00> : vector<16x128xf32>
    %137 = tpu.matmul %134, %136, %cst_199 {dimension_numbers = #tpu.dot_dimension_numbers<[1], [0], [0], [1], [0, 0, 1, 1], [], []>} : vector<16x8xbf16>, vector<8x128xbf16>, vector<16x128xf32> -> vector<16x128xf32>
    %138 = arith.addf %132, %137 : vector<16x128xf32>
    %c0_200 = arith.constant 0 : index
    %c0_201 = arith.constant 0 : index
    %c1_202 = arith.constant 1 : index
    %c0_203 = arith.constant 0 : index
    %139 = vector.load %arg8[%c0_200, %c0_201, %c1_202, %c0_203] : memref<1x1x19x8xbf16, #tpu.memory_space<vmem>>, vector<1x1x16x8xbf16>
    %140 = vector.shape_cast %139 : vector<1x1x16x8xbf16> to vector<16x8xbf16>
    %c3_204 = arith.constant 3 : index
    %c2_205 = arith.constant 2 : index
    %c0_206 = arith.constant 0 : index
    %c0_207 = arith.constant 0 : index
    %141 = vector.load %arg16[%c3_204, %c2_205, %c0_206, %c0_207] : memref<7x7x8x128xbf16, #tpu.memory_space<vmem>>, vector<1x1x8x128xbf16>
    %142 = vector.shape_cast %141 : vector<1x1x8x128xbf16> to vector<8x128xbf16>
    %cst_208 = arith.constant dense<0.000000e+00> : vector<16x128xf32>
    %143 = tpu.matmul %140, %142, %cst_208 {dimension_numbers = #tpu.dot_dimension_numbers<[1], [0], [0], [1], [0, 0, 1, 1], [], []>} : vector<16x8xbf16>, vector<8x128xbf16>, vector<16x128xf32> -> vector<16x128xf32>
    %144 = arith.addf %138, %143 : vector<16x128xf32>
    %c0_209 = arith.constant 0 : index
    %c0_210 = arith.constant 0 : index
    %c1_211 = arith.constant 1 : index
    %c0_212 = arith.constant 0 : index
    %145 = vector.load %arg9[%c0_209, %c0_210, %c1_211, %c0_212] : memref<1x1x19x8xbf16, #tpu.memory_space<vmem>>, vector<1x1x16x8xbf16>
    %146 = vector.shape_cast %145 : vector<1x1x16x8xbf16> to vector<16x8xbf16>
    %c3_213 = arith.constant 3 : index
    %c3_214 = arith.constant 3 : index
    %c0_215 = arith.constant 0 : index
    %c0_216 = arith.constant 0 : index
    %147 = vector.load %arg16[%c3_213, %c3_214, %c0_215, %c0_216] : memref<7x7x8x128xbf16, #tpu.memory_space<vmem>>, vector<1x1x8x128xbf16>
    %148 = vector.shape_cast %147 : vector<1x1x8x128xbf16> to vector<8x128xbf16>
    %cst_217 = arith.constant dense<0.000000e+00> : vector<16x128xf32>
    %149 = tpu.matmul %146, %148, %cst_217 {dimension_numbers = #tpu.dot_dimension_numbers<[1], [0], [0], [1], [0, 0, 1, 1], [], []>} : vector<16x8xbf16>, vector<8x128xbf16>, vector<16x128xf32> -> vector<16x128xf32>
    %150 = arith.addf %144, %149 : vector<16x128xf32>
    %c0_218 = arith.constant 0 : index
    %c0_219 = arith.constant 0 : index
    %c2_220 = arith.constant 2 : index
    %c0_221 = arith.constant 0 : index
    %151 = vector.load %arg8[%c0_218, %c0_219, %c2_220, %c0_221] : memref<1x1x19x8xbf16, #tpu.memory_space<vmem>>, vector<1x1x16x8xbf16>
    %152 = vector.shape_cast %151 : vector<1x1x16x8xbf16> to vector<16x8xbf16>
    %c3_222 = arith.constant 3 : index
    %c4_223 = arith.constant 4 : index
    %c0_224 = arith.constant 0 : index
    %c0_225 = arith.constant 0 : index
    %153 = vector.load %arg16[%c3_222, %c4_223, %c0_224, %c0_225] : memref<7x7x8x128xbf16, #tpu.memory_space<vmem>>, vector<1x1x8x128xbf16>
    %154 = vector.shape_cast %153 : vector<1x1x8x128xbf16> to vector<8x128xbf16>
    %cst_226 = arith.constant dense<0.000000e+00> : vector<16x128xf32>
    %155 = tpu.matmul %152, %154, %cst_226 {dimension_numbers = #tpu.dot_dimension_numbers<[1], [0], [0], [1], [0, 0, 1, 1], [], []>} : vector<16x8xbf16>, vector<8x128xbf16>, vector<16x128xf32> -> vector<16x128xf32>
    %156 = arith.addf %150, %155 : vector<16x128xf32>
    %c0_227 = arith.constant 0 : index
    %c0_228 = arith.constant 0 : index
    %c2_229 = arith.constant 2 : index
    %c0_230 = arith.constant 0 : index
    %157 = vector.load %arg9[%c0_227, %c0_228, %c2_229, %c0_230] : memref<1x1x19x8xbf16, #tpu.memory_space<vmem>>, vector<1x1x16x8xbf16>
    %158 = vector.shape_cast %157 : vector<1x1x16x8xbf16> to vector<16x8xbf16>
    %c3_231 = arith.constant 3 : index
    %c5_232 = arith.constant 5 : index
    %c0_233 = arith.constant 0 : index
    %c0_234 = arith.constant 0 : index
    %159 = vector.load %arg16[%c3_231, %c5_232, %c0_233, %c0_234] : memref<7x7x8x128xbf16, #tpu.memory_space<vmem>>, vector<1x1x8x128xbf16>
    %160 = vector.shape_cast %159 : vector<1x1x8x128xbf16> to vector<8x128xbf16>
    %cst_235 = arith.constant dense<0.000000e+00> : vector<16x128xf32>
    %161 = tpu.matmul %158, %160, %cst_235 {dimension_numbers = #tpu.dot_dimension_numbers<[1], [0], [0], [1], [0, 0, 1, 1], [], []>} : vector<16x8xbf16>, vector<8x128xbf16>, vector<16x128xf32> -> vector<16x128xf32>
    %162 = arith.addf %156, %161 : vector<16x128xf32>
    %c0_236 = arith.constant 0 : index
    %c0_237 = arith.constant 0 : index
    %c3_238 = arith.constant 3 : index
    %c0_239 = arith.constant 0 : index
    %163 = vector.load %arg8[%c0_236, %c0_237, %c3_238, %c0_239] : memref<1x1x19x8xbf16, #tpu.memory_space<vmem>>, vector<1x1x16x8xbf16>
    %164 = vector.shape_cast %163 : vector<1x1x16x8xbf16> to vector<16x8xbf16>
    %c3_240 = arith.constant 3 : index
    %c6_241 = arith.constant 6 : index
    %c0_242 = arith.constant 0 : index
    %c0_243 = arith.constant 0 : index
    %165 = vector.load %arg16[%c3_240, %c6_241, %c0_242, %c0_243] : memref<7x7x8x128xbf16, #tpu.memory_space<vmem>>, vector<1x1x8x128xbf16>
    %166 = vector.shape_cast %165 : vector<1x1x8x128xbf16> to vector<8x128xbf16>
    %cst_244 = arith.constant dense<0.000000e+00> : vector<16x128xf32>
    %167 = tpu.matmul %164, %166, %cst_244 {dimension_numbers = #tpu.dot_dimension_numbers<[1], [0], [0], [1], [0, 0, 1, 1], [], []>} : vector<16x8xbf16>, vector<8x128xbf16>, vector<16x128xf32> -> vector<16x128xf32>
    %168 = arith.addf %162, %167 : vector<16x128xf32>
    %c0_245 = arith.constant 0 : index
    %c0_246 = arith.constant 0 : index
    %c0_247 = arith.constant 0 : index
    %c0_248 = arith.constant 0 : index
    %169 = vector.load %arg10[%c0_245, %c0_246, %c0_247, %c0_248] : memref<1x1x19x8xbf16, #tpu.memory_space<vmem>>, vector<1x1x16x8xbf16>
    %170 = vector.shape_cast %169 : vector<1x1x16x8xbf16> to vector<16x8xbf16>
    %c4_249 = arith.constant 4 : index
    %c0_250 = arith.constant 0 : index
    %c0_251 = arith.constant 0 : index
    %c0_252 = arith.constant 0 : index
    %171 = vector.load %arg16[%c4_249, %c0_250, %c0_251, %c0_252] : memref<7x7x8x128xbf16, #tpu.memory_space<vmem>>, vector<1x1x8x128xbf16>
    %172 = vector.shape_cast %171 : vector<1x1x8x128xbf16> to vector<8x128xbf16>
    %cst_253 = arith.constant dense<0.000000e+00> : vector<16x128xf32>
    %173 = tpu.matmul %170, %172, %cst_253 {dimension_numbers = #tpu.dot_dimension_numbers<[1], [0], [0], [1], [0, 0, 1, 1], [], []>} : vector<16x8xbf16>, vector<8x128xbf16>, vector<16x128xf32> -> vector<16x128xf32>
    %174 = arith.addf %168, %173 : vector<16x128xf32>
    %c0_254 = arith.constant 0 : index
    %c0_255 = arith.constant 0 : index
    %c0_256 = arith.constant 0 : index
    %c0_257 = arith.constant 0 : index
    %175 = vector.load %arg11[%c0_254, %c0_255, %c0_256, %c0_257] : memref<1x1x19x8xbf16, #tpu.memory_space<vmem>>, vector<1x1x16x8xbf16>
    %176 = vector.shape_cast %175 : vector<1x1x16x8xbf16> to vector<16x8xbf16>
    %c4_258 = arith.constant 4 : index
    %c1_259 = arith.constant 1 : index
    %c0_260 = arith.constant 0 : index
    %c0_261 = arith.constant 0 : index
    %177 = vector.load %arg16[%c4_258, %c1_259, %c0_260, %c0_261] : memref<7x7x8x128xbf16, #tpu.memory_space<vmem>>, vector<1x1x8x128xbf16>
    %178 = vector.shape_cast %177 : vector<1x1x8x128xbf16> to vector<8x128xbf16>
    %cst_262 = arith.constant dense<0.000000e+00> : vector<16x128xf32>
    %179 = tpu.matmul %176, %178, %cst_262 {dimension_numbers = #tpu.dot_dimension_numbers<[1], [0], [0], [1], [0, 0, 1, 1], [], []>} : vector<16x8xbf16>, vector<8x128xbf16>, vector<16x128xf32> -> vector<16x128xf32>
    %180 = arith.addf %174, %179 : vector<16x128xf32>
    %c0_263 = arith.constant 0 : index
    %c0_264 = arith.constant 0 : index
    %c1_265 = arith.constant 1 : index
    %c0_266 = arith.constant 0 : index
    %181 = vector.load %arg10[%c0_263, %c0_264, %c1_265, %c0_266] : memref<1x1x19x8xbf16, #tpu.memory_space<vmem>>, vector<1x1x16x8xbf16>
    %182 = vector.shape_cast %181 : vector<1x1x16x8xbf16> to vector<16x8xbf16>
    %c4_267 = arith.constant 4 : index
    %c2_268 = arith.constant 2 : index
    %c0_269 = arith.constant 0 : index
    %c0_270 = arith.constant 0 : index
    %183 = vector.load %arg16[%c4_267, %c2_268, %c0_269, %c0_270] : memref<7x7x8x128xbf16, #tpu.memory_space<vmem>>, vector<1x1x8x128xbf16>
    %184 = vector.shape_cast %183 : vector<1x1x8x128xbf16> to vector<8x128xbf16>
    %cst_271 = arith.constant dense<0.000000e+00> : vector<16x128xf32>
    %185 = tpu.matmul %182, %184, %cst_271 {dimension_numbers = #tpu.dot_dimension_numbers<[1], [0], [0], [1], [0, 0, 1, 1], [], []>} : vector<16x8xbf16>, vector<8x128xbf16>, vector<16x128xf32> -> vector<16x128xf32>
    %186 = arith.addf %180, %185 : vector<16x128xf32>
    %c0_272 = arith.constant 0 : index
    %c0_273 = arith.constant 0 : index
    %c1_274 = arith.constant 1 : index
    %c0_275 = arith.constant 0 : index
    %187 = vector.load %arg11[%c0_272, %c0_273, %c1_274, %c0_275] : memref<1x1x19x8xbf16, #tpu.memory_space<vmem>>, vector<1x1x16x8xbf16>
    %188 = vector.shape_cast %187 : vector<1x1x16x8xbf16> to vector<16x8xbf16>
    %c4_276 = arith.constant 4 : index
    %c3_277 = arith.constant 3 : index
    %c0_278 = arith.constant 0 : index
    %c0_279 = arith.constant 0 : index
    %189 = vector.load %arg16[%c4_276, %c3_277, %c0_278, %c0_279] : memref<7x7x8x128xbf16, #tpu.memory_space<vmem>>, vector<1x1x8x128xbf16>
    %190 = vector.shape_cast %189 : vector<1x1x8x128xbf16> to vector<8x128xbf16>
    %cst_280 = arith.constant dense<0.000000e+00> : vector<16x128xf32>
    %191 = tpu.matmul %188, %190, %cst_280 {dimension_numbers = #tpu.dot_dimension_numbers<[1], [0], [0], [1], [0, 0, 1, 1], [], []>} : vector<16x8xbf16>, vector<8x128xbf16>, vector<16x128xf32> -> vector<16x128xf32>
    %192 = arith.addf %186, %191 : vector<16x128xf32>
    %c0_281 = arith.constant 0 : index
    %c0_282 = arith.constant 0 : index
    %c2_283 = arith.constant 2 : index
    %c0_284 = arith.constant 0 : index
    %193 = vector.load %arg10[%c0_281, %c0_282, %c2_283, %c0_284] : memref<1x1x19x8xbf16, #tpu.memory_space<vmem>>, vector<1x1x16x8xbf16>
    %194 = vector.shape_cast %193 : vector<1x1x16x8xbf16> to vector<16x8xbf16>
    %c4_285 = arith.constant 4 : index
    %c4_286 = arith.constant 4 : index
    %c0_287 = arith.constant 0 : index
    %c0_288 = arith.constant 0 : index
    %195 = vector.load %arg16[%c4_285, %c4_286, %c0_287, %c0_288] : memref<7x7x8x128xbf16, #tpu.memory_space<vmem>>, vector<1x1x8x128xbf16>
    %196 = vector.shape_cast %195 : vector<1x1x8x128xbf16> to vector<8x128xbf16>
    %cst_289 = arith.constant dense<0.000000e+00> : vector<16x128xf32>
    %197 = tpu.matmul %194, %196, %cst_289 {dimension_numbers = #tpu.dot_dimension_numbers<[1], [0], [0], [1], [0, 0, 1, 1], [], []>} : vector<16x8xbf16>, vector<8x128xbf16>, vector<16x128xf32> -> vector<16x128xf32>
    %198 = arith.addf %192, %197 : vector<16x128xf32>
    %c0_290 = arith.constant 0 : index
    %c0_291 = arith.constant 0 : index
    %c2_292 = arith.constant 2 : index
    %c0_293 = arith.constant 0 : index
    %199 = vector.load %arg11[%c0_290, %c0_291, %c2_292, %c0_293] : memref<1x1x19x8xbf16, #tpu.memory_space<vmem>>, vector<1x1x16x8xbf16>
    %200 = vector.shape_cast %199 : vector<1x1x16x8xbf16> to vector<16x8xbf16>
    %c4_294 = arith.constant 4 : index
    %c5_295 = arith.constant 5 : index
    %c0_296 = arith.constant 0 : index
    %c0_297 = arith.constant 0 : index
    %201 = vector.load %arg16[%c4_294, %c5_295, %c0_296, %c0_297] : memref<7x7x8x128xbf16, #tpu.memory_space<vmem>>, vector<1x1x8x128xbf16>
    %202 = vector.shape_cast %201 : vector<1x1x8x128xbf16> to vector<8x128xbf16>
    %cst_298 = arith.constant dense<0.000000e+00> : vector<16x128xf32>
    %203 = tpu.matmul %200, %202, %cst_298 {dimension_numbers = #tpu.dot_dimension_numbers<[1], [0], [0], [1], [0, 0, 1, 1], [], []>} : vector<16x8xbf16>, vector<8x128xbf16>, vector<16x128xf32> -> vector<16x128xf32>
    %204 = arith.addf %198, %203 : vector<16x128xf32>
    %c0_299 = arith.constant 0 : index
    %c0_300 = arith.constant 0 : index
    %c3_301 = arith.constant 3 : index
    %c0_302 = arith.constant 0 : index
    %205 = vector.load %arg10[%c0_299, %c0_300, %c3_301, %c0_302] : memref<1x1x19x8xbf16, #tpu.memory_space<vmem>>, vector<1x1x16x8xbf16>
    %206 = vector.shape_cast %205 : vector<1x1x16x8xbf16> to vector<16x8xbf16>
    %c4_303 = arith.constant 4 : index
    %c6_304 = arith.constant 6 : index
    %c0_305 = arith.constant 0 : index
    %c0_306 = arith.constant 0 : index
    %207 = vector.load %arg16[%c4_303, %c6_304, %c0_305, %c0_306] : memref<7x7x8x128xbf16, #tpu.memory_space<vmem>>, vector<1x1x8x128xbf16>
    %208 = vector.shape_cast %207 : vector<1x1x8x128xbf16> to vector<8x128xbf16>
    %cst_307 = arith.constant dense<0.000000e+00> : vector<16x128xf32>
    %209 = tpu.matmul %206, %208, %cst_307 {dimension_numbers = #tpu.dot_dimension_numbers<[1], [0], [0], [1], [0, 0, 1, 1], [], []>} : vector<16x8xbf16>, vector<8x128xbf16>, vector<16x128xf32> -> vector<16x128xf32>
    %210 = arith.addf %204, %209 : vector<16x128xf32>
    %c0_308 = arith.constant 0 : index
    %c0_309 = arith.constant 0 : index
    %c0_310 = arith.constant 0 : index
    %c0_311 = arith.constant 0 : index
    %211 = vector.load %arg12[%c0_308, %c0_309, %c0_310, %c0_311] : memref<1x1x19x8xbf16, #tpu.memory_space<vmem>>, vector<1x1x16x8xbf16>
    %212 = vector.shape_cast %211 : vector<1x1x16x8xbf16> to vector<16x8xbf16>
    %c5_312 = arith.constant 5 : index
    %c0_313 = arith.constant 0 : index
    %c0_314 = arith.constant 0 : index
    %c0_315 = arith.constant 0 : index
    %213 = vector.load %arg16[%c5_312, %c0_313, %c0_314, %c0_315] : memref<7x7x8x128xbf16, #tpu.memory_space<vmem>>, vector<1x1x8x128xbf16>
    %214 = vector.shape_cast %213 : vector<1x1x8x128xbf16> to vector<8x128xbf16>
    %cst_316 = arith.constant dense<0.000000e+00> : vector<16x128xf32>
    %215 = tpu.matmul %212, %214, %cst_316 {dimension_numbers = #tpu.dot_dimension_numbers<[1], [0], [0], [1], [0, 0, 1, 1], [], []>} : vector<16x8xbf16>, vector<8x128xbf16>, vector<16x128xf32> -> vector<16x128xf32>
    %216 = arith.addf %210, %215 : vector<16x128xf32>
    %c0_317 = arith.constant 0 : index
    %c0_318 = arith.constant 0 : index
    %c0_319 = arith.constant 0 : index
    %c0_320 = arith.constant 0 : index
    %217 = vector.load %arg13[%c0_317, %c0_318, %c0_319, %c0_320] : memref<1x1x19x8xbf16, #tpu.memory_space<vmem>>, vector<1x1x16x8xbf16>
    %218 = vector.shape_cast %217 : vector<1x1x16x8xbf16> to vector<16x8xbf16>
    %c5_321 = arith.constant 5 : index
    %c1_322 = arith.constant 1 : index
    %c0_323 = arith.constant 0 : index
    %c0_324 = arith.constant 0 : index
    %219 = vector.load %arg16[%c5_321, %c1_322, %c0_323, %c0_324] : memref<7x7x8x128xbf16, #tpu.memory_space<vmem>>, vector<1x1x8x128xbf16>
    %220 = vector.shape_cast %219 : vector<1x1x8x128xbf16> to vector<8x128xbf16>
    %cst_325 = arith.constant dense<0.000000e+00> : vector<16x128xf32>
    %221 = tpu.matmul %218, %220, %cst_325 {dimension_numbers = #tpu.dot_dimension_numbers<[1], [0], [0], [1], [0, 0, 1, 1], [], []>} : vector<16x8xbf16>, vector<8x128xbf16>, vector<16x128xf32> -> vector<16x128xf32>
    %222 = arith.addf %216, %221 : vector<16x128xf32>
    %c0_326 = arith.constant 0 : index
    %c0_327 = arith.constant 0 : index
    %c1_328 = arith.constant 1 : index
    %c0_329 = arith.constant 0 : index
    %223 = vector.load %arg12[%c0_326, %c0_327, %c1_328, %c0_329] : memref<1x1x19x8xbf16, #tpu.memory_space<vmem>>, vector<1x1x16x8xbf16>
    %224 = vector.shape_cast %223 : vector<1x1x16x8xbf16> to vector<16x8xbf16>
    %c5_330 = arith.constant 5 : index
    %c2_331 = arith.constant 2 : index
    %c0_332 = arith.constant 0 : index
    %c0_333 = arith.constant 0 : index
    %225 = vector.load %arg16[%c5_330, %c2_331, %c0_332, %c0_333] : memref<7x7x8x128xbf16, #tpu.memory_space<vmem>>, vector<1x1x8x128xbf16>
    %226 = vector.shape_cast %225 : vector<1x1x8x128xbf16> to vector<8x128xbf16>
    %cst_334 = arith.constant dense<0.000000e+00> : vector<16x128xf32>
    %227 = tpu.matmul %224, %226, %cst_334 {dimension_numbers = #tpu.dot_dimension_numbers<[1], [0], [0], [1], [0, 0, 1, 1], [], []>} : vector<16x8xbf16>, vector<8x128xbf16>, vector<16x128xf32> -> vector<16x128xf32>
    %228 = arith.addf %222, %227 : vector<16x128xf32>
    %c0_335 = arith.constant 0 : index
    %c0_336 = arith.constant 0 : index
    %c1_337 = arith.constant 1 : index
    %c0_338 = arith.constant 0 : index
    %229 = vector.load %arg13[%c0_335, %c0_336, %c1_337, %c0_338] : memref<1x1x19x8xbf16, #tpu.memory_space<vmem>>, vector<1x1x16x8xbf16>
    %230 = vector.shape_cast %229 : vector<1x1x16x8xbf16> to vector<16x8xbf16>
    %c5_339 = arith.constant 5 : index
    %c3_340 = arith.constant 3 : index
    %c0_341 = arith.constant 0 : index
    %c0_342 = arith.constant 0 : index
    %231 = vector.load %arg16[%c5_339, %c3_340, %c0_341, %c0_342] : memref<7x7x8x128xbf16, #tpu.memory_space<vmem>>, vector<1x1x8x128xbf16>
    %232 = vector.shape_cast %231 : vector<1x1x8x128xbf16> to vector<8x128xbf16>
    %cst_343 = arith.constant dense<0.000000e+00> : vector<16x128xf32>
    %233 = tpu.matmul %230, %232, %cst_343 {dimension_numbers = #tpu.dot_dimension_numbers<[1], [0], [0], [1], [0, 0, 1, 1], [], []>} : vector<16x8xbf16>, vector<8x128xbf16>, vector<16x128xf32> -> vector<16x128xf32>
    %234 = arith.addf %228, %233 : vector<16x128xf32>
    %c0_344 = arith.constant 0 : index
    %c0_345 = arith.constant 0 : index
    %c2_346 = arith.constant 2 : index
    %c0_347 = arith.constant 0 : index
    %235 = vector.load %arg12[%c0_344, %c0_345, %c2_346, %c0_347] : memref<1x1x19x8xbf16, #tpu.memory_space<vmem>>, vector<1x1x16x8xbf16>
    %236 = vector.shape_cast %235 : vector<1x1x16x8xbf16> to vector<16x8xbf16>
    %c5_348 = arith.constant 5 : index
    %c4_349 = arith.constant 4 : index
    %c0_350 = arith.constant 0 : index
    %c0_351 = arith.constant 0 : index
    %237 = vector.load %arg16[%c5_348, %c4_349, %c0_350, %c0_351] : memref<7x7x8x128xbf16, #tpu.memory_space<vmem>>, vector<1x1x8x128xbf16>
    %238 = vector.shape_cast %237 : vector<1x1x8x128xbf16> to vector<8x128xbf16>
    %cst_352 = arith.constant dense<0.000000e+00> : vector<16x128xf32>
    %239 = tpu.matmul %236, %238, %cst_352 {dimension_numbers = #tpu.dot_dimension_numbers<[1], [0], [0], [1], [0, 0, 1, 1], [], []>} : vector<16x8xbf16>, vector<8x128xbf16>, vector<16x128xf32> -> vector<16x128xf32>
    %240 = arith.addf %234, %239 : vector<16x128xf32>
    %c0_353 = arith.constant 0 : index
    %c0_354 = arith.constant 0 : index
    %c2_355 = arith.constant 2 : index
    %c0_356 = arith.constant 0 : index
    %241 = vector.load %arg13[%c0_353, %c0_354, %c2_355, %c0_356] : memref<1x1x19x8xbf16, #tpu.memory_space<vmem>>, vector<1x1x16x8xbf16>
    %242 = vector.shape_cast %241 : vector<1x1x16x8xbf16> to vector<16x8xbf16>
    %c5_357 = arith.constant 5 : index
    %c5_358 = arith.constant 5 : index
    %c0_359 = arith.constant 0 : index
    %c0_360 = arith.constant 0 : index
    %243 = vector.load %arg16[%c5_357, %c5_358, %c0_359, %c0_360] : memref<7x7x8x128xbf16, #tpu.memory_space<vmem>>, vector<1x1x8x128xbf16>
    %244 = vector.shape_cast %243 : vector<1x1x8x128xbf16> to vector<8x128xbf16>
    %cst_361 = arith.constant dense<0.000000e+00> : vector<16x128xf32>
    %245 = tpu.matmul %242, %244, %cst_361 {dimension_numbers = #tpu.dot_dimension_numbers<[1], [0], [0], [1], [0, 0, 1, 1], [], []>} : vector<16x8xbf16>, vector<8x128xbf16>, vector<16x128xf32> -> vector<16x128xf32>
    %246 = arith.addf %240, %245 : vector<16x128xf32>
    %c0_362 = arith.constant 0 : index
    %c0_363 = arith.constant 0 : index
    %c3_364 = arith.constant 3 : index
    %c0_365 = arith.constant 0 : index
    %247 = vector.load %arg12[%c0_362, %c0_363, %c3_364, %c0_365] : memref<1x1x19x8xbf16, #tpu.memory_space<vmem>>, vector<1x1x16x8xbf16>
    %248 = vector.shape_cast %247 : vector<1x1x16x8xbf16> to vector<16x8xbf16>
    %c5_366 = arith.constant 5 : index
    %c6_367 = arith.constant 6 : index
    %c0_368 = arith.constant 0 : index
    %c0_369 = arith.constant 0 : index
    %249 = vector.load %arg16[%c5_366, %c6_367, %c0_368, %c0_369] : memref<7x7x8x128xbf16, #tpu.memory_space<vmem>>, vector<1x1x8x128xbf16>
    %250 = vector.shape_cast %249 : vector<1x1x8x128xbf16> to vector<8x128xbf16>
    %cst_370 = arith.constant dense<0.000000e+00> : vector<16x128xf32>
    %251 = tpu.matmul %248, %250, %cst_370 {dimension_numbers = #tpu.dot_dimension_numbers<[1], [0], [0], [1], [0, 0, 1, 1], [], []>} : vector<16x8xbf16>, vector<8x128xbf16>, vector<16x128xf32> -> vector<16x128xf32>
    %252 = arith.addf %246, %251 : vector<16x128xf32>
    %c0_371 = arith.constant 0 : index
    %c0_372 = arith.constant 0 : index
    %c0_373 = arith.constant 0 : index
    %c0_374 = arith.constant 0 : index
    %253 = vector.load %arg14[%c0_371, %c0_372, %c0_373, %c0_374] : memref<1x1x19x8xbf16, #tpu.memory_space<vmem>>, vector<1x1x16x8xbf16>
    %254 = vector.shape_cast %253 : vector<1x1x16x8xbf16> to vector<16x8xbf16>
    %c6_375 = arith.constant 6 : index
    %c0_376 = arith.constant 0 : index
    %c0_377 = arith.constant 0 : index
    %c0_378 = arith.constant 0 : index
    %255 = vector.load %arg16[%c6_375, %c0_376, %c0_377, %c0_378] : memref<7x7x8x128xbf16, #tpu.memory_space<vmem>>, vector<1x1x8x128xbf16>
    %256 = vector.shape_cast %255 : vector<1x1x8x128xbf16> to vector<8x128xbf16>
    %cst_379 = arith.constant dense<0.000000e+00> : vector<16x128xf32>
    %257 = tpu.matmul %254, %256, %cst_379 {dimension_numbers = #tpu.dot_dimension_numbers<[1], [0], [0], [1], [0, 0, 1, 1], [], []>} : vector<16x8xbf16>, vector<8x128xbf16>, vector<16x128xf32> -> vector<16x128xf32>
    %258 = arith.addf %252, %257 : vector<16x128xf32>
    %c0_380 = arith.constant 0 : index
    %c0_381 = arith.constant 0 : index
    %c0_382 = arith.constant 0 : index
    %c0_383 = arith.constant 0 : index
    %259 = vector.load %arg15[%c0_380, %c0_381, %c0_382, %c0_383] : memref<1x1x19x8xbf16, #tpu.memory_space<vmem>>, vector<1x1x16x8xbf16>
    %260 = vector.shape_cast %259 : vector<1x1x16x8xbf16> to vector<16x8xbf16>
    %c6_384 = arith.constant 6 : index
    %c1_385 = arith.constant 1 : index
    %c0_386 = arith.constant 0 : index
    %c0_387 = arith.constant 0 : index
    %261 = vector.load %arg16[%c6_384, %c1_385, %c0_386, %c0_387] : memref<7x7x8x128xbf16, #tpu.memory_space<vmem>>, vector<1x1x8x128xbf16>
    %262 = vector.shape_cast %261 : vector<1x1x8x128xbf16> to vector<8x128xbf16>
    %cst_388 = arith.constant dense<0.000000e+00> : vector<16x128xf32>
    %263 = tpu.matmul %260, %262, %cst_388 {dimension_numbers = #tpu.dot_dimension_numbers<[1], [0], [0], [1], [0, 0, 1, 1], [], []>} : vector<16x8xbf16>, vector<8x128xbf16>, vector<16x128xf32> -> vector<16x128xf32>
    %264 = arith.addf %258, %263 : vector<16x128xf32>
    %c0_389 = arith.constant 0 : index
    %c0_390 = arith.constant 0 : index
    %c1_391 = arith.constant 1 : index
    %c0_392 = arith.constant 0 : index
    %265 = vector.load %arg14[%c0_389, %c0_390, %c1_391, %c0_392] : memref<1x1x19x8xbf16, #tpu.memory_space<vmem>>, vector<1x1x16x8xbf16>
    %266 = vector.shape_cast %265 : vector<1x1x16x8xbf16> to vector<16x8xbf16>
    %c6_393 = arith.constant 6 : index
    %c2_394 = arith.constant 2 : index
    %c0_395 = arith.constant 0 : index
    %c0_396 = arith.constant 0 : index
    %267 = vector.load %arg16[%c6_393, %c2_394, %c0_395, %c0_396] : memref<7x7x8x128xbf16, #tpu.memory_space<vmem>>, vector<1x1x8x128xbf16>
    %268 = vector.shape_cast %267 : vector<1x1x8x128xbf16> to vector<8x128xbf16>
    %cst_397 = arith.constant dense<0.000000e+00> : vector<16x128xf32>
    %269 = tpu.matmul %266, %268, %cst_397 {dimension_numbers = #tpu.dot_dimension_numbers<[1], [0], [0], [1], [0, 0, 1, 1], [], []>} : vector<16x8xbf16>, vector<8x128xbf16>, vector<16x128xf32> -> vector<16x128xf32>
    %270 = arith.addf %264, %269 : vector<16x128xf32>
    %c0_398 = arith.constant 0 : index
    %c0_399 = arith.constant 0 : index
    %c1_400 = arith.constant 1 : index
    %c0_401 = arith.constant 0 : index
    %271 = vector.load %arg15[%c0_398, %c0_399, %c1_400, %c0_401] : memref<1x1x19x8xbf16, #tpu.memory_space<vmem>>, vector<1x1x16x8xbf16>
    %272 = vector.shape_cast %271 : vector<1x1x16x8xbf16> to vector<16x8xbf16>
    %c6_402 = arith.constant 6 : index
    %c3_403 = arith.constant 3 : index
    %c0_404 = arith.constant 0 : index
    %c0_405 = arith.constant 0 : index
    %273 = vector.load %arg16[%c6_402, %c3_403, %c0_404, %c0_405] : memref<7x7x8x128xbf16, #tpu.memory_space<vmem>>, vector<1x1x8x128xbf16>
    %274 = vector.shape_cast %273 : vector<1x1x8x128xbf16> to vector<8x128xbf16>
    %cst_406 = arith.constant dense<0.000000e+00> : vector<16x128xf32>
    %275 = tpu.matmul %272, %274, %cst_406 {dimension_numbers = #tpu.dot_dimension_numbers<[1], [0], [0], [1], [0, 0, 1, 1], [], []>} : vector<16x8xbf16>, vector<8x128xbf16>, vector<16x128xf32> -> vector<16x128xf32>
    %276 = arith.addf %270, %275 : vector<16x128xf32>
    %c0_407 = arith.constant 0 : index
    %c0_408 = arith.constant 0 : index
    %c2_409 = arith.constant 2 : index
    %c0_410 = arith.constant 0 : index
    %277 = vector.load %arg14[%c0_407, %c0_408, %c2_409, %c0_410] : memref<1x1x19x8xbf16, #tpu.memory_space<vmem>>, vector<1x1x16x8xbf16>
    %278 = vector.shape_cast %277 : vector<1x1x16x8xbf16> to vector<16x8xbf16>
    %c6_411 = arith.constant 6 : index
    %c4_412 = arith.constant 4 : index
    %c0_413 = arith.constant 0 : index
    %c0_414 = arith.constant 0 : index
    %279 = vector.load %arg16[%c6_411, %c4_412, %c0_413, %c0_414] : memref<7x7x8x128xbf16, #tpu.memory_space<vmem>>, vector<1x1x8x128xbf16>
    %280 = vector.shape_cast %279 : vector<1x1x8x128xbf16> to vector<8x128xbf16>
    %cst_415 = arith.constant dense<0.000000e+00> : vector<16x128xf32>
    %281 = tpu.matmul %278, %280, %cst_415 {dimension_numbers = #tpu.dot_dimension_numbers<[1], [0], [0], [1], [0, 0, 1, 1], [], []>} : vector<16x8xbf16>, vector<8x128xbf16>, vector<16x128xf32> -> vector<16x128xf32>
    %282 = arith.addf %276, %281 : vector<16x128xf32>
    %c0_416 = arith.constant 0 : index
    %c0_417 = arith.constant 0 : index
    %c2_418 = arith.constant 2 : index
    %c0_419 = arith.constant 0 : index
    %283 = vector.load %arg15[%c0_416, %c0_417, %c2_418, %c0_419] : memref<1x1x19x8xbf16, #tpu.memory_space<vmem>>, vector<1x1x16x8xbf16>
    %284 = vector.shape_cast %283 : vector<1x1x16x8xbf16> to vector<16x8xbf16>
    %c6_420 = arith.constant 6 : index
    %c5_421 = arith.constant 5 : index
    %c0_422 = arith.constant 0 : index
    %c0_423 = arith.constant 0 : index
    %285 = vector.load %arg16[%c6_420, %c5_421, %c0_422, %c0_423] : memref<7x7x8x128xbf16, #tpu.memory_space<vmem>>, vector<1x1x8x128xbf16>
    %286 = vector.shape_cast %285 : vector<1x1x8x128xbf16> to vector<8x128xbf16>
    %cst_424 = arith.constant dense<0.000000e+00> : vector<16x128xf32>
    %287 = tpu.matmul %284, %286, %cst_424 {dimension_numbers = #tpu.dot_dimension_numbers<[1], [0], [0], [1], [0, 0, 1, 1], [], []>} : vector<16x8xbf16>, vector<8x128xbf16>, vector<16x128xf32> -> vector<16x128xf32>
    %288 = arith.addf %282, %287 : vector<16x128xf32>
    %c0_425 = arith.constant 0 : index
    %c0_426 = arith.constant 0 : index
    %c3_427 = arith.constant 3 : index
    %c0_428 = arith.constant 0 : index
    %289 = vector.load %arg14[%c0_425, %c0_426, %c3_427, %c0_428] : memref<1x1x19x8xbf16, #tpu.memory_space<vmem>>, vector<1x1x16x8xbf16>
    %290 = vector.shape_cast %289 : vector<1x1x16x8xbf16> to vector<16x8xbf16>
    %c6_429 = arith.constant 6 : index
    %c6_430 = arith.constant 6 : index
    %c0_431 = arith.constant 0 : index
    %c0_432 = arith.constant 0 : index
    %291 = vector.load %arg16[%c6_429, %c6_430, %c0_431, %c0_432] : memref<7x7x8x128xbf16, #tpu.memory_space<vmem>>, vector<1x1x8x128xbf16>
    %292 = vector.shape_cast %291 : vector<1x1x8x128xbf16> to vector<8x128xbf16>
    %cst_433 = arith.constant dense<0.000000e+00> : vector<16x128xf32>
    %293 = tpu.matmul %290, %292, %cst_433 {dimension_numbers = #tpu.dot_dimension_numbers<[1], [0], [0], [1], [0, 0, 1, 1], [], []>} : vector<16x8xbf16>, vector<8x128xbf16>, vector<16x128xf32> -> vector<16x128xf32>
    %294 = arith.addf %288, %293 : vector<16x128xf32>
    %c0_434 = arith.constant 0 : index
    %c0_435 = arith.constant 0 : index
    %295 = vector.load %arg17[%c0_434, %c0_435] : memref<1x128xf32, #tpu.memory_space<vmem>>, vector<1x128xf32>
    %296 = vector.broadcast %295 : vector<1x128xf32> to vector<16x128xf32>
    %297 = arith.addf %294, %296 : vector<16x128xf32>
    %cst_436 = arith.constant 0.000000e+00 : f32
    %298 = vector.broadcast %cst_436 : f32 to vector<16x128xf32>
    %299 = arith.maximumf %297, %298 : vector<16x128xf32>
    %300 = arith.truncf %299 : vector<16x128xf32> to vector<16x128xbf16>
    %c0_437 = arith.constant 0 : index
    %c0_438 = arith.constant 0 : index
    %c0_439 = arith.constant 0 : index
    %c0_440 = arith.constant 0 : index
    %301 = vector.load %arg18[%c0_437, %c0_438, %c0_439, %c0_440] : memref<1x1x16x128xbf16, #tpu.memory_space<vmem>>, vector<1x1x16x128xbf16>
    %302 = vector.shape_cast %301 : vector<1x1x16x128xbf16> to vector<16x128xbf16>
    %303 = vector.shape_cast %300 : vector<16x128xbf16> to vector<1x1x16x128xbf16>
    tpu.vector_store %arg18[%c0_437, %c0_438, %c0_439, %c0_440], %303 {strides = array<i32>} : memref<1x1x16x128xbf16, #tpu.memory_space<vmem>>, vector<1x1x16x128xbf16>,
    return
  }
  func.func @transform_0(%arg0: i32, %arg1: i32) -> (i32, i32, i32, i32) {
    %c2_i32 = arith.constant 2 : i32
    %0 = arith.muli %arg1, %c2_i32 : i32
    %c0_i32 = arith.constant 0 : i32
    %1 = arith.addi %0, %c0_i32 : i32
    %c0_i32_0 = arith.constant 0 : i32
    %c0_i32_1 = arith.constant 0 : i32
    %c0_i32_2 = arith.constant 0 : i32
    return %arg0, %1, %c0_i32_0, %c0_i32_1 : i32, i32, i32, i32
  }
  func.func @transform_1(%arg0: i32, %arg1: i32) -> (i32, i32, i32, i32) {
    %c2_i32 = arith.constant 2 : i32
    %0 = arith.muli %arg1, %c2_i32 : i32
    %c0_i32 = arith.constant 0 : i32
    %1 = arith.addi %0, %c0_i32 : i32
    %c0_i32_0 = arith.constant 0 : i32
    %c0_i32_1 = arith.constant 0 : i32
    %c0_i32_2 = arith.constant 0 : i32
    return %arg0, %1, %c0_i32_0, %c0_i32_1 : i32, i32, i32, i32
  }
  func.func @transform_2(%arg0: i32, %arg1: i32) -> (i32, i32, i32, i32) {
    %c2_i32 = arith.constant 2 : i32
    %0 = arith.muli %arg1, %c2_i32 : i32
    %c1_i32 = arith.constant 1 : i32
    %1 = arith.addi %0, %c1_i32 : i32
    %c0_i32 = arith.constant 0 : i32
    %c0_i32_0 = arith.constant 0 : i32
    %c0_i32_1 = arith.constant 0 : i32
    return %arg0, %1, %c0_i32, %c0_i32_0 : i32, i32, i32, i32
  }
  func.func @transform_3(%arg0: i32, %arg1: i32) -> (i32, i32, i32, i32) {
    %c2_i32 = arith.constant 2 : i32
    %0 = arith.muli %arg1, %c2_i32 : i32
    %c1_i32 = arith.constant 1 : i32
    %1 = arith.addi %0, %c1_i32 : i32
    %c0_i32 = arith.constant 0 : i32
    %c0_i32_0 = arith.constant 0 : i32
    %c0_i32_1 = arith.constant 0 : i32
    return %arg0, %1, %c0_i32, %c0_i32_0 : i32, i32, i32, i32
  }
  func.func @transform_4(%arg0: i32, %arg1: i32) -> (i32, i32, i32, i32) {
    %c2_i32 = arith.constant 2 : i32
    %0 = arith.muli %arg1, %c2_i32 : i32
    %c2_i32_0 = arith.constant 2 : i32
    %1 = arith.addi %0, %c2_i32_0 : i32
    %c0_i32 = arith.constant 0 : i32
    %c0_i32_1 = arith.constant 0 : i32
    %c0_i32_2 = arith.constant 0 : i32
    return %arg0, %1, %c0_i32, %c0_i32_1 : i32, i32, i32, i32
  }
  func.func @transform_5(%arg0: i32, %arg1: i32) -> (i32, i32, i32, i32) {
    %c2_i32 = arith.constant 2 : i32
    %0 = arith.muli %arg1, %c2_i32 : i32
    %c2_i32_0 = arith.constant 2 : i32
    %1 = arith.addi %0, %c2_i32_0 : i32
    %c0_i32 = arith.constant 0 : i32
    %c0_i32_1 = arith.constant 0 : i32
    %c0_i32_2 = arith.constant 0 : i32
    return %arg0, %1, %c0_i32, %c0_i32_1 : i32, i32, i32, i32
  }
  func.func @transform_6(%arg0: i32, %arg1: i32) -> (i32, i32, i32, i32) {
    %c2_i32 = arith.constant 2 : i32
    %0 = arith.muli %arg1, %c2_i32 : i32
    %c3_i32 = arith.constant 3 : i32
    %1 = arith.addi %0, %c3_i32 : i32
    %c0_i32 = arith.constant 0 : i32
    %c0_i32_0 = arith.constant 0 : i32
    %c0_i32_1 = arith.constant 0 : i32
    return %arg0, %1, %c0_i32, %c0_i32_0 : i32, i32, i32, i32
  }
  func.func @transform_7(%arg0: i32, %arg1: i32) -> (i32, i32, i32, i32) {
    %c2_i32 = arith.constant 2 : i32
    %0 = arith.muli %arg1, %c2_i32 : i32
    %c3_i32 = arith.constant 3 : i32
    %1 = arith.addi %0, %c3_i32 : i32
    %c0_i32 = arith.constant 0 : i32
    %c0_i32_0 = arith.constant 0 : i32
    %c0_i32_1 = arith.constant 0 : i32
    return %arg0, %1, %c0_i32, %c0_i32_0 : i32, i32, i32, i32
  }
  func.func @transform_8(%arg0: i32, %arg1: i32) -> (i32, i32, i32, i32) {
    %c2_i32 = arith.constant 2 : i32
    %0 = arith.muli %arg1, %c2_i32 : i32
    %c4_i32 = arith.constant 4 : i32
    %1 = arith.addi %0, %c4_i32 : i32
    %c0_i32 = arith.constant 0 : i32
    %c0_i32_0 = arith.constant 0 : i32
    %c0_i32_1 = arith.constant 0 : i32
    return %arg0, %1, %c0_i32, %c0_i32_0 : i32, i32, i32, i32
  }
  func.func @transform_9(%arg0: i32, %arg1: i32) -> (i32, i32, i32, i32) {
    %c2_i32 = arith.constant 2 : i32
    %0 = arith.muli %arg1, %c2_i32 : i32
    %c4_i32 = arith.constant 4 : i32
    %1 = arith.addi %0, %c4_i32 : i32
    %c0_i32 = arith.constant 0 : i32
    %c0_i32_0 = arith.constant 0 : i32
    %c0_i32_1 = arith.constant 0 : i32
    return %arg0, %1, %c0_i32, %c0_i32_0 : i32, i32, i32, i32
  }
  func.func @transform_10(%arg0: i32, %arg1: i32) -> (i32, i32, i32, i32) {
    %c2_i32 = arith.constant 2 : i32
    %0 = arith.muli %arg1, %c2_i32 : i32
    %c5_i32 = arith.constant 5 : i32
    %1 = arith.addi %0, %c5_i32 : i32
    %c0_i32 = arith.constant 0 : i32
    %c0_i32_0 = arith.constant 0 : i32
    %c0_i32_1 = arith.constant 0 : i32
    return %arg0, %1, %c0_i32, %c0_i32_0 : i32, i32, i32, i32
  }
  func.func @transform_11(%arg0: i32, %arg1: i32) -> (i32, i32, i32, i32) {
    %c2_i32 = arith.constant 2 : i32
    %0 = arith.muli %arg1, %c2_i32 : i32
    %c5_i32 = arith.constant 5 : i32
    %1 = arith.addi %0, %c5_i32 : i32
    %c0_i32 = arith.constant 0 : i32
    %c0_i32_0 = arith.constant 0 : i32
    %c0_i32_1 = arith.constant 0 : i32
    return %arg0, %1, %c0_i32, %c0_i32_0 : i32, i32, i32, i32
  }
  func.func @transform_12(%arg0: i32, %arg1: i32) -> (i32, i32, i32, i32) {
    %c2_i32 = arith.constant 2 : i32
    %0 = arith.muli %arg1, %c2_i32 : i32
    %c6_i32 = arith.constant 6 : i32
    %1 = arith.addi %0, %c6_i32 : i32
    %c0_i32 = arith.constant 0 : i32
    %c0_i32_0 = arith.constant 0 : i32
    %c0_i32_1 = arith.constant 0 : i32
    return %arg0, %1, %c0_i32, %c0_i32_0 : i32, i32, i32, i32
  }
  func.func @transform_13(%arg0: i32, %arg1: i32) -> (i32, i32, i32, i32) {
    %c2_i32 = arith.constant 2 : i32
    %0 = arith.muli %arg1, %c2_i32 : i32
    %c6_i32 = arith.constant 6 : i32
    %1 = arith.addi %0, %c6_i32 : i32
    %c0_i32 = arith.constant 0 : i32
    %c0_i32_0 = arith.constant 0 : i32
    %c0_i32_1 = arith.constant 0 : i32
    return %arg0, %1, %c0_i32, %c0_i32_0 : i32, i32, i32, i32
  }
  func.func @transform_14(%arg0: i32, %arg1: i32) -> (i32, i32, i32, i32) {
    %c0_i32 = arith.constant 0 : i32
    %c0_i32_0 = arith.constant 0 : i32
    %c0_i32_1 = arith.constant 0 : i32
    %c0_i32_2 = arith.constant 0 : i32
    %c0_i32_3 = arith.constant 0 : i32
    return %c0_i32, %c0_i32_0, %c0_i32_1, %c0_i32_2 : i32, i32, i32, i32
  }
  func.func @transform_15(%arg0: i32, %arg1: i32) -> (i32, i32) {
    %c0_i32 = arith.constant 0 : i32
    %c0_i32_0 = arith.constant 0 : i32
    %c0_i32_1 = arith.constant 0 : i32
    return %c0_i32, %c0_i32_0 : i32, i32
  }
  func.func @transform_16(%arg0: i32, %arg1: i32) -> (i32, i32, i32, i32) {
    %c0_i32 = arith.constant 0 : i32
    %c0_i32_0 = arith.constant 0 : i32
    %c0_i32_1 = arith.constant 0 : i32
    return %arg0, %arg1, %c0_i32, %c0_i32_0 : i32, i32, i32, i32
  }
}

module attributes {stable_mosaic.version = 11 : i64} {
  func.func @_mm_kernel(%arg0: i32, %arg1: i32, %arg2: i32, %arg3: memref<128x128xbf16, #tpu.memory_space<vmem>>, %arg4: memref<128x128xbf16, #tpu.memory_space<vmem>>, %arg5: memref<1x128xf32, #tpu.memory_space<vmem>>, %arg6: memref<128x128xbf16, #tpu.memory_space<vmem>>, %arg7: memref<128x128xf32, #tpu.memory_space<vmem>>) attributes {dimension_semantics = [#tpu.dimension_semantics<parallel>, #tpu.dimension_semantics<parallel>, #tpu.dimension_semantics<arbitrary>], iteration_bounds = array<i64: 1, 1, 1>, scalar_prefetch = 0 : i64, scratch_operands = 1 : i64, tpu.core_type = #tpu.core_type<tc>, window_params = [{transform_indices = @transform_0, window_bounds = array<i64: 128, 128>}, {transform_indices = @transform_1, window_bounds = array<i64: 128, 128>}, {transform_indices = @transform_2, window_bounds = array<i64: 1, 128>}, {transform_indices = @transform_3, window_bounds = array<i64: 128, 128>}]} {
    %c0_i32 = arith.constant 0 : i32
    %0 = arith.cmpi eq, %arg2, %c0_i32 : i32
    %1 = arith.extui %0 : i1 to i32
    %c0_i32_0 = arith.constant 0 : i32
    %2 = arith.cmpi ne, %1, %c0_i32_0 : i32
    scf.if %2 {
      %cst_10 = arith.constant 0.000000e+00 : f32
      %12 = vector.broadcast %cst_10 : f32 to vector<128x128xf32>
      %c0_11 = arith.constant 0 : index
      %c0_12 = arith.constant 0 : index
      %13 = vector.load %arg7[%c0_11, %c0_12] : memref<128x128xf32, #tpu.memory_space<vmem>>, vector<128x128xf32>
      tpu.vector_store %arg7[%c0_11, %c0_12], %12 {strides = array<i32>} : memref<128x128xf32, #tpu.memory_space<vmem>>, vector<128x128xf32>,
    } else {
    }
    %c0 = arith.constant 0 : index
    %c0_1 = arith.constant 0 : index
    %3 = vector.load %arg7[%c0, %c0_1] : memref<128x128xf32, #tpu.memory_space<vmem>>, vector<128x128xf32>
    %c0_2 = arith.constant 0 : index
    %c0_3 = arith.constant 0 : index
    %4 = vector.load %arg3[%c0_2, %c0_3] : memref<128x128xbf16, #tpu.memory_space<vmem>>, vector<128x128xbf16>
    %c0_4 = arith.constant 0 : index
    %c0_5 = arith.constant 0 : index
    %5 = vector.load %arg4[%c0_4, %c0_5] : memref<128x128xbf16, #tpu.memory_space<vmem>>, vector<128x128xbf16>
    %cst = arith.constant dense<0.000000e+00> : vector<128x128xf32>
    %6 = tpu.matmul %4, %5, %cst {dimension_numbers = #tpu.dot_dimension_numbers<[1], [0], [0], [1], [0, 0, 1, 1], [], []>} : vector<128x128xbf16>, vector<128x128xbf16>, vector<128x128xf32> -> vector<128x128xf32>
    %7 = arith.addf %3, %6 : vector<128x128xf32>
    %c0_6 = arith.constant 0 : index
    %c0_7 = arith.constant 0 : index
    %8 = vector.load %arg7[%c0_6, %c0_7] : memref<128x128xf32, #tpu.memory_space<vmem>>, vector<128x128xf32>
    tpu.vector_store %arg7[%c0_6, %c0_7], %7 {strides = array<i32>} : memref<128x128xf32, #tpu.memory_space<vmem>>, vector<128x128xf32>,
    %c0_i32_8 = arith.constant 0 : i32
    %9 = arith.cmpi eq, %arg2, %c0_i32_8 : i32
    %10 = arith.extui %9 : i1 to i32
    %c0_i32_9 = arith.constant 0 : i32
    %11 = arith.cmpi ne, %10, %c0_i32_9 : i32
    scf.if %11 {
      %c0_10 = arith.constant 0 : index
      %c0_11 = arith.constant 0 : index
      %12 = vector.load %arg7[%c0_10, %c0_11] : memref<128x128xf32, #tpu.memory_space<vmem>>, vector<128x128xf32>
      %c0_12 = arith.constant 0 : index
      %c0_13 = arith.constant 0 : index
      %13 = vector.load %arg5[%c0_12, %c0_13] : memref<1x128xf32, #tpu.memory_space<vmem>>, vector<1x128xf32>
      %14 = vector.broadcast %13 : vector<1x128xf32> to vector<128x128xf32>
      %15 = arith.addf %12, %14 : vector<128x128xf32>
      %cst_14 = arith.constant 0.000000e+00 : f32
      %16 = vector.broadcast %cst_14 : f32 to vector<128x128xf32>
      %17 = arith.maximumf %15, %16 : vector<128x128xf32>
      %18 = arith.truncf %17 : vector<128x128xf32> to vector<128x128xbf16>
      %c0_15 = arith.constant 0 : index
      %c0_16 = arith.constant 0 : index
      %19 = vector.load %arg6[%c0_15, %c0_16] : memref<128x128xbf16, #tpu.memory_space<vmem>>, vector<128x128xbf16>
      tpu.vector_store %arg6[%c0_15, %c0_16], %18 {strides = array<i32>} : memref<128x128xbf16, #tpu.memory_space<vmem>>, vector<128x128xbf16>,
    } else {
    }
    return
  }
  func.func @transform_0(%arg0: i32, %arg1: i32, %arg2: i32) -> (i32, i32) {
    %c0_i32 = arith.constant 0 : i32
    return %arg0, %arg2 : i32, i32
  }
  func.func @transform_1(%arg0: i32, %arg1: i32, %arg2: i32) -> (i32, i32) {
    %c0_i32 = arith.constant 0 : i32
    return %arg2, %arg1 : i32, i32
  }
  func.func @transform_2(%arg0: i32, %arg1: i32, %arg2: i32) -> (i32, i32) {
    %c0_i32 = arith.constant 0 : i32
    %c0_i32_0 = arith.constant 0 : i32
    return %c0_i32, %arg1 : i32, i32
  }
  func.func @transform_3(%arg0: i32, %arg1: i32, %arg2: i32) -> (i32, i32) {
    %c0_i32 = arith.constant 0 : i32
    return %arg0, %arg1 : i32, i32
  }
}

module attributes {stable_mosaic.version = 11 : i64} {
  func.func @_mm_kernel(%arg0: i32, %arg1: i32, %arg2: i32, %arg3: memref<128x128xbf16, #tpu.memory_space<vmem>>, %arg4: memref<128x128xbf16, #tpu.memory_space<vmem>>, %arg5: memref<1x128xf32, #tpu.memory_space<vmem>>, %arg6: memref<128x128xbf16, #tpu.memory_space<vmem>>, %arg7: memref<128x128xf32, #tpu.memory_space<vmem>>) attributes {dimension_semantics = [#tpu.dimension_semantics<parallel>, #tpu.dimension_semantics<parallel>, #tpu.dimension_semantics<arbitrary>], iteration_bounds = array<i64: 1, 1, 1>, scalar_prefetch = 0 : i64, scratch_operands = 1 : i64, tpu.core_type = #tpu.core_type<tc>, window_params = [{transform_indices = @transform_0, window_bounds = array<i64: 128, 128>}, {transform_indices = @transform_1, window_bounds = array<i64: 128, 128>}, {transform_indices = @transform_2, window_bounds = array<i64: 1, 128>}, {transform_indices = @transform_3, window_bounds = array<i64: 128, 128>}]} {
    %c0_i32 = arith.constant 0 : i32
    %0 = arith.cmpi eq, %arg2, %c0_i32 : i32
    %1 = arith.extui %0 : i1 to i32
    %c0_i32_0 = arith.constant 0 : i32
    %2 = arith.cmpi ne, %1, %c0_i32_0 : i32
    scf.if %2 {
      %cst_10 = arith.constant 0.000000e+00 : f32
      %12 = vector.broadcast %cst_10 : f32 to vector<128x128xf32>
      %c0_11 = arith.constant 0 : index
      %c0_12 = arith.constant 0 : index
      %13 = vector.load %arg7[%c0_11, %c0_12] : memref<128x128xf32, #tpu.memory_space<vmem>>, vector<128x128xf32>
      tpu.vector_store %arg7[%c0_11, %c0_12], %12 {strides = array<i32>} : memref<128x128xf32, #tpu.memory_space<vmem>>, vector<128x128xf32>,
    } else {
    }
    %c0 = arith.constant 0 : index
    %c0_1 = arith.constant 0 : index
    %3 = vector.load %arg7[%c0, %c0_1] : memref<128x128xf32, #tpu.memory_space<vmem>>, vector<128x128xf32>
    %c0_2 = arith.constant 0 : index
    %c0_3 = arith.constant 0 : index
    %4 = vector.load %arg3[%c0_2, %c0_3] : memref<128x128xbf16, #tpu.memory_space<vmem>>, vector<128x128xbf16>
    %c0_4 = arith.constant 0 : index
    %c0_5 = arith.constant 0 : index
    %5 = vector.load %arg4[%c0_4, %c0_5] : memref<128x128xbf16, #tpu.memory_space<vmem>>, vector<128x128xbf16>
    %cst = arith.constant dense<0.000000e+00> : vector<128x128xf32>
    %6 = tpu.matmul %4, %5, %cst {dimension_numbers = #tpu.dot_dimension_numbers<[1], [0], [0], [1], [0, 0, 1, 1], [], []>} : vector<128x128xbf16>, vector<128x128xbf16>, vector<128x128xf32> -> vector<128x128xf32>
    %7 = arith.addf %3, %6 : vector<128x128xf32>
    %c0_6 = arith.constant 0 : index
    %c0_7 = arith.constant 0 : index
    %8 = vector.load %arg7[%c0_6, %c0_7] : memref<128x128xf32, #tpu.memory_space<vmem>>, vector<128x128xf32>
    tpu.vector_store %arg7[%c0_6, %c0_7], %7 {strides = array<i32>} : memref<128x128xf32, #tpu.memory_space<vmem>>, vector<128x128xf32>,
    %c0_i32_8 = arith.constant 0 : i32
    %9 = arith.cmpi eq, %arg2, %c0_i32_8 : i32
    %10 = arith.extui %9 : i1 to i32
    %c0_i32_9 = arith.constant 0 : i32
    %11 = arith.cmpi ne, %10, %c0_i32_9 : i32
    scf.if %11 {
      %c0_10 = arith.constant 0 : index
      %c0_11 = arith.constant 0 : index
      %12 = vector.load %arg7[%c0_10, %c0_11] : memref<128x128xf32, #tpu.memory_space<vmem>>, vector<128x128xf32>
      %c0_12 = arith.constant 0 : index
      %c0_13 = arith.constant 0 : index
      %13 = vector.load %arg5[%c0_12, %c0_13] : memref<1x128xf32, #tpu.memory_space<vmem>>, vector<1x128xf32>
      %14 = vector.broadcast %13 : vector<1x128xf32> to vector<128x128xf32>
      %15 = arith.addf %12, %14 : vector<128x128xf32>
      %16 = arith.truncf %15 : vector<128x128xf32> to vector<128x128xbf16>
      %c0_14 = arith.constant 0 : index
      %c0_15 = arith.constant 0 : index
      %17 = vector.load %arg6[%c0_14, %c0_15] : memref<128x128xbf16, #tpu.memory_space<vmem>>, vector<128x128xbf16>
      tpu.vector_store %arg6[%c0_14, %c0_15], %16 {strides = array<i32>} : memref<128x128xbf16, #tpu.memory_space<vmem>>, vector<128x128xbf16>,
    } else {
    }
    return
  }
  func.func @transform_0(%arg0: i32, %arg1: i32, %arg2: i32) -> (i32, i32) {
    %c0_i32 = arith.constant 0 : i32
    return %arg0, %arg2 : i32, i32
  }
  func.func @transform_1(%arg0: i32, %arg1: i32, %arg2: i32) -> (i32, i32) {
    %c0_i32 = arith.constant 0 : i32
    return %arg2, %arg1 : i32, i32
  }
  func.func @transform_2(%arg0: i32, %arg1: i32, %arg2: i32) -> (i32, i32) {
    %c0_i32 = arith.constant 0 : i32
    %c0_i32_0 = arith.constant 0 : i32
    return %c0_i32, %arg1 : i32, i32
  }
  func.func @transform_3(%arg0: i32, %arg1: i32, %arg2: i32) -> (i32, i32) {
    %c0_i32 = arith.constant 0 : i32
    return %arg0, %arg1 : i32, i32
  }
}

module attributes {stable_mosaic.version = 11 : i64} {
  func.func @_maxpool_rows_kernel(%arg0: i32, %arg1: i32, %arg2: memref<1x1x9x128xbf16, #tpu.memory_space<vmem>>, %arg3: memref<1x1x9x128xbf16, #tpu.memory_space<vmem>>, %arg4: memref<1x1x9x128xbf16, #tpu.memory_space<vmem>>, %arg5: memref<1x1x9x128xbf16, #tpu.memory_space<vmem>>, %arg6: memref<1x1x9x128xbf16, #tpu.memory_space<vmem>>, %arg7: memref<1x1x9x128xbf16, #tpu.memory_space<vmem>>, %arg8: memref<1x1x8x128xbf16, #tpu.memory_space<vmem>>) attributes {dimension_semantics = [#tpu.dimension_semantics<parallel>, #tpu.dimension_semantics<parallel>], iteration_bounds = array<i64: 2, 8>, scalar_prefetch = 0 : i64, scratch_operands = 0 : i64, tpu.core_type = #tpu.core_type<tc>, window_params = [{transform_indices = @transform_0, window_bounds = array<i64: 1, 1, 9, 128>}, {transform_indices = @transform_1, window_bounds = array<i64: 1, 1, 9, 128>}, {transform_indices = @transform_2, window_bounds = array<i64: 1, 1, 9, 128>}, {transform_indices = @transform_3, window_bounds = array<i64: 1, 1, 9, 128>}, {transform_indices = @transform_4, window_bounds = array<i64: 1, 1, 9, 128>}, {transform_indices = @transform_5, window_bounds = array<i64: 1, 1, 9, 128>}, {transform_indices = @transform_6, window_bounds = array<i64: 1, 1, 8, 128>}]} {
    %c0 = arith.constant 0 : index
    %c0_0 = arith.constant 0 : index
    %c0_1 = arith.constant 0 : index
    %c0_2 = arith.constant 0 : index
    %0 = vector.load %arg2[%c0, %c0_0, %c0_1, %c0_2] : memref<1x1x9x128xbf16, #tpu.memory_space<vmem>>, vector<1x1x8x128xbf16>
    %1 = vector.shape_cast %0 : vector<1x1x8x128xbf16> to vector<8x128xbf16>
    %c0_3 = arith.constant 0 : index
    %c0_4 = arith.constant 0 : index
    %c0_5 = arith.constant 0 : index
    %c0_6 = arith.constant 0 : index
    %2 = vector.load %arg3[%c0_3, %c0_4, %c0_5, %c0_6] : memref<1x1x9x128xbf16, #tpu.memory_space<vmem>>, vector<1x1x8x128xbf16>
    %3 = vector.shape_cast %2 : vector<1x1x8x128xbf16> to vector<8x128xbf16>
    %4 = arith.maximumf %1, %3 : vector<8x128xbf16>
    %c0_7 = arith.constant 0 : index
    %c0_8 = arith.constant 0 : index
    %c1 = arith.constant 1 : index
    %c0_9 = arith.constant 0 : index
    %5 = vector.load %arg2[%c0_7, %c0_8, %c1, %c0_9] : memref<1x1x9x128xbf16, #tpu.memory_space<vmem>>, vector<1x1x8x128xbf16>
    %6 = vector.shape_cast %5 : vector<1x1x8x128xbf16> to vector<8x128xbf16>
    %7 = arith.maximumf %4, %6 : vector<8x128xbf16>
    %c0_10 = arith.constant 0 : index
    %c0_11 = arith.constant 0 : index
    %c0_12 = arith.constant 0 : index
    %c0_13 = arith.constant 0 : index
    %8 = vector.load %arg4[%c0_10, %c0_11, %c0_12, %c0_13] : memref<1x1x9x128xbf16, #tpu.memory_space<vmem>>, vector<1x1x8x128xbf16>
    %9 = vector.shape_cast %8 : vector<1x1x8x128xbf16> to vector<8x128xbf16>
    %10 = arith.maximumf %7, %9 : vector<8x128xbf16>
    %c0_14 = arith.constant 0 : index
    %c0_15 = arith.constant 0 : index
    %c0_16 = arith.constant 0 : index
    %c0_17 = arith.constant 0 : index
    %11 = vector.load %arg5[%c0_14, %c0_15, %c0_16, %c0_17] : memref<1x1x9x128xbf16, #tpu.memory_space<vmem>>, vector<1x1x8x128xbf16>
    %12 = vector.shape_cast %11 : vector<1x1x8x128xbf16> to vector<8x128xbf16>
    %13 = arith.maximumf %10, %12 : vector<8x128xbf16>
    %c0_18 = arith.constant 0 : index
    %c0_19 = arith.constant 0 : index
    %c1_20 = arith.constant 1 : index
    %c0_21 = arith.constant 0 : index
    %14 = vector.load %arg4[%c0_18, %c0_19, %c1_20, %c0_21] : memref<1x1x9x128xbf16, #tpu.memory_space<vmem>>, vector<1x1x8x128xbf16>
    %15 = vector.shape_cast %14 : vector<1x1x8x128xbf16> to vector<8x128xbf16>
    %16 = arith.maximumf %13, %15 : vector<8x128xbf16>
    %c0_22 = arith.constant 0 : index
    %c0_23 = arith.constant 0 : index
    %c0_24 = arith.constant 0 : index
    %c0_25 = arith.constant 0 : index
    %17 = vector.load %arg6[%c0_22, %c0_23, %c0_24, %c0_25] : memref<1x1x9x128xbf16, #tpu.memory_space<vmem>>, vector<1x1x8x128xbf16>
    %18 = vector.shape_cast %17 : vector<1x1x8x128xbf16> to vector<8x128xbf16>
    %19 = arith.maximumf %16, %18 : vector<8x128xbf16>
    %c0_26 = arith.constant 0 : index
    %c0_27 = arith.constant 0 : index
    %c0_28 = arith.constant 0 : index
    %c0_29 = arith.constant 0 : index
    %20 = vector.load %arg7[%c0_26, %c0_27, %c0_28, %c0_29] : memref<1x1x9x128xbf16, #tpu.memory_space<vmem>>, vector<1x1x8x128xbf16>
    %21 = vector.shape_cast %20 : vector<1x1x8x128xbf16> to vector<8x128xbf16>
    %22 = arith.maximumf %19, %21 : vector<8x128xbf16>
    %c0_30 = arith.constant 0 : index
    %c0_31 = arith.constant 0 : index
    %c1_32 = arith.constant 1 : index
    %c0_33 = arith.constant 0 : index
    %23 = vector.load %arg6[%c0_30, %c0_31, %c1_32, %c0_33] : memref<1x1x9x128xbf16, #tpu.memory_space<vmem>>, vector<1x1x8x128xbf16>
    %24 = vector.shape_cast %23 : vector<1x1x8x128xbf16> to vector<8x128xbf16>
    %25 = arith.maximumf %22, %24 : vector<8x128xbf16>
    %c0_34 = arith.constant 0 : index
    %c0_35 = arith.constant 0 : index
    %c0_36 = arith.constant 0 : index
    %c0_37 = arith.constant 0 : index
    %26 = vector.load %arg8[%c0_34, %c0_35, %c0_36, %c0_37] : memref<1x1x8x128xbf16, #tpu.memory_space<vmem>>, vector<1x1x8x128xbf16>
    %27 = vector.shape_cast %26 : vector<1x1x8x128xbf16> to vector<8x128xbf16>
    %28 = vector.shape_cast %25 : vector<8x128xbf16> to vector<1x1x8x128xbf16>
    tpu.vector_store %arg8[%c0_34, %c0_35, %c0_36, %c0_37], %28 {strides = array<i32>} : memref<1x1x8x128xbf16, #tpu.memory_space<vmem>>, vector<1x1x8x128xbf16>,
    return
  }
  func.func @transform_0(%arg0: i32, %arg1: i32) -> (i32, i32, i32, i32) {
    %c2_i32 = arith.constant 2 : i32
    %0 = arith.muli %arg1, %c2_i32 : i32
    %c0_i32 = arith.constant 0 : i32
    %1 = arith.addi %0, %c0_i32 : i32
    %c0_i32_0 = arith.constant 0 : i32
    %c0_i32_1 = arith.constant 0 : i32
    %c0_i32_2 = arith.constant 0 : i32
    return %arg0, %1, %c0_i32_0, %c0_i32_1 : i32, i32, i32, i32
  }
  func.func @transform_1(%arg0: i32, %arg1: i32) -> (i32, i32, i32, i32) {
    %c2_i32 = arith.constant 2 : i32
    %0 = arith.muli %arg1, %c2_i32 : i32
    %c0_i32 = arith.constant 0 : i32
    %1 = arith.addi %0, %c0_i32 : i32
    %c0_i32_0 = arith.constant 0 : i32
    %c0_i32_1 = arith.constant 0 : i32
    %c0_i32_2 = arith.constant 0 : i32
    return %arg0, %1, %c0_i32_0, %c0_i32_1 : i32, i32, i32, i32
  }
  func.func @transform_2(%arg0: i32, %arg1: i32) -> (i32, i32, i32, i32) {
    %c2_i32 = arith.constant 2 : i32
    %0 = arith.muli %arg1, %c2_i32 : i32
    %c1_i32 = arith.constant 1 : i32
    %1 = arith.addi %0, %c1_i32 : i32
    %c0_i32 = arith.constant 0 : i32
    %c0_i32_0 = arith.constant 0 : i32
    %c0_i32_1 = arith.constant 0 : i32
    return %arg0, %1, %c0_i32, %c0_i32_0 : i32, i32, i32, i32
  }
  func.func @transform_3(%arg0: i32, %arg1: i32) -> (i32, i32, i32, i32) {
    %c2_i32 = arith.constant 2 : i32
    %0 = arith.muli %arg1, %c2_i32 : i32
    %c1_i32 = arith.constant 1 : i32
    %1 = arith.addi %0, %c1_i32 : i32
    %c0_i32 = arith.constant 0 : i32
    %c0_i32_0 = arith.constant 0 : i32
    %c0_i32_1 = arith.constant 0 : i32
    return %arg0, %1, %c0_i32, %c0_i32_0 : i32, i32, i32, i32
  }
  func.func @transform_4(%arg0: i32, %arg1: i32) -> (i32, i32, i32, i32) {
    %c2_i32 = arith.constant 2 : i32
    %0 = arith.muli %arg1, %c2_i32 : i32
    %c2_i32_0 = arith.constant 2 : i32
    %1 = arith.addi %0, %c2_i32_0 : i32
    %c0_i32 = arith.constant 0 : i32
    %c0_i32_1 = arith.constant 0 : i32
    %c0_i32_2 = arith.constant 0 : i32
    return %arg0, %1, %c0_i32, %c0_i32_1 : i32, i32, i32, i32
  }
  func.func @transform_5(%arg0: i32, %arg1: i32) -> (i32, i32, i32, i32) {
    %c2_i32 = arith.constant 2 : i32
    %0 = arith.muli %arg1, %c2_i32 : i32
    %c2_i32_0 = arith.constant 2 : i32
    %1 = arith.addi %0, %c2_i32_0 : i32
    %c0_i32 = arith.constant 0 : i32
    %c0_i32_1 = arith.constant 0 : i32
    %c0_i32_2 = arith.constant 0 : i32
    return %arg0, %1, %c0_i32, %c0_i32_1 : i32, i32, i32, i32
  }
  func.func @transform_6(%arg0: i32, %arg1: i32) -> (i32, i32, i32, i32) {
    %c0_i32 = arith.constant 0 : i32
    %c0_i32_0 = arith.constant 0 : i32
    %c0_i32_1 = arith.constant 0 : i32
    return %arg0, %arg1, %c0_i32, %c0_i32_0 : i32, i32, i32, i32
  }
}

module attributes {stable_mosaic.version = 11 : i64} {
  func.func @_mm_res_kernel(%arg0: i32, %arg1: i32, %arg2: i32, %arg3: memref<128x128xbf16, #tpu.memory_space<vmem>>, %arg4: memref<128x128xbf16, #tpu.memory_space<vmem>>, %arg5: memref<1x128xf32, #tpu.memory_space<vmem>>, %arg6: memref<128x128xbf16, #tpu.memory_space<vmem>>, %arg7: memref<128x128xbf16, #tpu.memory_space<vmem>>, %arg8: memref<128x128xf32, #tpu.memory_space<vmem>>) attributes {dimension_semantics = [#tpu.dimension_semantics<parallel>, #tpu.dimension_semantics<parallel>, #tpu.dimension_semantics<arbitrary>], iteration_bounds = array<i64: 1, 1, 1>, scalar_prefetch = 0 : i64, scratch_operands = 1 : i64, tpu.core_type = #tpu.core_type<tc>, window_params = [{transform_indices = @transform_0, window_bounds = array<i64: 128, 128>}, {transform_indices = @transform_1, window_bounds = array<i64: 128, 128>}, {transform_indices = @transform_2, window_bounds = array<i64: 1, 128>}, {transform_indices = @transform_3, window_bounds = array<i64: 128, 128>}, {transform_indices = @transform_4, window_bounds = array<i64: 128, 128>}]} {
    %c0_i32 = arith.constant 0 : i32
    %0 = arith.cmpi eq, %arg2, %c0_i32 : i32
    %1 = arith.extui %0 : i1 to i32
    %c0_i32_0 = arith.constant 0 : i32
    %2 = arith.cmpi ne, %1, %c0_i32_0 : i32
    scf.if %2 {
      %cst_10 = arith.constant 0.000000e+00 : f32
      %12 = vector.broadcast %cst_10 : f32 to vector<128x128xf32>
      %c0_11 = arith.constant 0 : index
      %c0_12 = arith.constant 0 : index
      %13 = vector.load %arg8[%c0_11, %c0_12] : memref<128x128xf32, #tpu.memory_space<vmem>>, vector<128x128xf32>
      tpu.vector_store %arg8[%c0_11, %c0_12], %12 {strides = array<i32>} : memref<128x128xf32, #tpu.memory_space<vmem>>, vector<128x128xf32>,
    } else {
    }
    %c0 = arith.constant 0 : index
    %c0_1 = arith.constant 0 : index
    %3 = vector.load %arg8[%c0, %c0_1] : memref<128x128xf32, #tpu.memory_space<vmem>>, vector<128x128xf32>
    %c0_2 = arith.constant 0 : index
    %c0_3 = arith.constant 0 : index
    %4 = vector.load %arg3[%c0_2, %c0_3] : memref<128x128xbf16, #tpu.memory_space<vmem>>, vector<128x128xbf16>
    %c0_4 = arith.constant 0 : index
    %c0_5 = arith.constant 0 : index
    %5 = vector.load %arg4[%c0_4, %c0_5] : memref<128x128xbf16, #tpu.memory_space<vmem>>, vector<128x128xbf16>
    %cst = arith.constant dense<0.000000e+00> : vector<128x128xf32>
    %6 = tpu.matmul %4, %5, %cst {dimension_numbers = #tpu.dot_dimension_numbers<[1], [0], [0], [1], [0, 0, 1, 1], [], []>} : vector<128x128xbf16>, vector<128x128xbf16>, vector<128x128xf32> -> vector<128x128xf32>
    %7 = arith.addf %3, %6 : vector<128x128xf32>
    %c0_6 = arith.constant 0 : index
    %c0_7 = arith.constant 0 : index
    %8 = vector.load %arg8[%c0_6, %c0_7] : memref<128x128xf32, #tpu.memory_space<vmem>>, vector<128x128xf32>
    tpu.vector_store %arg8[%c0_6, %c0_7], %7 {strides = array<i32>} : memref<128x128xf32, #tpu.memory_space<vmem>>, vector<128x128xf32>,
    %c0_i32_8 = arith.constant 0 : i32
    %9 = arith.cmpi eq, %arg2, %c0_i32_8 : i32
    %10 = arith.extui %9 : i1 to i32
    %c0_i32_9 = arith.constant 0 : i32
    %11 = arith.cmpi ne, %10, %c0_i32_9 : i32
    scf.if %11 {
      %c0_10 = arith.constant 0 : index
      %c0_11 = arith.constant 0 : index
      %12 = vector.load %arg8[%c0_10, %c0_11] : memref<128x128xf32, #tpu.memory_space<vmem>>, vector<128x128xf32>
      %c0_12 = arith.constant 0 : index
      %c0_13 = arith.constant 0 : index
      %13 = vector.load %arg5[%c0_12, %c0_13] : memref<1x128xf32, #tpu.memory_space<vmem>>, vector<1x128xf32>
      %14 = vector.broadcast %13 : vector<1x128xf32> to vector<128x128xf32>
      %15 = arith.addf %12, %14 : vector<128x128xf32>
      %c0_14 = arith.constant 0 : index
      %c0_15 = arith.constant 0 : index
      %16 = vector.load %arg6[%c0_14, %c0_15] : memref<128x128xbf16, #tpu.memory_space<vmem>>, vector<128x128xbf16>
      %17 = arith.extf %16 : vector<128x128xbf16> to vector<128x128xf32>
      %18 = arith.addf %15, %17 : vector<128x128xf32>
      %cst_16 = arith.constant 0.000000e+00 : f32
      %19 = vector.broadcast %cst_16 : f32 to vector<128x128xf32>
      %20 = arith.maximumf %18, %19 : vector<128x128xf32>
      %21 = arith.truncf %20 : vector<128x128xf32> to vector<128x128xbf16>
      %c0_17 = arith.constant 0 : index
      %c0_18 = arith.constant 0 : index
      %22 = vector.load %arg7[%c0_17, %c0_18] : memref<128x128xbf16, #tpu.memory_space<vmem>>, vector<128x128xbf16>
      tpu.vector_store %arg7[%c0_17, %c0_18], %21 {strides = array<i32>} : memref<128x128xbf16, #tpu.memory_space<vmem>>, vector<128x128xbf16>,
    } else {
    }
    return
  }
  func.func @transform_0(%arg0: i32, %arg1: i32, %arg2: i32) -> (i32, i32) {
    %c0_i32 = arith.constant 0 : i32
    return %arg0, %arg2 : i32, i32
  }
  func.func @transform_1(%arg0: i32, %arg1: i32, %arg2: i32) -> (i32, i32) {
    %c0_i32 = arith.constant 0 : i32
    return %arg2, %arg1 : i32, i32
  }
  func.func @transform_2(%arg0: i32, %arg1: i32, %arg2: i32) -> (i32, i32) {
    %c0_i32 = arith.constant 0 : i32
    %c0_i32_0 = arith.constant 0 : i32
    return %c0_i32, %arg1 : i32, i32
  }
  func.func @transform_3(%arg0: i32, %arg1: i32, %arg2: i32) -> (i32, i32) {
    %c0_i32 = arith.constant 0 : i32
    return %arg0, %arg1 : i32, i32
  }
  func.func @transform_4(%arg0: i32, %arg1: i32, %arg2: i32) -> (i32, i32) {
    %c0_i32 = arith.constant 0 : i32
    return %arg0, %arg1 : i32, i32
  }
}

module attributes {stable_mosaic.version = 11 : i64} {
  func.func @_conv_rows_kernel(%arg0: i32, %arg1: i32, %arg2: memref<1x1x10x128xbf16, #tpu.memory_space<vmem>>, %arg3: memref<1x1x10x128xbf16, #tpu.memory_space<vmem>>, %arg4: memref<1x1x10x128xbf16, #tpu.memory_space<vmem>>, %arg5: memref<3x3x128x128xbf16, #tpu.memory_space<vmem>>, %arg6: memref<1x128xf32, #tpu.memory_space<vmem>>, %arg7: memref<1x1x8x128xbf16, #tpu.memory_space<vmem>>) attributes {dimension_semantics = [#tpu.dimension_semantics<parallel>, #tpu.dimension_semantics<parallel>], iteration_bounds = array<i64: 2, 8>, scalar_prefetch = 0 : i64, scratch_operands = 0 : i64, tpu.core_type = #tpu.core_type<tc>, window_params = [{transform_indices = @transform_0, window_bounds = array<i64: 1, 1, 10, 128>}, {transform_indices = @transform_1, window_bounds = array<i64: 1, 1, 10, 128>}, {transform_indices = @transform_2, window_bounds = array<i64: 1, 1, 10, 128>}, {pipeline_mode = #tpu.pipeline_mode<synchronous>, transform_indices = @transform_3, window_bounds = array<i64: 3, 3, 128, 128>}, {pipeline_mode = #tpu.pipeline_mode<synchronous>, transform_indices = @transform_4, window_bounds = array<i64: 1, 128>}, {transform_indices = @transform_5, window_bounds = array<i64: 1, 1, 8, 128>}]} {
    %cst = arith.constant 0.000000e+00 : f32
    %0 = vector.broadcast %cst : f32 to vector<8x128xf32>
    %c0 = arith.constant 0 : index
    %c0_0 = arith.constant 0 : index
    %c0_1 = arith.constant 0 : index
    %c0_2 = arith.constant 0 : index
    %1 = vector.load %arg2[%c0, %c0_0, %c0_1, %c0_2] : memref<1x1x10x128xbf16, #tpu.memory_space<vmem>>, vector<1x1x8x128xbf16>
    %2 = vector.shape_cast %1 : vector<1x1x8x128xbf16> to vector<8x128xbf16>
    %c0_3 = arith.constant 0 : index
    %c0_4 = arith.constant 0 : index
    %c0_5 = arith.constant 0 : index
    %c0_6 = arith.constant 0 : index
    %3 = vector.load %arg5[%c0_3, %c0_4, %c0_5, %c0_6] : memref<3x3x128x128xbf16, #tpu.memory_space<vmem>>, vector<1x1x128x128xbf16>
    %4 = vector.shape_cast %3 : vector<1x1x128x128xbf16> to vector<128x128xbf16>
    %cst_7 = arith.constant dense<0.000000e+00> : vector<8x128xf32>
    %5 = tpu.matmul %2, %4, %cst_7 {dimension_numbers = #tpu.dot_dimension_numbers<[1], [0], [0], [1], [0, 0, 1, 1], [], []>} : vector<8x128xbf16>, vector<128x128xbf16>, vector<8x128xf32> -> vector<8x128xf32>
    %6 = arith.addf %0, %5 : vector<8x128xf32>
    %c0_8 = arith.constant 0 : index
    %c0_9 = arith.constant 0 : index
    %c1 = arith.constant 1 : index
    %c0_10 = arith.constant 0 : index
    %7 = vector.load %arg2[%c0_8, %c0_9, %c1, %c0_10] : memref<1x1x10x128xbf16, #tpu.memory_space<vmem>>, vector<1x1x8x128xbf16>
    %8 = vector.shape_cast %7 : vector<1x1x8x128xbf16> to vector<8x128xbf16>
    %c0_11 = arith.constant 0 : index
    %c1_12 = arith.constant 1 : index
    %c0_13 = arith.constant 0 : index
    %c0_14 = arith.constant 0 : index
    %9 = vector.load %arg5[%c0_11, %c1_12, %c0_13, %c0_14] : memref<3x3x128x128xbf16, #tpu.memory_space<vmem>>, vector<1x1x128x128xbf16>
    %10 = vector.shape_cast %9 : vector<1x1x128x128xbf16> to vector<128x128xbf16>
    %cst_15 = arith.constant dense<0.000000e+00> : vector<8x128xf32>
    %11 = tpu.matmul %8, %10, %cst_15 {dimension_numbers = #tpu.dot_dimension_numbers<[1], [0], [0], [1], [0, 0, 1, 1], [], []>} : vector<8x128xbf16>, vector<128x128xbf16>, vector<8x128xf32> -> vector<8x128xf32>
    %12 = arith.addf %6, %11 : vector<8x128xf32>
    %c0_16 = arith.constant 0 : index
    %c0_17 = arith.constant 0 : index
    %c2 = arith.constant 2 : index
    %c0_18 = arith.constant 0 : index
    %13 = vector.load %arg2[%c0_16, %c0_17, %c2, %c0_18] : memref<1x1x10x128xbf16, #tpu.memory_space<vmem>>, vector<1x1x8x128xbf16>
    %14 = vector.shape_cast %13 : vector<1x1x8x128xbf16> to vector<8x128xbf16>
    %c0_19 = arith.constant 0 : index
    %c2_20 = arith.constant 2 : index
    %c0_21 = arith.constant 0 : index
    %c0_22 = arith.constant 0 : index
    %15 = vector.load %arg5[%c0_19, %c2_20, %c0_21, %c0_22] : memref<3x3x128x128xbf16, #tpu.memory_space<vmem>>, vector<1x1x128x128xbf16>
    %16 = vector.shape_cast %15 : vector<1x1x128x128xbf16> to vector<128x128xbf16>
    %cst_23 = arith.constant dense<0.000000e+00> : vector<8x128xf32>
    %17 = tpu.matmul %14, %16, %cst_23 {dimension_numbers = #tpu.dot_dimension_numbers<[1], [0], [0], [1], [0, 0, 1, 1], [], []>} : vector<8x128xbf16>, vector<128x128xbf16>, vector<8x128xf32> -> vector<8x128xf32>
    %18 = arith.addf %12, %17 : vector<8x128xf32>
    %c0_24 = arith.constant 0 : index
    %c0_25 = arith.constant 0 : index
    %c0_26 = arith.constant 0 : index
    %c0_27 = arith.constant 0 : index
    %19 = vector.load %arg3[%c0_24, %c0_25, %c0_26, %c0_27] : memref<1x1x10x128xbf16, #tpu.memory_space<vmem>>, vector<1x1x8x128xbf16>
    %20 = vector.shape_cast %19 : vector<1x1x8x128xbf16> to vector<8x128xbf16>
    %c1_28 = arith.constant 1 : index
    %c0_29 = arith.constant 0 : index
    %c0_30 = arith.constant 0 : index
    %c0_31 = arith.constant 0 : index
    %21 = vector.load %arg5[%c1_28, %c0_29, %c0_30, %c0_31] : memref<3x3x128x128xbf16, #tpu.memory_space<vmem>>, vector<1x1x128x128xbf16>
    %22 = vector.shape_cast %21 : vector<1x1x128x128xbf16> to vector<128x128xbf16>
    %cst_32 = arith.constant dense<0.000000e+00> : vector<8x128xf32>
    %23 = tpu.matmul %20, %22, %cst_32 {dimension_numbers = #tpu.dot_dimension_numbers<[1], [0], [0], [1], [0, 0, 1, 1], [], []>} : vector<8x128xbf16>, vector<128x128xbf16>, vector<8x128xf32> -> vector<8x128xf32>
    %24 = arith.addf %18, %23 : vector<8x128xf32>
    %c0_33 = arith.constant 0 : index
    %c0_34 = arith.constant 0 : index
    %c1_35 = arith.constant 1 : index
    %c0_36 = arith.constant 0 : index
    %25 = vector.load %arg3[%c0_33, %c0_34, %c1_35, %c0_36] : memref<1x1x10x128xbf16, #tpu.memory_space<vmem>>, vector<1x1x8x128xbf16>
    %26 = vector.shape_cast %25 : vector<1x1x8x128xbf16> to vector<8x128xbf16>
    %c1_37 = arith.constant 1 : index
    %c1_38 = arith.constant 1 : index
    %c0_39 = arith.constant 0 : index
    %c0_40 = arith.constant 0 : index
    %27 = vector.load %arg5[%c1_37, %c1_38, %c0_39, %c0_40] : memref<3x3x128x128xbf16, #tpu.memory_space<vmem>>, vector<1x1x128x128xbf16>
    %28 = vector.shape_cast %27 : vector<1x1x128x128xbf16> to vector<128x128xbf16>
    %cst_41 = arith.constant dense<0.000000e+00> : vector<8x128xf32>
    %29 = tpu.matmul %26, %28, %cst_41 {dimension_numbers = #tpu.dot_dimension_numbers<[1], [0], [0], [1], [0, 0, 1, 1], [], []>} : vector<8x128xbf16>, vector<128x128xbf16>, vector<8x128xf32> -> vector<8x128xf32>
    %30 = arith.addf %24, %29 : vector<8x128xf32>
    %c0_42 = arith.constant 0 : index
    %c0_43 = arith.constant 0 : index
    %c2_44 = arith.constant 2 : index
    %c0_45 = arith.constant 0 : index
    %31 = vector.load %arg3[%c0_42, %c0_43, %c2_44, %c0_45] : memref<1x1x10x128xbf16, #tpu.memory_space<vmem>>, vector<1x1x8x128xbf16>
    %32 = vector.shape_cast %31 : vector<1x1x8x128xbf16> to vector<8x128xbf16>
    %c1_46 = arith.constant 1 : index
    %c2_47 = arith.constant 2 : index
    %c0_48 = arith.constant 0 : index
    %c0_49 = arith.constant 0 : index
    %33 = vector.load %arg5[%c1_46, %c2_47, %c0_48, %c0_49] : memref<3x3x128x128xbf16, #tpu.memory_space<vmem>>, vector<1x1x128x128xbf16>
    %34 = vector.shape_cast %33 : vector<1x1x128x128xbf16> to vector<128x128xbf16>
    %cst_50 = arith.constant dense<0.000000e+00> : vector<8x128xf32>
    %35 = tpu.matmul %32, %34, %cst_50 {dimension_numbers = #tpu.dot_dimension_numbers<[1], [0], [0], [1], [0, 0, 1, 1], [], []>} : vector<8x128xbf16>, vector<128x128xbf16>, vector<8x128xf32> -> vector<8x128xf32>
    %36 = arith.addf %30, %35 : vector<8x128xf32>
    %c0_51 = arith.constant 0 : index
    %c0_52 = arith.constant 0 : index
    %c0_53 = arith.constant 0 : index
    %c0_54 = arith.constant 0 : index
    %37 = vector.load %arg4[%c0_51, %c0_52, %c0_53, %c0_54] : memref<1x1x10x128xbf16, #tpu.memory_space<vmem>>, vector<1x1x8x128xbf16>
    %38 = vector.shape_cast %37 : vector<1x1x8x128xbf16> to vector<8x128xbf16>
    %c2_55 = arith.constant 2 : index
    %c0_56 = arith.constant 0 : index
    %c0_57 = arith.constant 0 : index
    %c0_58 = arith.constant 0 : index
    %39 = vector.load %arg5[%c2_55, %c0_56, %c0_57, %c0_58] : memref<3x3x128x128xbf16, #tpu.memory_space<vmem>>, vector<1x1x128x128xbf16>
    %40 = vector.shape_cast %39 : vector<1x1x128x128xbf16> to vector<128x128xbf16>
    %cst_59 = arith.constant dense<0.000000e+00> : vector<8x128xf32>
    %41 = tpu.matmul %38, %40, %cst_59 {dimension_numbers = #tpu.dot_dimension_numbers<[1], [0], [0], [1], [0, 0, 1, 1], [], []>} : vector<8x128xbf16>, vector<128x128xbf16>, vector<8x128xf32> -> vector<8x128xf32>
    %42 = arith.addf %36, %41 : vector<8x128xf32>
    %c0_60 = arith.constant 0 : index
    %c0_61 = arith.constant 0 : index
    %c1_62 = arith.constant 1 : index
    %c0_63 = arith.constant 0 : index
    %43 = vector.load %arg4[%c0_60, %c0_61, %c1_62, %c0_63] : memref<1x1x10x128xbf16, #tpu.memory_space<vmem>>, vector<1x1x8x128xbf16>
    %44 = vector.shape_cast %43 : vector<1x1x8x128xbf16> to vector<8x128xbf16>
    %c2_64 = arith.constant 2 : index
    %c1_65 = arith.constant 1 : index
    %c0_66 = arith.constant 0 : index
    %c0_67 = arith.constant 0 : index
    %45 = vector.load %arg5[%c2_64, %c1_65, %c0_66, %c0_67] : memref<3x3x128x128xbf16, #tpu.memory_space<vmem>>, vector<1x1x128x128xbf16>
    %46 = vector.shape_cast %45 : vector<1x1x128x128xbf16> to vector<128x128xbf16>
    %cst_68 = arith.constant dense<0.000000e+00> : vector<8x128xf32>
    %47 = tpu.matmul %44, %46, %cst_68 {dimension_numbers = #tpu.dot_dimension_numbers<[1], [0], [0], [1], [0, 0, 1, 1], [], []>} : vector<8x128xbf16>, vector<128x128xbf16>, vector<8x128xf32> -> vector<8x128xf32>
    %48 = arith.addf %42, %47 : vector<8x128xf32>
    %c0_69 = arith.constant 0 : index
    %c0_70 = arith.constant 0 : index
    %c2_71 = arith.constant 2 : index
    %c0_72 = arith.constant 0 : index
    %49 = vector.load %arg4[%c0_69, %c0_70, %c2_71, %c0_72] : memref<1x1x10x128xbf16, #tpu.memory_space<vmem>>, vector<1x1x8x128xbf16>
    %50 = vector.shape_cast %49 : vector<1x1x8x128xbf16> to vector<8x128xbf16>
    %c2_73 = arith.constant 2 : index
    %c2_74 = arith.constant 2 : index
    %c0_75 = arith.constant 0 : index
    %c0_76 = arith.constant 0 : index
    %51 = vector.load %arg5[%c2_73, %c2_74, %c0_75, %c0_76] : memref<3x3x128x128xbf16, #tpu.memory_space<vmem>>, vector<1x1x128x128xbf16>
    %52 = vector.shape_cast %51 : vector<1x1x128x128xbf16> to vector<128x128xbf16>
    %cst_77 = arith.constant dense<0.000000e+00> : vector<8x128xf32>
    %53 = tpu.matmul %50, %52, %cst_77 {dimension_numbers = #tpu.dot_dimension_numbers<[1], [0], [0], [1], [0, 0, 1, 1], [], []>} : vector<8x128xbf16>, vector<128x128xbf16>, vector<8x128xf32> -> vector<8x128xf32>
    %54 = arith.addf %48, %53 : vector<8x128xf32>
    %c0_78 = arith.constant 0 : index
    %c0_79 = arith.constant 0 : index
    %55 = vector.load %arg6[%c0_78, %c0_79] : memref<1x128xf32, #tpu.memory_space<vmem>>, vector<1x128xf32>
    %56 = vector.broadcast %55 : vector<1x128xf32> to vector<8x128xf32>
    %57 = arith.addf %54, %56 : vector<8x128xf32>
    %cst_80 = arith.constant 0.000000e+00 : f32
    %58 = vector.broadcast %cst_80 : f32 to vector<8x128xf32>
    %59 = arith.maximumf %57, %58 : vector<8x128xf32>
    %60 = arith.truncf %59 : vector<8x128xf32> to vector<8x128xbf16>
    %c0_81 = arith.constant 0 : index
    %c0_82 = arith.constant 0 : index
    %c0_83 = arith.constant 0 : index
    %c0_84 = arith.constant 0 : index
    %61 = vector.load %arg7[%c0_81, %c0_82, %c0_83, %c0_84] : memref<1x1x8x128xbf16, #tpu.memory_space<vmem>>, vector<1x1x8x128xbf16>
    %62 = vector.shape_cast %61 : vector<1x1x8x128xbf16> to vector<8x128xbf16>
    %63 = vector.shape_cast %60 : vector<8x128xbf16> to vector<1x1x8x128xbf16>
    tpu.vector_store %arg7[%c0_81, %c0_82, %c0_83, %c0_84], %63 {strides = array<i32>} : memref<1x1x8x128xbf16, #tpu.memory_space<vmem>>, vector<1x1x8x128xbf16>,
    return
  }
  func.func @transform_0(%arg0: i32, %arg1: i32) -> (i32, i32, i32, i32) {
    %c1_i32 = arith.constant 1 : i32
    %0 = arith.muli %arg1, %c1_i32 : i32
    %c0_i32 = arith.constant 0 : i32
    %1 = arith.addi %0, %c0_i32 : i32
    %c0_i32_0 = arith.constant 0 : i32
    %c0_i32_1 = arith.constant 0 : i32
    %c0_i32_2 = arith.constant 0 : i32
    return %arg0, %1, %c0_i32_0, %c0_i32_1 : i32, i32, i32, i32
  }
  func.func @transform_1(%arg0: i32, %arg1: i32) -> (i32, i32, i32, i32) {
    %c1_i32 = arith.constant 1 : i32
    %0 = arith.muli %arg1, %c1_i32 : i32
    %c1_i32_0 = arith.constant 1 : i32
    %1 = arith.addi %0, %c1_i32_0 : i32
    %c0_i32 = arith.constant 0 : i32
    %c0_i32_1 = arith.constant 0 : i32
    %c0_i32_2 = arith.constant 0 : i32
    return %arg0, %1, %c0_i32, %c0_i32_1 : i32, i32, i32, i32
  }
  func.func @transform_2(%arg0: i32, %arg1: i32) -> (i32, i32, i32, i32) {
    %c1_i32 = arith.constant 1 : i32
    %0 = arith.muli %arg1, %c1_i32 : i32
    %c2_i32 = arith.constant 2 : i32
    %1 = arith.addi %0, %c2_i32 : i32
    %c0_i32 = arith.constant 0 : i32
    %c0_i32_0 = arith.constant 0 : i32
    %c0_i32_1 = arith.constant 0 : i32
    return %arg0, %1, %c0_i32, %c0_i32_0 : i32, i32, i32, i32
  }
  func.func @transform_3(%arg0: i32, %arg1: i32) -> (i32, i32, i32, i32) {
    %c0_i32 = arith.constant 0 : i32
    %c0_i32_0 = arith.constant 0 : i32
    %c0_i32_1 = arith.constant 0 : i32
    %c0_i32_2 = arith.constant 0 : i32
    %c0_i32_3 = arith.constant 0 : i32
    return %c0_i32, %c0_i32_0, %c0_i32_1, %c0_i32_2 : i32, i32, i32, i32
  }
  func.func @transform_4(%arg0: i32, %arg1: i32) -> (i32, i32) {
    %c0_i32 = arith.constant 0 : i32
    %c0_i32_0 = arith.constant 0 : i32
    %c0_i32_1 = arith.constant 0 : i32
    return %c0_i32, %c0_i32_0 : i32, i32
  }
  func.func @transform_5(%arg0: i32, %arg1: i32) -> (i32, i32, i32, i32) {
    %c0_i32 = arith.constant 0 : i32
    %c0_i32_0 = arith.constant 0 : i32
    %c0_i32_1 = arith.constant 0 : i32
    return %arg0, %arg1, %c0_i32, %c0_i32_0 : i32, i32, i32, i32
  }
}

module attributes {stable_mosaic.version = 11 : i64} {
  func.func @_mm_kernel(%arg0: i32, %arg1: i32, %arg2: i32, %arg3: memref<32x128xbf16, #tpu.memory_space<vmem>>, %arg4: memref<128x128xbf16, #tpu.memory_space<vmem>>, %arg5: memref<1x128xf32, #tpu.memory_space<vmem>>, %arg6: memref<32x128xbf16, #tpu.memory_space<vmem>>, %arg7: memref<32x128xf32, #tpu.memory_space<vmem>>) attributes {dimension_semantics = [#tpu.dimension_semantics<parallel>, #tpu.dimension_semantics<parallel>, #tpu.dimension_semantics<arbitrary>], iteration_bounds = array<i64: 1, 1, 1>, scalar_prefetch = 0 : i64, scratch_operands = 1 : i64, tpu.core_type = #tpu.core_type<tc>, window_params = [{transform_indices = @transform_0, window_bounds = array<i64: 32, 128>}, {transform_indices = @transform_1, window_bounds = array<i64: 128, 128>}, {transform_indices = @transform_2, window_bounds = array<i64: 1, 128>}, {transform_indices = @transform_3, window_bounds = array<i64: 32, 128>}]} {
    %c0_i32 = arith.constant 0 : i32
    %0 = arith.cmpi eq, %arg2, %c0_i32 : i32
    %1 = arith.extui %0 : i1 to i32
    %c0_i32_0 = arith.constant 0 : i32
    %2 = arith.cmpi ne, %1, %c0_i32_0 : i32
    scf.if %2 {
      %cst_10 = arith.constant 0.000000e+00 : f32
      %12 = vector.broadcast %cst_10 : f32 to vector<32x128xf32>
      %c0_11 = arith.constant 0 : index
      %c0_12 = arith.constant 0 : index
      %13 = vector.load %arg7[%c0_11, %c0_12] : memref<32x128xf32, #tpu.memory_space<vmem>>, vector<32x128xf32>
      tpu.vector_store %arg7[%c0_11, %c0_12], %12 {strides = array<i32>} : memref<32x128xf32, #tpu.memory_space<vmem>>, vector<32x128xf32>,
    } else {
    }
    %c0 = arith.constant 0 : index
    %c0_1 = arith.constant 0 : index
    %3 = vector.load %arg7[%c0, %c0_1] : memref<32x128xf32, #tpu.memory_space<vmem>>, vector<32x128xf32>
    %c0_2 = arith.constant 0 : index
    %c0_3 = arith.constant 0 : index
    %4 = vector.load %arg3[%c0_2, %c0_3] : memref<32x128xbf16, #tpu.memory_space<vmem>>, vector<32x128xbf16>
    %c0_4 = arith.constant 0 : index
    %c0_5 = arith.constant 0 : index
    %5 = vector.load %arg4[%c0_4, %c0_5] : memref<128x128xbf16, #tpu.memory_space<vmem>>, vector<128x128xbf16>
    %cst = arith.constant dense<0.000000e+00> : vector<32x128xf32>
    %6 = tpu.matmul %4, %5, %cst {dimension_numbers = #tpu.dot_dimension_numbers<[1], [0], [0], [1], [0, 0, 1, 1], [], []>} : vector<32x128xbf16>, vector<128x128xbf16>, vector<32x128xf32> -> vector<32x128xf32>
    %7 = arith.addf %3, %6 : vector<32x128xf32>
    %c0_6 = arith.constant 0 : index
    %c0_7 = arith.constant 0 : index
    %8 = vector.load %arg7[%c0_6, %c0_7] : memref<32x128xf32, #tpu.memory_space<vmem>>, vector<32x128xf32>
    tpu.vector_store %arg7[%c0_6, %c0_7], %7 {strides = array<i32>} : memref<32x128xf32, #tpu.memory_space<vmem>>, vector<32x128xf32>,
    %c0_i32_8 = arith.constant 0 : i32
    %9 = arith.cmpi eq, %arg2, %c0_i32_8 : i32
    %10 = arith.extui %9 : i1 to i32
    %c0_i32_9 = arith.constant 0 : i32
    %11 = arith.cmpi ne, %10, %c0_i32_9 : i32
    scf.if %11 {
      %c0_10 = arith.constant 0 : index
      %c0_11 = arith.constant 0 : index
      %12 = vector.load %arg7[%c0_10, %c0_11] : memref<32x128xf32, #tpu.memory_space<vmem>>, vector<32x128xf32>
      %c0_12 = arith.constant 0 : index
      %c0_13 = arith.constant 0 : index
      %13 = vector.load %arg5[%c0_12, %c0_13] : memref<1x128xf32, #tpu.memory_space<vmem>>, vector<1x128xf32>
      %14 = vector.broadcast %13 : vector<1x128xf32> to vector<32x128xf32>
      %15 = arith.addf %12, %14 : vector<32x128xf32>
      %16 = arith.truncf %15 : vector<32x128xf32> to vector<32x128xbf16>
      %c0_14 = arith.constant 0 : index
      %c0_15 = arith.constant 0 : index
      %17 = vector.load %arg6[%c0_14, %c0_15] : memref<32x128xbf16, #tpu.memory_space<vmem>>, vector<32x128xbf16>
      tpu.vector_store %arg6[%c0_14, %c0_15], %16 {strides = array<i32>} : memref<32x128xbf16, #tpu.memory_space<vmem>>, vector<32x128xbf16>,
    } else {
    }
    return
  }
  func.func @transform_0(%arg0: i32, %arg1: i32, %arg2: i32) -> (i32, i32) {
    %c0_i32 = arith.constant 0 : i32
    return %arg0, %arg2 : i32, i32
  }
  func.func @transform_1(%arg0: i32, %arg1: i32, %arg2: i32) -> (i32, i32) {
    %c0_i32 = arith.constant 0 : i32
    return %arg2, %arg1 : i32, i32
  }
  func.func @transform_2(%arg0: i32, %arg1: i32, %arg2: i32) -> (i32, i32) {
    %c0_i32 = arith.constant 0 : i32
    %c0_i32_0 = arith.constant 0 : i32
    return %c0_i32, %arg1 : i32, i32
  }
  func.func @transform_3(%arg0: i32, %arg1: i32, %arg2: i32) -> (i32, i32) {
    %c0_i32 = arith.constant 0 : i32
    return %arg0, %arg1 : i32, i32
  }
}

module attributes {stable_mosaic.version = 11 : i64} {
  func.func @_mm_res_kernel(%arg0: i32, %arg1: i32, %arg2: i32, %arg3: memref<32x128xbf16, #tpu.memory_space<vmem>>, %arg4: memref<128x128xbf16, #tpu.memory_space<vmem>>, %arg5: memref<1x128xf32, #tpu.memory_space<vmem>>, %arg6: memref<32x128xbf16, #tpu.memory_space<vmem>>, %arg7: memref<32x128xbf16, #tpu.memory_space<vmem>>, %arg8: memref<32x128xf32, #tpu.memory_space<vmem>>) attributes {dimension_semantics = [#tpu.dimension_semantics<parallel>, #tpu.dimension_semantics<parallel>, #tpu.dimension_semantics<arbitrary>], iteration_bounds = array<i64: 1, 1, 1>, scalar_prefetch = 0 : i64, scratch_operands = 1 : i64, tpu.core_type = #tpu.core_type<tc>, window_params = [{transform_indices = @transform_0, window_bounds = array<i64: 32, 128>}, {transform_indices = @transform_1, window_bounds = array<i64: 128, 128>}, {transform_indices = @transform_2, window_bounds = array<i64: 1, 128>}, {transform_indices = @transform_3, window_bounds = array<i64: 32, 128>}, {transform_indices = @transform_4, window_bounds = array<i64: 32, 128>}]} {
    %c0_i32 = arith.constant 0 : i32
    %0 = arith.cmpi eq, %arg2, %c0_i32 : i32
    %1 = arith.extui %0 : i1 to i32
    %c0_i32_0 = arith.constant 0 : i32
    %2 = arith.cmpi ne, %1, %c0_i32_0 : i32
    scf.if %2 {
      %cst_10 = arith.constant 0.000000e+00 : f32
      %12 = vector.broadcast %cst_10 : f32 to vector<32x128xf32>
      %c0_11 = arith.constant 0 : index
      %c0_12 = arith.constant 0 : index
      %13 = vector.load %arg8[%c0_11, %c0_12] : memref<32x128xf32, #tpu.memory_space<vmem>>, vector<32x128xf32>
      tpu.vector_store %arg8[%c0_11, %c0_12], %12 {strides = array<i32>} : memref<32x128xf32, #tpu.memory_space<vmem>>, vector<32x128xf32>,
    } else {
    }
    %c0 = arith.constant 0 : index
    %c0_1 = arith.constant 0 : index
    %3 = vector.load %arg8[%c0, %c0_1] : memref<32x128xf32, #tpu.memory_space<vmem>>, vector<32x128xf32>
    %c0_2 = arith.constant 0 : index
    %c0_3 = arith.constant 0 : index
    %4 = vector.load %arg3[%c0_2, %c0_3] : memref<32x128xbf16, #tpu.memory_space<vmem>>, vector<32x128xbf16>
    %c0_4 = arith.constant 0 : index
    %c0_5 = arith.constant 0 : index
    %5 = vector.load %arg4[%c0_4, %c0_5] : memref<128x128xbf16, #tpu.memory_space<vmem>>, vector<128x128xbf16>
    %cst = arith.constant dense<0.000000e+00> : vector<32x128xf32>
    %6 = tpu.matmul %4, %5, %cst {dimension_numbers = #tpu.dot_dimension_numbers<[1], [0], [0], [1], [0, 0, 1, 1], [], []>} : vector<32x128xbf16>, vector<128x128xbf16>, vector<32x128xf32> -> vector<32x128xf32>
    %7 = arith.addf %3, %6 : vector<32x128xf32>
    %c0_6 = arith.constant 0 : index
    %c0_7 = arith.constant 0 : index
    %8 = vector.load %arg8[%c0_6, %c0_7] : memref<32x128xf32, #tpu.memory_space<vmem>>, vector<32x128xf32>
    tpu.vector_store %arg8[%c0_6, %c0_7], %7 {strides = array<i32>} : memref<32x128xf32, #tpu.memory_space<vmem>>, vector<32x128xf32>,
    %c0_i32_8 = arith.constant 0 : i32
    %9 = arith.cmpi eq, %arg2, %c0_i32_8 : i32
    %10 = arith.extui %9 : i1 to i32
    %c0_i32_9 = arith.constant 0 : i32
    %11 = arith.cmpi ne, %10, %c0_i32_9 : i32
    scf.if %11 {
      %c0_10 = arith.constant 0 : index
      %c0_11 = arith.constant 0 : index
      %12 = vector.load %arg8[%c0_10, %c0_11] : memref<32x128xf32, #tpu.memory_space<vmem>>, vector<32x128xf32>
      %c0_12 = arith.constant 0 : index
      %c0_13 = arith.constant 0 : index
      %13 = vector.load %arg5[%c0_12, %c0_13] : memref<1x128xf32, #tpu.memory_space<vmem>>, vector<1x128xf32>
      %14 = vector.broadcast %13 : vector<1x128xf32> to vector<32x128xf32>
      %15 = arith.addf %12, %14 : vector<32x128xf32>
      %c0_14 = arith.constant 0 : index
      %c0_15 = arith.constant 0 : index
      %16 = vector.load %arg6[%c0_14, %c0_15] : memref<32x128xbf16, #tpu.memory_space<vmem>>, vector<32x128xbf16>
      %17 = arith.extf %16 : vector<32x128xbf16> to vector<32x128xf32>
      %18 = arith.addf %15, %17 : vector<32x128xf32>
      %cst_16 = arith.constant 0.000000e+00 : f32
      %19 = vector.broadcast %cst_16 : f32 to vector<32x128xf32>
      %20 = arith.maximumf %18, %19 : vector<32x128xf32>
      %21 = arith.truncf %20 : vector<32x128xf32> to vector<32x128xbf16>
      %c0_17 = arith.constant 0 : index
      %c0_18 = arith.constant 0 : index
      %22 = vector.load %arg7[%c0_17, %c0_18] : memref<32x128xbf16, #tpu.memory_space<vmem>>, vector<32x128xbf16>
      tpu.vector_store %arg7[%c0_17, %c0_18], %21 {strides = array<i32>} : memref<32x128xbf16, #tpu.memory_space<vmem>>, vector<32x128xbf16>,
    } else {
    }
    return
  }
  func.func @transform_0(%arg0: i32, %arg1: i32, %arg2: i32) -> (i32, i32) {
    %c0_i32 = arith.constant 0 : i32
    return %arg0, %arg2 : i32, i32
  }
  func.func @transform_1(%arg0: i32, %arg1: i32, %arg2: i32) -> (i32, i32) {
    %c0_i32 = arith.constant 0 : i32
    return %arg2, %arg1 : i32, i32
  }
  func.func @transform_2(%arg0: i32, %arg1: i32, %arg2: i32) -> (i32, i32) {
    %c0_i32 = arith.constant 0 : i32
    %c0_i32_0 = arith.constant 0 : i32
    return %c0_i32, %arg1 : i32, i32
  }
  func.func @transform_3(%arg0: i32, %arg1: i32, %arg2: i32) -> (i32, i32) {
    %c0_i32 = arith.constant 0 : i32
    return %arg0, %arg1 : i32, i32
  }
  func.func @transform_4(%arg0: i32, %arg1: i32, %arg2: i32) -> (i32, i32) {
    %c0_i32 = arith.constant 0 : i32
    return %arg0, %arg1 : i32, i32
  }
}

module attributes {stable_mosaic.version = 11 : i64} {
  func.func @_conv_rows_kernel(%arg0: i32, %arg1: i32, %arg2: memref<1x1x5x128xbf16, #tpu.memory_space<vmem>>, %arg3: memref<1x1x5x128xbf16, #tpu.memory_space<vmem>>, %arg4: memref<1x1x5x128xbf16, #tpu.memory_space<vmem>>, %arg5: memref<1x1x5x128xbf16, #tpu.memory_space<vmem>>, %arg6: memref<1x1x5x128xbf16, #tpu.memory_space<vmem>>, %arg7: memref<1x1x5x128xbf16, #tpu.memory_space<vmem>>, %arg8: memref<3x3x128x128xbf16, #tpu.memory_space<vmem>>, %arg9: memref<1x128xf32, #tpu.memory_space<vmem>>, %arg10: memref<1x1x4x128xbf16, #tpu.memory_space<vmem>>) attributes {dimension_semantics = [#tpu.dimension_semantics<parallel>, #tpu.dimension_semantics<parallel>], iteration_bounds = array<i64: 2, 4>, scalar_prefetch = 0 : i64, scratch_operands = 0 : i64, tpu.core_type = #tpu.core_type<tc>, window_params = [{transform_indices = @transform_0, window_bounds = array<i64: 1, 1, 5, 128>}, {transform_indices = @transform_1, window_bounds = array<i64: 1, 1, 5, 128>}, {transform_indices = @transform_2, window_bounds = array<i64: 1, 1, 5, 128>}, {transform_indices = @transform_3, window_bounds = array<i64: 1, 1, 5, 128>}, {transform_indices = @transform_4, window_bounds = array<i64: 1, 1, 5, 128>}, {transform_indices = @transform_5, window_bounds = array<i64: 1, 1, 5, 128>}, {pipeline_mode = #tpu.pipeline_mode<synchronous>, transform_indices = @transform_6, window_bounds = array<i64: 3, 3, 128, 128>}, {pipeline_mode = #tpu.pipeline_mode<synchronous>, transform_indices = @transform_7, window_bounds = array<i64: 1, 128>}, {transform_indices = @transform_8, window_bounds = array<i64: 1, 1, 4, 128>}]} {
    %cst = arith.constant 0.000000e+00 : f32
    %0 = vector.broadcast %cst : f32 to vector<4x128xf32>
    %c0 = arith.constant 0 : index
    %c0_0 = arith.constant 0 : index
    %c0_1 = arith.constant 0 : index
    %c0_2 = arith.constant 0 : index
    %1 = vector.load %arg2[%c0, %c0_0, %c0_1, %c0_2] : memref<1x1x5x128xbf16, #tpu.memory_space<vmem>>, vector<1x1x4x128xbf16>
    %2 = vector.shape_cast %1 : vector<1x1x4x128xbf16> to vector<4x128xbf16>
    %c0_3 = arith.constant 0 : index
    %c0_4 = arith.constant 0 : index
    %c0_5 = arith.constant 0 : index
    %c0_6 = arith.constant 0 : index
    %3 = vector.load %arg8[%c0_3, %c0_4, %c0_5, %c0_6] : memref<3x3x128x128xbf16, #tpu.memory_space<vmem>>, vector<1x1x128x128xbf16>
    %4 = vector.shape_cast %3 : vector<1x1x128x128xbf16> to vector<128x128xbf16>
    %cst_7 = arith.constant dense<0.000000e+00> : vector<4x128xf32>
    %5 = tpu.matmul %2, %4, %cst_7 {dimension_numbers = #tpu.dot_dimension_numbers<[1], [0], [0], [1], [0, 0, 1, 1], [], []>} : vector<4x128xbf16>, vector<128x128xbf16>, vector<4x128xf32> -> vector<4x128xf32>
    %6 = arith.addf %0, %5 : vector<4x128xf32>
    %c0_8 = arith.constant 0 : index
    %c0_9 = arith.constant 0 : index
    %c0_10 = arith.constant 0 : index
    %c0_11 = arith.constant 0 : index
    %7 = vector.load %arg3[%c0_8, %c0_9, %c0_10, %c0_11] : memref<1x1x5x128xbf16, #tpu.memory_space<vmem>>, vector<1x1x4x128xbf16>
    %8 = vector.shape_cast %7 : vector<1x1x4x128xbf16> to vector<4x128xbf16>
    %c0_12 = arith.constant 0 : index
    %c1 = arith.constant 1 : index
    %c0_13 = arith.constant 0 : index
    %c0_14 = arith.constant 0 : index
    %9 = vector.load %arg8[%c0_12, %c1, %c0_13, %c0_14] : memref<3x3x128x128xbf16, #tpu.memory_space<vmem>>, vector<1x1x128x128xbf16>
    %10 = vector.shape_cast %9 : vector<1x1x128x128xbf16> to vector<128x128xbf16>
    %cst_15 = arith.constant dense<0.000000e+00> : vector<4x128xf32>
    %11 = tpu.matmul %8, %10, %cst_15 {dimension_numbers = #tpu.dot_dimension_numbers<[1], [0], [0], [1], [0, 0, 1, 1], [], []>} : vector<4x128xbf16>, vector<128x128xbf16>, vector<4x128xf32> -> vector<4x128xf32>
    %12 = arith.addf %6, %11 : vector<4x128xf32>
    %c0_16 = arith.constant 0 : index
    %c0_17 = arith.constant 0 : index
    %c1_18 = arith.constant 1 : index
    %c0_19 = arith.constant 0 : index
    %13 = vector.load %arg2[%c0_16, %c0_17, %c1_18, %c0_19] : memref<1x1x5x128xbf16, #tpu.memory_space<vmem>>, vector<1x1x4x128xbf16>
    %14 = vector.shape_cast %13 : vector<1x1x4x128xbf16> to vector<4x128xbf16>
    %c0_20 = arith.constant 0 : index
    %c2 = arith.constant 2 : index
    %c0_21 = arith.constant 0 : index
    %c0_22 = arith.constant 0 : index
    %15 = vector.load %arg8[%c0_20, %c2, %c0_21, %c0_22] : memref<3x3x128x128xbf16, #tpu.memory_space<vmem>>, vector<1x1x128x128xbf16>
    %16 = vector.shape_cast %15 : vector<1x1x128x128xbf16> to vector<128x128xbf16>
    %cst_23 = arith.constant dense<0.000000e+00> : vector<4x128xf32>
    %17 = tpu.matmul %14, %16, %cst_23 {dimension_numbers = #tpu.dot_dimension_numbers<[1], [0], [0], [1], [0, 0, 1, 1], [], []>} : vector<4x128xbf16>, vector<128x128xbf16>, vector<4x128xf32> -> vector<4x128xf32>
    %18 = arith.addf %12, %17 : vector<4x128xf32>
    %c0_24 = arith.constant 0 : index
    %c0_25 = arith.constant 0 : index
    %c0_26 = arith.constant 0 : index
    %c0_27 = arith.constant 0 : index
    %19 = vector.load %arg4[%c0_24, %c0_25, %c0_26, %c0_27] : memref<1x1x5x128xbf16, #tpu.memory_space<vmem>>, vector<1x1x4x128xbf16>
    %20 = vector.shape_cast %19 : vector<1x1x4x128xbf16> to vector<4x128xbf16>
    %c1_28 = arith.constant 1 : index
    %c0_29 = arith.constant 0 : index
    %c0_30 = arith.constant 0 : index
    %c0_31 = arith.constant 0 : index
    %21 = vector.load %arg8[%c1_28, %c0_29, %c0_30, %c0_31] : memref<3x3x128x128xbf16, #tpu.memory_space<vmem>>, vector<1x1x128x128xbf16>
    %22 = vector.shape_cast %21 : vector<1x1x128x128xbf16> to vector<128x128xbf16>
    %cst_32 = arith.constant dense<0.000000e+00> : vector<4x128xf32>
    %23 = tpu.matmul %20, %22, %cst_32 {dimension_numbers = #tpu.dot_dimension_numbers<[1], [0], [0], [1], [0, 0, 1, 1], [], []>} : vector<4x128xbf16>, vector<128x128xbf16>, vector<4x128xf32> -> vector<4x128xf32>
    %24 = arith.addf %18, %23 : vector<4x128xf32>
    %c0_33 = arith.constant 0 : index
    %c0_34 = arith.constant 0 : index
    %c0_35 = arith.constant 0 : index
    %c0_36 = arith.constant 0 : index
    %25 = vector.load %arg5[%c0_33, %c0_34, %c0_35, %c0_36] : memref<1x1x5x128xbf16, #tpu.memory_space<vmem>>, vector<1x1x4x128xbf16>
    %26 = vector.shape_cast %25 : vector<1x1x4x128xbf16> to vector<4x128xbf16>
    %c1_37 = arith.constant 1 : index
    %c1_38 = arith.constant 1 : index
    %c0_39 = arith.constant 0 : index
    %c0_40 = arith.constant 0 : index
    %27 = vector.load %arg8[%c1_37, %c1_38, %c0_39, %c0_40] : memref<3x3x128x128xbf16, #tpu.memory_space<vmem>>, vector<1x1x128x128xbf16>
    %28 = vector.shape_cast %27 : vector<1x1x128x128xbf16> to vector<128x128xbf16>
    %cst_41 = arith.constant dense<0.000000e+00> : vector<4x128xf32>
    %29 = tpu.matmul %26, %28, %cst_41 {dimension_numbers = #tpu.dot_dimension_numbers<[1], [0], [0], [1], [0, 0, 1, 1], [], []>} : vector<4x128xbf16>, vector<128x128xbf16>, vector<4x128xf32> -> vector<4x128xf32>
    %30 = arith.addf %24, %29 : vector<4x128xf32>
    %c0_42 = arith.constant 0 : index
    %c0_43 = arith.constant 0 : index
    %c1_44 = arith.constant 1 : index
    %c0_45 = arith.constant 0 : index
    %31 = vector.load %arg4[%c0_42, %c0_43, %c1_44, %c0_45] : memref<1x1x5x128xbf16, #tpu.memory_space<vmem>>, vector<1x1x4x128xbf16>
    %32 = vector.shape_cast %31 : vector<1x1x4x128xbf16> to vector<4x128xbf16>
    %c1_46 = arith.constant 1 : index
    %c2_47 = arith.constant 2 : index
    %c0_48 = arith.constant 0 : index
    %c0_49 = arith.constant 0 : index
    %33 = vector.load %arg8[%c1_46, %c2_47, %c0_48, %c0_49] : memref<3x3x128x128xbf16, #tpu.memory_space<vmem>>, vector<1x1x128x128xbf16>
    %34 = vector.shape_cast %33 : vector<1x1x128x128xbf16> to vector<128x128xbf16>
    %cst_50 = arith.constant dense<0.000000e+00> : vector<4x128xf32>
    %35 = tpu.matmul %32, %34, %cst_50 {dimension_numbers = #tpu.dot_dimension_numbers<[1], [0], [0], [1], [0, 0, 1, 1], [], []>} : vector<4x128xbf16>, vector<128x128xbf16>, vector<4x128xf32> -> vector<4x128xf32>
    %36 = arith.addf %30, %35 : vector<4x128xf32>
    %c0_51 = arith.constant 0 : index
    %c0_52 = arith.constant 0 : index
    %c0_53 = arith.constant 0 : index
    %c0_54 = arith.constant 0 : index
    %37 = vector.load %arg6[%c0_51, %c0_52, %c0_53, %c0_54] : memref<1x1x5x128xbf16, #tpu.memory_space<vmem>>, vector<1x1x4x128xbf16>
    %38 = vector.shape_cast %37 : vector<1x1x4x128xbf16> to vector<4x128xbf16>
    %c2_55 = arith.constant 2 : index
    %c0_56 = arith.constant 0 : index
    %c0_57 = arith.constant 0 : index
    %c0_58 = arith.constant 0 : index
    %39 = vector.load %arg8[%c2_55, %c0_56, %c0_57, %c0_58] : memref<3x3x128x128xbf16, #tpu.memory_space<vmem>>, vector<1x1x128x128xbf16>
    %40 = vector.shape_cast %39 : vector<1x1x128x128xbf16> to vector<128x128xbf16>
    %cst_59 = arith.constant dense<0.000000e+00> : vector<4x128xf32>
    %41 = tpu.matmul %38, %40, %cst_59 {dimension_numbers = #tpu.dot_dimension_numbers<[1], [0], [0], [1], [0, 0, 1, 1], [], []>} : vector<4x128xbf16>, vector<128x128xbf16>, vector<4x128xf32> -> vector<4x128xf32>
    %42 = arith.addf %36, %41 : vector<4x128xf32>
    %c0_60 = arith.constant 0 : index
    %c0_61 = arith.constant 0 : index
    %c0_62 = arith.constant 0 : index
    %c0_63 = arith.constant 0 : index
    %43 = vector.load %arg7[%c0_60, %c0_61, %c0_62, %c0_63] : memref<1x1x5x128xbf16, #tpu.memory_space<vmem>>, vector<1x1x4x128xbf16>
    %44 = vector.shape_cast %43 : vector<1x1x4x128xbf16> to vector<4x128xbf16>
    %c2_64 = arith.constant 2 : index
    %c1_65 = arith.constant 1 : index
    %c0_66 = arith.constant 0 : index
    %c0_67 = arith.constant 0 : index
    %45 = vector.load %arg8[%c2_64, %c1_65, %c0_66, %c0_67] : memref<3x3x128x128xbf16, #tpu.memory_space<vmem>>, vector<1x1x128x128xbf16>
    %46 = vector.shape_cast %45 : vector<1x1x128x128xbf16> to vector<128x128xbf16>
    %cst_68 = arith.constant dense<0.000000e+00> : vector<4x128xf32>
    %47 = tpu.matmul %44, %46, %cst_68 {dimension_numbers = #tpu.dot_dimension_numbers<[1], [0], [0], [1], [0, 0, 1, 1], [], []>} : vector<4x128xbf16>, vector<128x128xbf16>, vector<4x128xf32> -> vector<4x128xf32>
    %48 = arith.addf %42, %47 : vector<4x128xf32>
    %c0_69 = arith.constant 0 : index
    %c0_70 = arith.constant 0 : index
    %c1_71 = arith.constant 1 : index
    %c0_72 = arith.constant 0 : index
    %49 = vector.load %arg6[%c0_69, %c0_70, %c1_71, %c0_72] : memref<1x1x5x128xbf16, #tpu.memory_space<vmem>>, vector<1x1x4x128xbf16>
    %50 = vector.shape_cast %49 : vector<1x1x4x128xbf16> to vector<4x128xbf16>
    %c2_73 = arith.constant 2 : index
    %c2_74 = arith.constant 2 : index
    %c0_75 = arith.constant 0 : index
    %c0_76 = arith.constant 0 : index
    %51 = vector.load %arg8[%c2_73, %c2_74, %c0_75, %c0_76] : memref<3x3x128x128xbf16, #tpu.memory_space<vmem>>, vector<1x1x128x128xbf16>
    %52 = vector.shape_cast %51 : vector<1x1x128x128xbf16> to vector<128x128xbf16>
    %cst_77 = arith.constant dense<0.000000e+00> : vector<4x128xf32>
    %53 = tpu.matmul %50, %52, %cst_77 {dimension_numbers = #tpu.dot_dimension_numbers<[1], [0], [0], [1], [0, 0, 1, 1], [], []>} : vector<4x128xbf16>, vector<128x128xbf16>, vector<4x128xf32> -> vector<4x128xf32>
    %54 = arith.addf %48, %53 : vector<4x128xf32>
    %c0_78 = arith.constant 0 : index
    %c0_79 = arith.constant 0 : index
    %55 = vector.load %arg9[%c0_78, %c0_79] : memref<1x128xf32, #tpu.memory_space<vmem>>, vector<1x128xf32>
    %56 = vector.broadcast %55 : vector<1x128xf32> to vector<4x128xf32>
    %57 = arith.addf %54, %56 : vector<4x128xf32>
    %cst_80 = arith.constant 0.000000e+00 : f32
    %58 = vector.broadcast %cst_80 : f32 to vector<4x128xf32>
    %59 = arith.maximumf %57, %58 : vector<4x128xf32>
    %60 = arith.truncf %59 : vector<4x128xf32> to vector<4x128xbf16>
    %c0_81 = arith.constant 0 : index
    %c0_82 = arith.constant 0 : index
    %c0_83 = arith.constant 0 : index
    %c0_84 = arith.constant 0 : index
    %61 = vector.load %arg10[%c0_81, %c0_82, %c0_83, %c0_84] : memref<1x1x4x128xbf16, #tpu.memory_space<vmem>>, vector<1x1x4x128xbf16>
    %62 = vector.shape_cast %61 : vector<1x1x4x128xbf16> to vector<4x128xbf16>
    %63 = vector.shape_cast %60 : vector<4x128xbf16> to vector<1x1x4x128xbf16>
    tpu.vector_store %arg10[%c0_81, %c0_82, %c0_83, %c0_84], %63 {strides = array<i32>} : memref<1x1x4x128xbf16, #tpu.memory_space<vmem>>, vector<1x1x4x128xbf16>,
    return
  }
  func.func @transform_0(%arg0: i32, %arg1: i32) -> (i32, i32, i32, i32) {
    %c2_i32 = arith.constant 2 : i32
    %0 = arith.muli %arg1, %c2_i32 : i32
    %c0_i32 = arith.constant 0 : i32
    %1 = arith.addi %0, %c0_i32 : i32
    %c0_i32_0 = arith.constant 0 : i32
    %c0_i32_1 = arith.constant 0 : i32
    %c0_i32_2 = arith.constant 0 : i32
    return %arg0, %1, %c0_i32_0, %c0_i32_1 : i32, i32, i32, i32
  }
  func.func @transform_1(%arg0: i32, %arg1: i32) -> (i32, i32, i32, i32) {
    %c2_i32 = arith.constant 2 : i32
    %0 = arith.muli %arg1, %c2_i32 : i32
    %c0_i32 = arith.constant 0 : i32
    %1 = arith.addi %0, %c0_i32 : i32
    %c0_i32_0 = arith.constant 0 : i32
    %c0_i32_1 = arith.constant 0 : i32
    %c0_i32_2 = arith.constant 0 : i32
    return %arg0, %1, %c0_i32_0, %c0_i32_1 : i32, i32, i32, i32
  }
  func.func @transform_2(%arg0: i32, %arg1: i32) -> (i32, i32, i32, i32) {
    %c2_i32 = arith.constant 2 : i32
    %0 = arith.muli %arg1, %c2_i32 : i32
    %c1_i32 = arith.constant 1 : i32
    %1 = arith.addi %0, %c1_i32 : i32
    %c0_i32 = arith.constant 0 : i32
    %c0_i32_0 = arith.constant 0 : i32
    %c0_i32_1 = arith.constant 0 : i32
    return %arg0, %1, %c0_i32, %c0_i32_0 : i32, i32, i32, i32
  }
  func.func @transform_3(%arg0: i32, %arg1: i32) -> (i32, i32, i32, i32) {
    %c2_i32 = arith.constant 2 : i32
    %0 = arith.muli %arg1, %c2_i32 : i32
    %c1_i32 = arith.constant 1 : i32
    %1 = arith.addi %0, %c1_i32 : i32
    %c0_i32 = arith.constant 0 : i32
    %c0_i32_0 = arith.constant 0 : i32
    %c0_i32_1 = arith.constant 0 : i32
    return %arg0, %1, %c0_i32, %c0_i32_0 : i32, i32, i32, i32
  }
  func.func @transform_4(%arg0: i32, %arg1: i32) -> (i32, i32, i32, i32) {
    %c2_i32 = arith.constant 2 : i32
    %0 = arith.muli %arg1, %c2_i32 : i32
    %c2_i32_0 = arith.constant 2 : i32
    %1 = arith.addi %0, %c2_i32_0 : i32
    %c0_i32 = arith.constant 0 : i32
    %c0_i32_1 = arith.constant 0 : i32
    %c0_i32_2 = arith.constant 0 : i32
    return %arg0, %1, %c0_i32, %c0_i32_1 : i32, i32, i32, i32
  }
  func.func @transform_5(%arg0: i32, %arg1: i32) -> (i32, i32, i32, i32) {
    %c2_i32 = arith.constant 2 : i32
    %0 = arith.muli %arg1, %c2_i32 : i32
    %c2_i32_0 = arith.constant 2 : i32
    %1 = arith.addi %0, %c2_i32_0 : i32
    %c0_i32 = arith.constant 0 : i32
    %c0_i32_1 = arith.constant 0 : i32
    %c0_i32_2 = arith.constant 0 : i32
    return %arg0, %1, %c0_i32, %c0_i32_1 : i32, i32, i32, i32
  }
  func.func @transform_6(%arg0: i32, %arg1: i32) -> (i32, i32, i32, i32) {
    %c0_i32 = arith.constant 0 : i32
    %c0_i32_0 = arith.constant 0 : i32
    %c0_i32_1 = arith.constant 0 : i32
    %c0_i32_2 = arith.constant 0 : i32
    %c0_i32_3 = arith.constant 0 : i32
    return %c0_i32, %c0_i32_0, %c0_i32_1, %c0_i32_2 : i32, i32, i32, i32
  }
  func.func @transform_7(%arg0: i32, %arg1: i32) -> (i32, i32) {
    %c0_i32 = arith.constant 0 : i32
    %c0_i32_0 = arith.constant 0 : i32
    %c0_i32_1 = arith.constant 0 : i32
    return %c0_i32, %c0_i32_0 : i32, i32
  }
  func.func @transform_8(%arg0: i32, %arg1: i32) -> (i32, i32, i32, i32) {
    %c0_i32 = arith.constant 0 : i32
    %c0_i32_0 = arith.constant 0 : i32
    %c0_i32_1 = arith.constant 0 : i32
    return %arg0, %arg1, %c0_i32, %c0_i32_0 : i32, i32, i32, i32
  }
}

module attributes {stable_mosaic.version = 11 : i64} {
  func.func @_mm_kernel(%arg0: i32, %arg1: i32, %arg2: i32, %arg3: memref<8x128xbf16, #tpu.memory_space<vmem>>, %arg4: memref<128x128xbf16, #tpu.memory_space<vmem>>, %arg5: memref<1x128xf32, #tpu.memory_space<vmem>>, %arg6: memref<8x128xbf16, #tpu.memory_space<vmem>>, %arg7: memref<8x128xf32, #tpu.memory_space<vmem>>) attributes {dimension_semantics = [#tpu.dimension_semantics<parallel>, #tpu.dimension_semantics<parallel>, #tpu.dimension_semantics<arbitrary>], iteration_bounds = array<i64: 1, 1, 1>, scalar_prefetch = 0 : i64, scratch_operands = 1 : i64, tpu.core_type = #tpu.core_type<tc>, window_params = [{transform_indices = @transform_0, window_bounds = array<i64: 8, 128>}, {transform_indices = @transform_1, window_bounds = array<i64: 128, 128>}, {transform_indices = @transform_2, window_bounds = array<i64: 1, 128>}, {transform_indices = @transform_3, window_bounds = array<i64: 8, 128>}]} {
    %c0_i32 = arith.constant 0 : i32
    %0 = arith.cmpi eq, %arg2, %c0_i32 : i32
    %1 = arith.extui %0 : i1 to i32
    %c0_i32_0 = arith.constant 0 : i32
    %2 = arith.cmpi ne, %1, %c0_i32_0 : i32
    scf.if %2 {
      %cst_10 = arith.constant 0.000000e+00 : f32
      %12 = vector.broadcast %cst_10 : f32 to vector<8x128xf32>
      %c0_11 = arith.constant 0 : index
      %c0_12 = arith.constant 0 : index
      %13 = vector.load %arg7[%c0_11, %c0_12] : memref<8x128xf32, #tpu.memory_space<vmem>>, vector<8x128xf32>
      tpu.vector_store %arg7[%c0_11, %c0_12], %12 {strides = array<i32>} : memref<8x128xf32, #tpu.memory_space<vmem>>, vector<8x128xf32>,
    } else {
    }
    %c0 = arith.constant 0 : index
    %c0_1 = arith.constant 0 : index
    %3 = vector.load %arg7[%c0, %c0_1] : memref<8x128xf32, #tpu.memory_space<vmem>>, vector<8x128xf32>
    %c0_2 = arith.constant 0 : index
    %c0_3 = arith.constant 0 : index
    %4 = vector.load %arg3[%c0_2, %c0_3] : memref<8x128xbf16, #tpu.memory_space<vmem>>, vector<8x128xbf16>
    %c0_4 = arith.constant 0 : index
    %c0_5 = arith.constant 0 : index
    %5 = vector.load %arg4[%c0_4, %c0_5] : memref<128x128xbf16, #tpu.memory_space<vmem>>, vector<128x128xbf16>
    %cst = arith.constant dense<0.000000e+00> : vector<8x128xf32>
    %6 = tpu.matmul %4, %5, %cst {dimension_numbers = #tpu.dot_dimension_numbers<[1], [0], [0], [1], [0, 0, 1, 1], [], []>} : vector<8x128xbf16>, vector<128x128xbf16>, vector<8x128xf32> -> vector<8x128xf32>
    %7 = arith.addf %3, %6 : vector<8x128xf32>
    %c0_6 = arith.constant 0 : index
    %c0_7 = arith.constant 0 : index
    %8 = vector.load %arg7[%c0_6, %c0_7] : memref<8x128xf32, #tpu.memory_space<vmem>>, vector<8x128xf32>
    tpu.vector_store %arg7[%c0_6, %c0_7], %7 {strides = array<i32>} : memref<8x128xf32, #tpu.memory_space<vmem>>, vector<8x128xf32>,
    %c0_i32_8 = arith.constant 0 : i32
    %9 = arith.cmpi eq, %arg2, %c0_i32_8 : i32
    %10 = arith.extui %9 : i1 to i32
    %c0_i32_9 = arith.constant 0 : i32
    %11 = arith.cmpi ne, %10, %c0_i32_9 : i32
    scf.if %11 {
      %c0_10 = arith.constant 0 : index
      %c0_11 = arith.constant 0 : index
      %12 = vector.load %arg7[%c0_10, %c0_11] : memref<8x128xf32, #tpu.memory_space<vmem>>, vector<8x128xf32>
      %c0_12 = arith.constant 0 : index
      %c0_13 = arith.constant 0 : index
      %13 = vector.load %arg5[%c0_12, %c0_13] : memref<1x128xf32, #tpu.memory_space<vmem>>, vector<1x128xf32>
      %14 = vector.broadcast %13 : vector<1x128xf32> to vector<8x128xf32>
      %15 = arith.addf %12, %14 : vector<8x128xf32>
      %16 = arith.truncf %15 : vector<8x128xf32> to vector<8x128xbf16>
      %c0_14 = arith.constant 0 : index
      %c0_15 = arith.constant 0 : index
      %17 = vector.load %arg6[%c0_14, %c0_15] : memref<8x128xbf16, #tpu.memory_space<vmem>>, vector<8x128xbf16>
      tpu.vector_store %arg6[%c0_14, %c0_15], %16 {strides = array<i32>} : memref<8x128xbf16, #tpu.memory_space<vmem>>, vector<8x128xbf16>,
    } else {
    }
    return
  }
  func.func @transform_0(%arg0: i32, %arg1: i32, %arg2: i32) -> (i32, i32) {
    %c0_i32 = arith.constant 0 : i32
    return %arg0, %arg2 : i32, i32
  }
  func.func @transform_1(%arg0: i32, %arg1: i32, %arg2: i32) -> (i32, i32) {
    %c0_i32 = arith.constant 0 : i32
    return %arg2, %arg1 : i32, i32
  }
  func.func @transform_2(%arg0: i32, %arg1: i32, %arg2: i32) -> (i32, i32) {
    %c0_i32 = arith.constant 0 : i32
    %c0_i32_0 = arith.constant 0 : i32
    return %c0_i32, %arg1 : i32, i32
  }
  func.func @transform_3(%arg0: i32, %arg1: i32, %arg2: i32) -> (i32, i32) {
    %c0_i32 = arith.constant 0 : i32
    return %arg0, %arg1 : i32, i32
  }
}

module attributes {stable_mosaic.version = 11 : i64} {
  func.func @_mm_kernel(%arg0: i32, %arg1: i32, %arg2: i32, %arg3: memref<32x128xbf16, #tpu.memory_space<vmem>>, %arg4: memref<128x128xbf16, #tpu.memory_space<vmem>>, %arg5: memref<1x128xf32, #tpu.memory_space<vmem>>, %arg6: memref<32x128xbf16, #tpu.memory_space<vmem>>, %arg7: memref<32x128xf32, #tpu.memory_space<vmem>>) attributes {dimension_semantics = [#tpu.dimension_semantics<parallel>, #tpu.dimension_semantics<parallel>, #tpu.dimension_semantics<arbitrary>], iteration_bounds = array<i64: 1, 1, 1>, scalar_prefetch = 0 : i64, scratch_operands = 1 : i64, tpu.core_type = #tpu.core_type<tc>, window_params = [{transform_indices = @transform_0, window_bounds = array<i64: 32, 128>}, {transform_indices = @transform_1, window_bounds = array<i64: 128, 128>}, {transform_indices = @transform_2, window_bounds = array<i64: 1, 128>}, {transform_indices = @transform_3, window_bounds = array<i64: 32, 128>}]} {
    %c0_i32 = arith.constant 0 : i32
    %0 = arith.cmpi eq, %arg2, %c0_i32 : i32
    %1 = arith.extui %0 : i1 to i32
    %c0_i32_0 = arith.constant 0 : i32
    %2 = arith.cmpi ne, %1, %c0_i32_0 : i32
    scf.if %2 {
      %cst_10 = arith.constant 0.000000e+00 : f32
      %12 = vector.broadcast %cst_10 : f32 to vector<32x128xf32>
      %c0_11 = arith.constant 0 : index
      %c0_12 = arith.constant 0 : index
      %13 = vector.load %arg7[%c0_11, %c0_12] : memref<32x128xf32, #tpu.memory_space<vmem>>, vector<32x128xf32>
      tpu.vector_store %arg7[%c0_11, %c0_12], %12 {strides = array<i32>} : memref<32x128xf32, #tpu.memory_space<vmem>>, vector<32x128xf32>,
    } else {
    }
    %c0 = arith.constant 0 : index
    %c0_1 = arith.constant 0 : index
    %3 = vector.load %arg7[%c0, %c0_1] : memref<32x128xf32, #tpu.memory_space<vmem>>, vector<32x128xf32>
    %c0_2 = arith.constant 0 : index
    %c0_3 = arith.constant 0 : index
    %4 = vector.load %arg3[%c0_2, %c0_3] : memref<32x128xbf16, #tpu.memory_space<vmem>>, vector<32x128xbf16>
    %c0_4 = arith.constant 0 : index
    %c0_5 = arith.constant 0 : index
    %5 = vector.load %arg4[%c0_4, %c0_5] : memref<128x128xbf16, #tpu.memory_space<vmem>>, vector<128x128xbf16>
    %cst = arith.constant dense<0.000000e+00> : vector<32x128xf32>
    %6 = tpu.matmul %4, %5, %cst {dimension_numbers = #tpu.dot_dimension_numbers<[1], [0], [0], [1], [0, 0, 1, 1], [], []>} : vector<32x128xbf16>, vector<128x128xbf16>, vector<32x128xf32> -> vector<32x128xf32>
    %7 = arith.addf %3, %6 : vector<32x128xf32>
    %c0_6 = arith.constant 0 : index
    %c0_7 = arith.constant 0 : index
    %8 = vector.load %arg7[%c0_6, %c0_7] : memref<32x128xf32, #tpu.memory_space<vmem>>, vector<32x128xf32>
    tpu.vector_store %arg7[%c0_6, %c0_7], %7 {strides = array<i32>} : memref<32x128xf32, #tpu.memory_space<vmem>>, vector<32x128xf32>,
    %c0_i32_8 = arith.constant 0 : i32
    %9 = arith.cmpi eq, %arg2, %c0_i32_8 : i32
    %10 = arith.extui %9 : i1 to i32
    %c0_i32_9 = arith.constant 0 : i32
    %11 = arith.cmpi ne, %10, %c0_i32_9 : i32
    scf.if %11 {
      %c0_10 = arith.constant 0 : index
      %c0_11 = arith.constant 0 : index
      %12 = vector.load %arg7[%c0_10, %c0_11] : memref<32x128xf32, #tpu.memory_space<vmem>>, vector<32x128xf32>
      %c0_12 = arith.constant 0 : index
      %c0_13 = arith.constant 0 : index
      %13 = vector.load %arg5[%c0_12, %c0_13] : memref<1x128xf32, #tpu.memory_space<vmem>>, vector<1x128xf32>
      %14 = vector.broadcast %13 : vector<1x128xf32> to vector<32x128xf32>
      %15 = arith.addf %12, %14 : vector<32x128xf32>
      %cst_14 = arith.constant 0.000000e+00 : f32
      %16 = vector.broadcast %cst_14 : f32 to vector<32x128xf32>
      %17 = arith.maximumf %15, %16 : vector<32x128xf32>
      %18 = arith.truncf %17 : vector<32x128xf32> to vector<32x128xbf16>
      %c0_15 = arith.constant 0 : index
      %c0_16 = arith.constant 0 : index
      %19 = vector.load %arg6[%c0_15, %c0_16] : memref<32x128xbf16, #tpu.memory_space<vmem>>, vector<32x128xbf16>
      tpu.vector_store %arg6[%c0_15, %c0_16], %18 {strides = array<i32>} : memref<32x128xbf16, #tpu.memory_space<vmem>>, vector<32x128xbf16>,
    } else {
    }
    return
  }
  func.func @transform_0(%arg0: i32, %arg1: i32, %arg2: i32) -> (i32, i32) {
    %c0_i32 = arith.constant 0 : i32
    return %arg0, %arg2 : i32, i32
  }
  func.func @transform_1(%arg0: i32, %arg1: i32, %arg2: i32) -> (i32, i32) {
    %c0_i32 = arith.constant 0 : i32
    return %arg2, %arg1 : i32, i32
  }
  func.func @transform_2(%arg0: i32, %arg1: i32, %arg2: i32) -> (i32, i32) {
    %c0_i32 = arith.constant 0 : i32
    %c0_i32_0 = arith.constant 0 : i32
    return %c0_i32, %arg1 : i32, i32
  }
  func.func @transform_3(%arg0: i32, %arg1: i32, %arg2: i32) -> (i32, i32) {
    %c0_i32 = arith.constant 0 : i32
    return %arg0, %arg1 : i32, i32
  }
}

module attributes {stable_mosaic.version = 11 : i64} {
  func.func @_conv_rows_kernel(%arg0: i32, %arg1: i32, %arg2: memref<1x1x3x128xbf16, #tpu.memory_space<vmem>>, %arg3: memref<1x1x3x128xbf16, #tpu.memory_space<vmem>>, %arg4: memref<1x1x3x128xbf16, #tpu.memory_space<vmem>>, %arg5: memref<1x1x3x128xbf16, #tpu.memory_space<vmem>>, %arg6: memref<1x1x3x128xbf16, #tpu.memory_space<vmem>>, %arg7: memref<1x1x3x128xbf16, #tpu.memory_space<vmem>>, %arg8: memref<3x3x128x128xbf16, #tpu.memory_space<vmem>>, %arg9: memref<1x128xf32, #tpu.memory_space<vmem>>, %arg10: memref<1x1x2x128xbf16, #tpu.memory_space<vmem>>) attributes {dimension_semantics = [#tpu.dimension_semantics<parallel>, #tpu.dimension_semantics<parallel>], iteration_bounds = array<i64: 2, 2>, scalar_prefetch = 0 : i64, scratch_operands = 0 : i64, tpu.core_type = #tpu.core_type<tc>, window_params = [{transform_indices = @transform_0, window_bounds = array<i64: 1, 1, 3, 128>}, {transform_indices = @transform_1, window_bounds = array<i64: 1, 1, 3, 128>}, {transform_indices = @transform_2, window_bounds = array<i64: 1, 1, 3, 128>}, {transform_indices = @transform_3, window_bounds = array<i64: 1, 1, 3, 128>}, {transform_indices = @transform_4, window_bounds = array<i64: 1, 1, 3, 128>}, {transform_indices = @transform_5, window_bounds = array<i64: 1, 1, 3, 128>}, {pipeline_mode = #tpu.pipeline_mode<synchronous>, transform_indices = @transform_6, window_bounds = array<i64: 3, 3, 128, 128>}, {pipeline_mode = #tpu.pipeline_mode<synchronous>, transform_indices = @transform_7, window_bounds = array<i64: 1, 128>}, {transform_indices = @transform_8, window_bounds = array<i64: 1, 1, 2, 128>}]} {
    %cst = arith.constant 0.000000e+00 : f32
    %0 = vector.broadcast %cst : f32 to vector<2x128xf32>
    %c0 = arith.constant 0 : index
    %c0_0 = arith.constant 0 : index
    %c0_1 = arith.constant 0 : index
    %c0_2 = arith.constant 0 : index
    %1 = vector.load %arg2[%c0, %c0_0, %c0_1, %c0_2] : memref<1x1x3x128xbf16, #tpu.memory_space<vmem>>, vector<1x1x2x128xbf16>
    %2 = vector.shape_cast %1 : vector<1x1x2x128xbf16> to vector<2x128xbf16>
    %c0_3 = arith.constant 0 : index
    %c0_4 = arith.constant 0 : index
    %c0_5 = arith.constant 0 : index
    %c0_6 = arith.constant 0 : index
    %3 = vector.load %arg8[%c0_3, %c0_4, %c0_5, %c0_6] : memref<3x3x128x128xbf16, #tpu.memory_space<vmem>>, vector<1x1x128x128xbf16>
    %4 = vector.shape_cast %3 : vector<1x1x128x128xbf16> to vector<128x128xbf16>
    %cst_7 = arith.constant dense<0.000000e+00> : vector<2x128xf32>
    %5 = tpu.matmul %2, %4, %cst_7 {dimension_numbers = #tpu.dot_dimension_numbers<[1], [0], [0], [1], [0, 0, 1, 1], [], []>} : vector<2x128xbf16>, vector<128x128xbf16>, vector<2x128xf32> -> vector<2x128xf32>
    %6 = arith.addf %0, %5 : vector<2x128xf32>
    %c0_8 = arith.constant 0 : index
    %c0_9 = arith.constant 0 : index
    %c0_10 = arith.constant 0 : index
    %c0_11 = arith.constant 0 : index
    %7 = vector.load %arg3[%c0_8, %c0_9, %c0_10, %c0_11] : memref<1x1x3x128xbf16, #tpu.memory_space<vmem>>, vector<1x1x2x128xbf16>
    %8 = vector.shape_cast %7 : vector<1x1x2x128xbf16> to vector<2x128xbf16>
    %c0_12 = arith.constant 0 : index
    %c1 = arith.constant 1 : index
    %c0_13 = arith.constant 0 : index
    %c0_14 = arith.constant 0 : index
    %9 = vector.load %arg8[%c0_12, %c1, %c0_13, %c0_14] : memref<3x3x128x128xbf16, #tpu.memory_space<vmem>>, vector<1x1x128x128xbf16>
    %10 = vector.shape_cast %9 : vector<1x1x128x128xbf16> to vector<128x128xbf16>
    %cst_15 = arith.constant dense<0.000000e+00> : vector<2x128xf32>
    %11 = tpu.matmul %8, %10, %cst_15 {dimension_numbers = #tpu.dot_dimension_numbers<[1], [0], [0], [1], [0, 0, 1, 1], [], []>} : vector<2x128xbf16>, vector<128x128xbf16>, vector<2x128xf32> -> vector<2x128xf32>
    %12 = arith.addf %6, %11 : vector<2x128xf32>
    %c0_16 = arith.constant 0 : index
    %c0_17 = arith.constant 0 : index
    %c1_18 = arith.constant 1 : index
    %c0_19 = arith.constant 0 : index
    %13 = vector.load %arg2[%c0_16, %c0_17, %c1_18, %c0_19] : memref<1x1x3x128xbf16, #tpu.memory_space<vmem>>, vector<1x1x2x128xbf16>
    %14 = vector.shape_cast %13 : vector<1x1x2x128xbf16> to vector<2x128xbf16>
    %c0_20 = arith.constant 0 : index
    %c2 = arith.constant 2 : index
    %c0_21 = arith.constant 0 : index
    %c0_22 = arith.constant 0 : index
    %15 = vector.load %arg8[%c0_20, %c2, %c0_21, %c0_22] : memref<3x3x128x128xbf16, #tpu.memory_space<vmem>>, vector<1x1x128x128xbf16>
    %16 = vector.shape_cast %15 : vector<1x1x128x128xbf16> to vector<128x128xbf16>
    %cst_23 = arith.constant dense<0.000000e+00> : vector<2x128xf32>
    %17 = tpu.matmul %14, %16, %cst_23 {dimension_numbers = #tpu.dot_dimension_numbers<[1], [0], [0], [1], [0, 0, 1, 1], [], []>} : vector<2x128xbf16>, vector<128x128xbf16>, vector<2x128xf32> -> vector<2x128xf32>
    %18 = arith.addf %12, %17 : vector<2x128xf32>
    %c0_24 = arith.constant 0 : index
    %c0_25 = arith.constant 0 : index
    %c0_26 = arith.constant 0 : index
    %c0_27 = arith.constant 0 : index
    %19 = vector.load %arg4[%c0_24, %c0_25, %c0_26, %c0_27] : memref<1x1x3x128xbf16, #tpu.memory_space<vmem>>, vector<1x1x2x128xbf16>
    %20 = vector.shape_cast %19 : vector<1x1x2x128xbf16> to vector<2x128xbf16>
    %c1_28 = arith.constant 1 : index
    %c0_29 = arith.constant 0 : index
    %c0_30 = arith.constant 0 : index
    %c0_31 = arith.constant 0 : index
    %21 = vector.load %arg8[%c1_28, %c0_29, %c0_30, %c0_31] : memref<3x3x128x128xbf16, #tpu.memory_space<vmem>>, vector<1x1x128x128xbf16>
    %22 = vector.shape_cast %21 : vector<1x1x128x128xbf16> to vector<128x128xbf16>
    %cst_32 = arith.constant dense<0.000000e+00> : vector<2x128xf32>
    %23 = tpu.matmul %20, %22, %cst_32 {dimension_numbers = #tpu.dot_dimension_numbers<[1], [0], [0], [1], [0, 0, 1, 1], [], []>} : vector<2x128xbf16>, vector<128x128xbf16>, vector<2x128xf32> -> vector<2x128xf32>
    %24 = arith.addf %18, %23 : vector<2x128xf32>
    %c0_33 = arith.constant 0 : index
    %c0_34 = arith.constant 0 : index
    %c0_35 = arith.constant 0 : index
    %c0_36 = arith.constant 0 : index
    %25 = vector.load %arg5[%c0_33, %c0_34, %c0_35, %c0_36] : memref<1x1x3x128xbf16, #tpu.memory_space<vmem>>, vector<1x1x2x128xbf16>
    %26 = vector.shape_cast %25 : vector<1x1x2x128xbf16> to vector<2x128xbf16>
    %c1_37 = arith.constant 1 : index
    %c1_38 = arith.constant 1 : index
    %c0_39 = arith.constant 0 : index
    %c0_40 = arith.constant 0 : index
    %27 = vector.load %arg8[%c1_37, %c1_38, %c0_39, %c0_40] : memref<3x3x128x128xbf16, #tpu.memory_space<vmem>>, vector<1x1x128x128xbf16>
    %28 = vector.shape_cast %27 : vector<1x1x128x128xbf16> to vector<128x128xbf16>
    %cst_41 = arith.constant dense<0.000000e+00> : vector<2x128xf32>
    %29 = tpu.matmul %26, %28, %cst_41 {dimension_numbers = #tpu.dot_dimension_numbers<[1], [0], [0], [1], [0, 0, 1, 1], [], []>} : vector<2x128xbf16>, vector<128x128xbf16>, vector<2x128xf32> -> vector<2x128xf32>
    %30 = arith.addf %24, %29 : vector<2x128xf32>
    %c0_42 = arith.constant 0 : index
    %c0_43 = arith.constant 0 : index
    %c1_44 = arith.constant 1 : index
    %c0_45 = arith.constant 0 : index
    %31 = vector.load %arg4[%c0_42, %c0_43, %c1_44, %c0_45] : memref<1x1x3x128xbf16, #tpu.memory_space<vmem>>, vector<1x1x2x128xbf16>
    %32 = vector.shape_cast %31 : vector<1x1x2x128xbf16> to vector<2x128xbf16>
    %c1_46 = arith.constant 1 : index
    %c2_47 = arith.constant 2 : index
    %c0_48 = arith.constant 0 : index
    %c0_49 = arith.constant 0 : index
    %33 = vector.load %arg8[%c1_46, %c2_47, %c0_48, %c0_49] : memref<3x3x128x128xbf16, #tpu.memory_space<vmem>>, vector<1x1x128x128xbf16>
    %34 = vector.shape_cast %33 : vector<1x1x128x128xbf16> to vector<128x128xbf16>
    %cst_50 = arith.constant dense<0.000000e+00> : vector<2x128xf32>
    %35 = tpu.matmul %32, %34, %cst_50 {dimension_numbers = #tpu.dot_dimension_numbers<[1], [0], [0], [1], [0, 0, 1, 1], [], []>} : vector<2x128xbf16>, vector<128x128xbf16>, vector<2x128xf32> -> vector<2x128xf32>
    %36 = arith.addf %30, %35 : vector<2x128xf32>
    %c0_51 = arith.constant 0 : index
    %c0_52 = arith.constant 0 : index
    %c0_53 = arith.constant 0 : index
    %c0_54 = arith.constant 0 : index
    %37 = vector.load %arg6[%c0_51, %c0_52, %c0_53, %c0_54] : memref<1x1x3x128xbf16, #tpu.memory_space<vmem>>, vector<1x1x2x128xbf16>
    %38 = vector.shape_cast %37 : vector<1x1x2x128xbf16> to vector<2x128xbf16>
    %c2_55 = arith.constant 2 : index
    %c0_56 = arith.constant 0 : index
    %c0_57 = arith.constant 0 : index
    %c0_58 = arith.constant 0 : index
    %39 = vector.load %arg8[%c2_55, %c0_56, %c0_57, %c0_58] : memref<3x3x128x128xbf16, #tpu.memory_space<vmem>>, vector<1x1x128x128xbf16>
    %40 = vector.shape_cast %39 : vector<1x1x128x128xbf16> to vector<128x128xbf16>
    %cst_59 = arith.constant dense<0.000000e+00> : vector<2x128xf32>
    %41 = tpu.matmul %38, %40, %cst_59 {dimension_numbers = #tpu.dot_dimension_numbers<[1], [0], [0], [1], [0, 0, 1, 1], [], []>} : vector<2x128xbf16>, vector<128x128xbf16>, vector<2x128xf32> -> vector<2x128xf32>
    %42 = arith.addf %36, %41 : vector<2x128xf32>
    %c0_60 = arith.constant 0 : index
    %c0_61 = arith.constant 0 : index
    %c0_62 = arith.constant 0 : index
    %c0_63 = arith.constant 0 : index
    %43 = vector.load %arg7[%c0_60, %c0_61, %c0_62, %c0_63] : memref<1x1x3x128xbf16, #tpu.memory_space<vmem>>, vector<1x1x2x128xbf16>
    %44 = vector.shape_cast %43 : vector<1x1x2x128xbf16> to vector<2x128xbf16>
    %c2_64 = arith.constant 2 : index
    %c1_65 = arith.constant 1 : index
    %c0_66 = arith.constant 0 : index
    %c0_67 = arith.constant 0 : index
    %45 = vector.load %arg8[%c2_64, %c1_65, %c0_66, %c0_67] : memref<3x3x128x128xbf16, #tpu.memory_space<vmem>>, vector<1x1x128x128xbf16>
    %46 = vector.shape_cast %45 : vector<1x1x128x128xbf16> to vector<128x128xbf16>
    %cst_68 = arith.constant dense<0.000000e+00> : vector<2x128xf32>
    %47 = tpu.matmul %44, %46, %cst_68 {dimension_numbers = #tpu.dot_dimension_numbers<[1], [0], [0], [1], [0, 0, 1, 1], [], []>} : vector<2x128xbf16>, vector<128x128xbf16>, vector<2x128xf32> -> vector<2x128xf32>
    %48 = arith.addf %42, %47 : vector<2x128xf32>
    %c0_69 = arith.constant 0 : index
    %c0_70 = arith.constant 0 : index
    %c1_71 = arith.constant 1 : index
    %c0_72 = arith.constant 0 : index
    %49 = vector.load %arg6[%c0_69, %c0_70, %c1_71, %c0_72] : memref<1x1x3x128xbf16, #tpu.memory_space<vmem>>, vector<1x1x2x128xbf16>
    %50 = vector.shape_cast %49 : vector<1x1x2x128xbf16> to vector<2x128xbf16>
    %c2_73 = arith.constant 2 : index
    %c2_74 = arith.constant 2 : index
    %c0_75 = arith.constant 0 : index
    %c0_76 = arith.constant 0 : index
    %51 = vector.load %arg8[%c2_73, %c2_74, %c0_75, %c0_76] : memref<3x3x128x128xbf16, #tpu.memory_space<vmem>>, vector<1x1x128x128xbf16>
    %52 = vector.shape_cast %51 : vector<1x1x128x128xbf16> to vector<128x128xbf16>
    %cst_77 = arith.constant dense<0.000000e+00> : vector<2x128xf32>
    %53 = tpu.matmul %50, %52, %cst_77 {dimension_numbers = #tpu.dot_dimension_numbers<[1], [0], [0], [1], [0, 0, 1, 1], [], []>} : vector<2x128xbf16>, vector<128x128xbf16>, vector<2x128xf32> -> vector<2x128xf32>
    %54 = arith.addf %48, %53 : vector<2x128xf32>
    %c0_78 = arith.constant 0 : index
    %c0_79 = arith.constant 0 : index
    %55 = vector.load %arg9[%c0_78, %c0_79] : memref<1x128xf32, #tpu.memory_space<vmem>>, vector<1x128xf32>
    %56 = vector.broadcast %55 : vector<1x128xf32> to vector<2x128xf32>
    %57 = arith.addf %54, %56 : vector<2x128xf32>
    %cst_80 = arith.constant 0.000000e+00 : f32
    %58 = vector.broadcast %cst_80 : f32 to vector<2x128xf32>
    %59 = arith.maximumf %57, %58 : vector<2x128xf32>
    %60 = arith.truncf %59 : vector<2x128xf32> to vector<2x128xbf16>
    %c0_81 = arith.constant 0 : index
    %c0_82 = arith.constant 0 : index
    %c0_83 = arith.constant 0 : index
    %c0_84 = arith.constant 0 : index
    %61 = vector.load %arg10[%c0_81, %c0_82, %c0_83, %c0_84] : memref<1x1x2x128xbf16, #tpu.memory_space<vmem>>, vector<1x1x2x128xbf16>
    %62 = vector.shape_cast %61 : vector<1x1x2x128xbf16> to vector<2x128xbf16>
    %63 = vector.shape_cast %60 : vector<2x128xbf16> to vector<1x1x2x128xbf16>
    tpu.vector_store %arg10[%c0_81, %c0_82, %c0_83, %c0_84], %63 {strides = array<i32>} : memref<1x1x2x128xbf16, #tpu.memory_space<vmem>>, vector<1x1x2x128xbf16>,
    return
  }
  func.func @transform_0(%arg0: i32, %arg1: i32) -> (i32, i32, i32, i32) {
    %c2_i32 = arith.constant 2 : i32
    %0 = arith.muli %arg1, %c2_i32 : i32
    %c0_i32 = arith.constant 0 : i32
    %1 = arith.addi %0, %c0_i32 : i32
    %c0_i32_0 = arith.constant 0 : i32
    %c0_i32_1 = arith.constant 0 : i32
    %c0_i32_2 = arith.constant 0 : i32
    return %arg0, %1, %c0_i32_0, %c0_i32_1 : i32, i32, i32, i32
  }
  func.func @transform_1(%arg0: i32, %arg1: i32) -> (i32, i32, i32, i32) {
    %c2_i32 = arith.constant 2 : i32
    %0 = arith.muli %arg1, %c2_i32 : i32
    %c0_i32 = arith.constant 0 : i32
    %1 = arith.addi %0, %c0_i32 : i32
    %c0_i32_0 = arith.constant 0 : i32
    %c0_i32_1 = arith.constant 0 : i32
    %c0_i32_2 = arith.constant 0 : i32
    return %arg0, %1, %c0_i32_0, %c0_i32_1 : i32, i32, i32, i32
  }
  func.func @transform_2(%arg0: i32, %arg1: i32) -> (i32, i32, i32, i32) {
    %c2_i32 = arith.constant 2 : i32
    %0 = arith.muli %arg1, %c2_i32 : i32
    %c1_i32 = arith.constant 1 : i32
    %1 = arith.addi %0, %c1_i32 : i32
    %c0_i32 = arith.constant 0 : i32
    %c0_i32_0 = arith.constant 0 : i32
    %c0_i32_1 = arith.constant 0 : i32
    return %arg0, %1, %c0_i32, %c0_i32_0 : i32, i32, i32, i32
  }
  func.func @transform_3(%arg0: i32, %arg1: i32) -> (i32, i32, i32, i32) {
    %c2_i32 = arith.constant 2 : i32
    %0 = arith.muli %arg1, %c2_i32 : i32
    %c1_i32 = arith.constant 1 : i32
    %1 = arith.addi %0, %c1_i32 : i32
    %c0_i32 = arith.constant 0 : i32
    %c0_i32_0 = arith.constant 0 : i32
    %c0_i32_1 = arith.constant 0 : i32
    return %arg0, %1, %c0_i32, %c0_i32_0 : i32, i32, i32, i32
  }
  func.func @transform_4(%arg0: i32, %arg1: i32) -> (i32, i32, i32, i32) {
    %c2_i32 = arith.constant 2 : i32
    %0 = arith.muli %arg1, %c2_i32 : i32
    %c2_i32_0 = arith.constant 2 : i32
    %1 = arith.addi %0, %c2_i32_0 : i32
    %c0_i32 = arith.constant 0 : i32
    %c0_i32_1 = arith.constant 0 : i32
    %c0_i32_2 = arith.constant 0 : i32
    return %arg0, %1, %c0_i32, %c0_i32_1 : i32, i32, i32, i32
  }
  func.func @transform_5(%arg0: i32, %arg1: i32) -> (i32, i32, i32, i32) {
    %c2_i32 = arith.constant 2 : i32
    %0 = arith.muli %arg1, %c2_i32 : i32
    %c2_i32_0 = arith.constant 2 : i32
    %1 = arith.addi %0, %c2_i32_0 : i32
    %c0_i32 = arith.constant 0 : i32
    %c0_i32_1 = arith.constant 0 : i32
    %c0_i32_2 = arith.constant 0 : i32
    return %arg0, %1, %c0_i32, %c0_i32_1 : i32, i32, i32, i32
  }
  func.func @transform_6(%arg0: i32, %arg1: i32) -> (i32, i32, i32, i32) {
    %c0_i32 = arith.constant 0 : i32
    %c0_i32_0 = arith.constant 0 : i32
    %c0_i32_1 = arith.constant 0 : i32
    %c0_i32_2 = arith.constant 0 : i32
    %c0_i32_3 = arith.constant 0 : i32
    return %c0_i32, %c0_i32_0, %c0_i32_1, %c0_i32_2 : i32, i32, i32, i32
  }
  func.func @transform_7(%arg0: i32, %arg1: i32) -> (i32, i32) {
    %c0_i32 = arith.constant 0 : i32
    %c0_i32_0 = arith.constant 0 : i32
    %c0_i32_1 = arith.constant 0 : i32
    return %c0_i32, %c0_i32_0 : i32, i32
  }
  func.func @transform_8(%arg0: i32, %arg1: i32) -> (i32, i32, i32, i32) {
    %c0_i32 = arith.constant 0 : i32
    %c0_i32_0 = arith.constant 0 : i32
    %c0_i32_1 = arith.constant 0 : i32
    return %arg0, %arg1, %c0_i32, %c0_i32_0 : i32, i32, i32, i32
  }
}

module attributes {stable_mosaic.version = 11 : i64} {
  func.func @_mm_res_kernel(%arg0: i32, %arg1: i32, %arg2: i32, %arg3: memref<8x128xbf16, #tpu.memory_space<vmem>>, %arg4: memref<128x128xbf16, #tpu.memory_space<vmem>>, %arg5: memref<1x128xf32, #tpu.memory_space<vmem>>, %arg6: memref<8x128xbf16, #tpu.memory_space<vmem>>, %arg7: memref<8x128xbf16, #tpu.memory_space<vmem>>, %arg8: memref<8x128xf32, #tpu.memory_space<vmem>>) attributes {dimension_semantics = [#tpu.dimension_semantics<parallel>, #tpu.dimension_semantics<parallel>, #tpu.dimension_semantics<arbitrary>], iteration_bounds = array<i64: 1, 1, 1>, scalar_prefetch = 0 : i64, scratch_operands = 1 : i64, tpu.core_type = #tpu.core_type<tc>, window_params = [{transform_indices = @transform_0, window_bounds = array<i64: 8, 128>}, {transform_indices = @transform_1, window_bounds = array<i64: 128, 128>}, {transform_indices = @transform_2, window_bounds = array<i64: 1, 128>}, {transform_indices = @transform_3, window_bounds = array<i64: 8, 128>}, {transform_indices = @transform_4, window_bounds = array<i64: 8, 128>}]} {
    %c0_i32 = arith.constant 0 : i32
    %0 = arith.cmpi eq, %arg2, %c0_i32 : i32
    %1 = arith.extui %0 : i1 to i32
    %c0_i32_0 = arith.constant 0 : i32
    %2 = arith.cmpi ne, %1, %c0_i32_0 : i32
    scf.if %2 {
      %cst_10 = arith.constant 0.000000e+00 : f32
      %12 = vector.broadcast %cst_10 : f32 to vector<8x128xf32>
      %c0_11 = arith.constant 0 : index
      %c0_12 = arith.constant 0 : index
      %13 = vector.load %arg8[%c0_11, %c0_12] : memref<8x128xf32, #tpu.memory_space<vmem>>, vector<8x128xf32>
      tpu.vector_store %arg8[%c0_11, %c0_12], %12 {strides = array<i32>} : memref<8x128xf32, #tpu.memory_space<vmem>>, vector<8x128xf32>,
    } else {
    }
    %c0 = arith.constant 0 : index
    %c0_1 = arith.constant 0 : index
    %3 = vector.load %arg8[%c0, %c0_1] : memref<8x128xf32, #tpu.memory_space<vmem>>, vector<8x128xf32>
    %c0_2 = arith.constant 0 : index
    %c0_3 = arith.constant 0 : index
    %4 = vector.load %arg3[%c0_2, %c0_3] : memref<8x128xbf16, #tpu.memory_space<vmem>>, vector<8x128xbf16>
    %c0_4 = arith.constant 0 : index
    %c0_5 = arith.constant 0 : index
    %5 = vector.load %arg4[%c0_4, %c0_5] : memref<128x128xbf16, #tpu.memory_space<vmem>>, vector<128x128xbf16>
    %cst = arith.constant dense<0.000000e+00> : vector<8x128xf32>
    %6 = tpu.matmul %4, %5, %cst {dimension_numbers = #tpu.dot_dimension_numbers<[1], [0], [0], [1], [0, 0, 1, 1], [], []>} : vector<8x128xbf16>, vector<128x128xbf16>, vector<8x128xf32> -> vector<8x128xf32>
    %7 = arith.addf %3, %6 : vector<8x128xf32>
    %c0_6 = arith.constant 0 : index
    %c0_7 = arith.constant 0 : index
    %8 = vector.load %arg8[%c0_6, %c0_7] : memref<8x128xf32, #tpu.memory_space<vmem>>, vector<8x128xf32>
    tpu.vector_store %arg8[%c0_6, %c0_7], %7 {strides = array<i32>} : memref<8x128xf32, #tpu.memory_space<vmem>>, vector<8x128xf32>,
    %c0_i32_8 = arith.constant 0 : i32
    %9 = arith.cmpi eq, %arg2, %c0_i32_8 : i32
    %10 = arith.extui %9 : i1 to i32
    %c0_i32_9 = arith.constant 0 : i32
    %11 = arith.cmpi ne, %10, %c0_i32_9 : i32
    scf.if %11 {
      %c0_10 = arith.constant 0 : index
      %c0_11 = arith.constant 0 : index
      %12 = vector.load %arg8[%c0_10, %c0_11] : memref<8x128xf32, #tpu.memory_space<vmem>>, vector<8x128xf32>
      %c0_12 = arith.constant 0 : index
      %c0_13 = arith.constant 0 : index
      %13 = vector.load %arg5[%c0_12, %c0_13] : memref<1x128xf32, #tpu.memory_space<vmem>>, vector<1x128xf32>
      %14 = vector.broadcast %13 : vector<1x128xf32> to vector<8x128xf32>
      %15 = arith.addf %12, %14 : vector<8x128xf32>
      %c0_14 = arith.constant 0 : index
      %c0_15 = arith.constant 0 : index
      %16 = vector.load %arg6[%c0_14, %c0_15] : memref<8x128xbf16, #tpu.memory_space<vmem>>, vector<8x128xbf16>
      %17 = arith.extf %16 : vector<8x128xbf16> to vector<8x128xf32>
      %18 = arith.addf %15, %17 : vector<8x128xf32>
      %cst_16 = arith.constant 0.000000e+00 : f32
      %19 = vector.broadcast %cst_16 : f32 to vector<8x128xf32>
      %20 = arith.maximumf %18, %19 : vector<8x128xf32>
      %21 = arith.truncf %20 : vector<8x128xf32> to vector<8x128xbf16>
      %c0_17 = arith.constant 0 : index
      %c0_18 = arith.constant 0 : index
      %22 = vector.load %arg7[%c0_17, %c0_18] : memref<8x128xbf16, #tpu.memory_space<vmem>>, vector<8x128xbf16>
      tpu.vector_store %arg7[%c0_17, %c0_18], %21 {strides = array<i32>} : memref<8x128xbf16, #tpu.memory_space<vmem>>, vector<8x128xbf16>,
    } else {
    }
    return
  }
  func.func @transform_0(%arg0: i32, %arg1: i32, %arg2: i32) -> (i32, i32) {
    %c0_i32 = arith.constant 0 : i32
    return %arg0, %arg2 : i32, i32
  }
  func.func @transform_1(%arg0: i32, %arg1: i32, %arg2: i32) -> (i32, i32) {
    %c0_i32 = arith.constant 0 : i32
    return %arg2, %arg1 : i32, i32
  }
  func.func @transform_2(%arg0: i32, %arg1: i32, %arg2: i32) -> (i32, i32) {
    %c0_i32 = arith.constant 0 : i32
    %c0_i32_0 = arith.constant 0 : i32
    return %c0_i32, %arg1 : i32, i32
  }
  func.func @transform_3(%arg0: i32, %arg1: i32, %arg2: i32) -> (i32, i32) {
    %c0_i32 = arith.constant 0 : i32
    return %arg0, %arg1 : i32, i32
  }
  func.func @transform_4(%arg0: i32, %arg1: i32, %arg2: i32) -> (i32, i32) {
    %c0_i32 = arith.constant 0 : i32
    return %arg0, %arg1 : i32, i32
  }
}

module attributes {stable_mosaic.version = 11 : i64} {
  func.func @_mm_kernel(%arg0: i32, %arg1: i32, %arg2: i32, %arg3: memref<8x128xbf16, #tpu.memory_space<vmem>>, %arg4: memref<128x256xbf16, #tpu.memory_space<vmem>>, %arg5: memref<1x256xf32, #tpu.memory_space<vmem>>, %arg6: memref<8x256xbf16, #tpu.memory_space<vmem>>, %arg7: memref<8x256xf32, #tpu.memory_space<vmem>>) attributes {dimension_semantics = [#tpu.dimension_semantics<parallel>, #tpu.dimension_semantics<parallel>, #tpu.dimension_semantics<arbitrary>], iteration_bounds = array<i64: 1, 1, 1>, scalar_prefetch = 0 : i64, scratch_operands = 1 : i64, tpu.core_type = #tpu.core_type<tc>, window_params = [{transform_indices = @transform_0, window_bounds = array<i64: 8, 128>}, {transform_indices = @transform_1, window_bounds = array<i64: 128, 256>}, {transform_indices = @transform_2, window_bounds = array<i64: 1, 256>}, {transform_indices = @transform_3, window_bounds = array<i64: 8, 256>}]} {
    %c0_i32 = arith.constant 0 : i32
    %0 = arith.cmpi eq, %arg2, %c0_i32 : i32
    %1 = arith.extui %0 : i1 to i32
    %c0_i32_0 = arith.constant 0 : i32
    %2 = arith.cmpi ne, %1, %c0_i32_0 : i32
    scf.if %2 {
      %cst_10 = arith.constant 0.000000e+00 : f32
      %12 = vector.broadcast %cst_10 : f32 to vector<8x256xf32>
      %c0_11 = arith.constant 0 : index
      %c0_12 = arith.constant 0 : index
      %13 = vector.load %arg7[%c0_11, %c0_12] : memref<8x256xf32, #tpu.memory_space<vmem>>, vector<8x256xf32>
      tpu.vector_store %arg7[%c0_11, %c0_12], %12 {strides = array<i32>} : memref<8x256xf32, #tpu.memory_space<vmem>>, vector<8x256xf32>,
    } else {
    }
    %c0 = arith.constant 0 : index
    %c0_1 = arith.constant 0 : index
    %3 = vector.load %arg7[%c0, %c0_1] : memref<8x256xf32, #tpu.memory_space<vmem>>, vector<8x256xf32>
    %c0_2 = arith.constant 0 : index
    %c0_3 = arith.constant 0 : index
    %4 = vector.load %arg3[%c0_2, %c0_3] : memref<8x128xbf16, #tpu.memory_space<vmem>>, vector<8x128xbf16>
    %c0_4 = arith.constant 0 : index
    %c0_5 = arith.constant 0 : index
    %5 = vector.load %arg4[%c0_4, %c0_5] : memref<128x256xbf16, #tpu.memory_space<vmem>>, vector<128x256xbf16>
    %cst = arith.constant dense<0.000000e+00> : vector<8x256xf32>
    %6 = tpu.matmul %4, %5, %cst {dimension_numbers = #tpu.dot_dimension_numbers<[1], [0], [0], [1], [0, 0, 1, 1], [], []>} : vector<8x128xbf16>, vector<128x256xbf16>, vector<8x256xf32> -> vector<8x256xf32>
    %7 = arith.addf %3, %6 : vector<8x256xf32>
    %c0_6 = arith.constant 0 : index
    %c0_7 = arith.constant 0 : index
    %8 = vector.load %arg7[%c0_6, %c0_7] : memref<8x256xf32, #tpu.memory_space<vmem>>, vector<8x256xf32>
    tpu.vector_store %arg7[%c0_6, %c0_7], %7 {strides = array<i32>} : memref<8x256xf32, #tpu.memory_space<vmem>>, vector<8x256xf32>,
    %c0_i32_8 = arith.constant 0 : i32
    %9 = arith.cmpi eq, %arg2, %c0_i32_8 : i32
    %10 = arith.extui %9 : i1 to i32
    %c0_i32_9 = arith.constant 0 : i32
    %11 = arith.cmpi ne, %10, %c0_i32_9 : i32
    scf.if %11 {
      %c0_10 = arith.constant 0 : index
      %c0_11 = arith.constant 0 : index
      %12 = vector.load %arg7[%c0_10, %c0_11] : memref<8x256xf32, #tpu.memory_space<vmem>>, vector<8x256xf32>
      %c0_12 = arith.constant 0 : index
      %c0_13 = arith.constant 0 : index
      %13 = vector.load %arg5[%c0_12, %c0_13] : memref<1x256xf32, #tpu.memory_space<vmem>>, vector<1x256xf32>
      %14 = vector.broadcast %13 : vector<1x256xf32> to vector<8x256xf32>
      %15 = arith.addf %12, %14 : vector<8x256xf32>
      %16 = arith.truncf %15 : vector<8x256xf32> to vector<8x256xbf16>
      %c0_14 = arith.constant 0 : index
      %c0_15 = arith.constant 0 : index
      %17 = vector.load %arg6[%c0_14, %c0_15] : memref<8x256xbf16, #tpu.memory_space<vmem>>, vector<8x256xbf16>
      tpu.vector_store %arg6[%c0_14, %c0_15], %16 {strides = array<i32>} : memref<8x256xbf16, #tpu.memory_space<vmem>>, vector<8x256xbf16>,
    } else {
    }
    return
  }
  func.func @transform_0(%arg0: i32, %arg1: i32, %arg2: i32) -> (i32, i32) {
    %c0_i32 = arith.constant 0 : i32
    return %arg0, %arg2 : i32, i32
  }
  func.func @transform_1(%arg0: i32, %arg1: i32, %arg2: i32) -> (i32, i32) {
    %c0_i32 = arith.constant 0 : i32
    return %arg2, %arg1 : i32, i32
  }
  func.func @transform_2(%arg0: i32, %arg1: i32, %arg2: i32) -> (i32, i32) {
    %c0_i32 = arith.constant 0 : i32
    %c0_i32_0 = arith.constant 0 : i32
    return %c0_i32, %arg1 : i32, i32
  }
  func.func @transform_3(%arg0: i32, %arg1: i32, %arg2: i32) -> (i32, i32) {
    %c0_i32 = arith.constant 0 : i32
    return %arg0, %arg1 : i32, i32
  }
}

module attributes {stable_mosaic.version = 11 : i64} {
  func.func @_mm_kernel(%arg0: i32, %arg1: i32, %arg2: i32, %arg3: memref<8x128xbf16, #tpu.memory_space<vmem>>, %arg4: memref<128x128xbf16, #tpu.memory_space<vmem>>, %arg5: memref<1x128xf32, #tpu.memory_space<vmem>>, %arg6: memref<8x128xbf16, #tpu.memory_space<vmem>>, %arg7: memref<8x128xf32, #tpu.memory_space<vmem>>) attributes {dimension_semantics = [#tpu.dimension_semantics<parallel>, #tpu.dimension_semantics<parallel>, #tpu.dimension_semantics<arbitrary>], iteration_bounds = array<i64: 1, 1, 1>, scalar_prefetch = 0 : i64, scratch_operands = 1 : i64, tpu.core_type = #tpu.core_type<tc>, window_params = [{transform_indices = @transform_0, window_bounds = array<i64: 8, 128>}, {transform_indices = @transform_1, window_bounds = array<i64: 128, 128>}, {transform_indices = @transform_2, window_bounds = array<i64: 1, 128>}, {transform_indices = @transform_3, window_bounds = array<i64: 8, 128>}]} {
    %c0_i32 = arith.constant 0 : i32
    %0 = arith.cmpi eq, %arg2, %c0_i32 : i32
    %1 = arith.extui %0 : i1 to i32
    %c0_i32_0 = arith.constant 0 : i32
    %2 = arith.cmpi ne, %1, %c0_i32_0 : i32
    scf.if %2 {
      %cst_10 = arith.constant 0.000000e+00 : f32
      %12 = vector.broadcast %cst_10 : f32 to vector<8x128xf32>
      %c0_11 = arith.constant 0 : index
      %c0_12 = arith.constant 0 : index
      %13 = vector.load %arg7[%c0_11, %c0_12] : memref<8x128xf32, #tpu.memory_space<vmem>>, vector<8x128xf32>
      tpu.vector_store %arg7[%c0_11, %c0_12], %12 {strides = array<i32>} : memref<8x128xf32, #tpu.memory_space<vmem>>, vector<8x128xf32>,
    } else {
    }
    %c0 = arith.constant 0 : index
    %c0_1 = arith.constant 0 : index
    %3 = vector.load %arg7[%c0, %c0_1] : memref<8x128xf32, #tpu.memory_space<vmem>>, vector<8x128xf32>
    %c0_2 = arith.constant 0 : index
    %c0_3 = arith.constant 0 : index
    %4 = vector.load %arg3[%c0_2, %c0_3] : memref<8x128xbf16, #tpu.memory_space<vmem>>, vector<8x128xbf16>
    %c0_4 = arith.constant 0 : index
    %c0_5 = arith.constant 0 : index
    %5 = vector.load %arg4[%c0_4, %c0_5] : memref<128x128xbf16, #tpu.memory_space<vmem>>, vector<128x128xbf16>
    %cst = arith.constant dense<0.000000e+00> : vector<8x128xf32>
    %6 = tpu.matmul %4, %5, %cst {dimension_numbers = #tpu.dot_dimension_numbers<[1], [0], [0], [1], [0, 0, 1, 1], [], []>} : vector<8x128xbf16>, vector<128x128xbf16>, vector<8x128xf32> -> vector<8x128xf32>
    %7 = arith.addf %3, %6 : vector<8x128xf32>
    %c0_6 = arith.constant 0 : index
    %c0_7 = arith.constant 0 : index
    %8 = vector.load %arg7[%c0_6, %c0_7] : memref<8x128xf32, #tpu.memory_space<vmem>>, vector<8x128xf32>
    tpu.vector_store %arg7[%c0_6, %c0_7], %7 {strides = array<i32>} : memref<8x128xf32, #tpu.memory_space<vmem>>, vector<8x128xf32>,
    %c0_i32_8 = arith.constant 0 : i32
    %9 = arith.cmpi eq, %arg2, %c0_i32_8 : i32
    %10 = arith.extui %9 : i1 to i32
    %c0_i32_9 = arith.constant 0 : i32
    %11 = arith.cmpi ne, %10, %c0_i32_9 : i32
    scf.if %11 {
      %c0_10 = arith.constant 0 : index
      %c0_11 = arith.constant 0 : index
      %12 = vector.load %arg7[%c0_10, %c0_11] : memref<8x128xf32, #tpu.memory_space<vmem>>, vector<8x128xf32>
      %c0_12 = arith.constant 0 : index
      %c0_13 = arith.constant 0 : index
      %13 = vector.load %arg5[%c0_12, %c0_13] : memref<1x128xf32, #tpu.memory_space<vmem>>, vector<1x128xf32>
      %14 = vector.broadcast %13 : vector<1x128xf32> to vector<8x128xf32>
      %15 = arith.addf %12, %14 : vector<8x128xf32>
      %cst_14 = arith.constant 0.000000e+00 : f32
      %16 = vector.broadcast %cst_14 : f32 to vector<8x128xf32>
      %17 = arith.maximumf %15, %16 : vector<8x128xf32>
      %18 = arith.truncf %17 : vector<8x128xf32> to vector<8x128xbf16>
      %c0_15 = arith.constant 0 : index
      %c0_16 = arith.constant 0 : index
      %19 = vector.load %arg6[%c0_15, %c0_16] : memref<8x128xbf16, #tpu.memory_space<vmem>>, vector<8x128xbf16>
      tpu.vector_store %arg6[%c0_15, %c0_16], %18 {strides = array<i32>} : memref<8x128xbf16, #tpu.memory_space<vmem>>, vector<8x128xbf16>,
    } else {
    }
    return
  }
  func.func @transform_0(%arg0: i32, %arg1: i32, %arg2: i32) -> (i32, i32) {
    %c0_i32 = arith.constant 0 : i32
    return %arg0, %arg2 : i32, i32
  }
  func.func @transform_1(%arg0: i32, %arg1: i32, %arg2: i32) -> (i32, i32) {
    %c0_i32 = arith.constant 0 : i32
    return %arg2, %arg1 : i32, i32
  }
  func.func @transform_2(%arg0: i32, %arg1: i32, %arg2: i32) -> (i32, i32) {
    %c0_i32 = arith.constant 0 : i32
    %c0_i32_0 = arith.constant 0 : i32
    return %c0_i32, %arg1 : i32, i32
  }
  func.func @transform_3(%arg0: i32, %arg1: i32, %arg2: i32) -> (i32, i32) {
    %c0_i32 = arith.constant 0 : i32
    return %arg0, %arg1 : i32, i32
  }
}

module attributes {stable_mosaic.version = 11 : i64} {
  func.func @_conv_rows_kernel(%arg0: i32, %arg1: i32, %arg2: memref<1x1x2x128xbf16, #tpu.memory_space<vmem>>, %arg3: memref<1x1x2x128xbf16, #tpu.memory_space<vmem>>, %arg4: memref<1x1x2x128xbf16, #tpu.memory_space<vmem>>, %arg5: memref<1x1x2x128xbf16, #tpu.memory_space<vmem>>, %arg6: memref<1x1x2x128xbf16, #tpu.memory_space<vmem>>, %arg7: memref<1x1x2x128xbf16, #tpu.memory_space<vmem>>, %arg8: memref<3x3x128x128xbf16, #tpu.memory_space<vmem>>, %arg9: memref<1x128xf32, #tpu.memory_space<vmem>>, %arg10: memref<1x1x1x128xbf16, #tpu.memory_space<vmem>>) attributes {dimension_semantics = [#tpu.dimension_semantics<parallel>, #tpu.dimension_semantics<parallel>], iteration_bounds = array<i64: 2, 1>, scalar_prefetch = 0 : i64, scratch_operands = 0 : i64, tpu.core_type = #tpu.core_type<tc>, window_params = [{transform_indices = @transform_0, window_bounds = array<i64: 1, 1, 2, 128>}, {transform_indices = @transform_1, window_bounds = array<i64: 1, 1, 2, 128>}, {transform_indices = @transform_2, window_bounds = array<i64: 1, 1, 2, 128>}, {transform_indices = @transform_3, window_bounds = array<i64: 1, 1, 2, 128>}, {transform_indices = @transform_4, window_bounds = array<i64: 1, 1, 2, 128>}, {transform_indices = @transform_5, window_bounds = array<i64: 1, 1, 2, 128>}, {pipeline_mode = #tpu.pipeline_mode<synchronous>, transform_indices = @transform_6, window_bounds = array<i64: 3, 3, 128, 128>}, {pipeline_mode = #tpu.pipeline_mode<synchronous>, transform_indices = @transform_7, window_bounds = array<i64: 1, 128>}, {transform_indices = @transform_8, window_bounds = array<i64: 1, 1, 1, 128>}]} {
    %cst = arith.constant 0.000000e+00 : f32
    %0 = vector.broadcast %cst : f32 to vector<1x128xf32>
    %c0 = arith.constant 0 : index
    %c0_0 = arith.constant 0 : index
    %c0_1 = arith.constant 0 : index
    %c0_2 = arith.constant 0 : index
    %1 = vector.load %arg2[%c0, %c0_0, %c0_1, %c0_2] : memref<1x1x2x128xbf16, #tpu.memory_space<vmem>>, vector<1x1x1x128xbf16>
    %2 = vector.shape_cast %1 : vector<1x1x1x128xbf16> to vector<1x128xbf16>
    %c0_3 = arith.constant 0 : index
    %c0_4 = arith.constant 0 : index
    %c0_5 = arith.constant 0 : index
    %c0_6 = arith.constant 0 : index
    %3 = vector.load %arg8[%c0_3, %c0_4, %c0_5, %c0_6] : memref<3x3x128x128xbf16, #tpu.memory_space<vmem>>, vector<1x1x128x128xbf16>
    %4 = vector.shape_cast %3 : vector<1x1x128x128xbf16> to vector<128x128xbf16>
    %cst_7 = arith.constant dense<0.000000e+00> : vector<1x128xf32>
    %5 = tpu.matmul %2, %4, %cst_7 {dimension_numbers = #tpu.dot_dimension_numbers<[1], [0], [0], [1], [0, 0, 1, 1], [], []>} : vector<1x128xbf16>, vector<128x128xbf16>, vector<1x128xf32> -> vector<1x128xf32>
    %6 = arith.addf %0, %5 : vector<1x128xf32>
    %c0_8 = arith.constant 0 : index
    %c0_9 = arith.constant 0 : index
    %c0_10 = arith.constant 0 : index
    %c0_11 = arith.constant 0 : index
    %7 = vector.load %arg3[%c0_8, %c0_9, %c0_10, %c0_11] : memref<1x1x2x128xbf16, #tpu.memory_space<vmem>>, vector<1x1x1x128xbf16>
    %8 = vector.shape_cast %7 : vector<1x1x1x128xbf16> to vector<1x128xbf16>
    %c0_12 = arith.constant 0 : index
    %c1 = arith.constant 1 : index
    %c0_13 = arith.constant 0 : index
    %c0_14 = arith.constant 0 : index
    %9 = vector.load %arg8[%c0_12, %c1, %c0_13, %c0_14] : memref<3x3x128x128xbf16, #tpu.memory_space<vmem>>, vector<1x1x128x128xbf16>
    %10 = vector.shape_cast %9 : vector<1x1x128x128xbf16> to vector<128x128xbf16>
    %cst_15 = arith.constant dense<0.000000e+00> : vector<1x128xf32>
    %11 = tpu.matmul %8, %10, %cst_15 {dimension_numbers = #tpu.dot_dimension_numbers<[1], [0], [0], [1], [0, 0, 1, 1], [], []>} : vector<1x128xbf16>, vector<128x128xbf16>, vector<1x128xf32> -> vector<1x128xf32>
    %12 = arith.addf %6, %11 : vector<1x128xf32>
    %c0_16 = arith.constant 0 : index
    %c0_17 = arith.constant 0 : index
    %c1_18 = arith.constant 1 : index
    %c0_19 = arith.constant 0 : index
    %13 = vector.load %arg2[%c0_16, %c0_17, %c1_18, %c0_19] : memref<1x1x2x128xbf16, #tpu.memory_space<vmem>>, vector<1x1x1x128xbf16>
    %14 = vector.shape_cast %13 : vector<1x1x1x128xbf16> to vector<1x128xbf16>
    %c0_20 = arith.constant 0 : index
    %c2 = arith.constant 2 : index
    %c0_21 = arith.constant 0 : index
    %c0_22 = arith.constant 0 : index
    %15 = vector.load %arg8[%c0_20, %c2, %c0_21, %c0_22] : memref<3x3x128x128xbf16, #tpu.memory_space<vmem>>, vector<1x1x128x128xbf16>
    %16 = vector.shape_cast %15 : vector<1x1x128x128xbf16> to vector<128x128xbf16>
    %cst_23 = arith.constant dense<0.000000e+00> : vector<1x128xf32>
    %17 = tpu.matmul %14, %16, %cst_23 {dimension_numbers = #tpu.dot_dimension_numbers<[1], [0], [0], [1], [0, 0, 1, 1], [], []>} : vector<1x128xbf16>, vector<128x128xbf16>, vector<1x128xf32> -> vector<1x128xf32>
    %18 = arith.addf %12, %17 : vector<1x128xf32>
    %c0_24 = arith.constant 0 : index
    %c0_25 = arith.constant 0 : index
    %c0_26 = arith.constant 0 : index
    %c0_27 = arith.constant 0 : index
    %19 = vector.load %arg4[%c0_24, %c0_25, %c0_26, %c0_27] : memref<1x1x2x128xbf16, #tpu.memory_space<vmem>>, vector<1x1x1x128xbf16>
    %20 = vector.shape_cast %19 : vector<1x1x1x128xbf16> to vector<1x128xbf16>
    %c1_28 = arith.constant 1 : index
    %c0_29 = arith.constant 0 : index
    %c0_30 = arith.constant 0 : index
    %c0_31 = arith.constant 0 : index
    %21 = vector.load %arg8[%c1_28, %c0_29, %c0_30, %c0_31] : memref<3x3x128x128xbf16, #tpu.memory_space<vmem>>, vector<1x1x128x128xbf16>
    %22 = vector.shape_cast %21 : vector<1x1x128x128xbf16> to vector<128x128xbf16>
    %cst_32 = arith.constant dense<0.000000e+00> : vector<1x128xf32>
    %23 = tpu.matmul %20, %22, %cst_32 {dimension_numbers = #tpu.dot_dimension_numbers<[1], [0], [0], [1], [0, 0, 1, 1], [], []>} : vector<1x128xbf16>, vector<128x128xbf16>, vector<1x128xf32> -> vector<1x128xf32>
    %24 = arith.addf %18, %23 : vector<1x128xf32>
    %c0_33 = arith.constant 0 : index
    %c0_34 = arith.constant 0 : index
    %c0_35 = arith.constant 0 : index
    %c0_36 = arith.constant 0 : index
    %25 = vector.load %arg5[%c0_33, %c0_34, %c0_35, %c0_36] : memref<1x1x2x128xbf16, #tpu.memory_space<vmem>>, vector<1x1x1x128xbf16>
    %26 = vector.shape_cast %25 : vector<1x1x1x128xbf16> to vector<1x128xbf16>
    %c1_37 = arith.constant 1 : index
    %c1_38 = arith.constant 1 : index
    %c0_39 = arith.constant 0 : index
    %c0_40 = arith.constant 0 : index
    %27 = vector.load %arg8[%c1_37, %c1_38, %c0_39, %c0_40] : memref<3x3x128x128xbf16, #tpu.memory_space<vmem>>, vector<1x1x128x128xbf16>
    %28 = vector.shape_cast %27 : vector<1x1x128x128xbf16> to vector<128x128xbf16>
    %cst_41 = arith.constant dense<0.000000e+00> : vector<1x128xf32>
    %29 = tpu.matmul %26, %28, %cst_41 {dimension_numbers = #tpu.dot_dimension_numbers<[1], [0], [0], [1], [0, 0, 1, 1], [], []>} : vector<1x128xbf16>, vector<128x128xbf16>, vector<1x128xf32> -> vector<1x128xf32>
    %30 = arith.addf %24, %29 : vector<1x128xf32>
    %c0_42 = arith.constant 0 : index
    %c0_43 = arith.constant 0 : index
    %c1_44 = arith.constant 1 : index
    %c0_45 = arith.constant 0 : index
    %31 = vector.load %arg4[%c0_42, %c0_43, %c1_44, %c0_45] : memref<1x1x2x128xbf16, #tpu.memory_space<vmem>>, vector<1x1x1x128xbf16>
    %32 = vector.shape_cast %31 : vector<1x1x1x128xbf16> to vector<1x128xbf16>
    %c1_46 = arith.constant 1 : index
    %c2_47 = arith.constant 2 : index
    %c0_48 = arith.constant 0 : index
    %c0_49 = arith.constant 0 : index
    %33 = vector.load %arg8[%c1_46, %c2_47, %c0_48, %c0_49] : memref<3x3x128x128xbf16, #tpu.memory_space<vmem>>, vector<1x1x128x128xbf16>
    %34 = vector.shape_cast %33 : vector<1x1x128x128xbf16> to vector<128x128xbf16>
    %cst_50 = arith.constant dense<0.000000e+00> : vector<1x128xf32>
    %35 = tpu.matmul %32, %34, %cst_50 {dimension_numbers = #tpu.dot_dimension_numbers<[1], [0], [0], [1], [0, 0, 1, 1], [], []>} : vector<1x128xbf16>, vector<128x128xbf16>, vector<1x128xf32> -> vector<1x128xf32>
    %36 = arith.addf %30, %35 : vector<1x128xf32>
    %c0_51 = arith.constant 0 : index
    %c0_52 = arith.constant 0 : index
    %c0_53 = arith.constant 0 : index
    %c0_54 = arith.constant 0 : index
    %37 = vector.load %arg6[%c0_51, %c0_52, %c0_53, %c0_54] : memref<1x1x2x128xbf16, #tpu.memory_space<vmem>>, vector<1x1x1x128xbf16>
    %38 = vector.shape_cast %37 : vector<1x1x1x128xbf16> to vector<1x128xbf16>
    %c2_55 = arith.constant 2 : index
    %c0_56 = arith.constant 0 : index
    %c0_57 = arith.constant 0 : index
    %c0_58 = arith.constant 0 : index
    %39 = vector.load %arg8[%c2_55, %c0_56, %c0_57, %c0_58] : memref<3x3x128x128xbf16, #tpu.memory_space<vmem>>, vector<1x1x128x128xbf16>
    %40 = vector.shape_cast %39 : vector<1x1x128x128xbf16> to vector<128x128xbf16>
    %cst_59 = arith.constant dense<0.000000e+00> : vector<1x128xf32>
    %41 = tpu.matmul %38, %40, %cst_59 {dimension_numbers = #tpu.dot_dimension_numbers<[1], [0], [0], [1], [0, 0, 1, 1], [], []>} : vector<1x128xbf16>, vector<128x128xbf16>, vector<1x128xf32> -> vector<1x128xf32>
    %42 = arith.addf %36, %41 : vector<1x128xf32>
    %c0_60 = arith.constant 0 : index
    %c0_61 = arith.constant 0 : index
    %c0_62 = arith.constant 0 : index
    %c0_63 = arith.constant 0 : index
    %43 = vector.load %arg7[%c0_60, %c0_61, %c0_62, %c0_63] : memref<1x1x2x128xbf16, #tpu.memory_space<vmem>>, vector<1x1x1x128xbf16>
    %44 = vector.shape_cast %43 : vector<1x1x1x128xbf16> to vector<1x128xbf16>
    %c2_64 = arith.constant 2 : index
    %c1_65 = arith.constant 1 : index
    %c0_66 = arith.constant 0 : index
    %c0_67 = arith.constant 0 : index
    %45 = vector.load %arg8[%c2_64, %c1_65, %c0_66, %c0_67] : memref<3x3x128x128xbf16, #tpu.memory_space<vmem>>, vector<1x1x128x128xbf16>
    %46 = vector.shape_cast %45 : vector<1x1x128x128xbf16> to vector<128x128xbf16>
    %cst_68 = arith.constant dense<0.000000e+00> : vector<1x128xf32>
    %47 = tpu.matmul %44, %46, %cst_68 {dimension_numbers = #tpu.dot_dimension_numbers<[1], [0], [0], [1], [0, 0, 1, 1], [], []>} : vector<1x128xbf16>, vector<128x128xbf16>, vector<1x128xf32> -> vector<1x128xf32>
    %48 = arith.addf %42, %47 : vector<1x128xf32>
    %c0_69 = arith.constant 0 : index
    %c0_70 = arith.constant 0 : index
    %c1_71 = arith.constant 1 : index
    %c0_72 = arith.constant 0 : index
    %49 = vector.load %arg6[%c0_69, %c0_70, %c1_71, %c0_72] : memref<1x1x2x128xbf16, #tpu.memory_space<vmem>>, vector<1x1x1x128xbf16>
    %50 = vector.shape_cast %49 : vector<1x1x1x128xbf16> to vector<1x128xbf16>
    %c2_73 = arith.constant 2 : index
    %c2_74 = arith.constant 2 : index
    %c0_75 = arith.constant 0 : index
    %c0_76 = arith.constant 0 : index
    %51 = vector.load %arg8[%c2_73, %c2_74, %c0_75, %c0_76] : memref<3x3x128x128xbf16, #tpu.memory_space<vmem>>, vector<1x1x128x128xbf16>
    %52 = vector.shape_cast %51 : vector<1x1x128x128xbf16> to vector<128x128xbf16>
    %cst_77 = arith.constant dense<0.000000e+00> : vector<1x128xf32>
    %53 = tpu.matmul %50, %52, %cst_77 {dimension_numbers = #tpu.dot_dimension_numbers<[1], [0], [0], [1], [0, 0, 1, 1], [], []>} : vector<1x128xbf16>, vector<128x128xbf16>, vector<1x128xf32> -> vector<1x128xf32>
    %54 = arith.addf %48, %53 : vector<1x128xf32>
    %c0_78 = arith.constant 0 : index
    %c0_79 = arith.constant 0 : index
    %55 = vector.load %arg9[%c0_78, %c0_79] : memref<1x128xf32, #tpu.memory_space<vmem>>, vector<1x128xf32>
    %56 = arith.addf %54, %55 : vector<1x128xf32>
    %cst_80 = arith.constant 0.000000e+00 : f32
    %57 = vector.broadcast %cst_80 : f32 to vector<1x128xf32>
    %58 = arith.maximumf %56, %57 : vector<1x128xf32>
    %59 = arith.truncf %58 : vector<1x128xf32> to vector<1x128xbf16>
    %c0_81 = arith.constant 0 : index
    %c0_82 = arith.constant 0 : index
    %c0_83 = arith.constant 0 : index
    %c0_84 = arith.constant 0 : index
    %60 = vector.load %arg10[%c0_81, %c0_82, %c0_83, %c0_84] : memref<1x1x1x128xbf16, #tpu.memory_space<vmem>>, vector<1x1x1x128xbf16>
    %61 = vector.shape_cast %60 : vector<1x1x1x128xbf16> to vector<1x128xbf16>
    %62 = vector.shape_cast %59 : vector<1x128xbf16> to vector<1x1x1x128xbf16>
    tpu.vector_store %arg10[%c0_81, %c0_82, %c0_83, %c0_84], %62 {strides = array<i32>} : memref<1x1x1x128xbf16, #tpu.memory_space<vmem>>, vector<1x1x1x128xbf16>,
    return
  }
  func.func @transform_0(%arg0: i32, %arg1: i32) -> (i32, i32, i32, i32) {
    %c2_i32 = arith.constant 2 : i32
    %0 = arith.muli %arg1, %c2_i32 : i32
    %c0_i32 = arith.constant 0 : i32
    %1 = arith.addi %0, %c0_i32 : i32
    %c0_i32_0 = arith.constant 0 : i32
    %c0_i32_1 = arith.constant 0 : i32
    %c0_i32_2 = arith.constant 0 : i32
    return %arg0, %1, %c0_i32_0, %c0_i32_1 : i32, i32, i32, i32
  }
  func.func @transform_1(%arg0: i32, %arg1: i32) -> (i32, i32, i32, i32) {
    %c2_i32 = arith.constant 2 : i32
    %0 = arith.muli %arg1, %c2_i32 : i32
    %c0_i32 = arith.constant 0 : i32
    %1 = arith.addi %0, %c0_i32 : i32
    %c0_i32_0 = arith.constant 0 : i32
    %c0_i32_1 = arith.constant 0 : i32
    %c0_i32_2 = arith.constant 0 : i32
    return %arg0, %1, %c0_i32_0, %c0_i32_1 : i32, i32, i32, i32
  }
  func.func @transform_2(%arg0: i32, %arg1: i32) -> (i32, i32, i32, i32) {
    %c2_i32 = arith.constant 2 : i32
    %0 = arith.muli %arg1, %c2_i32 : i32
    %c1_i32 = arith.constant 1 : i32
    %1 = arith.addi %0, %c1_i32 : i32
    %c0_i32 = arith.constant 0 : i32
    %c0_i32_0 = arith.constant 0 : i32
    %c0_i32_1 = arith.constant 0 : i32
    return %arg0, %1, %c0_i32, %c0_i32_0 : i32, i32, i32, i32
  }
  func.func @transform_3(%arg0: i32, %arg1: i32) -> (i32, i32, i32, i32) {
    %c2_i32 = arith.constant 2 : i32
    %0 = arith.muli %arg1, %c2_i32 : i32
    %c1_i32 = arith.constant 1 : i32
    %1 = arith.addi %0, %c1_i32 : i32
    %c0_i32 = arith.constant 0 : i32
    %c0_i32_0 = arith.constant 0 : i32
    %c0_i32_1 = arith.constant 0 : i32
    return %arg0, %1, %c0_i32, %c0_i32_0 : i32, i32, i32, i32
  }
  func.func @transform_4(%arg0: i32, %arg1: i32) -> (i32, i32, i32, i32) {
    %c2_i32 = arith.constant 2 : i32
    %0 = arith.muli %arg1, %c2_i32 : i32
    %c2_i32_0 = arith.constant 2 : i32
    %1 = arith.addi %0, %c2_i32_0 : i32
    %c0_i32 = arith.constant 0 : i32
    %c0_i32_1 = arith.constant 0 : i32
    %c0_i32_2 = arith.constant 0 : i32
    return %arg0, %1, %c0_i32, %c0_i32_1 : i32, i32, i32, i32
  }
  func.func @transform_5(%arg0: i32, %arg1: i32) -> (i32, i32, i32, i32) {
    %c2_i32 = arith.constant 2 : i32
    %0 = arith.muli %arg1, %c2_i32 : i32
    %c2_i32_0 = arith.constant 2 : i32
    %1 = arith.addi %0, %c2_i32_0 : i32
    %c0_i32 = arith.constant 0 : i32
    %c0_i32_1 = arith.constant 0 : i32
    %c0_i32_2 = arith.constant 0 : i32
    return %arg0, %1, %c0_i32, %c0_i32_1 : i32, i32, i32, i32
  }
  func.func @transform_6(%arg0: i32, %arg1: i32) -> (i32, i32, i32, i32) {
    %c0_i32 = arith.constant 0 : i32
    %c0_i32_0 = arith.constant 0 : i32
    %c0_i32_1 = arith.constant 0 : i32
    %c0_i32_2 = arith.constant 0 : i32
    %c0_i32_3 = arith.constant 0 : i32
    return %c0_i32, %c0_i32_0, %c0_i32_1, %c0_i32_2 : i32, i32, i32, i32
  }
  func.func @transform_7(%arg0: i32, %arg1: i32) -> (i32, i32) {
    %c0_i32 = arith.constant 0 : i32
    %c0_i32_0 = arith.constant 0 : i32
    %c0_i32_1 = arith.constant 0 : i32
    return %c0_i32, %c0_i32_0 : i32, i32
  }
  func.func @transform_8(%arg0: i32, %arg1: i32) -> (i32, i32, i32, i32) {
    %c0_i32 = arith.constant 0 : i32
    %c0_i32_0 = arith.constant 0 : i32
    %c0_i32_1 = arith.constant 0 : i32
    return %arg0, %arg1, %c0_i32, %c0_i32_0 : i32, i32, i32, i32
  }
}

module attributes {stable_mosaic.version = 11 : i64} {
  func.func @_mm_res_kernel(%arg0: i32, %arg1: i32, %arg2: i32, %arg3: memref<8x128xbf16, #tpu.memory_space<vmem>>, %arg4: memref<128x256xbf16, #tpu.memory_space<vmem>>, %arg5: memref<1x256xf32, #tpu.memory_space<vmem>>, %arg6: memref<8x256xbf16, #tpu.memory_space<vmem>>, %arg7: memref<8x256xbf16, #tpu.memory_space<vmem>>, %arg8: memref<8x256xf32, #tpu.memory_space<vmem>>) attributes {dimension_semantics = [#tpu.dimension_semantics<parallel>, #tpu.dimension_semantics<parallel>, #tpu.dimension_semantics<arbitrary>], iteration_bounds = array<i64: 1, 1, 1>, scalar_prefetch = 0 : i64, scratch_operands = 1 : i64, tpu.core_type = #tpu.core_type<tc>, window_params = [{transform_indices = @transform_0, window_bounds = array<i64: 8, 128>}, {transform_indices = @transform_1, window_bounds = array<i64: 128, 256>}, {transform_indices = @transform_2, window_bounds = array<i64: 1, 256>}, {transform_indices = @transform_3, window_bounds = array<i64: 8, 256>}, {transform_indices = @transform_4, window_bounds = array<i64: 8, 256>}]} {
    %c0_i32 = arith.constant 0 : i32
    %0 = arith.cmpi eq, %arg2, %c0_i32 : i32
    %1 = arith.extui %0 : i1 to i32
    %c0_i32_0 = arith.constant 0 : i32
    %2 = arith.cmpi ne, %1, %c0_i32_0 : i32
    scf.if %2 {
      %cst_10 = arith.constant 0.000000e+00 : f32
      %12 = vector.broadcast %cst_10 : f32 to vector<8x256xf32>
      %c0_11 = arith.constant 0 : index
      %c0_12 = arith.constant 0 : index
      %13 = vector.load %arg8[%c0_11, %c0_12] : memref<8x256xf32, #tpu.memory_space<vmem>>, vector<8x256xf32>
      tpu.vector_store %arg8[%c0_11, %c0_12], %12 {strides = array<i32>} : memref<8x256xf32, #tpu.memory_space<vmem>>, vector<8x256xf32>,
    } else {
    }
    %c0 = arith.constant 0 : index
    %c0_1 = arith.constant 0 : index
    %3 = vector.load %arg8[%c0, %c0_1] : memref<8x256xf32, #tpu.memory_space<vmem>>, vector<8x256xf32>
    %c0_2 = arith.constant 0 : index
    %c0_3 = arith.constant 0 : index
    %4 = vector.load %arg3[%c0_2, %c0_3] : memref<8x128xbf16, #tpu.memory_space<vmem>>, vector<8x128xbf16>
    %c0_4 = arith.constant 0 : index
    %c0_5 = arith.constant 0 : index
    %5 = vector.load %arg4[%c0_4, %c0_5] : memref<128x256xbf16, #tpu.memory_space<vmem>>, vector<128x256xbf16>
    %cst = arith.constant dense<0.000000e+00> : vector<8x256xf32>
    %6 = tpu.matmul %4, %5, %cst {dimension_numbers = #tpu.dot_dimension_numbers<[1], [0], [0], [1], [0, 0, 1, 1], [], []>} : vector<8x128xbf16>, vector<128x256xbf16>, vector<8x256xf32> -> vector<8x256xf32>
    %7 = arith.addf %3, %6 : vector<8x256xf32>
    %c0_6 = arith.constant 0 : index
    %c0_7 = arith.constant 0 : index
    %8 = vector.load %arg8[%c0_6, %c0_7] : memref<8x256xf32, #tpu.memory_space<vmem>>, vector<8x256xf32>
    tpu.vector_store %arg8[%c0_6, %c0_7], %7 {strides = array<i32>} : memref<8x256xf32, #tpu.memory_space<vmem>>, vector<8x256xf32>,
    %c0_i32_8 = arith.constant 0 : i32
    %9 = arith.cmpi eq, %arg2, %c0_i32_8 : i32
    %10 = arith.extui %9 : i1 to i32
    %c0_i32_9 = arith.constant 0 : i32
    %11 = arith.cmpi ne, %10, %c0_i32_9 : i32
    scf.if %11 {
      %c0_10 = arith.constant 0 : index
      %c0_11 = arith.constant 0 : index
      %12 = vector.load %arg8[%c0_10, %c0_11] : memref<8x256xf32, #tpu.memory_space<vmem>>, vector<8x256xf32>
      %c0_12 = arith.constant 0 : index
      %c0_13 = arith.constant 0 : index
      %13 = vector.load %arg5[%c0_12, %c0_13] : memref<1x256xf32, #tpu.memory_space<vmem>>, vector<1x256xf32>
      %14 = vector.broadcast %13 : vector<1x256xf32> to vector<8x256xf32>
      %15 = arith.addf %12, %14 : vector<8x256xf32>
      %c0_14 = arith.constant 0 : index
      %c0_15 = arith.constant 0 : index
      %16 = vector.load %arg6[%c0_14, %c0_15] : memref<8x256xbf16, #tpu.memory_space<vmem>>, vector<8x256xbf16>
      %17 = arith.extf %16 : vector<8x256xbf16> to vector<8x256xf32>
      %18 = arith.addf %15, %17 : vector<8x256xf32>
      %cst_16 = arith.constant 0.000000e+00 : f32
      %19 = vector.broadcast %cst_16 : f32 to vector<8x256xf32>
      %20 = arith.maximumf %18, %19 : vector<8x256xf32>
      %21 = arith.truncf %20 : vector<8x256xf32> to vector<8x256xbf16>
      %c0_17 = arith.constant 0 : index
      %c0_18 = arith.constant 0 : index
      %22 = vector.load %arg7[%c0_17, %c0_18] : memref<8x256xbf16, #tpu.memory_space<vmem>>, vector<8x256xbf16>
      tpu.vector_store %arg7[%c0_17, %c0_18], %21 {strides = array<i32>} : memref<8x256xbf16, #tpu.memory_space<vmem>>, vector<8x256xbf16>,
    } else {
    }
    return
  }
  func.func @transform_0(%arg0: i32, %arg1: i32, %arg2: i32) -> (i32, i32) {
    %c0_i32 = arith.constant 0 : i32
    return %arg0, %arg2 : i32, i32
  }
  func.func @transform_1(%arg0: i32, %arg1: i32, %arg2: i32) -> (i32, i32) {
    %c0_i32 = arith.constant 0 : i32
    return %arg2, %arg1 : i32, i32
  }
  func.func @transform_2(%arg0: i32, %arg1: i32, %arg2: i32) -> (i32, i32) {
    %c0_i32 = arith.constant 0 : i32
    %c0_i32_0 = arith.constant 0 : i32
    return %c0_i32, %arg1 : i32, i32
  }
  func.func @transform_3(%arg0: i32, %arg1: i32, %arg2: i32) -> (i32, i32) {
    %c0_i32 = arith.constant 0 : i32
    return %arg0, %arg1 : i32, i32
  }
  func.func @transform_4(%arg0: i32, %arg1: i32, %arg2: i32) -> (i32, i32) {
    %c0_i32 = arith.constant 0 : i32
    return %arg0, %arg1 : i32, i32
  }
}

module attributes {stable_mosaic.version = 11 : i64} {
  func.func @_avgpool_kernel(%arg0: i32, %arg1: memref<2x8x256xbf16, #tpu.memory_space<vmem>>, %arg2: memref<2x256xf32, #tpu.memory_space<vmem>>, %arg3: memref<2x256xf32, #tpu.memory_space<vmem>>) attributes {dimension_semantics = [#tpu.dimension_semantics<arbitrary>], iteration_bounds = array<i64: 1>, scalar_prefetch = 0 : i64, scratch_operands = 1 : i64, tpu.core_type = #tpu.core_type<tc>, window_params = [{transform_indices = @transform_0, window_bounds = array<i64: 2, 8, 256>}, {pipeline_mode = #tpu.pipeline_mode<synchronous>, transform_indices = @transform_1, window_bounds = array<i64: 2, 256>}]} {
    %c0_i32 = arith.constant 0 : i32
    %0 = arith.cmpi eq, %arg0, %c0_i32 : i32
    %1 = arith.extui %0 : i1 to i32
    %c0_i32_0 = arith.constant 0 : i32
    %2 = arith.cmpi ne, %1, %c0_i32_0 : i32
    scf.if %2 {
      %cst_9 = arith.constant 0.000000e+00 : f32
      %12 = vector.broadcast %cst_9 : f32 to vector<2x256xf32>
      %c0_10 = arith.constant 0 : index
      %c0_11 = arith.constant 0 : index
      %13 = vector.load %arg3[%c0_10, %c0_11] : memref<2x256xf32, #tpu.memory_space<vmem>>, vector<2x256xf32>
      tpu.vector_store %arg3[%c0_10, %c0_11], %12 {strides = array<i32>} : memref<2x256xf32, #tpu.memory_space<vmem>>, vector<2x256xf32>,
    } else {
    }
    %c0 = arith.constant 0 : index
    %c0_1 = arith.constant 0 : index
    %3 = vector.load %arg3[%c0, %c0_1] : memref<2x256xf32, #tpu.memory_space<vmem>>, vector<2x256xf32>
    %c0_2 = arith.constant 0 : index
    %c0_3 = arith.constant 0 : index
    %c0_4 = arith.constant 0 : index
    %4 = vector.load %arg1[%c0_2, %c0_3, %c0_4] : memref<2x8x256xbf16, #tpu.memory_space<vmem>>, vector<2x8x256xbf16>
    %5 = arith.extf %4 : vector<2x8x256xbf16> to vector<2x8x256xf32>
    %cst = arith.constant dense<0.000000e+00> : vector<2x256xf32>
    %6 = vector.multi_reduction <add>, %5, %cst [1] : vector<2x8x256xf32> to vector<2x256xf32>
    %7 = arith.addf %3, %6 : vector<2x256xf32>
    %c0_5 = arith.constant 0 : index
    %c0_6 = arith.constant 0 : index
    %8 = vector.load %arg3[%c0_5, %c0_6] : memref<2x256xf32, #tpu.memory_space<vmem>>, vector<2x256xf32>
    tpu.vector_store %arg3[%c0_5, %c0_6], %7 {strides = array<i32>} : memref<2x256xf32, #tpu.memory_space<vmem>>, vector<2x256xf32>,
    %c0_i32_7 = arith.constant 0 : i32
    %9 = arith.cmpi eq, %arg0, %c0_i32_7 : i32
    %10 = arith.extui %9 : i1 to i32
    %c0_i32_8 = arith.constant 0 : i32
    %11 = arith.cmpi ne, %10, %c0_i32_8 : i32
    scf.if %11 {
      %c0_9 = arith.constant 0 : index
      %c0_10 = arith.constant 0 : index
      %12 = vector.load %arg3[%c0_9, %c0_10] : memref<2x256xf32, #tpu.memory_space<vmem>>, vector<2x256xf32>
      %cst_11 = arith.constant 1.000000e+00 : f32
      %13 = vector.broadcast %cst_11 : f32 to vector<2x256xf32>
      %14 = arith.mulf %12, %13 : vector<2x256xf32>
      %c0_12 = arith.constant 0 : index
      %c0_13 = arith.constant 0 : index
      %15 = vector.load %arg2[%c0_12, %c0_13] : memref<2x256xf32, #tpu.memory_space<vmem>>, vector<2x256xf32>
      tpu.vector_store %arg2[%c0_12, %c0_13], %14 {strides = array<i32>} : memref<2x256xf32, #tpu.memory_space<vmem>>, vector<2x256xf32>,
    } else {
    }
    return
  }
  func.func @transform_0(%arg0: i32) -> (i32, i32, i32) {
    %c0_i32 = arith.constant 0 : i32
    %c0_i32_0 = arith.constant 0 : i32
    %c0_i32_1 = arith.constant 0 : i32
    return %c0_i32, %arg0, %c0_i32_0 : i32, i32, i32
  }
  func.func @transform_1(%arg0: i32) -> (i32, i32) {
    %c0_i32 = arith.constant 0 : i32
    %c0_i32_0 = arith.constant 0 : i32
    %c0_i32_1 = arith.constant 0 : i32
    return %c0_i32, %c0_i32_0 : i32, i32
  }
}

module attributes {stable_mosaic.version = 11 : i64} {
  func.func @_mm_kernel(%arg0: i32, %arg1: i32, %arg2: i32, %arg3: memref<8x256xbf16, #tpu.memory_space<vmem>>, %arg4: memref<256x128xbf16, #tpu.memory_space<vmem>>, %arg5: memref<1x128xf32, #tpu.memory_space<vmem>>, %arg6: memref<8x128xf32, #tpu.memory_space<vmem>>, %arg7: memref<8x128xf32, #tpu.memory_space<vmem>>) attributes {dimension_semantics = [#tpu.dimension_semantics<parallel>, #tpu.dimension_semantics<parallel>, #tpu.dimension_semantics<arbitrary>], iteration_bounds = array<i64: 1, 1, 1>, scalar_prefetch = 0 : i64, scratch_operands = 1 : i64, tpu.core_type = #tpu.core_type<tc>, window_params = [{transform_indices = @transform_0, window_bounds = array<i64: 8, 256>}, {transform_indices = @transform_1, window_bounds = array<i64: 256, 128>}, {transform_indices = @transform_2, window_bounds = array<i64: 1, 128>}, {transform_indices = @transform_3, window_bounds = array<i64: 8, 128>}]} {
    %c0_i32 = arith.constant 0 : i32
    %0 = arith.cmpi eq, %arg2, %c0_i32 : i32
    %1 = arith.extui %0 : i1 to i32
    %c0_i32_0 = arith.constant 0 : i32
    %2 = arith.cmpi ne, %1, %c0_i32_0 : i32
    scf.if %2 {
      %cst_10 = arith.constant 0.000000e+00 : f32
      %12 = vector.broadcast %cst_10 : f32 to vector<8x128xf32>
      %c0_11 = arith.constant 0 : index
      %c0_12 = arith.constant 0 : index
      %13 = vector.load %arg7[%c0_11, %c0_12] : memref<8x128xf32, #tpu.memory_space<vmem>>, vector<8x128xf32>
      tpu.vector_store %arg7[%c0_11, %c0_12], %12 {strides = array<i32>} : memref<8x128xf32, #tpu.memory_space<vmem>>, vector<8x128xf32>,
    } else {
    }
    %c0 = arith.constant 0 : index
    %c0_1 = arith.constant 0 : index
    %3 = vector.load %arg7[%c0, %c0_1] : memref<8x128xf32, #tpu.memory_space<vmem>>, vector<8x128xf32>
    %c0_2 = arith.constant 0 : index
    %c0_3 = arith.constant 0 : index
    %4 = vector.load %arg3[%c0_2, %c0_3] : memref<8x256xbf16, #tpu.memory_space<vmem>>, vector<8x256xbf16>
    %c0_4 = arith.constant 0 : index
    %c0_5 = arith.constant 0 : index
    %5 = vector.load %arg4[%c0_4, %c0_5] : memref<256x128xbf16, #tpu.memory_space<vmem>>, vector<256x128xbf16>
    %cst = arith.constant dense<0.000000e+00> : vector<8x128xf32>
    %6 = tpu.matmul %4, %5, %cst {dimension_numbers = #tpu.dot_dimension_numbers<[1], [0], [0], [1], [0, 0, 1, 1], [], []>} : vector<8x256xbf16>, vector<256x128xbf16>, vector<8x128xf32> -> vector<8x128xf32>
    %7 = arith.addf %3, %6 : vector<8x128xf32>
    %c0_6 = arith.constant 0 : index
    %c0_7 = arith.constant 0 : index
    %8 = vector.load %arg7[%c0_6, %c0_7] : memref<8x128xf32, #tpu.memory_space<vmem>>, vector<8x128xf32>
    tpu.vector_store %arg7[%c0_6, %c0_7], %7 {strides = array<i32>} : memref<8x128xf32, #tpu.memory_space<vmem>>, vector<8x128xf32>,
    %c0_i32_8 = arith.constant 0 : i32
    %9 = arith.cmpi eq, %arg2, %c0_i32_8 : i32
    %10 = arith.extui %9 : i1 to i32
    %c0_i32_9 = arith.constant 0 : i32
    %11 = arith.cmpi ne, %10, %c0_i32_9 : i32
    scf.if %11 {
      %c0_10 = arith.constant 0 : index
      %c0_11 = arith.constant 0 : index
      %12 = vector.load %arg7[%c0_10, %c0_11] : memref<8x128xf32, #tpu.memory_space<vmem>>, vector<8x128xf32>
      %c0_12 = arith.constant 0 : index
      %c0_13 = arith.constant 0 : index
      %13 = vector.load %arg5[%c0_12, %c0_13] : memref<1x128xf32, #tpu.memory_space<vmem>>, vector<1x128xf32>
      %14 = vector.broadcast %13 : vector<1x128xf32> to vector<8x128xf32>
      %15 = arith.addf %12, %14 : vector<8x128xf32>
      %c0_14 = arith.constant 0 : index
      %c0_15 = arith.constant 0 : index
      %16 = vector.load %arg6[%c0_14, %c0_15] : memref<8x128xf32, #tpu.memory_space<vmem>>, vector<8x128xf32>
      tpu.vector_store %arg6[%c0_14, %c0_15], %15 {strides = array<i32>} : memref<8x128xf32, #tpu.memory_space<vmem>>, vector<8x128xf32>,
    } else {
    }
    return
  }
  func.func @transform_0(%arg0: i32, %arg1: i32, %arg2: i32) -> (i32, i32) {
    %c0_i32 = arith.constant 0 : i32
    return %arg0, %arg2 : i32, i32
  }
  func.func @transform_1(%arg0: i32, %arg1: i32, %arg2: i32) -> (i32, i32) {
    %c0_i32 = arith.constant 0 : i32
    return %arg2, %arg1 : i32, i32
  }
  func.func @transform_2(%arg0: i32, %arg1: i32, %arg2: i32) -> (i32, i32) {
    %c0_i32 = arith.constant 0 : i32
    %c0_i32_0 = arith.constant 0 : i32
    return %c0_i32, %arg1 : i32, i32
  }
  func.func @transform_3(%arg0: i32, %arg1: i32, %arg2: i32) -> (i32, i32) {
    %c0_i32 = arith.constant 0 : i32
    return %arg0, %arg1 : i32, i32
  }
}

</mosaic_0001>

<bundles_post_ra>
// kernel: tsn_forward.21
= control target key start
LH: loop header
LB: loop body
LE: loop exit
PB: predicated region body
PF: predicated region fallthrough
CT: control target
= control target key end

     0   :  { %s941_s21 = smov 0   ;;  %s943_s22 = smov 0   ;;  %s1036_s0 = inlined_call_operand.vmem [shape: bf16[2,18,9,128], index: 0, kind: input, shape index: {}, may-alias: {0,2,4}]   ;;  %s1037_s1 = inlined_call_operand.vmem [shape: bf16[2,18,9,128], index: 1, kind: input, shape index: {}, may-alias: {1,3,5}]   ;;  %s1038_s2 = inlined_call_operand.vmem [shape: bf16[2,18,9,128], index: 2, kind: input, shape index: {}, may-alias: {0,2,4}]   ;;  %s1039_s3 = inlined_call_operand.vmem [shape: bf16[2,18,9,128], index: 3, kind: input, shape index: {}, may-alias: {1,3,5}]   ;;  %s1040_s4 = inlined_call_operand.vmem [shape: bf16[2,18,9,128], index: 4, kind: input, shape index: {}, may-alias: {0,2,4}]   ;;  %s1041_s5 = inlined_call_operand.vmem [shape: bf16[2,18,9,128], index: 5, kind: input, shape index: {}, may-alias: {1,3,5}]   ;;  %s1042_s6 = inlined_call_operand.vmem [shape: bf16[2,8,8,128], index: 6, kind: output, shape index: {}]  }
   0x1   :  { %s945_s23 = smov 0   ;;  %s947_s24 = smov 0  }
   0x2   :  { %s949_s25 = smov 0  }
   0x3 LB: > { %s25_s26 = sadd.s32 1, %s896_s23  ;;  %s28_s27 = sadd.s32 1, %s900_s24  ;;  %s904_s25 = sphi %s949_s25, %s16_s25   ;;  %s900_s24 = sphi %s947_s24, %s1048_s24   ;;  %s896_s23 = sphi %s945_s23, %s1047_s23   ;;  %s892_s22 = sphi %s943_s22, %s1046_s22   ;;  %s888_s21 = sphi %s941_s21, %s1045_s21  }
   0x4   : > { %p26_p0 = scmp.ge.s32.totalorder %s25_s26, 8  ;;  %p802_p1 = scmp.ge.s32.totalorder %s904_s25, 1 }
   0x5   : > { %p352_p2 = scmp.lt.s32.totalorder %s904_s25, 17 }
   0x6   : > { %s1050_s26 = smov (%p26_p0, %s25_s26), 0  ;;  %s1052_s27 = smov (!%p26_p0, %s28_s27), %s900_s24 }
   0x7   : > { %p353_p3 = pnand %p802_p1, %p352_p2  ;;  %p30_p4 = scmp.ge.s32.totalorder %s1052_s27, 2 }
   0x8   : > { %s803_s28 = sshll.u32 (!%p353_p3), %s888_s21, 1  ;;  %p445_p5 = scmp.lt.s32.totalorder (!%p353_p3), %s892_s22, 1 }
   0x9   : > { %s1054_s27 = smov (%p30_p4, %s1052_s27), 0  ;;  %356 = sbr.rel (%p353_p3) target bundleno = 46 (0x2e), region = 44 }
   0xa   : > { %p447_p6 = scmp.lt.s32.totalorder (!%p353_p3), %s803_s28, 17  ;;  %s467_s29 = sadd.s32 (!%p353_p3), 1, %s803_s28 }
   0xb   : > { %p470_p7 = scmp.lt.s32.totalorder (!%p353_p3), %s467_s29, 17  ;;  %s493_s9 = sadd.s32 (!%p353_p3), 2, %s803_s28 }
   0xc   : > { %p496_p8 = scmp.lt.s32.totalorder (!%p353_p3), %s493_s9, 17  ;;  %p520_p9 = scmp.lt.s32.totalorder (!%p353_p3), %s888_s21, 7 }
   0xe   : > { %s1056_s22 = smov (!%p445_p5, %s892_s22), 1  ;;  %s1058_s29 = smov (!%p470_p7, %s467_s29), 17  ;;  %vm530_vm0 = vsmask.f32 3328  ;;  %vm531_vm1 = vsmask.f32 7440 }
   0xf   : > { %s448_s30 = scalar_select %p447_p6, %s803_s28, 17  ;;  %vm990_vm2 = vmor %vm530_vm0, %vm531_vm1 }
  0x10   : > { %s825_s7 = smul.u32 36, %s1056_s22  ;;  %s1060_s9 = smov (!%p496_p8, %s493_s9), 17 }
  0x11   : > { %s804_s8 = sshll.u32 %s448_s30, 1  ;;  %s810_s18 = sshll.u32 %s1058_s29, 1 }
  0x12   : > { %s451_s10 = sadd.s32 %s825_s7, %s804_s8  ;;  %s474_s19 = sadd.s32 %s825_s7, %s810_s18 }
  0x13   : > { %s805_s11 = sshll.u32 %s451_s10, 2  ;;  %s816_s20 = sshll.u32 %s1060_s9, 1 }
  0x14   : > { %s453_s14 = scalar_lea.vmem %s1036_s0, %s805_s11  ;;  %s464_s17 = scalar_lea.vmem %s1037_s1, %s805_s11 }
  0x15   : > { %v526_v0 = vld [vmem:[%s453_s14] sm:$0xf]  ;;  %v529_v1 = vld [vmem:[%s453_s14 + $0x4] sm:$0x1]  ;;  %s811_s28 = sshll.u32 %s474_s19, 2  ;;  %s983_s30 = sadd.s32 %s825_s7, %s816_s20 }
  0x16   : > { %v534_v2 = vshrl.u32 %v526_v0, 16  ;;  %v537_v3 = vshll.u32 %v526_v0, 16  ;;  %v543_v4 = vshll.u32 %v529_v1, 16  ;;  %v527_v5 = vld [vmem:[%s464_s17] sm:$0xf]  ;;  %s476_s11 = scalar_lea.vmem %s1038_s2, %s811_s28  ;;  %s817_s29 = sshll.u32 %s983_s30, 2 }
  0x17   : > { %v528_v10 = vmax.bf16 %v527_v5, %v526_v0  ;;  %v549_v12 = vld [vmem:[%s476_s11] sm:$0xf]  ;;  %s502_s12 = scalar_lea.vmem %s1040_s4, %s817_s29  ;;  %v553_v14 = vld [vmem:[%s476_s11 + $0x4] sm:$0x1]  ;;  %s489_s15 = scalar_lea.vmem %s1039_s3, %s811_s28 }
  0x18   : > { %v536_v6 = vrot.slane %v534_v2, 4  ;;  %v539_v7 = vrot.slane %v537_v3, 5  ;;  %v545_v9 = vrot.slane %v543_v4, 5  ;;  %v555_v15 = vshrl.u32 %v549_v12, 16  ;;  %v570_v18 = vld [vmem:[%s502_s12] sm:$0xf]  ;;  %s515_s19 = scalar_lea.vmem %s1041_s5, %s817_s29 }
  0x19   : > { %v558_v16 = vshll.u32 %v549_v12, 16  ;;  %v564_v17 = vshll.u32 %v553_v14, 16  ;;  %v574_v22 = vld [vmem:[%s502_s12 + $0x4] sm:$0x1]  ;;  %v576_v23 = vshrl.u32 %v570_v18, 16  ;;  %v579_v25 = vshll.u32 %v570_v18, 16 }
  0x1a   : > { %v540_v8 = vor.u32 %v539_v7, %v536_v6  ;;  %v557_v20 = vrot.slane %v555_v15, 4  ;;  %s1062_s21 = smov (!%p520_p9, %s888_s21), 7  ;;  %v551_v26 = vld [vmem:[%s489_s15] sm:$0xf]  ;;  %v585_v30 = vshll.u32 %v574_v22, 16  ;;  %s821_s16 = sshll.u32 %s1056_s22, 3 }
  0x1b   : > { %v560_v21 = vrot.slane %v558_v16, 5  ;;  %v566_v28 = vrot.slane %v564_v17, 5  ;;  %v578_v29 = vrot.slane %v576_v23, 4  ;;  %v581_v32 = vrot.slane %v579_v25, 5  ;;  %s523_s20 = sadd.s32 %s821_s16, %s1062_s21  ;;  %v572_v40 = vld [vmem:[%s515_s19] sm:$0xf] }
  0x1c   : > { %v541_v13 = vrot.slane %v540_v8, 4  ;;  %v587_v37 = vrot.slane %v585_v30, 5  ;;  %s822_s28 = sshll.u32 %s523_s20, 2 }
  0x1d   : > { %v561_v27 = vor.u32 %v560_v21, %v557_v20  ;;  %v582_v35 = vor.u32 %v581_v32, %v578_v29  ;;  %s525_s8 = scalar_lea.vmem %s1042_s6, %s822_s28 }
  0x1e   : > { %v546_v19 = vsel %vm990_vm2, %v541_v13, %v545_v9 }
  0x1f   : > { %v548_v24 = vmax.bf16 %v546_v19, %v528_v10  ;;  %v562_v33 = vrot.slane %v561_v27, 4  ;;  %v583_v39 = vrot.slane %v582_v35, 4 }
  0x21   : > { %v550_v31 = vmax.bf16 %v549_v12, %v548_v24  ;;  %v567_v36 = vsel %vm990_vm2, %v562_v33, %v566_v28  ;;  %v588_v42 = vsel %vm990_vm2, %v583_v39, %v587_v37 }
  0x23   : > { %v552_v34 = vmax.bf16 %v551_v26, %v550_v31 }
  0x25   : > { %v569_v38 = vmax.bf16 %v567_v36, %v552_v34 }
  0x27   : > { %v571_v41 = vmax.bf16 %v570_v18, %v569_v38 }
  0x29   : > { %v573_v43 = vmax.bf16 %v572_v40, %v571_v41 }
  0x2b   : > { %v590_v44 = vmax.bf16 %v588_v42, %v573_v43 }
  0x2d   : > { %591 = vst [vmem:[%s525_s8] sm:$0xf] %v590_v44 }
  0x2e PF: > { %s16_s25 = sadd.s32 1, %s904_s25   ;;  %s1045_s21 = smov %s896_s23 }
  0x2f   : > { %p13_p10 = scmp.ge.s32.totalorder %s16_s25, 18   ;;  %s1046_s22 = smov %s900_s24 }
  0x30   : > { %s1047_s23 = smov %s1050_s26  ;;  %s1048_s24 = smov %s1054_s27 }
  0x31   :  { %15 = sbr.rel (!%p13_p10) target bundleno = 3 (0x3), region = 89 }

// kernel: tsn_forward.24
= control target key start
LH: loop header
LB: loop body
LE: loop exit
PB: predicated region body
PF: predicated region fallthrough
CT: control target
= control target key end

     0   :  { %s705_s1 = inlined_call_operand.vmem [shape: bf16[128,128], index: 1, kind: input, shape index: {}]   ;;  %s706_s0 = inlined_call_operand.vmem [shape: bf16[128,128], index: 0, kind: input, shape index: {}]   ;;  %s707_s2 = inlined_call_operand.vmem [shape: f32[1,128], index: 2, kind: input, shape index: {}]   ;;  %s708_s3 = inlined_call_operand.vmem [shape: bf16[128,128], index: 3, kind: output, shape index: {}]  }
   0x1   :  { %v594_v0 = vld [vmem:[%s705_s1 + $0x38] sm:$0xff]   ;;  %v595_v1 = vld [vmem:[%s705_s1 + $0x30] sm:$0xff]   ;;  %v596_v2 = vld [vmem:[%s705_s1 + $0x28] sm:$0xff]  }
   0x2   :  { %546 = vmatprep.subr.bf16.mxu0 %v594_v0  ;;  %578 = vmatprep.subr.bf16.mxu1 %v594_v0  ;;  %v597_v3 = vld [vmem:[%s705_s1 + $0x20] sm:$0xff]   ;;  %v598_v6 = vld [vmem:[%s705_s1 + $0x18] sm:$0xff]   ;;  %v599_v7 = vld [vmem:[%s705_s1 + $0x10] sm:$0xff]  }
   0x3   :  { %547 = vmatpush3.bf16.msra.mxu0 %v594_v0  ;;  %586 = vmatpush3.bf16.msra.mxu1 %v594_v0  ;;  %v602_v4 = vld [vmem:[%s706_s0] sm:$0xff]   ;;  %v600_v8 = vld [vmem:[%s705_s1 + $0x8] sm:$0xff]   ;;  %v606_v12 = vld [vmem:[%s706_s0 + $0x10] sm:$0xff]  }
   0x4   :  { %548 = vmatprep.subr.bf16.mxu0 %v595_v1  ;;  %579 = vmatprep.subr.bf16.mxu1 %v595_v1  ;;  %v603_v5 = vld [vmem:[%s706_s0 + $0x20] sm:$0xff]   ;;  %v604_v10 = vld [vmem:[%s706_s0 + $0x8] sm:$0xff]   ;;  %v607_v13 = vld [vmem:[%s706_s0 + $0x30] sm:$0xff]  }
   0x5   :  { %562 = vmatprep.mubr.bf16.mxu0 %v602_v4  ;;  %570 = vmatprep.mubr.bf16.mxu1 %v603_v5  ;;  %v601_v9 = vld [vmem:[%s705_s1] sm:$0xff]   ;;  %v605_v11 = vld [vmem:[%s706_s0 + $0x28] sm:$0xff]   ;;  %v608_v14 = vld [vmem:[%s706_s0 + $0x18] sm:$0xff]  }
   0x6   :  { %v609_v15 = vld [vmem:[%s706_s0 + $0x38] sm:$0xff]   ;;  %v450_v18 = vld [vmem:[%s707_s2] ss:$0 sm:$0xff] }
   0x7   :  { %549 = vmatpush3.bf16.msra.mxu0 %v595_v1  ;;  %587 = vmatpush3.bf16.msra.mxu1 %v595_v1 }
   0x8   :  { %550 = vmatprep.subr.bf16.mxu0 %v596_v2  ;;  %580 = vmatprep.subr.bf16.mxu1 %v596_v2 }
   0xb   :  { %551 = vmatpush3.bf16.msra.mxu0 %v596_v2  ;;  %588 = vmatpush3.bf16.msra.mxu1 %v596_v2 }
   0xc   :  { %552 = vmatprep.subr.bf16.mxu0 %v597_v3  ;;  %581 = vmatprep.subr.bf16.mxu1 %v597_v3 }
   0xf   :  { %553 = vmatpush3.bf16.msra.mxu0 %v597_v3  ;;  %589 = vmatpush3.bf16.msra.mxu1 %v597_v3 }
  0x10   :  { %554 = vmatprep.subr.bf16.mxu0 %v598_v6  ;;  %582 = vmatprep.subr.bf16.mxu1 %v598_v6 }
  0x13   :  { %555 = vmatpush3.bf16.msra.mxu0 %v598_v6  ;;  %590 = vmatpush3.bf16.msra.mxu1 %v598_v6 }
  0x14   :  { %556 = vmatprep.subr.bf16.mxu0 %v599_v7  ;;  %583 = vmatprep.subr.bf16.mxu1 %v599_v7 }
  0x17   :  { %557 = vmatpush3.bf16.msra.mxu0 %v599_v7  ;;  %591 = vmatpush3.bf16.msra.mxu1 %v599_v7 }
  0x18   :  { %558 = vmatprep.subr.bf16.mxu0 %v600_v8  ;;  %584 = vmatprep.subr.bf16.mxu1 %v600_v8 }
  0x1b   :  { %559 = vmatpush3.bf16.msra.mxu0 %v600_v8  ;;  %592 = vmatpush3.bf16.msra.mxu1 %v600_v8 }
  0x1c   :  { %560 = vmatprep.subr.bf16.mxu0 %v601_v9  ;;  %585 = vmatprep.subr.bf16.mxu1 %v601_v9 }
  0x1f   :  { %561 = vmatpush3.bf16.msra.mxu0 %v601_v9  ;;  %593 = vmatpush3.bf16.msra.mxu1 %v601_v9 }
  0x22   :  { %563 = vmatmul.mubr.bf16.vlgmr.msra.gmra.mxu0 %v604_v10  ;;  %571 = vmatmul.mubr.bf16.vlgmr.msra.gmra.mxu1 %v605_v11 }
  0x23   :  { %566 = vmatprep.mubr.bf16.mxu0 %v606_v12  ;;  %574 = vmatprep.mubr.bf16.mxu1 %v607_v13 }
  0x2a   :  { %567 = vmatmul.mubr.bf16.gmra.mxu0 %v608_v14  ;;  %575 = vmatmul.mubr.bf16.gmra.mxu1 %v609_v15 }
  0xe2   :  { %v564_v16 = vpop.f32.mrf.mxu0  ;;  %v572_v17 = vpop.f32.mrf.mxu1 }
  0xe3   :  { %v336_v23 = vadd.f32 %v564_v16, %v450_v18  ;;  %v344_v24 = vadd.f32 %v572_v17, %v450_v18 }
  0xe4   :  { %v213_v19 = vpop.f32.mrf.mxu0  ;;  %v245_v20 = vpop.f32.mrf.mxu1 }
  0xe5   :  { %v334_v27 = vadd.f32 %v450_v18, %v213_v19  ;;  %v342_v28 = vadd.f32 %v450_v18, %v245_v20 }
  0xe6   :  { %v565_v21 = vpop.f32.mrf.mxu0  ;;  %v573_v22 = vpop.f32.mrf.mxu1 }
  0xe7   :  { %v337_v25 = vadd.f32 %v565_v21, %v450_v18  ;;  %v345_v26 = vadd.f32 %v573_v22, %v450_v18 }
  0xe8   :  { %v216_v29 = vpop.f32.mrf.mxu0  ;;  %v248_v30 = vpop.f32.mrf.mxu1 }
  0xe9   :  { %v491_v31 = vpack.c.bf16 %v337_v25, %v336_v23  ;;  %v511_v32 = vpack.c.bf16 %v345_v26, %v344_v24  ;;  %v335_v33 = vadd.f32 %v450_v18, %v216_v29  ;;  %v343_v34 = vadd.f32 %v450_v18, %v248_v30 }
  0xea   :  { %v568_v35 = vpop.f32.mrf.mxu0  ;;  %v576_v36 = vpop.f32.mrf.mxu1 }
  0xeb   :  { %523 = vst [vmem:[%s708_s3 + $0x8] sm:$0xff] %v491_v31   ;;  %527 = vst [vmem:[%s708_s3 + $0x28] sm:$0xff] %v511_v32   ;;  %v486_v37 = vpack.c.bf16 %v335_v33, %v334_v27  ;;  %v506_v38 = vpack.c.bf16 %v343_v34, %v342_v28  ;;  %v340_v43 = vadd.f32 %v568_v35, %v450_v18 }
  0xec   :  { %v229_v39 = vpop.f32.mrf.mxu0  ;;  %v261_v40 = vpop.f32.mrf.mxu1  ;;  %v348_v44 = vadd.f32 %v576_v36, %v450_v18 }
  0xed   :  { %487 = vst [vmem:[%s708_s3] sm:$0xff] %v486_v37   ;;  %526 = vst [vmem:[%s708_s3 + $0x20] sm:$0xff] %v506_v38   ;;  %v338_v47 = vadd.f32 %v450_v18, %v229_v39  ;;  %v346_v48 = vadd.f32 %v450_v18, %v261_v40 }
  0xee   :  { %v569_v41 = vpop.f32.mrf.mxu0  ;;  %v577_v42 = vpop.f32.mrf.mxu1 }
  0xef   :  { %v341_v45 = vadd.f32 %v569_v41, %v450_v18  ;;  %v349_v46 = vadd.f32 %v577_v42, %v450_v18 }
  0xf0   :  { %v232_v49 = vpop.f32.mrf.mxu0  ;;  %v264_v50 = vpop.f32.mrf.mxu1 }
  0xf1   :  { %v501_v51 = vpack.c.bf16 %v341_v45, %v340_v43  ;;  %v521_v52 = vpack.c.bf16 %v349_v46, %v348_v44  ;;  %v339_v53 = vadd.f32 %v450_v18, %v232_v49  ;;  %v347_v54 = vadd.f32 %v450_v18, %v264_v50 }
  0xf3   :  { %525 = vst [vmem:[%s708_s3 + $0x18] sm:$0xff] %v501_v51   ;;  %529 = vst [vmem:[%s708_s3 + $0x38] sm:$0xff] %v521_v52   ;;  %v496_v55 = vpack.c.bf16 %v339_v53, %v338_v47  ;;  %v516_v56 = vpack.c.bf16 %v347_v54, %v346_v48 }
  0xf5   :  { %524 = vst [vmem:[%s708_s3 + $0x10] sm:$0xff] %v496_v55   ;;  %528 = vst [vmem:[%s708_s3 + $0x30] sm:$0xff] %v516_v56  }

// kernel: tsn_forward.22
= control target key start
LH: loop header
LB: loop body
LE: loop exit
PB: predicated region body
PF: predicated region fallthrough
CT: control target
= control target key end

     0   :  { %s721_s1 = inlined_call_operand.vmem [shape: bf16[128,128], index: 1, kind: input, shape index: {}]   ;;  %s722_s0 = inlined_call_operand.vmem [shape: bf16[128,128], index: 0, kind: input, shape index: {}]   ;;  %s723_s2 = inlined_call_operand.vmem [shape: f32[1,128], index: 2, kind: input, shape index: {}]   ;;  %s724_s3 = inlined_call_operand.vmem [shape: bf16[128,128], index: 3, kind: output, shape index: {}]  }
   0x1   :  { %v610_v0 = vld [vmem:[%s721_s1 + $0x38] sm:$0xff]   ;;  %v611_v1 = vld [vmem:[%s721_s1 + $0x30] sm:$0xff]   ;;  %v612_v2 = vld [vmem:[%s721_s1 + $0x28] sm:$0xff]  }
   0x2   :  { %562 = vmatprep.subr.bf16.mxu0 %v610_v0  ;;  %594 = vmatprep.subr.bf16.mxu1 %v610_v0  ;;  %v613_v3 = vld [vmem:[%s721_s1 + $0x20] sm:$0xff]   ;;  %v614_v6 = vld [vmem:[%s721_s1 + $0x18] sm:$0xff]   ;;  %v615_v7 = vld [vmem:[%s721_s1 + $0x10] sm:$0xff]  }
   0x3   :  { %563 = vmatpush3.bf16.msra.mxu0 %v610_v0  ;;  %602 = vmatpush3.bf16.msra.mxu1 %v610_v0  ;;  %v618_v4 = vld [vmem:[%s722_s0] sm:$0xff]   ;;  %v616_v8 = vld [vmem:[%s721_s1 + $0x8] sm:$0xff]   ;;  %v622_v12 = vld [vmem:[%s722_s0 + $0x10] sm:$0xff]  }
   0x4   :  { %564 = vmatprep.subr.bf16.mxu0 %v611_v1  ;;  %595 = vmatprep.subr.bf16.mxu1 %v611_v1  ;;  %v619_v5 = vld [vmem:[%s722_s0 + $0x20] sm:$0xff]   ;;  %v620_v10 = vld [vmem:[%s722_s0 + $0x8] sm:$0xff]   ;;  %v623_v13 = vld [vmem:[%s722_s0 + $0x30] sm:$0xff]  }
   0x5   :  { %578 = vmatprep.mubr.bf16.mxu0 %v618_v4  ;;  %586 = vmatprep.mubr.bf16.mxu1 %v619_v5  ;;  %v617_v9 = vld [vmem:[%s721_s1] sm:$0xff]   ;;  %v621_v11 = vld [vmem:[%s722_s0 + $0x28] sm:$0xff]   ;;  %v624_v14 = vld [vmem:[%s722_s0 + $0x18] sm:$0xff]  }
   0x6   :  { %v625_v15 = vld [vmem:[%s722_s0 + $0x38] sm:$0xff]   ;;  %v466_v16 = vld [vmem:[%s723_s2] ss:$0 sm:$0xff] }
   0x7   :  { %565 = vmatpush3.bf16.msra.mxu0 %v611_v1  ;;  %603 = vmatpush3.bf16.msra.mxu1 %v611_v1 }
   0x8   :  { %566 = vmatprep.subr.bf16.mxu0 %v612_v2  ;;  %596 = vmatprep.subr.bf16.mxu1 %v612_v2 }
   0xb   :  { %567 = vmatpush3.bf16.msra.mxu0 %v612_v2  ;;  %604 = vmatpush3.bf16.msra.mxu1 %v612_v2 }
   0xc   :  { %568 = vmatprep.subr.bf16.mxu0 %v613_v3  ;;  %597 = vmatprep.subr.bf16.mxu1 %v613_v3 }
   0xf   :  { %569 = vmatpush3.bf16.msra.mxu0 %v613_v3  ;;  %605 = vmatpush3.bf16.msra.mxu1 %v613_v3 }
  0x10   :  { %570 = vmatprep.subr.bf16.mxu0 %v614_v6  ;;  %598 = vmatprep.subr.bf16.mxu1 %v614_v6 }
  0x13   :  { %571 = vmatpush3.bf16.msra.mxu0 %v614_v6  ;;  %606 = vmatpush3.bf16.msra.mxu1 %v614_v6 }
  0x14   :  { %572 = vmatprep.subr.bf16.mxu0 %v615_v7  ;;  %599 = vmatprep.subr.bf16.mxu1 %v615_v7 }
  0x17   :  { %573 = vmatpush3.bf16.msra.mxu0 %v615_v7  ;;  %607 = vmatpush3.bf16.msra.mxu1 %v615_v7 }
  0x18   :  { %574 = vmatprep.subr.bf16.mxu0 %v616_v8  ;;  %600 = vmatprep.subr.bf16.mxu1 %v616_v8 }
  0x1b   :  { %575 = vmatpush3.bf16.msra.mxu0 %v616_v8  ;;  %608 = vmatpush3.bf16.msra.mxu1 %v616_v8 }
  0x1c   :  { %576 = vmatprep.subr.bf16.mxu0 %v617_v9  ;;  %601 = vmatprep.subr.bf16.mxu1 %v617_v9 }
  0x1f   :  { %577 = vmatpush3.bf16.msra.mxu0 %v617_v9  ;;  %609 = vmatpush3.bf16.msra.mxu1 %v617_v9 }
  0x22   :  { %579 = vmatmul.mubr.bf16.vlgmr.msra.gmra.mxu0 %v620_v10  ;;  %587 = vmatmul.mubr.bf16.vlgmr.msra.gmra.mxu1 %v621_v11 }
  0x23   :  { %582 = vmatprep.mubr.bf16.mxu0 %v622_v12  ;;  %590 = vmatprep.mubr.bf16.mxu1 %v623_v13 }
  0x2a   :  { %583 = vmatmul.mubr.bf16.gmra.mxu0 %v624_v14  ;;  %591 = vmatmul.mubr.bf16.gmra.mxu1 %v625_v15 }
  0xe2   :  { %v580_v17 = vpop.f32.mrf.mxu0  ;;  %v588_v18 = vpop.f32.mrf.mxu1 }
  0xe3   :  { %v336_v19 = vadd.f32 %v580_v17, %v466_v16  ;;  %v344_v20 = vadd.f32 %v588_v18, %v466_v16 }
  0xe4   :  { %v213_v21 = vpop.f32.mrf.mxu0  ;;  %v245_v22 = vpop.f32.mrf.mxu1 }
  0xe5   :  { %v334_v23 = vadd.f32 %v466_v16, %v213_v21  ;;  %v342_v24 = vadd.f32 %v466_v16, %v245_v22  ;;  %v352_v29 = vmax.f32 %v336_v19, 0.0  ;;  %v360_v30 = vmax.f32 %v344_v20, 0.0 }
  0xe6   :  { %v581_v25 = vpop.f32.mrf.mxu0  ;;  %v589_v26 = vpop.f32.mrf.mxu1 }
  0xe7   :  { %v337_v27 = vadd.f32 %v581_v25, %v466_v16  ;;  %v345_v28 = vadd.f32 %v589_v26, %v466_v16  ;;  %v350_v37 = vmax.f32 %v334_v23, 0.0  ;;  %v358_v38 = vmax.f32 %v342_v24, 0.0 }
  0xe8   :  { %v216_v31 = vpop.f32.mrf.mxu0  ;;  %v248_v32 = vpop.f32.mrf.mxu1 }
  0xe9   :  { %v353_v33 = vmax.f32 %v337_v27, 0.0  ;;  %v361_v34 = vmax.f32 %v345_v28, 0.0  ;;  %v335_v35 = vadd.f32 %v466_v16, %v216_v31  ;;  %v343_v36 = vadd.f32 %v466_v16, %v248_v32 }
  0xea   :  { %v584_v39 = vpop.f32.mrf.mxu0  ;;  %v592_v40 = vpop.f32.mrf.mxu1 }
  0xeb   :  { %v507_v41 = vpack.c.bf16 %v353_v33, %v352_v29  ;;  %v527_v42 = vpack.c.bf16 %v361_v34, %v360_v30  ;;  %v351_v43 = vmax.f32 %v335_v35, 0.0  ;;  %v359_v44 = vmax.f32 %v343_v36, 0.0 }
  0xec   :  { %v340_v45 = vadd.f32 %v584_v39, %v466_v16  ;;  %v348_v46 = vadd.f32 %v592_v40, %v466_v16  ;;  %v229_v47 = vpop.f32.mrf.mxu0  ;;  %v261_v48 = vpop.f32.mrf.mxu1 }
  0xed   :  { %539 = vst [vmem:[%s724_s3 + $0x8] sm:$0xff] %v507_v41   ;;  %543 = vst [vmem:[%s724_s3 + $0x28] sm:$0xff] %v527_v42   ;;  %v502_v49 = vpack.c.bf16 %v351_v43, %v350_v37  ;;  %v522_v50 = vpack.c.bf16 %v359_v44, %v358_v38  ;;  %v338_v51 = vadd.f32 %v466_v16, %v229_v47 }
  0xee   :  { %v346_v52 = vadd.f32 %v466_v16, %v261_v48  ;;  %v585_v53 = vpop.f32.mrf.mxu0  ;;  %v593_v54 = vpop.f32.mrf.mxu1  ;;  %v356_v57 = vmax.f32 %v340_v45, 0.0  ;;  %v364_v58 = vmax.f32 %v348_v46, 0.0 }
  0xef   :  { %503 = vst [vmem:[%s724_s3] sm:$0xff] %v502_v49   ;;  %542 = vst [vmem:[%s724_s3 + $0x20] sm:$0xff] %v522_v50   ;;  %v341_v55 = vadd.f32 %v585_v53, %v466_v16  ;;  %v349_v56 = vadd.f32 %v593_v54, %v466_v16  ;;  %v354_v1 = vmax.f32 %v338_v51, 0.0 }
  0xf0   :  { %v232_v59 = vpop.f32.mrf.mxu0  ;;  %v264_v60 = vpop.f32.mrf.mxu1  ;;  %v362_v2 = vmax.f32 %v346_v52, 0.0 }
  0xf1   :  { %v357_v61 = vmax.f32 %v341_v55, 0.0  ;;  %v365_v62 = vmax.f32 %v349_v56, 0.0  ;;  %v339_v63 = vadd.f32 %v466_v16, %v232_v59  ;;  %v347_v0 = vadd.f32 %v466_v16, %v264_v60 }
  0xf3   :  { %v517_v3 = vpack.c.bf16 %v357_v61, %v356_v57  ;;  %v537_v4 = vpack.c.bf16 %v365_v62, %v364_v58  ;;  %v355_v5 = vmax.f32 %v339_v63, 0.0  ;;  %v363_v6 = vmax.f32 %v347_v0, 0.0 }
  0xf5   :  { %541 = vst [vmem:[%s724_s3 + $0x18] sm:$0xff] %v517_v3   ;;  %545 = vst [vmem:[%s724_s3 + $0x38] sm:$0xff] %v537_v4   ;;  %v512_v7 = vpack.c.bf16 %v355_v5, %v354_v1  ;;  %v532_v8 = vpack.c.bf16 %v363_v6, %v362_v2 }
  0xf7   :  { %540 = vst [vmem:[%s724_s3 + $0x10] sm:$0xff] %v512_v7   ;;  %544 = vst [vmem:[%s724_s3 + $0x30] sm:$0xff] %v532_v8  }

// kernel: tsn_forward.25
= control target key start
LH: loop header
LB: loop body
LE: loop exit
PB: predicated region body
PF: predicated region fallthrough
CT: control target
= control target key end

     0   :  { %s874_s1 = inlined_call_operand.vmem [shape: bf16[128,128], index: 1, kind: input, shape index: {}]   ;;  %s875_s0 = inlined_call_operand.vmem [shape: bf16[128,128], index: 0, kind: input, shape index: {}]   ;;  %s876_s2 = inlined_call_operand.vmem [shape: f32[1,128], index: 2, kind: input, shape index: {}]   ;;  %s877_s3 = inlined_call_operand.vmem [shape: bf16[128,128], index: 3, kind: input, shape index: {}]   ;;  %s878_s4 = inlined_call_operand.vmem [shape: bf16[128,128], index: 4, kind: output, shape index: {}]  }
   0x1   :  { %v700_v0 = vld [vmem:[%s874_s1 + $0x38] sm:$0xff]   ;;  %v701_v1 = vld [vmem:[%s874_s1 + $0x30] sm:$0xff]   ;;  %v702_v2 = vld [vmem:[%s874_s1 + $0x28] sm:$0xff]  }
   0x2   :  { %652 = vmatprep.subr.bf16.mxu0 %v700_v0  ;;  %684 = vmatprep.subr.bf16.mxu1 %v700_v0  ;;  %v703_v3 = vld [vmem:[%s874_s1 + $0x20] sm:$0xff]   ;;  %v704_v6 = vld [vmem:[%s874_s1 + $0x18] sm:$0xff]   ;;  %v705_v7 = vld [vmem:[%s874_s1 + $0x10] sm:$0xff]  }
   0x3   :  { %653 = vmatpush3.bf16.msra.mxu0 %v700_v0  ;;  %692 = vmatpush3.bf16.msra.mxu1 %v700_v0  ;;  %v708_v4 = vld [vmem:[%s875_s0] sm:$0xff]   ;;  %v706_v8 = vld [vmem:[%s874_s1 + $0x8] sm:$0xff]   ;;  %v712_v12 = vld [vmem:[%s875_s0 + $0x10] sm:$0xff]  }
   0x4   :  { %654 = vmatprep.subr.bf16.mxu0 %v701_v1  ;;  %685 = vmatprep.subr.bf16.mxu1 %v701_v1  ;;  %v709_v5 = vld [vmem:[%s875_s0 + $0x20] sm:$0xff]   ;;  %v710_v10 = vld [vmem:[%s875_s0 + $0x8] sm:$0xff]   ;;  %v713_v13 = vld [vmem:[%s875_s0 + $0x30] sm:$0xff]  }
   0x5   :  { %668 = vmatprep.mubr.bf16.mxu0 %v708_v4  ;;  %676 = vmatprep.mubr.bf16.mxu1 %v709_v5  ;;  %v707_v9 = vld [vmem:[%s874_s1] sm:$0xff]   ;;  %v711_v11 = vld [vmem:[%s875_s0 + $0x28] sm:$0xff]   ;;  %v714_v14 = vld [vmem:[%s875_s0 + $0x18] sm:$0xff]  }
   0x6   :  { %v715_v15 = vld [vmem:[%s875_s0 + $0x38] sm:$0xff]   ;;  %v792_v16 = vld [vmem:[%s876_s2] ss:$0 sm:$0xff]  ;;  %v622_v17 = vld [vmem:[%s877_s3 + $0x8] sm:$0xff]  }
   0x7   :  { %655 = vmatpush3.bf16.msra.mxu0 %v701_v1  ;;  %693 = vmatpush3.bf16.msra.mxu1 %v701_v1  ;;  %v626_v18 = vld [vmem:[%s877_s3 + $0x28] sm:$0xff]   ;;  %v551_v21 = vld [vmem:[%s877_s3] sm:$0xff]   ;;  %v556_v24 = vunpack.c.l.bf16 %v622_v17  ;;  %v811_v29 = vld [vmem:[%s877_s3 + $0x18] sm:$0xff]   ;;  %v557_v38 = vunpack.c.h.bf16 %v622_v17 }
   0x8   :  { %656 = vmatprep.subr.bf16.mxu0 %v702_v2  ;;  %686 = vmatprep.subr.bf16.mxu1 %v702_v2  ;;  %v625_v22 = vld [vmem:[%s877_s3 + $0x20] sm:$0xff]   ;;  %v572_v26 = vunpack.c.l.bf16 %v626_v18  ;;  %v816_v30 = vld [vmem:[%s877_s3 + $0x38] sm:$0xff]   ;;  %v552_v32 = vunpack.c.l.bf16 %v551_v21  ;;  %v823_v35 = vld [vmem:[%s877_s3 + $0x10] sm:$0xff]   ;;  %v573_v40 = vunpack.c.h.bf16 %v626_v18  ;;  %v553_v41 = vunpack.c.h.bf16 %v551_v21 }
   0x9   :  { %v568_v34 = vunpack.c.l.bf16 %v625_v22  ;;  %v828_v36 = vld [vmem:[%s877_s3 + $0x30] sm:$0xff]   ;;  %v569_v42 = vunpack.c.h.bf16 %v625_v22  ;;  %v564_v45 = vunpack.c.l.bf16 %v811_v29  ;;  %v580_v46 = vunpack.c.l.bf16 %v816_v30 }
   0xa   :  { %v560_v51 = vunpack.c.l.bf16 %v823_v35  ;;  %v576_v52 = vunpack.c.l.bf16 %v828_v36  ;;  %v565_v61 = vunpack.c.h.bf16 %v811_v29  ;;  %v581_v62 = vunpack.c.h.bf16 %v816_v30 }
   0xb   :  { %657 = vmatpush3.bf16.msra.mxu0 %v702_v2  ;;  %694 = vmatpush3.bf16.msra.mxu1 %v702_v2  ;;  %v561_v22 = vunpack.c.h.bf16 %v823_v35 }
   0xc   :  { %658 = vmatprep.subr.bf16.mxu0 %v703_v3  ;;  %687 = vmatprep.subr.bf16.mxu1 %v703_v3 }
   0xf   :  { %659 = vmatpush3.bf16.msra.mxu0 %v703_v3  ;;  %695 = vmatpush3.bf16.msra.mxu1 %v703_v3 }
  0x10   :  { %660 = vmatprep.subr.bf16.mxu0 %v704_v6  ;;  %688 = vmatprep.subr.bf16.mxu1 %v704_v6 }
  0x13   :  { %661 = vmatpush3.bf16.msra.mxu0 %v704_v6  ;;  %696 = vmatpush3.bf16.msra.mxu1 %v704_v6 }
  0x14   :  { %662 = vmatprep.subr.bf16.mxu0 %v705_v7  ;;  %689 = vmatprep.subr.bf16.mxu1 %v705_v7 }
  0x17   :  { %663 = vmatpush3.bf16.msra.mxu0 %v705_v7  ;;  %697 = vmatpush3.bf16.msra.mxu1 %v705_v7 }
  0x18   :  { %664 = vmatprep.subr.bf16.mxu0 %v706_v8  ;;  %690 = vmatprep.subr.bf16.mxu1 %v706_v8 }
  0x1b   :  { %665 = vmatpush3.bf16.msra.mxu0 %v706_v8  ;;  %698 = vmatpush3.bf16.msra.mxu1 %v706_v8 }
  0x1c   :  { %666 = vmatprep.subr.bf16.mxu0 %v707_v9  ;;  %691 = vmatprep.subr.bf16.mxu1 %v707_v9 }
  0x1f   :  { %667 = vmatpush3.bf16.msra.mxu0 %v707_v9  ;;  %699 = vmatpush3.bf16.msra.mxu1 %v707_v9 }
  0x22   :  { %669 = vmatmul.mubr.bf16.vlgmr.msra.gmra.mxu0 %v710_v10  ;;  %677 = vmatmul.mubr.bf16.vlgmr.msra.gmra.mxu1 %v711_v11 }
  0x23   :  { %672 = vmatprep.mubr.bf16.mxu0 %v712_v12  ;;  %680 = vmatprep.mubr.bf16.mxu1 %v713_v13 }
  0x2a   :  { %673 = vmatmul.mubr.bf16.gmra.mxu0 %v714_v14  ;;  %681 = vmatmul.mubr.bf16.gmra.mxu1 %v715_v15 }
  0xe2   :  { %v670_v19 = vpop.f32.mrf.mxu0  ;;  %v678_v20 = vpop.f32.mrf.mxu1 }
  0xe3   :  { %v339_v23 = vadd.f32 %v670_v19, %v792_v16  ;;  %v347_v25 = vadd.f32 %v678_v20, %v792_v16 }
  0xe4   :  { %v216_v27 = vpop.f32.mrf.mxu0  ;;  %v248_v28 = vpop.f32.mrf.mxu1 }
  0xe5   :  { %v337_v31 = vadd.f32 %v792_v16, %v216_v27  ;;  %v345_v33 = vadd.f32 %v792_v16, %v248_v28  ;;  %v387_v43 = vadd.f32 %v556_v24, %v339_v23  ;;  %v395_v44 = vadd.f32 %v572_v26, %v347_v25 }
  0xe6   :  { %v671_v37 = vpop.f32.mrf.mxu0  ;;  %v679_v39 = vpop.f32.mrf.mxu1  ;;  %v577_v23 = vunpack.c.h.bf16 %v828_v36 }
  0xe7   :  { %v340_v47 = vadd.f32 %v671_v37, %v792_v16  ;;  %v348_v48 = vadd.f32 %v679_v39, %v792_v16  ;;  %v385_v53 = vadd.f32 %v552_v32, %v337_v31  ;;  %v393_v54 = vadd.f32 %v568_v34, %v345_v33 }
  0xe8   :  { %v219_v49 = vpop.f32.mrf.mxu0  ;;  %v251_v50 = vpop.f32.mrf.mxu1  ;;  %v403_v63 = vmax.f32 %v387_v43, 0.0  ;;  %v411_v0 = vmax.f32 %v395_v44, 0.0 }
  0xe9   :  { %v338_v55 = vadd.f32 %v792_v16, %v219_v49  ;;  %v346_v56 = vadd.f32 %v792_v16, %v251_v50  ;;  %v388_v57 = vadd.f32 %v557_v38, %v340_v47  ;;  %v396_v58 = vadd.f32 %v573_v40, %v348_v48 }
  0xea   :  { %v674_v59 = vpop.f32.mrf.mxu0  ;;  %v682_v60 = vpop.f32.mrf.mxu1  ;;  %v401_v9 = vmax.f32 %v385_v53, 0.0  ;;  %v409_v10 = vmax.f32 %v393_v54, 0.0 }
  0xeb   :  { %v386_v1 = vadd.f32 %v553_v41, %v338_v55  ;;  %v394_v2 = vadd.f32 %v569_v42, %v346_v56  ;;  %v404_v3 = vmax.f32 %v388_v57, 0.0  ;;  %v412_v4 = vmax.f32 %v396_v58, 0.0 }
  0xec   :  { %v343_v5 = vadd.f32 %v674_v59, %v792_v16  ;;  %v351_v6 = vadd.f32 %v682_v60, %v792_v16  ;;  %v232_v7 = vpop.f32.mrf.mxu0  ;;  %v264_v8 = vpop.f32.mrf.mxu1 }
  0xed   :  { %v402_v11 = vmax.f32 %v386_v1, 0.0  ;;  %v410_v12 = vmax.f32 %v394_v2, 0.0  ;;  %v590_v13 = vpack.c.bf16 %v404_v3, %v403_v63  ;;  %v610_v14 = vpack.c.bf16 %v412_v4, %v411_v0 }
  0xee   :  { %v341_v15 = vadd.f32 %v792_v16, %v232_v7  ;;  %v349_v17 = vadd.f32 %v792_v16, %v264_v8  ;;  %v675_v18 = vpop.f32.mrf.mxu0  ;;  %v683_v19 = vpop.f32.mrf.mxu1  ;;  %v391_v24 = vadd.f32 %v564_v45, %v343_v5  ;;  %v399_v25 = vadd.f32 %v580_v46, %v351_v6 }
  0xef   :  { %v585_v20 = vpack.c.bf16 %v402_v11, %v401_v9  ;;  %v605_v21 = vpack.c.bf16 %v410_v12, %v409_v10  ;;  %629 = vst [vmem:[%s878_s4 + $0x8] sm:$0xff] %v590_v13   ;;  %633 = vst [vmem:[%s878_s4 + $0x28] sm:$0xff] %v610_v14   ;;  %v344_v26 = vadd.f32 %v675_v18, %v792_v16 }
  0xf0   :  { %v352_v27 = vadd.f32 %v683_v19, %v792_v16  ;;  %v235_v28 = vpop.f32.mrf.mxu0  ;;  %v267_v29 = vpop.f32.mrf.mxu1  ;;  %v389_v30 = vadd.f32 %v560_v51, %v341_v15  ;;  %v397_v31 = vadd.f32 %v576_v52, %v349_v17  ;;  %v407_v38 = vmax.f32 %v391_v24, 0.0 }
  0xf1   :  { %586 = vst [vmem:[%s878_s4] sm:$0xff] %v585_v20   ;;  %632 = vst [vmem:[%s878_s4 + $0x20] sm:$0xff] %v605_v21   ;;  %v342_v32 = vadd.f32 %v792_v16, %v235_v28  ;;  %v350_v33 = vadd.f32 %v792_v16, %v267_v29  ;;  %v392_v34 = vadd.f32 %v565_v61, %v344_v26  ;;  %v415_v39 = vmax.f32 %v399_v25, 0.0 }
  0xf2   :  { %v400_v35 = vadd.f32 %v581_v62, %v352_v27  ;;  %v405_v42 = vmax.f32 %v389_v30, 0.0  ;;  %v413_v43 = vmax.f32 %v397_v31, 0.0 }
  0xf3   :  { %v390_v36 = vadd.f32 %v561_v22, %v342_v32  ;;  %v398_v37 = vadd.f32 %v577_v23, %v350_v33  ;;  %v408_v40 = vmax.f32 %v392_v34, 0.0 }
  0xf4   :  { %v416_v41 = vmax.f32 %v400_v35, 0.0 }
  0xf5   :  { %v406_v44 = vmax.f32 %v390_v36, 0.0  ;;  %v414_v45 = vmax.f32 %v398_v37, 0.0  ;;  %v600_v46 = vpack.c.bf16 %v408_v40, %v407_v38 }
  0xf6   :  { %v620_v47 = vpack.c.bf16 %v416_v41, %v415_v39 }
  0xf7   :  { %v595_v48 = vpack.c.bf16 %v406_v44, %v405_v42  ;;  %v615_v49 = vpack.c.bf16 %v414_v45, %v413_v43  ;;  %631 = vst [vmem:[%s878_s4 + $0x18] sm:$0xff] %v600_v46  }
  0xf8   :  { %635 = vst [vmem:[%s878_s4 + $0x38] sm:$0xff] %v620_v47  }
  0xf9   :  { %630 = vst [vmem:[%s878_s4 + $0x10] sm:$0xff] %v595_v48   ;;  %634 = vst [vmem:[%s878_s4 + $0x30] sm:$0xff] %v615_v49  }

// kernel: tsn_forward.28
= control target key start
LH: loop header
LB: loop body
LE: loop exit
PB: predicated region body
PF: predicated region fallthrough
CT: control target
= control target key end

     0   :  { %s335_s1 = inlined_call_operand.vmem [shape: bf16[128,128], index: 1, kind: input, shape index: {}]   ;;  %s336_s0 = inlined_call_operand.vmem [shape: bf16[32,128], index: 0, kind: input, shape index: {}]   ;;  %s337_s2 = inlined_call_operand.vmem [shape: f32[1,128], index: 2, kind: input, shape index: {}]   ;;  %s338_s3 = inlined_call_operand.vmem [shape: bf16[32,128], index: 3, kind: output, shape index: {}]  }
   0x1   :  { %v266_v0 = vld [vmem:[%s335_s1 + $0x38] sm:$0xff]   ;;  %v267_v1 = vld [vmem:[%s335_s1 + $0x30] sm:$0xff]   ;;  %v268_v2 = vld [vmem:[%s335_s1 + $0x28] sm:$0xff]  }
   0x2   :  { %246 = vmatprep.subr.bf16.mxu0 %v266_v0  ;;  %v269_v3 = vld [vmem:[%s335_s1 + $0x20] sm:$0xff]   ;;  %v270_v5 = vld [vmem:[%s335_s1 + $0x18] sm:$0xff]   ;;  %v271_v6 = vld [vmem:[%s335_s1 + $0x10] sm:$0xff]  }
   0x3   :  { %247 = vmatpush3.bf16.msra.mxu0 %v266_v0  ;;  %v274_v4 = vld [vmem:[%s336_s0] sm:$0xff]   ;;  %v272_v7 = vld [vmem:[%s335_s1 + $0x8] sm:$0xff]  }
   0x4   :  { %248 = vmatprep.subr.bf16.mxu0 %v267_v1  ;;  %262 = vmatprep.mubr.bf16.mxu0 %v274_v4  ;;  %v273_v8 = vld [vmem:[%s335_s1] sm:$0xff]   ;;  %v275_v9 = vld [vmem:[%s336_s0 + $0x8] sm:$0xff]  }
   0x5   :  { %v216_v11 = vld [vmem:[%s337_s2] ss:$0 sm:$0xff] }
   0x7   :  { %249 = vmatpush3.bf16.msra.mxu0 %v267_v1 }
   0x8   :  { %250 = vmatprep.subr.bf16.mxu0 %v268_v2 }
   0xb   :  { %251 = vmatpush3.bf16.msra.mxu0 %v268_v2 }
   0xc   :  { %252 = vmatprep.subr.bf16.mxu0 %v269_v3 }
   0xf   :  { %253 = vmatpush3.bf16.msra.mxu0 %v269_v3 }
  0x10   :  { %254 = vmatprep.subr.bf16.mxu0 %v270_v5 }
  0x13   :  { %255 = vmatpush3.bf16.msra.mxu0 %v270_v5 }
  0x14   :  { %256 = vmatprep.subr.bf16.mxu0 %v271_v6 }
  0x17   :  { %257 = vmatpush3.bf16.msra.mxu0 %v271_v6 }
  0x18   :  { %258 = vmatprep.subr.bf16.mxu0 %v272_v7 }
  0x1b   :  { %259 = vmatpush3.bf16.msra.mxu0 %v272_v7 }
  0x1c   :  { %260 = vmatprep.subr.bf16.mxu0 %v273_v8 }
  0x1f   :  { %261 = vmatpush3.bf16.msra.mxu0 %v273_v8 }
  0x22   :  { %263 = vmatmul.mubr.bf16.vlgmr.msra.gmra.mxu0 %v275_v9 }
  0xe2   :  { %v264_v10 = vpop.f32.mrf.mxu0 }
  0xe3   :  { %v180_v14 = vadd.f32 %v264_v10, %v216_v11 }
  0xe4   :  { %v141_v12 = vpop.f32.mrf.mxu0 }
  0xe5   :  { %v178_v17 = vadd.f32 %v216_v11, %v141_v12 }
  0xe6   :  { %v265_v13 = vpop.f32.mrf.mxu0 }
  0xe7   :  { %v181_v15 = vadd.f32 %v265_v13, %v216_v11 }
  0xe8   :  { %v144_v16 = vpop.f32.mrf.mxu0 }
  0xe9   :  { %v233_v18 = vpack.c.bf16 %v181_v15, %v180_v14  ;;  %v179_v19 = vadd.f32 %v216_v11, %v144_v16 }
  0xeb   :  { %235 = vst [vmem:[%s338_s3 + $0x8] sm:$0xff] %v233_v18   ;;  %v228_v20 = vpack.c.bf16 %v179_v19, %v178_v17 }
  0xed   :  { %229 = vst [vmem:[%s338_s3] sm:$0xff] %v228_v20  }

// kernel: tsn_forward.23
= control target key start
LH: loop header
LB: loop body
LE: loop exit
PB: predicated region body
PF: predicated region fallthrough
CT: control target
= control target key end

     0   :  { %s2176_s18 = smov 0   ;;  %s2178_s19 = smov 0   ;;  %s2584_s0 = inlined_call_operand.vmem [shape: bf16[2,10,10,128], index: 0, kind: input, shape index: {}, may-alias: {0,1,2}]   ;;  %s2585_s1 = inlined_call_operand.vmem [shape: bf16[2,10,10,128], index: 1, kind: input, shape index: {}, may-alias: {0,1,2}]   ;;  %s2586_s2 = inlined_call_operand.vmem [shape: bf16[2,10,10,128], index: 2, kind: input, shape index: {}, may-alias: {0,1,2}]   ;;  %s2587_s3 = inlined_call_operand.vmem [shape: bf16[3,3,128,128], index: 3, kind: input, shape index: {}]   ;;  %s2588_s4 = inlined_call_operand.vmem [shape: f32[1,128], index: 4, kind: input, shape index: {}]   ;;  %s2589_s5 = inlined_call_operand.vmem [shape: bf16[2,8,8,128], index: 5, kind: output, shape index: {}]  }
   0x1   :  { %s2180_s20 = smov 0   ;;  %s2182_s21 = smov 0  }
   0x2   :  { %s2184_s22 = smov 0  }
   0x3 LB: > { %s24_s23 = sadd.s32 1, %s2134_s20  ;;  %s27_s24 = sadd.s32 1, %s2138_s21  ;;  %s2142_s22 = sphi %s2184_s22, %s15_s22   ;;  %s2138_s21 = sphi %s2182_s21, %s2593_s21   ;;  %s2134_s20 = sphi %s2180_s20, %s2592_s20   ;;  %s2130_s19 = sphi %s2178_s19, %s2591_s19   ;;  %s2126_s18 = sphi %s2176_s18, %s2590_s18  }
   0x4   : > { %p25_p0 = scmp.ge.s32.totalorder %s24_s23, 8  ;;  %p1504_p1 = scmp.ge.s32.totalorder %s2142_s22, 1 }
   0x5   : > { %p247_p2 = scmp.lt.s32.totalorder %s2142_s22, 17 }
   0x6   : > { %s2595_s23 = smov (%p25_p0, %s24_s23), 0  ;;  %s2597_s24 = smov (!%p25_p0, %s27_s24), %s2138_s21 }
   0x7   : > { %p248_p3 = pnand %p1504_p1, %p247_p2  ;;  %p29_p4 = scmp.ge.s32.totalorder %s2597_s24, 2 }
   0x8   : > { %p302_p5 = scmp.lt.s32.totalorder (!%p248_p3), %s2130_s19, 1  ;;  %p304_p6 = scmp.lt.s32.totalorder (!%p248_p3), %s2126_s18, 9 }
   0x9   : > { %s2599_s24 = smov (%p29_p4, %s2597_s24), 0  ;;  %251 = sbr.rel (%p248_p3) target bundleno = 377 (0x179), region = 40 }
   0xa   : > { %s311_s26 = sadd.s32 (!%p248_p3), 1, %s2126_s18  ;;  %p335_p9 = scmp.lt.s32.totalorder (!%p248_p3), %s2126_s18, 7 }
   0xb   : > { %p314_p7 = scmp.lt.s32.totalorder (!%p248_p3), %s311_s26, 9 }
   0xe   : > { %v2026_v0 = vld [vmem:[%s2587_s3 + $0x78] sm:$0xff]   ;;  %v2144_v1 = vmov 0.0   ;;  %v2028_v3 = vld [vmem:[%s2587_s3 + $0x70] sm:$0xff]   ;;  %vm2145_vm0 = vmmov 0   ;;  %s2601_s19 = smov (!%p302_p5, %s2130_s19), 1  ;;  %v2030_v5 = vld [vmem:[%s2587_s3 + $0x68] sm:$0xff]  }
   0xf   : > { %1803 = vmatprep.subr.bf16.mxu0 %v2144_v1  ;;  %1823 = vmatprep.subr.bf16.mxu1 %v2144_v1  ;;  %v2027_v2 = vld [vmem:[%s2587_s3 + $0x38] sm:$0xff]   ;;  %v2029_v4 = vld [vmem:[%s2587_s3 + $0x30] sm:$0xff]   ;;  %s305_s8 = scalar_select %p304_p6, %s2126_s18, 9  ;;  %v2031_v6 = vld [vmem:[%s2587_s3 + $0x28] sm:$0xff]  }
  0x10   : > { %1804 = vmatpush3.bf16.msra.mxu0 %v2026_v0  ;;  %1819 = vmatprep.mubr.msk.bf16.mxu0 %vm2145_vm0, %v2144_v1  ;;  %s2240_s11 = smul.u32 20, %s2601_s19  ;;  %v2032_v7 = vld [vmem:[%s2587_s3 + $0x60] sm:$0xff]   ;;  %v2034_v9 = vld [vmem:[%s2587_s3 + $0x58] sm:$0xff]   ;;  %v2036_v14 = vld [vmem:[%s2587_s3 + $0x50] sm:$0xff]   ;;  %s2603_s26 = smov (!%p314_p7, %s311_s26), 9 }
  0x11   : > { %1824 = vmatpush3.bf16.msra.mxu1 %v2027_v2  ;;  %1805 = vmatprep.subr.bf16.mxu0 %v2144_v1  ;;  %s1505_s14 = sshll.u32 %s305_s8, 1  ;;  %v2033_v8 = vld [vmem:[%s2587_s3 + $0x20] sm:$0xff]   ;;  %v2035_v10 = vld [vmem:[%s2587_s3 + $0x18] sm:$0xff]   ;;  %v2037_v15 = vld [vmem:[%s2587_s3 + $0x10] sm:$0xff]  }
  0x12   : > { %1825 = vmatprep.subr.bf16.mxu1 %v2144_v1  ;;  %1839 = vmatprep.mubr.msk.bf16.mxu1 %vm2145_vm0, %v2144_v1  ;;  %s308_s15 = sadd.s32 %s2240_s11, %s1505_s14  ;;  %v2038_v17 = vld [vmem:[%s2587_s3 + $0x48] sm:$0xff]   ;;  %v2040_v21 = vld [vmem:[%s2587_s3 + $0x40] sm:$0xff]   ;;  %v2043_v24 = vld [vmem:[%s2587_s3 + $0xb8] sm:$0xff]   ;;  %s1507_s14 = sshll.u32 %s2603_s26, 1 }
  0x13   : > { %s1506_s25 = sshll.u32 %s308_s15, 2  ;;  %v2039_v18 = vld [vmem:[%s2587_s3 + $0x8] sm:$0xff]   ;;  %v2041_v22 = vld [vmem:[%s2587_s3] sm:$0xff]   ;;  %v2044_v25 = vld [vmem:[%s2587_s3 + $0xf8] sm:$0xff]   ;;  %s318_s27 = sadd.s32 %s2240_s11, %s1507_s14 }
  0x14   : > { %1806 = vmatpush3.bf16.msra.mxu0 %v2028_v3  ;;  %s2259_s30 = scalar_lea.vmem %s2584_s0, %s1506_s25  ;;  %v2045_v26 = vld [vmem:[%s2587_s3 + $0xb0] sm:$0xff]   ;;  %v2047_v28 = vld [vmem:[%s2587_s3 + $0xa8] sm:$0xff]   ;;  %v2049_v30 = vld [vmem:[%s2587_s3 + $0xa0] sm:$0xff]   ;;  %s1508_s29 = sshll.u32 %s318_s27, 2 }
  0x15   : > { %1826 = vmatpush3.bf16.msra.mxu1 %v2029_v4  ;;  %1807 = vmatprep.subr.bf16.mxu0 %v2144_v1  ;;  %v342_v11 = vld [vmem:[%s2259_s30] sm:$0xf]  ;;  %v2271_v12 = vld [vmem:[%s2259_s30 + $0x4] sm:$0x1]  ;;  %v2046_v27 = vld [vmem:[%s2587_s3 + $0xf0] sm:$0xff]   ;;  %s2372_s12 = scalar_lea.vmem %s2585_s1, %s1508_s29 }
  0x16   : > { %1827 = vmatprep.subr.bf16.mxu1 %v2144_v1  ;;  %v1529_v13 = vcombine.low %v342_v11, %v2271_v12  ;;  %v2048_v29 = vld [vmem:[%s2587_s3 + $0xe8] sm:$0xff]   ;;  %v2050_v31 = vld [vmem:[%s2587_s3 + $0xe0] sm:$0xff]   ;;  %v2051_v32 = vld [vmem:[%s2587_s3 + $0x98] sm:$0xff]  }
  0x17   : > { %v2052_v33 = vld [vmem:[%s2587_s3 + $0xd8] sm:$0xff]   ;;  %v2053_v34 = vld [vmem:[%s2587_s3 + $0x90] sm:$0xff]   ;;  %v2055_v36 = vld [vmem:[%s2587_s3 + $0x88] sm:$0xff]  }
  0x18   : > { %1808 = vmatpush3.bf16.msra.mxu0 %v2030_v5  ;;  %v385_v16 = vshll.u32 %v1529_v13, 16  ;;  %v383_v19 = vshrl.u32 %v1529_v13, 16  ;;  %v2054_v35 = vld [vmem:[%s2587_s3 + $0xd0] sm:$0xff]   ;;  %v566_v37 = vld [vmem:[%s2259_s30] sm:$0xe]  ;;  %v2056_v38 = vld [vmem:[%s2587_s3 + $0xc8] sm:$0xff]  }
  0x19   : > { %1828 = vmatpush3.bf16.msra.mxu1 %v2031_v6  ;;  %1809 = vmatprep.subr.bf16.mxu0 %v2144_v1  ;;  %v1562_v39 = vcombine.low %v566_v37, %v2271_v12  ;;  %v2057_v40 = vld [vmem:[%s2587_s3 + $0x80] sm:$0xff]   ;;  %v2060_v43 = vld [vmem:[%s2587_s3 + $0x138] sm:$0xff]   ;;  %v2062_v46 = vld [vmem:[%s2587_s3 + $0x130] sm:$0xff]   ;;  %s322_s30 = sadd.s32 2, %s2126_s18  ;;  %s2607_s18 = smov (!%p335_p9, %s2126_s18), 7 }
  0x1a   : > { %1829 = vmatprep.subr.bf16.mxu1 %v2144_v1  ;;  %v387_v20 = vrot.slane %v385_v16, 1  ;;  %v2058_v41 = vld [vmem:[%s2587_s3 + $0xc0] sm:$0xff]   ;;  %v2061_v45 = vld [vmem:[%s2587_s3 + $0x178] sm:$0xff]   ;;  %v2063_v47 = vld [vmem:[%s2587_s3 + $0x170] sm:$0xff]   ;;  %p325_p8 = scmp.lt.s32.totalorder %s322_s30, 9 }
  0x1b   : > { %v587_v42 = vrot.slane %v1562_v39, 1  ;;  %v678_v44 = vld [vmem:[%s2372_s12] sm:$0xf]  ;;  %v2064_v48 = vld [vmem:[%s2587_s3 + $0x128] sm:$0xff]   ;;  %v786_v53 = vld [vmem:[%s2372_s12 + $0x4] sm:$0x1] }
  0x1c   : > { %1810 = vmatpush3.bf16.msra.mxu0 %v2032_v7  ;;  %v388_v23 = vor.u32 %v387_v20, %v383_v19  ;;  %v2065_v49 = vld [vmem:[%s2587_s3 + $0x168] sm:$0xff]   ;;  %v2066_v50 = vld [vmem:[%s2587_s3 + $0x120] sm:$0xff]   ;;  %v2068_v54 = vld [vmem:[%s2587_s3 + $0x118] sm:$0xff]   ;;  %s2605_s30 = smov (!%p325_p8, %s322_s30), 9 }
  0x1d   : > { %1830 = vmatpush3.bf16.msra.mxu1 %v2033_v8  ;;  %1811 = vmatprep.subr.bf16.mxu0 %v2144_v1  ;;  %v2067_v51 = vld [vmem:[%s2587_s3 + $0x160] sm:$0xff]   ;;  %v2069_v55 = vld [vmem:[%s2587_s3 + $0x158] sm:$0xff]   ;;  %v2070_v57 = vld [vmem:[%s2587_s3 + $0x110] sm:$0xff]   ;;  %s1509_s28 = sshll.u32 %s2605_s30, 1 }
  0x1e   : > { %1831 = vmatprep.subr.bf16.mxu1 %v2144_v1  ;;  %v785_v52 = vld [vmem:[%s2372_s12] sm:$0xf]  ;;  %v2071_v58 = vld [vmem:[%s2587_s3 + $0x150] sm:$0xff]   ;;  %v2072_v60 = vld [vmem:[%s2587_s3 + $0x108] sm:$0xff]   ;;  %s329_s7 = sadd.s32 %s2240_s11, %s1509_s28 }
  0x1f   : > { %v1611_v56 = vcombine.low %v785_v52, %v786_v53  ;;  %v2073_v61 = vld [vmem:[%s2587_s3 + $0x148] sm:$0xff]   ;;  %v906_v62 = vld [vmem:[%s2372_s12] sm:$0xe]  ;;  %v2077_v6 = vld [vmem:[%s2587_s3 + $0x1b8] sm:$0xff]   ;;  %s1510_s30 = sshll.u32 %s329_s7, 2 }
  0x20   : > { %1812 = vmatpush3.bf16.msra.mxu0 %v2034_v9  ;;  %v2074_v2 = vld [vmem:[%s2587_s3 + $0x100] sm:$0xff]   ;;  %v1636_v3 = vcombine.low %v906_v62, %v786_v53  ;;  %v2079_v8 = vld [vmem:[%s2587_s3 + $0x1f8] sm:$0xff]   ;;  %v2080_v9 = vld [vmem:[%s2587_s3 + $0x1b0] sm:$0xff]   ;;  %s2488_s16 = scalar_lea.vmem %s2586_s2, %s1510_s30 }
  0x21   : > { %1832 = vmatpush3.bf16.msra.mxu1 %v2035_v10  ;;  %1813 = vmatprep.subr.bf16.mxu0 %v2144_v1  ;;  %v812_v59 = vshll.u32 %v1611_v56, 16  ;;  %v810_v63 = vshrl.u32 %v1611_v56, 16  ;;  %v2075_v4 = vld [vmem:[%s2587_s3 + $0x140] sm:$0xff]   ;;  %v2081_v10 = vld [vmem:[%s2587_s3 + $0x1f0] sm:$0xff]   ;;  %v2083_v12 = vld [vmem:[%s2587_s3 + $0x1e8] sm:$0xff]  }
  0x22   : > { %1833 = vmatprep.subr.bf16.mxu1 %v2144_v1  ;;  %v927_v7 = vrot.slane %v1636_v3, 1  ;;  %v2084_v13 = vld [vmem:[%s2587_s3 + $0x1a0] sm:$0xff]   ;;  %v2087_v16 = vld [vmem:[%s2587_s3 + $0x1d8] sm:$0xff]   ;;  %v2088_v19 = vld [vmem:[%s2587_s3 + $0x190] sm:$0xff]  }
  0x23   : > { %v814_v0 = vrot.slane %v812_v59, 1  ;;  %v2101_v37 = vld [vmem:[%s2587_s3 + $0x208] sm:$0xff]  }
  0x24   : > { %1814 = vmatpush3.bf16.msra.mxu0 %v2036_v14  ;;  %v2085_v14 = vld [vmem:[%s2587_s3 + $0x1e0] sm:$0xff]  }
  0x25   : > { %1834 = vmatpush3.bf16.msra.mxu1 %v2037_v15  ;;  %1815 = vmatprep.subr.bf16.mxu0 %v2144_v1  ;;  %v815_v5 = vor.u32 %v814_v0, %v810_v63  ;;  %v2086_v15 = vld [vmem:[%s2587_s3 + $0x198] sm:$0xff]  }
  0x26   : > { %1835 = vmatprep.subr.bf16.mxu1 %v2144_v1 }
  0x28   : > { %1816 = vmatpush3.bf16.msra.mxu0 %v2038_v17  ;;  %v1125_v17 = vld [vmem:[%s2488_s16] sm:$0xf] }
  0x29   : > { %1836 = vmatpush3.bf16.msra.mxu1 %v2039_v18  ;;  %1817 = vmatprep.subr.bf16.mxu0 %v2144_v1  ;;  %v1126_v18 = vld [vmem:[%s2488_s16 + $0x4] sm:$0x1] }
  0x2a   : > { %1837 = vmatprep.subr.bf16.mxu1 %v2144_v1  ;;  %v1685_v20 = vcombine.low %v1125_v17, %v1126_v18 }
  0x2c   : > { %1818 = vmatpush3.bf16.msra.mxu0 %v2040_v21  ;;  %v2089_v21 = vld [vmem:[%s2587_s3 + $0x1d0] sm:$0xff]  }
  0x2d   : > { %1838 = vmatpush3.bf16.msra.mxu1 %v2041_v22  ;;  %1843 = vmatprep.subr.bf16.mxu0 %v2144_v1  ;;  %v2090_v22 = vld [vmem:[%s2587_s3 + $0x188] sm:$0xff]  }
  0x2e   : > { %1863 = vmatprep.subr.bf16.mxu1 %v2144_v1 }
  0x2f   : > { %1820 = vmatmul.mubr.bf16.vlgmr.msra.gmra.mxu0 %v388_v23  ;;  %v1152_v23 = vshll.u32 %v1685_v20, 16 }
  0x30   : > { %1840 = vmatmul.mubr.bf16.vlgmr.msra.gmra.mxu1 %v342_v11  ;;  %1844 = vmatpush3.bf16.msra.mxu0 %v2043_v24  ;;  %v2082_v11 = vld [vmem:[%s2587_s3 + $0x1a8] sm:$0xff]  }
  0x31   : > { %1864 = vmatpush3.bf16.msra.mxu1 %v2044_v25  ;;  %1845 = vmatprep.subr.bf16.mxu0 %v2144_v1  ;;  %v2091_v24 = vld [vmem:[%s2587_s3 + $0x1c8] sm:$0xff]   ;;  %v2092_v25 = vld [vmem:[%s2587_s3 + $0x180] sm:$0xff]  }
  0x32   : > { %1865 = vmatprep.subr.bf16.mxu1 %v2144_v1  ;;  %1859 = vmatprep.mubr.msk.bf16.mxu0 %vm2145_vm0, %v2144_v1 }
  0x33   : > { %1879 = vmatprep.mubr.msk.bf16.mxu1 %vm2145_vm0, %v2144_v1 }
  0x34   : > { %1846 = vmatpush3.bf16.msra.mxu0 %v2045_v26  ;;  %v1150_v26 = vshrl.u32 %v1685_v20, 16 }
  0x35   : > { %1866 = vmatpush3.bf16.msra.mxu1 %v2046_v27  ;;  %1847 = vmatprep.subr.bf16.mxu0 %v2144_v1  ;;  %v1154_v27 = vrot.slane %v1152_v23, 1 }
  0x36   : > { %1867 = vmatprep.subr.bf16.mxu1 %v2144_v1 }
  0x38   : > { %1848 = vmatpush3.bf16.msra.mxu0 %v2047_v28  ;;  %v2093_v28 = vld [vmem:[%s2587_s3 + $0x1c0] sm:$0xff]  }
  0x39   : > { %1868 = vmatpush3.bf16.msra.mxu1 %v2048_v29  ;;  %1849 = vmatprep.subr.bf16.mxu0 %v2144_v1  ;;  %v1018_v29 = vld [vmem:[%s2488_s16] sm:$0xf] }
  0x3a   : > { %1869 = vmatprep.subr.bf16.mxu1 %v2144_v1 }
  0x3c   : > { %1850 = vmatpush3.bf16.msra.mxu0 %v2049_v30  ;;  %v2094_v30 = vld [vmem:[%s2587_s3 + $0x238] sm:$0xff]  }
  0x3d   : > { %1870 = vmatpush3.bf16.msra.mxu1 %v2050_v31  ;;  %1851 = vmatprep.subr.bf16.mxu0 %v2144_v1  ;;  %v1155_v31 = vor.u32 %v1154_v27, %v1150_v26 }
  0x3e   : > { %1871 = vmatprep.subr.bf16.mxu1 %v2144_v1 }
  0x40   : > { %1852 = vmatpush3.bf16.msra.mxu0 %v2051_v32  ;;  %v2096_v32 = vld [vmem:[%s2587_s3 + $0x230] sm:$0xff]  }
  0x41   : > { %1872 = vmatpush3.bf16.msra.mxu1 %v2052_v33  ;;  %1853 = vmatprep.subr.bf16.mxu0 %v2144_v1  ;;  %v2097_v33 = vld [vmem:[%s2587_s3 + $0x228] sm:$0xff]  }
  0x42   : > { %1873 = vmatprep.subr.bf16.mxu1 %v2144_v1 }
  0x44   : > { %1854 = vmatpush3.bf16.msra.mxu0 %v2053_v34  ;;  %v2098_v34 = vld [vmem:[%s2587_s3 + $0x220] sm:$0xff]  }
  0x45   : > { %1874 = vmatpush3.bf16.msra.mxu1 %v2054_v35  ;;  %1855 = vmatprep.subr.bf16.mxu0 %v2144_v1  ;;  %v2099_v35 = vld [vmem:[%s2587_s3 + $0x218] sm:$0xff]  }
  0x46   : > { %1875 = vmatprep.subr.bf16.mxu1 %v2144_v1 }
  0x48   : > { %1856 = vmatpush3.bf16.msra.mxu0 %v2055_v36  ;;  %v2100_v36 = vld [vmem:[%s2587_s3 + $0x210] sm:$0xff]  }
  0x49   : > { %1876 = vmatpush3.bf16.msra.mxu1 %v2056_v38  ;;  %1857 = vmatprep.subr.bf16.mxu0 %v2144_v1  ;;  %v1246_v38 = vld [vmem:[%s2488_s16] sm:$0xe]  ;;  %s1511_s16 = sshll.u32 %s2601_s19, 3 }
  0x4a   : > { %1877 = vmatprep.subr.bf16.mxu1 %v2144_v1  ;;  %v1710_v39 = vcombine.low %v1246_v38, %v1126_v18  ;;  %s338_s14 = sadd.s32 %s1511_s16, %s2607_s18  ;;  %v1719_v18 = vld [vmem:[%s2588_s4] ss:$0 sm:$0xff] }
  0x4b   : > { %s1512_s25 = sshll.u32 %s338_s14, 2 }
  0x4c   : > { %1858 = vmatpush3.bf16.msra.mxu0 %v2057_v40  ;;  %v2102_v40 = vld [vmem:[%s2587_s3 + $0x200] sm:$0xff]   ;;  %s340_s28 = scalar_lea.vmem %s2589_s5, %s1512_s25 }
  0x4d   : > { %1878 = vmatpush3.bf16.msra.mxu1 %v2058_v41  ;;  %1883 = vmatprep.subr.bf16.mxu0 %v2144_v1  ;;  %v1267_v41 = vrot.slane %v1710_v39, 1 }
  0x4e   : > { %1903 = vmatprep.subr.bf16.mxu1 %v2144_v1 }
  0x4f   : > { %1860 = vmatmul.mubr.bf16.vlgmr.msra.gmra.mxu0 %v587_v42 }
  0x50   : > { %1884 = vmatpush3.bf16.msra.mxu0 %v2060_v43  ;;  %1880 = vmatmul.mubr.bf16.vlgmr.msra.gmra.mxu1 %v678_v44 }
  0x51   : > { %1904 = vmatpush3.bf16.msra.mxu1 %v2061_v45  ;;  %1885 = vmatprep.subr.bf16.mxu0 %v2144_v1 }
  0x52   : > { %1905 = vmatprep.subr.bf16.mxu1 %v2144_v1  ;;  %1899 = vmatprep.mubr.msk.bf16.mxu0 %vm2145_vm0, %v2144_v1 }
  0x53   : > { %1919 = vmatprep.mubr.msk.bf16.mxu1 %vm2145_vm0, %v2144_v1 }
  0x54   : > { %1886 = vmatpush3.bf16.msra.mxu0 %v2062_v46 }
  0x55   : > { %1906 = vmatpush3.bf16.msra.mxu1 %v2063_v47  ;;  %1887 = vmatprep.subr.bf16.mxu0 %v2144_v1 }
  0x56   : > { %1907 = vmatprep.subr.bf16.mxu1 %v2144_v1 }
  0x58   : > { %1888 = vmatpush3.bf16.msra.mxu0 %v2064_v48 }
  0x59   : > { %1908 = vmatpush3.bf16.msra.mxu1 %v2065_v49  ;;  %1889 = vmatprep.subr.bf16.mxu0 %v2144_v1 }
  0x5a   : > { %1909 = vmatprep.subr.bf16.mxu1 %v2144_v1 }
  0x5c   : > { %1890 = vmatpush3.bf16.msra.mxu0 %v2066_v50 }
  0x5d   : > { %1910 = vmatpush3.bf16.msra.mxu1 %v2067_v51  ;;  %1891 = vmatprep.subr.bf16.mxu0 %v2144_v1 }
  0x5e   : > { %1911 = vmatprep.subr.bf16.mxu1 %v2144_v1 }
  0x60   : > { %1892 = vmatpush3.bf16.msra.mxu0 %v2068_v54 }
  0x61   : > { %1912 = vmatpush3.bf16.msra.mxu1 %v2069_v55  ;;  %1893 = vmatprep.subr.bf16.mxu0 %v2144_v1 }
  0x62   : > { %1913 = vmatprep.subr.bf16.mxu1 %v2144_v1 }
  0x64   : > { %1894 = vmatpush3.bf16.msra.mxu0 %v2070_v57 }
  0x65   : > { %1914 = vmatpush3.bf16.msra.mxu1 %v2071_v58  ;;  %1895 = vmatprep.subr.bf16.mxu0 %v2144_v1 }
  0x66   : > { %1915 = vmatprep.subr.bf16.mxu1 %v2144_v1 }
  0x68   : > { %1896 = vmatpush3.bf16.msra.mxu0 %v2072_v60 }
  0x69   : > { %1916 = vmatpush3.bf16.msra.mxu1 %v2073_v61  ;;  %1897 = vmatprep.subr.bf16.mxu0 %v2144_v1 }
  0x6a   : > { %1917 = vmatprep.subr.bf16.mxu1 %v2144_v1 }
  0x6c   : > { %1898 = vmatpush3.bf16.msra.mxu0 %v2074_v2 }
  0x6d   : > { %1918 = vmatpush3.bf16.msra.mxu1 %v2075_v4  ;;  %1923 = vmatprep.subr.bf16.mxu0 %v2144_v1 }
  0x6e   : > { %1943 = vmatprep.subr.bf16.mxu1 %v2144_v1 }
  0x6f   : > { %1900 = vmatmul.mubr.bf16.vlgmr.msra.gmra.mxu0 %v815_v5 }
  0x70   : > { %1924 = vmatpush3.bf16.msra.mxu0 %v2077_v6  ;;  %1920 = vmatmul.mubr.bf16.vlgmr.msra.gmra.mxu1 %v927_v7 }
  0x71   : > { %1944 = vmatpush3.bf16.msra.mxu1 %v2079_v8  ;;  %1925 = vmatprep.subr.bf16.mxu0 %v2144_v1 }
  0x72   : > { %1945 = vmatprep.subr.bf16.mxu1 %v2144_v1  ;;  %1939 = vmatprep.mubr.msk.bf16.mxu0 %vm2145_vm0, %v2144_v1 }
  0x73   : > { %1959 = vmatprep.mubr.msk.bf16.mxu1 %vm2145_vm0, %v2144_v1 }
  0x74   : > { %1926 = vmatpush3.bf16.msra.mxu0 %v2080_v9 }
  0x75   : > { %1946 = vmatpush3.bf16.msra.mxu1 %v2081_v10  ;;  %1927 = vmatprep.subr.bf16.mxu0 %v2144_v1 }
  0x76   : > { %1947 = vmatprep.subr.bf16.mxu1 %v2144_v1 }
  0x78   : > { %1928 = vmatpush3.bf16.msra.mxu0 %v2082_v11 }
  0x79   : > { %1948 = vmatpush3.bf16.msra.mxu1 %v2083_v12  ;;  %1929 = vmatprep.subr.bf16.mxu0 %v2144_v1 }
  0x7a   : > { %1949 = vmatprep.subr.bf16.mxu1 %v2144_v1 }
  0x7c   : > { %1930 = vmatpush3.bf16.msra.mxu0 %v2084_v13 }
  0x7d   : > { %1950 = vmatpush3.bf16.msra.mxu1 %v2085_v14  ;;  %1931 = vmatprep.subr.bf16.mxu0 %v2144_v1 }
  0x7e   : > { %1951 = vmatprep.subr.bf16.mxu1 %v2144_v1 }
  0x80   : > { %1932 = vmatpush3.bf16.msra.mxu0 %v2086_v15 }
  0x81   : > { %1952 = vmatpush3.bf16.msra.mxu1 %v2087_v16  ;;  %1933 = vmatprep.subr.bf16.mxu0 %v2144_v1 }
  0x82   : > { %1953 = vmatprep.subr.bf16.mxu1 %v2144_v1 }
  0x84   : > { %1934 = vmatpush3.bf16.msra.mxu0 %v2088_v19 }
  0x85   : > { %1954 = vmatpush3.bf16.msra.mxu1 %v2089_v21  ;;  %1935 = vmatprep.subr.bf16.mxu0 %v2144_v1 }
  0x86   : > { %1955 = vmatprep.subr.bf16.mxu1 %v2144_v1 }
  0x88   : > { %1936 = vmatpush3.bf16.msra.mxu0 %v2090_v22 }
  0x89   : > { %1956 = vmatpush3.bf16.msra.mxu1 %v2091_v24  ;;  %1937 = vmatprep.subr.bf16.mxu0 %v2144_v1 }
  0x8a   : > { %1957 = vmatprep.subr.bf16.mxu1 %v2144_v1 }
  0x8c   : > { %1938 = vmatpush3.bf16.msra.mxu0 %v2092_v25 }
  0x8d   : > { %1958 = vmatpush3.bf16.msra.mxu1 %v2093_v28  ;;  %1963 = vmatprep.subr.bf16.mxu0 %v2144_v1 }
  0x8f   : > { %1940 = vmatmul.mubr.bf16.vlgmr.msra.gmra.mxu0 %v1018_v29 }
  0x90   : > { %1964 = vmatpush3.bf16.msra.mxu0 %v2094_v30  ;;  %1960 = vmatmul.mubr.bf16.vlgmr.msra.gmra.mxu1 %v1155_v31 }
  0x91   : > { %1965 = vmatprep.subr.bf16.mxu0 %v2144_v1  ;;  %1979 = vmatprep.mubr.msk.bf16.mxu0 %vm2145_vm0, %v2144_v1 }
  0x94   : > { %1966 = vmatpush3.bf16.msra.mxu0 %v2096_v32 }
  0x95   : > { %1967 = vmatprep.subr.bf16.mxu0 %v2144_v1 }
  0x98   : > { %1968 = vmatpush3.bf16.msra.mxu0 %v2097_v33 }
  0x99   : > { %1969 = vmatprep.subr.bf16.mxu0 %v2144_v1 }
  0x9c   : > { %1970 = vmatpush3.bf16.msra.mxu0 %v2098_v34 }
  0x9d   : > { %1971 = vmatprep.subr.bf16.mxu0 %v2144_v1 }
  0xa0   : > { %1972 = vmatpush3.bf16.msra.mxu0 %v2099_v35 }
  0xa1   : > { %1973 = vmatprep.subr.bf16.mxu0 %v2144_v1 }
  0xa4   : > { %1974 = vmatpush3.bf16.msra.mxu0 %v2100_v36 }
  0xa5   : > { %1975 = vmatprep.subr.bf16.mxu0 %v2144_v1 }
  0xa8   : > { %1976 = vmatpush3.bf16.msra.mxu0 %v2101_v37 }
  0xa9   : > { %1977 = vmatprep.subr.bf16.mxu0 %v2144_v1 }
  0xac   : > { %1978 = vmatpush3.bf16.msra.mxu0 %v2102_v40 }
  0xaf   : > { %1980 = vmatmul.mubr.bf16.vlgmr.msra.gmra.mxu0 %v1267_v41 }
  0xef   : > { %v472_v42 = vpop.f32.mrf.mxu0 }
  0xf0   : > { %v560_v43 = vpop.f32.mrf.mxu1 }
  0xf1   : > { %v561_v44 = vadd.f32 %v560_v43, %v472_v42  ;;  %v1821_v45 = vpop.f32.mrf.mxu0 }
  0xf2   : > { %v1841_v46 = vpop.f32.mrf.mxu1 }
  0xf3   : > { %v475_v47 = vpop.f32.mrf.mxu0 }
  0xf4   : > { %v563_v48 = vpop.f32.mrf.mxu1 }
  0xf5   : > { %v1822_v49 = vpop.f32.mrf.mxu0 }
  0xf6   : > { %v1842_v50 = vpop.f32.mrf.mxu1 }
 0x10f   : > { %v671_v51 = vpop.f32.mrf.mxu0 }
 0x110   : > { %v677_v52 = vadd.f32 %v671_v51, %v561_v44  ;;  %v778_v53 = vpop.f32.mrf.mxu1 }
 0x111   : > { %v1861_v54 = vpop.f32.mrf.mxu0 }
 0x112   : > { %v784_v55 = vadd.f32 %v778_v53, %v677_v52  ;;  %v1881_v56 = vpop.f32.mrf.mxu1 }
 0x113   : > { %v674_v57 = vpop.f32.mrf.mxu0 }
 0x114   : > { %v781_v1 = vpop.f32.mrf.mxu1 }
 0x115   : > { %v1862_v58 = vpop.f32.mrf.mxu0 }
 0x116   : > { %v1882_v59 = vpop.f32.mrf.mxu1 }
 0x12f   : > { %v899_v60 = vpop.f32.mrf.mxu0 }
 0x130   : > { %v1011_v61 = vpop.f32.mrf.mxu1  ;;  %v905_v13 = vadd.f32 %v899_v60, %v784_v55 }
 0x131   : > { %v1901_v62 = vpop.f32.mrf.mxu0 }
 0x132   : > { %v1921_v63 = vpop.f32.mrf.mxu1  ;;  %v1017_v14 = vadd.f32 %v1011_v61, %v905_v13 }
 0x133   : > { %v902_v0 = vpop.f32.mrf.mxu0 }
 0x134   : > { %v1014_v2 = vpop.f32.mrf.mxu1 }
 0x135   : > { %v1902_v3 = vpop.f32.mrf.mxu0 }
 0x136   : > { %v1922_v4 = vpop.f32.mrf.mxu1 }
 0x14f   : > { %v1118_v5 = vpop.f32.mrf.mxu0 }
 0x150   : > { %v1239_v6 = vpop.f32.mrf.mxu1  ;;  %v1124_v15 = vadd.f32 %v1118_v5, %v1017_v14 }
 0x151   : > { %v1941_v7 = vpop.f32.mrf.mxu0 }
 0x152   : > { %v1961_v8 = vpop.f32.mrf.mxu1  ;;  %v1245_v16 = vadd.f32 %v1239_v6, %v1124_v15 }
 0x153   : > { %v1121_v9 = vpop.f32.mrf.mxu0 }
 0x154   : > { %v1242_v10 = vpop.f32.mrf.mxu1 }
 0x155   : > { %v1942_v11 = vpop.f32.mrf.mxu0 }
 0x156   : > { %v1962_v12 = vpop.f32.mrf.mxu1 }
 0x16f   : > { %v1351_v17 = vpop.f32.mrf.mxu0 }
 0x170   : > { %v1357_v19 = vadd.f32 %v1351_v17, %v1245_v16 }
 0x171   : > { %v1981_v20 = vpop.f32.mrf.mxu0 }
 0x172   : > { %v1365_v21 = vadd.f32 %v1719_v18, %v1357_v19 }
 0x173   : > { %v1354_v22 = vpop.f32.mrf.mxu0 }
 0x174   : > { %v1366_v23 = vmax.f32 %v1365_v21, 0.0 }
 0x175   : > { %v1982_v24 = vpop.f32.mrf.mxu0 }
 0x176   : > { %v1367_v25 = vpack.c.bf16 %v1366_v23, %v1366_v23 }
 0x178   : > { %1368 = vst [vmem:[%s340_s28] sm:$0xf] %v1367_v25 }
 0x179 PF: > { %s15_s22 = sadd.s32 1, %s2142_s22   ;;  %s2590_s18 = smov %s2134_s20 }
 0x17a   : > { %p12_p10 = scmp.ge.s32.totalorder %s15_s22, 18   ;;  %s2591_s19 = smov %s2138_s21 }
 0x17b   : > { %s2592_s20 = smov %s2595_s23  ;;  %s2593_s21 = smov %s2599_s24 }
 0x17c   :  { %14 = sbr.rel (!%p12_p10) target bundleno = 3 (0x3), region = 84 }

// kernel: tsn_forward.20
= control target key start
LH: loop header
LB: loop body
LE: loop exit
PB: predicated region body
PF: predicated region fallthrough
CT: control target
= control target key end

     0   :  { %s5604_s21 = smov 0   ;;  %s5606_s22 = smov 0   ;;  %s6339_s0 = inlined_call_operand.vmem [shape: bf16[2,38,19,8], index: 0, kind: input, shape index: {}, may-alias: {0,2,4,6,8,10,12}]   ;;  %s6340_s1 = inlined_call_operand.vmem [shape: bf16[2,38,19,8], index: 1, kind: input, shape index: {}, may-alias: {1,3,5,7,9,11,13}]   ;;  %s6341_s2 = inlined_call_operand.vmem [shape: bf16[2,38,19,8], index: 2, kind: input, shape index: {}, may-alias: {0,2,4,6,8,10,12}]   ;;  %s6342_s3 = inlined_call_operand.vmem [shape: bf16[2,38,19,8], index: 3, kind: input, shape index: {}, may-alias: {1,3,5,7,9,11,13}]   ;;  %s6343_s4 = inlined_call_operand.vmem [shape: bf16[2,38,19,8], index: 4, kind: input, shape index: {}, may-alias: {0,2,4,6,8,10,12}]   ;;  %s6344_s5 = inlined_call_operand.vmem [shape: bf16[2,38,19,8], index: 5, kind: input, shape index: {}, may-alias: {1,3,5,7,9,11,13}]   ;;  %s6345_s6 = inlined_call_operand.vmem [shape: bf16[2,38,19,8], index: 6, kind: input, shape index: {}, may-alias: {0,2,4,6,8,10,12}]   ;;  %s6346_s7 = inlined_call_operand.vmem [shape: bf16[2,38,19,8], index: 7, kind: input, shape index: {}, may-alias: {1,3,5,7,9,11,13}]   ;;  %s6347_s8 = inlined_call_operand.vmem [shape: bf16[2,38,19,8], index: 8, kind: input, shape index: {}, may-alias: {0,2,4,6,8,10,12}]   ;;  %s6348_s9 = inlined_call_operand.vmem [shape: bf16[2,38,19,8], index: 9, kind: input, shape index: {}, may-alias: {1,3,5,7,9,11,13}]   ;;  %s6349_s10 = inlined_call_operand.vmem [shape: bf16[2,38,19,8], index: 10, kind: input, shape index: {}, may-alias: {0,2,4,6,8,10,12}]   ;;  %s6350_s11 = inlined_call_operand.vmem [shape: bf16[2,38,19,8], index: 11, kind: input, shape index: {}, may-alias: {1,3,5,7,9,11,13}]   ;;  %s6351_s12 = inlined_call_operand.vmem [shape: bf16[2,38,19,8], index: 12, kind: input, shape index: {}, may-alias: {0,2,4,6,8,10,12}]   ;;  %s6352_s13 = inlined_call_operand.vmem [shape: bf16[2,38,19,8], index: 13, kind: input, shape index: {}, may-alias: {1,3,5,7,9,11,13}]   ;;  %s6353_s14 = inlined_call_operand.vmem [shape: bf16[7,7,8,128], index: 14, kind: input, shape index: {}]   ;;  %s6354_s15 = inlined_call_operand.vmem [shape: f32[1,128], index: 15, kind: input, shape index: {}]   ;;  %s6355_s16 = inlined_call_operand.vmem [shape: bf16[2,16,16,128], index: 16, kind: output, shape index: {}]  }
   0x1   :  { %6362 = sst [smem:[#allocation9_spill]] %s6339_s0  ;;  %s5608_s23 = smov 0  }
   0x2   :  { %6363 = sst [smem:[#allocation10_spill]] %s6340_s1  ;;  %s5610_s24 = smov 0  }
   0x3   :  { %6364 = sst [smem:[#allocation11_spill]] %s6354_s15  ;;  %s5612_s25 = smov 0  }
   0x4   :  { %6365 = sst [smem:[#allocation12_spill]] %s6355_s16 }
   0x5 LB: > { %6366 = sst [smem:[#allocation2_spill]] %s5499_s21  ;;  %s35_s26 = sadd.s32 1, %s5507_s23  ;;  %s5515_s25 = sphi %s5612_s25, %s26_s25   ;;  %s5511_s24 = sphi %s5610_s24, %s6385_s24   ;;  %s5507_s23 = sphi %s5608_s23, %s6384_s23   ;;  %s5503_s22 = sphi %s5606_s22, %s6383_s22   ;;  %s5499_s21 = sphi %s5604_s21, %s6382_s21  }
   0x6   : > { %6367 = sst [smem:[#allocation3_spill]] %s5507_s23  ;;  %s38_s27 = sadd.s32 1, %s5511_s24 }
   0x7   : > { %6368 = sst [smem:[#allocation4_spill]] %s5511_s24  ;;  %p36_p0 = scmp.ge.s32.totalorder %s35_s26, 16 }
   0x8   : > { %6369 = sst [smem:[#allocation5_spill]] %s5515_s25  ;;  %p4768_p1 = scmp.ge.s32.totalorder %s5515_s25, 1 }
   0x9   : > { %p794_p2 = scmp.lt.s32.totalorder %s5515_s25, 33  ;;  %s6387_s26 = smov (%p36_p0, %s35_s26), 0 }
   0xa   : > { %6370 = sst [smem:[#allocation6_spill]] %s6387_s26  ;;  %s6389_s27 = smov (!%p36_p0, %s38_s27), %s5511_s24 }
   0xb   : > { %p795_p3 = pnand %p4768_p1, %p794_p2  ;;  %p40_p4 = scmp.ge.s32.totalorder %s6389_s27, 2 }
   0xd   : > { %s6391_s27 = smov (%p40_p4, %s6389_s27), 0  ;;  %798 = sbr.rel (%p795_p3) target bundleno = 433 (0x1b1), region = 84 }
   0xe   : > { %6371 = sst [smem:[#allocation7_spill]] %s6391_s27 }
  0x12   : > { %v4800_v0 = vld [vmem:[%s6353_s14 + $0x4] sm:$0xf]  ;;  %vm1199_vm0 = vcmask 1043456   ;;  %v1185_v1 = vld [vmem:[%s6353_s14] sm:$0xf]  ;;  %v5517_v2 = vmov 0.0  }
  0x13   : > { %5070 = vmatprep.subr.bf16.mxu0 %v5517_v2  ;;  %v1201_v3 = vsel %vm1199_vm0, %v4800_v0, 0  ;;  %5076 = vmatprep.subr.bf16.mxu1 %v5517_v2  ;;  %v1253_v4 = vsel %vm1199_vm0, %v1185_v1, 0  ;;  %s5649_s17 = sshll.u32 %s5499_s21, 1  ;;  %p996_p5 = scmp.lt.s32.totalorder %s5503_s22, 1  ;;  %vm5518_vm1 = vmmov 0   ;;  %vm1195_vm2 = vcmask 64512  }
  0x14   : > { %5071 = vmatpush3.bf16.msra.mxu0 %v1201_v3  ;;  %5077 = vmatpush3.bf16.msra.mxu1 %v1253_v4  ;;  %p998_p6 = scmp.lt.s32.totalorder %s5649_s17, 37  ;;  %s1018_s20 = sadd.s32 1, %s5649_s17  ;;  %v4805_v5 = vld [vmem:[%s6353_s14 + $0x8] sm:$0xf]  ;;  %v4809_v6 = vld [vmem:[%s6353_s14 + $0xc] sm:$0xf] }
  0x15   : > { %5072 = vmatprep.mubr.msk.bf16.mxu0 %vm5518_vm1, %v5517_v2  ;;  %5078 = vmatprep.mubr.msk.bf16.mxu1 %vm5518_vm1, %v5517_v2  ;;  %s6393_s22 = smov (!%p996_p5, %s5503_s22), 1  ;;  %p1021_p7 = scmp.lt.s32.totalorder %s1018_s20, 37  ;;  %v1326_v7 = vsel %vm1199_vm0, %v4805_v5, 0  ;;  %v1400_v10 = vsel %vm1199_vm0, %v4809_v6, 0  ;;  %vm1309_vm3 = vsmask.f32 7424 }
  0x16   : > { %6372 = sst [smem:[#allocation8_spill]] %s6393_s22  ;;  %5082 = vmatprep.subr.bf16.mxu0 %v5517_v2  ;;  %5088 = vmatprep.subr.bf16.mxu1 %v5517_v2  ;;  %s5664_s19 = smul.u32 114, %s6393_s22  ;;  %v4813_v27 = vld [vmem:[%s6353_s14 + $0x10] sm:$0xf]  ;;  %v4816_v29 = vld [vmem:[%s6353_s14 + $0x14] sm:$0xf] }
  0x17   : > { %s999_s18 = scalar_select %p998_p6, %s5649_s17, 37  ;;  %v1459_v36 = vsel %vm1199_vm0, %v4813_v27, 0  ;;  %vm1451_vm4 = vcmask 1046528   ;;  %v1517_v40 = vsel %vm1199_vm0, %v4816_v29, 0  ;;  %v4819_v48 = vld [vmem:[%s6353_s14 + $0x18] sm:$0xf] }
  0x18   : > { %s6373_s16 = sld [smem:[#allocation9_spill]]  ;;  %s6395_s20 = smov (!%p1021_p7, %s1018_s20), 37  ;;  %v4822_v54 = vld [vmem:[%s6353_s14 + $0x1c] sm:$0xf]  ;;  %v1590_v59 = vsel %vm1199_vm0, %v4819_v48, 0 }
  0x19   : > { %s5364_s28 = smul.u32 3, %s999_s18  ;;  %s6374_s1 = sld [smem:[#allocation10_spill]]  ;;  %v1648_v62 = vsel %vm1199_vm0, %v4822_v54, 0  ;;  %vm1568_vm5 = vsmask.f32 6400 }
  0x1a   : > { %s1070_s24 = sadd.s32 3, %s5649_s17  ;;  %v4825_v1 = vld [vmem:[%s6353_s14 + $0x20] sm:$0xf] }
  0x1b   : > { %s1002_s0 = sadd.s32 %s5664_s19, %s5364_s28  ;;  %p1073_p9 = scmp.lt.s32.totalorder %s1070_s24, 37 }
  0x1c   : > { %s4770_s27 = sshll.u32 %s1002_s0, 2 }
  0x1d   : > { %s6399_s24 = smov (!%p1073_p9, %s1070_s24), 37 }
  0x1e   : > { %s5677_s15 = scalar_lea.vmem %s6373_s16, %s4770_s27  ;;  %s5366_s16 = smul.u32 3, %s6395_s20 }
  0x1f   : > { %s5682_s18 = scalar_lea.vmem %s6374_s1, %s4770_s27  ;;  %v5415_v9 = vld [vmem:[%s5677_s15] sm:$0xff]   ;;  %v5417_v14 = vld [vmem:[%s5677_s15 + $0x8] ss:$0 sps:$4 sm:$0x11]   ;;  %s5368_s25 = smul.u32 3, %s6399_s24 }
  0x20   : > { %v5414_v8 = vld [vmem:[%s5682_s18] sm:$0xff]   ;;  %5079 = vmatmul.mubr.msk.bf16.vlgmr.msra.gmra.mxu1 %vm1195_vm2, %v5415_v9  ;;  %v1318_v20 = vshll.u32 %v5417_v14, 16  ;;  %v5419_v22 = vld [vmem:[%s5682_s18 + $0x8] ss:$0 sps:$4 sm:$0x11]   ;;  %s1025_s21 = sadd.s32 %s5366_s16, %s5664_s19  ;;  %v1453_v42 = vrot.slane %v5417_v14, 1 }
  0x21   : > { %5073 = vmatmul.mubr.msk.bf16.vlgmr.msra.gmra.mxu0 %vm1195_vm2, %v5414_v8  ;;  %v1296_v11 = vld [vmem:[%s5677_s15] sm:$0xf]  ;;  %v1297_v12 = vld [vmem:[%s5677_s15 + $0x4] sm:$0xf]  ;;  %5089 = vmatpush3.bf16.msra.mxu1 %v1400_v10  ;;  %s4774_s22 = sshll.u32 %s1025_s21, 2  ;;  %v1392_v28 = vshll.u32 %v5419_v22, 16 }
  0x22   : > { %5083 = vmatpush3.bf16.msra.mxu0 %v1326_v7  ;;  %v4806_v13 = vcombine.low %v1296_v11, %v1297_v12  ;;  %v1371_v15 = vld [vmem:[%s5682_s18] sm:$0xf]  ;;  %5084 = vmatprep.mubr.msk.bf16.mxu0 %vm5518_vm1, %v5517_v2  ;;  %v1372_v16 = vld [vmem:[%s5682_s18 + $0x4] sm:$0xf]  ;;  %v1320_v24 = vrot.slane %v1318_v20, 1  ;;  %s5714_s28 = scalar_lea.vmem %s6341_s2, %s4774_s22  ;;  %s5721_s0 = scalar_lea.vmem %s6342_s3, %s4774_s22  ;;  %v1511_v50 = vrot.slane %v5419_v22, 1 }
  0x23   : > { %v1445_v17 = vld [vmem:[%s5677_s15] sm:$0xe]  ;;  %5090 = vmatprep.mubr.msk.bf16.mxu1 %vm5518_vm1, %v5517_v2  ;;  %5094 = vmatprep.subr.bf16.mxu0 %v5517_v2  ;;  %v4810_v21 = vcombine.low %v1371_v15, %v1372_v16  ;;  %v5422_v34 = vld [vmem:[%s5677_s15 + $0x8] ss:$0 sps:$4 sm:$0x33]   ;;  %v1394_v35 = vrot.slane %v1392_v28, 1 }
  0x24   : > { %v1311_v18 = vshrl.u32 %v4806_v13, 16  ;;  %v1313_v19 = vshll.u32 %v4806_v13, 16  ;;  %5100 = vmatprep.subr.bf16.mxu1 %v5517_v2  ;;  %v4814_v30 = vcombine.low %v1445_v17, %v1297_v12  ;;  %v1504_v31 = vld [vmem:[%s5682_s18] sm:$0xe]  ;;  %s1044_s15 = sadd.s32 2, %s5649_s17  ;;  %v1578_v46 = vshrl.u32 %v5422_v34, 16 }
  0x25   : > { %v1385_v25 = vshrl.u32 %v4810_v21, 16  ;;  %v1387_v26 = vshll.u32 %v4810_v21, 16  ;;  %v4817_v39 = vcombine.low %v1504_v31, %v1372_v16  ;;  %v1581_v47 = vshll.u32 %v5422_v34, 16  ;;  %p1047_p8 = scmp.lt.s32.totalorder %s1044_s15, 37  ;;  %v1751_v52 = vld [vmem:[%s5714_s28] sm:$0xf] }
  0x26   : > { %v1315_v23 = vrot.slane %v1313_v19, 1  ;;  %v1452_v41 = vrot.slane %v4814_v30, 1  ;;  %v1570_v43 = vshrl.u32 %v4814_v30, 16  ;;  %v1573_v45 = vshll.u32 %v4814_v30, 16  ;;  %v5741_v53 = vld [vmem:[%s5714_s28 + $0x4] sm:$0xf] }
  0x27   : > { %v1389_v33 = vrot.slane %v1387_v26, 1  ;;  %v1510_v49 = vrot.slane %v4817_v39, 1  ;;  %v1580_v57 = vrot.slane %v1578_v46, 1  ;;  %v1583_v58 = vrot.slane %v1581_v47, 2  ;;  %s6397_s15 = smov (!%p1047_p8, %s1044_s15), 37  ;;  %v5423_v8 = vld [vmem:[%s5714_s28] sm:$0xff]  }
  0x28   : > { %v1316_v32 = vor.u32 %v1315_v23, %v1311_v18  ;;  %v1454_v51 = vsel %vm1451_vm4, %v1452_v41, %v1453_v42  ;;  %v1572_v55 = vrot.slane %v1570_v43, 1  ;;  %v1575_v56 = vrot.slane %v1573_v45, 2  ;;  %s5367_s23 = smul.u32 3, %s6397_s15  ;;  %v1825_v3 = vld [vmem:[%s5721_s0] sm:$0xf] }
  0x29   : > { %v1390_v38 = vor.u32 %v1389_v33, %v1385_v25  ;;  %v1512_v60 = vsel %vm1451_vm4, %v1510_v49, %v1511_v50  ;;  %v4829_v61 = vcombine.low %v1751_v52, %v5741_v53  ;;  %v1584_v0 = vor.u32 %v1583_v58, %v1580_v57  ;;  %v5761_v4 = vld [vmem:[%s5721_s0 + $0x4] sm:$0xf]  ;;  %v5766_v5 = vld [vmem:[%s5714_s28 + $0x8] ss:$0 sps:$4 sm:$0x11]  }
  0x2a   : > { %v1321_v37 = vsel %vm1309_vm3, %v1316_v32, %v1320_v24  ;;  %v1576_v63 = vor.u32 %v1575_v56, %v1572_v55  ;;  %s1051_s27 = sadd.s32 %s5367_s23, %s5664_s19  ;;  %v1706_v9 = vsel %vm1199_vm0, %v4825_v1, 0  ;;  %v4828_v10 = vld [vmem:[%s6353_s14 + $0x24] sm:$0xf]  ;;  %v4833_v11 = vcombine.low %v1825_v3, %v5761_v4  ;;  %v5793_v16 = vld [vmem:[%s5721_s0 + $0x8] ss:$0 sps:$4 sm:$0x11]  }
  0x2b   : > { %5085 = vmatmul.mubr.msk.bf16.vlgmr.msra.gmra.mxu0 %vm1195_vm2, %v1321_v37  ;;  %v1395_v44 = vsel %vm1309_vm3, %v1390_v38, %v1394_v35  ;;  %v1767_v6 = vshll.u32 %v4829_v61, 16  ;;  %s4778_s20 = sshll.u32 %s1051_s27, 2  ;;  %v1765_v12 = vshrl.u32 %v4829_v61, 16  ;;  %v1772_v14 = vshll.u32 %v5766_v5, 16  ;;  %v4832_v20 = vld [vmem:[%s6353_s14 + $0x28] sm:$0xf] }
  0x2c   : > { %5095 = vmatpush3.bf16.msra.mxu0 %v1459_v36  ;;  %5096 = vmatprep.mubr.msk.bf16.mxu0 %vm5518_vm1, %v5517_v2  ;;  %v1585_v7 = vsel %vm1568_vm5, %v1576_v63, %v1584_v0  ;;  %s5780_s16 = scalar_lea.vmem %s6343_s4, %s4778_s20  ;;  %s5785_s23 = scalar_lea.vmem %s6344_s5, %s4778_s20  ;;  %v1780_v15 = vsel %vm1199_vm0, %v4828_v10, 0  ;;  %v1841_v17 = vshll.u32 %v4833_v11, 16  ;;  %v1899_v21 = vld [vmem:[%s5714_s28] sm:$0xe]  ;;  %v4836_v23 = vld [vmem:[%s6353_s14 + $0x2c] sm:$0xf] }
  0x2d   : > { %5091 = vmatmul.mubr.msk.bf16.vlgmr.msra.gmra.mxu1 %vm1195_vm2, %v1395_v44  ;;  %5106 = vmatprep.subr.bf16.mxu0 %v5517_v2  ;;  %v1769_v13 = vrot.slane %v1767_v6, 1  ;;  %v1774_v19 = vrot.slane %v1772_v14, 1  ;;  %s1077_s20 = sadd.s32 %s5368_s25, %s5664_s19  ;;  %v5424_v22 = vld [vmem:[%s5721_s0] sm:$0xff]   ;;  %v1839_v24 = vshrl.u32 %v4833_v11, 16  ;;  %v1846_v26 = vshll.u32 %v5793_v16, 16  ;;  %s1096_s27 = sadd.s32 4, %s5649_s17 }
  0x2e   : > { %5101 = vmatpush3.bf16.msra.mxu1 %v1517_v40  ;;  %5102 = vmatprep.mubr.msk.bf16.mxu1 %vm5518_vm1, %v5517_v2  ;;  %s4782_s24 = sshll.u32 %s1077_s20, 2  ;;  %v1843_v25 = vrot.slane %v1841_v17, 1  ;;  %v1854_v27 = vsel %vm1199_vm0, %v4832_v20, 0  ;;  %v4837_v28 = vcombine.low %v1899_v21, %v5741_v53  ;;  %v5431_v30 = vld [vmem:[%s5714_s28 + $0x8] ss:$0 sps:$4 sm:$0x33]  }
  0x2f   : > { %5112 = vmatprep.subr.bf16.mxu1 %v5517_v2  ;;  %v1770_v18 = vor.u32 %v1769_v13, %v1765_v12  ;;  %s5815_s21 = scalar_lea.vmem %s6345_s6, %s4782_s24  ;;  %v1912_v31 = vsel %vm1199_vm0, %v4836_v23, 0  ;;  %s5824_s26 = scalar_lea.vmem %s6346_s7, %s4782_s24  ;;  %v1848_v33 = vrot.slane %v1846_v26, 1  ;;  %v1906_v35 = vrot.slane %v5766_v5, 1  ;;  %v4839_v36 = vld [vmem:[%s6353_s14 + $0x30] sm:$0xf]  ;;  %v5432_v10 = vld [vmem:[%s5780_s16] sm:$0xff]  }
  0x30   : > { %v1844_v32 = vor.u32 %v1843_v25, %v1839_v24  ;;  %v1905_v34 = vrot.slane %v4837_v28, 1  ;;  %v1957_v37 = vld [vmem:[%s5721_s0] sm:$0xe]  ;;  %v2022_v38 = vshrl.u32 %v4837_v28, 16  ;;  %v2025_v39 = vshll.u32 %v4837_v28, 16  ;;  %p1099_p10 = scmp.lt.s32.totalorder %s1096_s27, 37 }
  0x31   : > { %v1775_v29 = vsel %vm1309_vm3, %v1770_v18, %v1774_v19  ;;  %v2030_v40 = vshrl.u32 %v5431_v30, 16  ;;  %v2033_v41 = vshll.u32 %v5431_v30, 16  ;;  %v4842_v43 = vld [vmem:[%s6353_s14 + $0x34] sm:$0xf]  ;;  %v4840_v44 = vcombine.low %v1957_v37, %v5761_v4  ;;  %s1122_s0 = sadd.s32 5, %s5649_s17 }
  0x32   : > { %v1849_v42 = vsel %vm1309_vm3, %v1844_v32, %v1848_v33  ;;  %v1907_v45 = vsel %vm1451_vm4, %v1905_v34, %v1906_v35  ;;  %v1970_v46 = vsel %vm1199_vm0, %v4839_v36, 0  ;;  %v2024_v47 = vrot.slane %v2022_v38, 1  ;;  %s6401_s27 = smov (!%p1099_p10, %s1096_s27), 37  ;;  %p5852_p11 = scmp.lt.s32.totalorder %s1122_s0, 37  ;;  %v2203_v54 = vld [vmem:[%s5780_s16] sm:$0xf] }
  0x33   : > { %5097 = vmatmul.mubr.msk.bf16.vlgmr.msra.gmra.mxu0 %vm1195_vm2, %v1454_v51  ;;  %v2027_v48 = vrot.slane %v2025_v39, 2  ;;  %v2032_v49 = vrot.slane %v2030_v40, 1  ;;  %v2035_v50 = vrot.slane %v2033_v41, 2  ;;  %v2042_v51 = vsel %vm1199_vm0, %v4842_v43, 0  ;;  %v5860_v55 = vld [vmem:[%s5780_s16 + $0x4] sm:$0xf] }
  0x34   : > { %5107 = vmatpush3.bf16.msra.mxu0 %v1590_v59  ;;  %5108 = vmatprep.mubr.msk.bf16.mxu0 %vm5518_vm1, %v5517_v2  ;;  %v1963_v52 = vrot.slane %v4840_v44, 1  ;;  %v1964_v53 = vrot.slane %v5793_v16, 1  ;;  %v4845_v58 = vld [vmem:[%s6353_s14 + $0x38] sm:$0xf]  ;;  %v2277_v59 = vld [vmem:[%s5785_s23] sm:$0xf]  ;;  %v4852_v63 = vcombine.low %v2203_v54, %v5860_v55 }
  0x35   : > { %5103 = vmatmul.mubr.msk.bf16.vlgmr.msra.gmra.mxu1 %vm1195_vm2, %v1512_v60  ;;  %5118 = vmatprep.subr.bf16.mxu0 %v5517_v2  ;;  %v2028_v56 = vor.u32 %v2027_v48, %v2024_v47  ;;  %v2036_v57 = vor.u32 %v2035_v50, %v2032_v49  ;;  %v5870_v60 = vld [vmem:[%s5785_s23 + $0x4] sm:$0xf]  ;;  %s5369_s22 = smul.u32 3, %s6401_s27  ;;  %s6403_s0 = smov (!%p5852_p11, %s1122_s0), 37  ;;  %v2100_v0 = vsel %vm1199_vm0, %v4845_v58, 0 }
  0x36   : > { %5113 = vmatpush3.bf16.msra.mxu1 %v1648_v62  ;;  %5114 = vmatprep.mubr.msk.bf16.mxu1 %vm5518_vm1, %v5517_v2  ;;  %v1965_v61 = vsel %vm1451_vm4, %v1963_v52, %v1964_v53  ;;  %v4848_v62 = vld [vmem:[%s6353_s14 + $0x3c] sm:$0xf]  ;;  %v4856_v3 = vcombine.low %v2277_v59, %v5870_v60  ;;  %v5886_v5 = vld [vmem:[%s5780_s16 + $0x8] ss:$0 sps:$4 sm:$0x11]   ;;  %v2217_v12 = vshrl.u32 %v4852_v63, 16 }
  0x37   : > { %5124 = vmatprep.subr.bf16.mxu1 %v5517_v2  ;;  %s1103_s20 = sadd.s32 %s5369_s22, %s5664_s19  ;;  %v2037_v1 = vsel %vm1568_vm5, %v2028_v56, %v2036_v57  ;;  %v2158_v4 = vsel %vm1199_vm0, %v4848_v62, 0  ;;  %v4851_v6 = vld [vmem:[%s6353_s14 + $0x40] sm:$0xf]  ;;  %v4855_v11 = vld [vmem:[%s6353_s14 + $0x44] sm:$0xf]  ;;  %v2224_v14 = vshll.u32 %v5886_v5, 16 }
  0x38   : > { %s4786_s24 = sshll.u32 %s1103_s20, 2  ;;  %s5370_s20 = smul.u32 3, %s6403_s0  ;;  %v2232_v16 = vsel %vm1199_vm0, %v4851_v6, 0  ;;  %v2291_v17 = vshrl.u32 %v4856_v3, 16  ;;  %v2306_v20 = vsel %vm1199_vm0, %v4855_v11, 0  ;;  %v2358_v37 = vrot.slane %v5886_v5, 1 }
  0x39   : > { %s5891_s30 = scalar_lea.vmem %s6347_s8, %s4786_s24  ;;  %s5901_s28 = scalar_lea.vmem %s6348_s9, %s4786_s24  ;;  %v2351_v23 = vld [vmem:[%s5780_s16] sm:$0xe]  ;;  %v4859_v26 = vld [vmem:[%s6353_s14 + $0x48] sm:$0xf]  ;;  %v4862_v30 = vld [vmem:[%s6353_s14 + $0x4c] sm:$0xf] }
  0x3a   : > { %s5916_s24 = sadd.s32 %s5370_s20, %s5664_s19  ;;  %s1148_s0 = sadd.s32 6, %s5649_s17  ;;  %v2409_v28 = vld [vmem:[%s5785_s23] sm:$0xe]  ;;  %v2364_v32 = vsel %vm1199_vm0, %v4859_v26, 0  ;;  %v2422_v35 = vsel %vm1199_vm0, %v4862_v30, 0 }
  0x3b   : > { %5109 = vmatmul.mubr.msk.bf16.vlgmr.msra.gmra.mxu0 %vm1195_vm2, %v1585_v7  ;;  %v2219_v7 = vshll.u32 %v4852_v63, 16  ;;  %s4790_s15 = sshll.u32 %s5916_s24, 2  ;;  %p5929_p12 = scmp.lt.s32.totalorder %s1148_s0, 37  ;;  %v4863_v34 = vcombine.low %v2409_v28, %v5870_v60  ;;  %v4865_v44 = vld [vmem:[%s6353_s14 + $0x50] sm:$0xf] }
  0x3c   : > { %5119 = vmatpush3.bf16.msra.mxu0 %v1706_v9  ;;  %5120 = vmatprep.mubr.msk.bf16.mxu0 %vm5518_vm1, %v5517_v2  ;;  %v2293_v9 = vshll.u32 %v4856_v3, 16  ;;  %s5938_s25 = scalar_lea.vmem %s6349_s10, %s4790_s15  ;;  %s5951_s18 = scalar_lea.vmem %s6350_s11, %s4790_s15  ;;  %v2655_v47 = vld [vmem:[%s5815_s21] sm:$0xf]  ;;  %v2656_v48 = vld [vmem:[%s5815_s21 + $0x4] sm:$0xf]  ;;  %v2494_v53 = vsel %vm1199_vm0, %v4865_v44, 0 }
  0x3d   : > { %5115 = vmatmul.mubr.msk.bf16.vlgmr.msra.gmra.mxu1 %vm1195_vm2, %v5423_v8  ;;  %5130 = vmatprep.subr.bf16.mxu0 %v5517_v2  ;;  %v5908_v8 = vld [vmem:[%s5785_s23 + $0x8] ss:$0 sps:$4 sm:$0x11]   ;;  %v2221_v13 = vrot.slane %v2219_v7, 1  ;;  %s6405_s0 = smov (!%p5929_p12, %s1148_s0), 37  ;;  %s6378_s22 = sld [smem:[#allocation8_spill]] }
  0x3e   : > { %5125 = vmatpush3.bf16.msra.mxu1 %v1780_v15  ;;  %5126 = vmatprep.mubr.msk.bf16.mxu1 %vm5518_vm1, %v5517_v2  ;;  %v5433_v15 = vld [vmem:[%s5785_s23] sm:$0xff]   ;;  %v2295_v18 = vrot.slane %v2293_v9, 1  ;;  %v2298_v19 = vshll.u32 %v5908_v8, 16  ;;  %s5371_s23 = smul.u32 3, %s6405_s0  ;;  %v2416_v43 = vrot.slane %v5908_v8, 1 }
  0x3f   : > { %5136 = vmatprep.subr.bf16.mxu1 %v5517_v2  ;;  %v2222_v21 = vor.u32 %v2221_v13, %v2217_v12  ;;  %v4871_v59 = vld [vmem:[%s6353_s14 + $0x58] sm:$0xf]  ;;  %v2729_v60 = vld [vmem:[%s5824_s26] sm:$0xf] }
  0x40   : > { %v2296_v24 = vor.u32 %v2295_v18, %v2291_v17  ;;  %v2300_v25 = vrot.slane %v2298_v19, 1  ;;  %s5971_s1 = sadd.s32 %s5371_s23, %s5664_s19  ;;  %v5444_v62 = vld [vmem:[%s5815_s21 + $0x8] ss:$0 sps:$4 sm:$0x11]   ;;  %v2610_v5 = vsel %vm1199_vm0, %v4871_v59, 0 }
  0x41   : > { %s4794_s19 = sshll.u32 %s5971_s1, 2  ;;  %v2676_v8 = vshll.u32 %v5444_v62, 16  ;;  %v4882_v17 = vld [vmem:[%s6353_s14 + $0x64] sm:$0xf]  ;;  %v2861_v30 = vld [vmem:[%s5824_s26] sm:$0xe] }
  0x42   : > { %v2301_v33 = vsel %vm1309_vm3, %v2296_v24, %v2300_v25  ;;  %s5994_s29 = scalar_lea.vmem %s6351_s12, %s4794_s19  ;;  %v5449_v24 = vld [vmem:[%s5815_s21 + $0x8] ss:$0 sps:$4 sm:$0x33]   ;;  %v2816_v25 = vsel %vm1199_vm0, %v4882_v17, 0  ;;  %v3255_v17 = vld [vmem:[%s5891_s30] sm:$0xe] }
  0x43   : > { %5121 = vmatmul.mubr.msk.bf16.vlgmr.msra.gmra.mxu0 %vm1195_vm2, %v5424_v22  ;;  %v2226_v22 = vrot.slane %v2224_v14, 1  ;;  %v2678_v13 = vrot.slane %v2676_v8, 1  ;;  %v4878_v14 = vld [vmem:[%s6353_s14 + $0x60] sm:$0xf] }
  0x44   : > { %5131 = vmatpush3.bf16.msra.mxu0 %v1854_v27  ;;  %5132 = vmatprep.mubr.msk.bf16.mxu0 %vm5518_vm1, %v5517_v2  ;;  %v4860_v27 = vcombine.low %v2351_v23, %v5860_v55  ;;  %v4875_v55 = vcombine.low %v2655_v47, %v2656_v48 }
  0x45   : > { %5127 = vmatmul.mubr.msk.bf16.vlgmr.msra.gmra.mxu1 %vm1195_vm2, %v1775_v29  ;;  %5142 = vmatprep.subr.bf16.mxu0 %v5517_v2  ;;  %v2227_v29 = vsel %vm1309_vm3, %v2222_v21, %v2226_v22  ;;  %v2758_v21 = vsel %vm1199_vm0, %v4878_v14, 0 }
  0x46   : > { %5137 = vmatpush3.bf16.msra.mxu1 %v1912_v31  ;;  %5138 = vmatprep.mubr.msk.bf16.mxu1 %vm5518_vm1, %v5517_v2  ;;  %v5440_v31 = vld [vmem:[%s5780_s16 + $0x8] ss:$0 sps:$4 sm:$0x33]   ;;  %v2357_v36 = vrot.slane %v4860_v27, 1  ;;  %v2474_v38 = vshrl.u32 %v4860_v27, 16  ;;  %v2477_v39 = vshll.u32 %v4860_v27, 16  ;;  %s6010_s16 = scalar_lea.vmem %s6352_s13, %s4794_s19 }
  0x47   : > { %5148 = vmatprep.subr.bf16.mxu1 %v5517_v2  ;;  %v2482_v40 = vshrl.u32 %v5440_v31, 16  ;;  %v2485_v41 = vshll.u32 %v5440_v31, 16  ;;  %v2671_v63 = vshll.u32 %v4875_v55, 16  ;;  %v2669_v6 = vshrl.u32 %v4875_v55, 16  ;;  %v4885_v31 = vld [vmem:[%s6353_s14 + $0x68] sm:$0xf] }
  0x48   : > { %v2476_v49 = vrot.slane %v2474_v38, 1  ;;  %v2479_v50 = vrot.slane %v2477_v39, 2  ;;  %s6380_s19 = sld [smem:[#allocation12_spill]] }
  0x49   : > { %v2487_v52 = vrot.slane %v2485_v41, 2  ;;  %v2673_v7 = vrot.slane %v2671_v63, 1 }
  0x4a   : > { %v2480_v57 = vor.u32 %v2479_v50, %v2476_v49  ;;  %v3108_v49 = vld [vmem:[%s5891_s30 + $0x4] sm:$0xf] }
  0x4b   : > { %5133 = vmatmul.mubr.msk.bf16.vlgmr.msra.gmra.mxu0 %vm1195_vm2, %v1849_v42  ;;  %v2415_v42 = vrot.slane %v4863_v34, 1  ;;  %v2674_v12 = vor.u32 %v2673_v7, %v2669_v6  ;;  %v2934_v34 = vshrl.u32 %v5449_v24, 16 }
  0x4c   : > { %5143 = vmatpush3.bf16.msra.mxu0 %v1970_v46  ;;  %5144 = vmatprep.mubr.msk.bf16.mxu0 %vm5518_vm1, %v5517_v2  ;;  %v4868_v46 = vld [vmem:[%s6353_s14 + $0x54] sm:$0xf] }
  0x4d   : > { %5139 = vmatmul.mubr.msk.bf16.vlgmr.msra.gmra.mxu1 %vm1195_vm2, %v1907_v45  ;;  %5154 = vmatprep.subr.bf16.mxu0 %v5517_v2  ;;  %v2359_v45 = vsel %vm1451_vm4, %v2357_v36, %v2358_v37  ;;  %v2417_v54 = vsel %vm1451_vm4, %v2415_v42, %v2416_v43  ;;  %v2552_v56 = vsel %vm1199_vm0, %v4868_v46, 0  ;;  %v2679_v23 = vsel %vm1309_vm3, %v2674_v12, %v2678_v13  ;;  %v4888_v37 = vld [vmem:[%s6353_s14 + $0x6c] sm:$0xf] }
  0x4e   : > { %5149 = vmatpush3.bf16.msra.mxu1 %v2042_v51  ;;  %5150 = vmatprep.mubr.msk.bf16.mxu1 %vm5518_vm1, %v5517_v2  ;;  %v2484_v51 = vrot.slane %v2482_v40, 1  ;;  %v2874_v40 = vsel %vm1199_vm0, %v4885_v31, 0  ;;  %v2936_v43 = vrot.slane %v2934_v34, 1 }
  0x4f   : > { %5160 = vmatprep.subr.bf16.mxu1 %v5517_v2 }
  0x50   : > { %v2488_v58 = vor.u32 %v2487_v52, %v2484_v51  ;;  %v4891_v52 = vld [vmem:[%s6353_s14 + $0x70] sm:$0xf] }
  0x53   : > { %5145 = vmatmul.mubr.msk.bf16.vlgmr.msra.gmra.mxu0 %vm1195_vm2, %v1965_v61  ;;  %v6005_v61 = vld [vmem:[%s5824_s26 + $0x4] sm:$0xf] }
  0x54   : > { %5155 = vmatpush3.bf16.msra.mxu0 %v2100_v0  ;;  %5156 = vmatprep.mubr.msk.bf16.mxu0 %vm5518_vm1, %v5517_v2  ;;  %v2489_v0 = vsel %vm1568_vm5, %v2480_v57, %v2488_v58  ;;  %v4879_v3 = vcombine.low %v2729_v60, %v6005_v61  ;;  %v4886_v38 = vcombine.low %v2861_v30, %v6005_v61  ;;  %v3004_v58 = vsel %vm1199_vm0, %v4891_v52, 0 }
  0x55   : > { %5151 = vmatmul.mubr.msk.bf16.vlgmr.msra.gmra.mxu1 %vm1195_vm2, %v2037_v1  ;;  %5166 = vmatprep.subr.bf16.mxu0 %v5517_v2  ;;  %v4874_v1 = vld [vmem:[%s6353_s14 + $0x5c] sm:$0xf] }
  0x56   : > { %5161 = vmatpush3.bf16.msra.mxu1 %v2158_v4  ;;  %5162 = vmatprep.mubr.msk.bf16.mxu1 %vm5518_vm1, %v5517_v2  ;;  %v5441_v4 = vld [vmem:[%s5815_s21] sm:$0xff]   ;;  %v2684_v9 = vsel %vm1199_vm0, %v4874_v1, 0  ;;  %v2745_v11 = vshll.u32 %v4879_v3, 16  ;;  %v2743_v18 = vshrl.u32 %v4879_v3, 16  ;;  %v2867_v46 = vrot.slane %v4886_v38, 1 }
  0x57   : > { %5172 = vmatprep.subr.bf16.mxu1 %v5517_v2  ;;  %v6106_v1 = vld [vmem:[%s5901_s28 + $0x8] ss:$0 sps:$4 sm:$0x11]  }
  0x58   : > { %v2747_v19 = vrot.slane %v2745_v11, 1  ;;  %v3202_v13 = vshll.u32 %v6106_v1, 16  ;;  %v4911_v38 = vld [vmem:[%s6353_s14 + $0x88] sm:$0xf] }
  0x5a   : > { %v2748_v26 = vor.u32 %v2747_v19, %v2743_v18  ;;  %v3204_v19 = vrot.slane %v3202_v13, 1 }
  0x5b   : > { %5157 = vmatmul.mubr.msk.bf16.vlgmr.msra.gmra.mxu0 %vm1195_vm2, %v5432_v10  ;;  %v6028_v10 = vld [vmem:[%s5824_s26 + $0x8] ss:$0 sps:$4 sm:$0x11]  }
  0x5c   : > { %5167 = vmatpush3.bf16.msra.mxu0 %v2232_v16  ;;  %5168 = vmatprep.mubr.msk.bf16.mxu0 %vm5518_vm1, %v5517_v2  ;;  %v5442_v16 = vld [vmem:[%s5824_s26] sm:$0xff]   ;;  %v2868_v47 = vrot.slane %v6028_v10, 1  ;;  %s6379_s26 = sld [smem:[#allocation11_spill]] }
  0x5d   : > { %5163 = vmatmul.mubr.msk.bf16.vlgmr.msra.gmra.mxu1 %vm1195_vm2, %v5433_v15  ;;  %5178 = vmatprep.subr.bf16.mxu0 %v5517_v2  ;;  %v2803_v15 = vld [vmem:[%s5815_s21] sm:$0xe] }
  0x5e   : > { %5173 = vmatpush3.bf16.msra.mxu1 %v2306_v20  ;;  %5174 = vmatprep.mubr.msk.bf16.mxu1 %vm5518_vm1, %v5517_v2  ;;  %v2750_v20 = vshll.u32 %v6028_v10, 16  ;;  %v4883_v22 = vcombine.low %v2803_v15, %v2656_v48  ;;  %v3107_v48 = vld [vmem:[%s5891_s30] sm:$0xf]  ;;  %v2869_v55 = vsel %vm1451_vm4, %v2867_v46, %v2868_v47  ;;  %v3398_v47 = vsel %vm1199_vm0, %v4911_v38, 0 }
  0x5f   : > { %5184 = vmatprep.subr.bf16.mxu1 %v5517_v2  ;;  %v4898_v57 = vcombine.low %v3107_v48, %v3108_v49 }
  0x60   : > { %v2752_v27 = vrot.slane %v2750_v20, 1  ;;  %v2809_v28 = vrot.slane %v4883_v22, 1  ;;  %v4905_v20 = vld [vmem:[%s6353_s14 + $0x80] sm:$0xf] }
  0x61   : > { %v3123_v63 = vshll.u32 %v4898_v57, 16  ;;  %v3121_v6 = vshrl.u32 %v4898_v57, 16 }
  0x62   : > { %v2753_v36 = vsel %vm1309_vm3, %v2748_v26, %v2752_v27  ;;  %v3268_v26 = vsel %vm1199_vm0, %v4905_v20, 0 }
  0x63   : > { %5169 = vmatmul.mubr.msk.bf16.vlgmr.msra.gmra.mxu0 %vm1195_vm2, %v2227_v29  ;;  %v2810_v29 = vrot.slane %v5444_v62, 1  ;;  %v5453_v62 = vld [vmem:[%s5891_s30 + $0x8] ss:$0 sps:$4 sm:$0x11]   ;;  %v3125_v7 = vrot.slane %v3123_v63, 1 }
  0x64   : > { %5179 = vmatpush3.bf16.msra.mxu0 %v2364_v32  ;;  %5180 = vmatprep.mubr.msk.bf16.mxu0 %vm5518_vm1, %v5517_v2  ;;  %v2926_v32 = vshrl.u32 %v4883_v22, 16  ;;  %v3128_v8 = vshll.u32 %v5453_v62, 16  ;;  %v3262_v31 = vrot.slane %v5453_v62, 1 }
  0x65   : > { %5175 = vmatmul.mubr.msk.bf16.vlgmr.msra.gmra.mxu1 %vm1195_vm2, %v2301_v33  ;;  %5190 = vmatprep.subr.bf16.mxu0 %v5517_v2  ;;  %v2929_v33 = vshll.u32 %v4883_v22, 16  ;;  %v2811_v39 = vsel %vm1451_vm4, %v2809_v28, %v2810_v29  ;;  %v3126_v15 = vor.u32 %v3125_v7, %v3121_v6  ;;  %v3313_v22 = vld [vmem:[%s5901_s28] sm:$0xe] }
  0x66   : > { %5185 = vmatpush3.bf16.msra.mxu1 %v2422_v35  ;;  %5186 = vmatprep.mubr.msk.bf16.mxu1 %vm5518_vm1, %v5517_v2  ;;  %v2937_v35 = vshll.u32 %v5449_v24, 16  ;;  %v2928_v41 = vrot.slane %v2926_v32, 1  ;;  %v4908_v24 = vld [vmem:[%s6353_s14 + $0x84] sm:$0xf] }
  0x67   : > { %5196 = vmatprep.subr.bf16.mxu1 %v5517_v2  ;;  %v2931_v42 = vrot.slane %v2929_v33, 2  ;;  %v3326_v29 = vsel %vm1199_vm0, %v4908_v24, 0  ;;  %v3765_v24 = vld [vmem:[%s5951_s18] sm:$0xe] }
  0x68   : > { %v2939_v44 = vrot.slane %v2937_v35, 2 }
  0x69   : > { %v2932_v50 = vor.u32 %v2931_v42, %v2928_v41  ;;  %v3560_v41 = vld [vmem:[%s5938_s25 + $0x4] sm:$0xf]  ;;  %v4914_v42 = vld [vmem:[%s6353_s14 + $0x8c] sm:$0xf] }
  0x6a   : > { %v2940_v51 = vor.u32 %v2939_v44, %v2936_v43 }
  0x6b   : > { %5181 = vmatmul.mubr.msk.bf16.vlgmr.msra.gmra.mxu0 %vm1195_vm2, %v2359_v45  ;;  %v2946_v45 = vsel %vm1199_vm0, %v4888_v37, 0  ;;  %v3320_v37 = vrot.slane %v6106_v1, 1 }
  0x6c   : > { %5191 = vmatpush3.bf16.msra.mxu0 %v2494_v53  ;;  %5192 = vmatprep.mubr.msk.bf16.mxu0 %vm5518_vm1, %v5517_v2  ;;  %v3181_v53 = vld [vmem:[%s5901_s28] sm:$0xf]  ;;  %v2941_v59 = vsel %vm1568_vm5, %v2932_v50, %v2940_v51  ;;  %v3456_v50 = vsel %vm1199_vm0, %v4914_v42, 0 }
  0x6d   : > { %5187 = vmatmul.mubr.msk.bf16.vlgmr.msra.gmra.mxu1 %vm1195_vm2, %v2417_v54  ;;  %5202 = vmatprep.subr.bf16.mxu0 %v5517_v2  ;;  %v6084_v54 = vld [vmem:[%s5901_s28 + $0x4] sm:$0xf]  ;;  %v4011_v42 = vld [vmem:[%s5994_s29] sm:$0xf] }
  0x6e   : > { %5197 = vmatpush3.bf16.msra.mxu1 %v2552_v56  ;;  %5198 = vmatprep.mubr.msk.bf16.mxu1 %vm5518_vm1, %v5517_v2  ;;  %v4894_v56 = vld [vmem:[%s6353_s14 + $0x74] sm:$0xf]  ;;  %v4902_v60 = vcombine.low %v3181_v53, %v6084_v54  ;;  %v4909_v28 = vcombine.low %v3313_v22, %v6084_v54  ;;  %v3633_v53 = vld [vmem:[%s5951_s18] sm:$0xf]  ;;  %v6167_v54 = vld [vmem:[%s5951_s18 + $0x4] sm:$0xf] }
  0x6f   : > { %5208 = vmatprep.subr.bf16.mxu1 %v5517_v2  ;;  %v3062_v61 = vsel %vm1199_vm0, %v4894_v56, 0  ;;  %v5462_v56 = vld [vmem:[%s5938_s25 + $0x8] ss:$0 sps:$4 sm:$0x11]  }
  0x70   : > { %v3197_v3 = vshll.u32 %v4902_v60, 16  ;;  %v3195_v11 = vshrl.u32 %v4902_v60, 16  ;;  %v4925_v60 = vcombine.low %v3633_v53, %v6167_v54  ;;  %v3580_v1 = vshll.u32 %v5462_v56, 16 }
  0x72   : > { %v3199_v12 = vrot.slane %v3197_v3, 1  ;;  %v3582_v7 = vrot.slane %v3580_v1, 1 }
  0x73   : > { %5193 = vmatmul.mubr.msk.bf16.vlgmr.msra.gmra.mxu0 %vm1195_vm2, %v2489_v0  ;;  %v4897_v0 = vld [vmem:[%s6353_s14 + $0x78] sm:$0xf] }
  0x74   : > { %5203 = vmatpush3.bf16.msra.mxu0 %v2610_v5  ;;  %5204 = vmatprep.mubr.msk.bf16.mxu0 %vm5518_vm1, %v5517_v2  ;;  %v4901_v5 = vld [vmem:[%s6353_s14 + $0x7c] sm:$0xf]  ;;  %v3136_v10 = vsel %vm1199_vm0, %v4897_v0, 0  ;;  %v3200_v18 = vor.u32 %v3199_v12, %v3195_v11  ;;  %v3647_v12 = vshrl.u32 %v4925_v60, 16 }
  0x75   : > { %5199 = vmatmul.mubr.msk.bf16.vlgmr.msra.gmra.mxu1 %vm1195_vm2, %v5441_v4  ;;  %5214 = vmatprep.subr.bf16.mxu0 %v5517_v2  ;;  %v5450_v4 = vld [vmem:[%s5891_s30] sm:$0xff]   ;;  %v3210_v14 = vsel %vm1199_vm0, %v4901_v5, 0  ;;  %v3649_v5 = vshll.u32 %v4925_v60, 16  ;;  %v4928_v11 = vld [vmem:[%s6353_s14 + $0x9c] sm:$0xf] }
  0x76   : > { %5209 = vmatpush3.bf16.msra.mxu1 %v2684_v9  ;;  %5210 = vmatprep.mubr.msk.bf16.mxu1 %vm5518_vm1, %v5517_v2  ;;  %v5451_v9 = vld [vmem:[%s5901_s28] sm:$0xff]   ;;  %v3205_v27 = vsel %vm1309_vm3, %v3200_v18, %v3204_v19  ;;  %v5467_v18 = vld [vmem:[%s5938_s25 + $0x8] ss:$0 sps:$4 sm:$0x33]   ;;  %v3720_v19 = vsel %vm1199_vm0, %v4928_v11, 0 }
  0x77   : > { %5220 = vmatprep.subr.bf16.mxu1 %v5517_v2  ;;  %v3651_v13 = vrot.slane %v3649_v5, 1  ;;  %v4159_v11 = vld [vmem:[%s5994_s29] sm:$0xe] }
  0x79   : > { %v3652_v20 = vor.u32 %v3651_v13, %v3647_v12 }
  0x7b   : > { %5205 = vmatmul.mubr.msk.bf16.vlgmr.msra.gmra.mxu0 %vm1195_vm2, %v5442_v16  ;;  %v3130_v16 = vrot.slane %v3128_v8, 1  ;;  %v4924_v8 = vld [vmem:[%s6353_s14 + $0x98] sm:$0xf] }
  0x7c   : > { %5215 = vmatpush3.bf16.msra.mxu0 %v2758_v21  ;;  %5216 = vmatprep.mubr.msk.bf16.mxu0 %vm5518_vm1, %v5517_v2  ;;  %v4906_v21 = vcombine.low %v3255_v17, %v3108_v49 }
  0x7d   : > { %5211 = vmatmul.mubr.msk.bf16.vlgmr.msra.gmra.mxu1 %vm1195_vm2, %v2679_v23  ;;  %5226 = vmatprep.subr.bf16.mxu0 %v5517_v2  ;;  %v3131_v23 = vsel %vm1309_vm3, %v3126_v15, %v3130_v16  ;;  %v3662_v15 = vsel %vm1199_vm0, %v4924_v8, 0 }
  0x7e   : > { %5221 = vmatpush3.bf16.msra.mxu1 %v2816_v25  ;;  %5222 = vmatprep.mubr.msk.bf16.mxu1 %vm5518_vm1, %v5517_v2  ;;  %v5458_v25 = vld [vmem:[%s5891_s30 + $0x8] ss:$0 sps:$4 sm:$0x33]   ;;  %v3261_v30 = vrot.slane %v4906_v21, 1  ;;  %v3378_v32 = vshrl.u32 %v4906_v21, 16  ;;  %v3381_v33 = vshll.u32 %v4906_v21, 16 }
  0x7f   : > { %5232 = vmatprep.subr.bf16.mxu1 %v5517_v2  ;;  %v3386_v34 = vshrl.u32 %v5458_v25, 16  ;;  %v3389_v35 = vshll.u32 %v5458_v25, 16  ;;  %v4931_v25 = vld [vmem:[%s6353_s14 + $0xa0] sm:$0xf]  ;;  %s4798_s30 = sshll.u32 %s6378_s22, 5 }
  0x80   : > { %v3380_v43 = vrot.slane %v3378_v32, 1  ;;  %v3383_v44 = vrot.slane %v3381_v33, 2  ;;  %v4932_v32 = vcombine.low %v3765_v24, %v6167_v54 }
  0x81   : > { %v3391_v46 = vrot.slane %v3389_v35, 2 }
  0x82   : > { %v3384_v51 = vor.u32 %v3383_v44, %v3380_v43  ;;  %v4012_v43 = vld [vmem:[%s5994_s29 + $0x4] sm:$0xf] }
  0x83   : > { %5217 = vmatmul.mubr.msk.bf16.vlgmr.msra.gmra.mxu0 %vm1195_vm2, %v2753_v36  ;;  %v3319_v36 = vrot.slane %v4909_v28, 1  ;;  %v3838_v28 = vshrl.u32 %v5467_v18, 16 }
  0x84   : > { %5227 = vmatpush3.bf16.msra.mxu0 %v2874_v40  ;;  %5228 = vmatprep.mubr.msk.bf16.mxu0 %vm5518_vm1, %v5517_v2  ;;  %v3559_v40 = vld [vmem:[%s5938_s25] sm:$0xf] }
  0x85   : > { %5223 = vmatmul.mubr.msk.bf16.vlgmr.msra.gmra.mxu1 %vm1195_vm2, %v2811_v39  ;;  %5238 = vmatprep.subr.bf16.mxu0 %v5517_v2  ;;  %v3263_v39 = vsel %vm1451_vm4, %v3261_v30, %v3262_v31  ;;  %v3321_v48 = vsel %vm1451_vm4, %v3319_v36, %v3320_v37  ;;  %v4921_v49 = vcombine.low %v3559_v40, %v3560_v41  ;;  %v4934_v31 = vld [vmem:[%s6353_s14 + $0xa4] sm:$0xf]  ;;  %v3840_v37 = vrot.slane %v3838_v28, 1 }
  0x86   : > { %5233 = vmatpush3.bf16.msra.mxu1 %v2946_v45  ;;  %5234 = vmatprep.mubr.msk.bf16.mxu1 %vm5518_vm1, %v5517_v2  ;;  %v3388_v45 = vrot.slane %v3386_v34, 1  ;;  %v3778_v34 = vsel %vm1199_vm0, %v4931_v25, 0  ;;  %v3771_v40 = vrot.slane %v4932_v32, 1  ;;  %v4957_v32 = vld [vmem:[%s6353_s14 + $0xc0] sm:$0xf] }
  0x87   : > { %5244 = vmatprep.subr.bf16.mxu1 %v5517_v2  ;;  %v3575_v57 = vshll.u32 %v4921_v49, 16  ;;  %v3573_v63 = vshrl.u32 %v4921_v49, 16 }
  0x88   : > { %v3392_v52 = vor.u32 %v3391_v46, %v3388_v45  ;;  %v4937_v46 = vld [vmem:[%s6353_s14 + $0xa8] sm:$0xf] }
  0x89   : > { %v3577_v0 = vrot.slane %v3575_v57, 1 }
  0x8b   : > { %5229 = vmatmul.mubr.msk.bf16.vlgmr.msra.gmra.mxu0 %vm1195_vm2, %v2869_v55  ;;  %v4917_v55 = vld [vmem:[%s6353_s14 + $0x90] sm:$0xf]  ;;  %v3578_v6 = vor.u32 %v3577_v0, %v3573_v63 }
  0x8c   : > { %5239 = vmatpush3.bf16.msra.mxu0 %v3004_v58  ;;  %5240 = vmatprep.mubr.msk.bf16.mxu0 %vm5518_vm1, %v5517_v2  ;;  %v3393_v58 = vsel %vm1568_vm5, %v3384_v51, %v3392_v52  ;;  %v3514_v62 = vsel %vm1199_vm0, %v4917_v55, 0  ;;  %v4944_v51 = vcombine.low %v4011_v42, %v4012_v43  ;;  %v3908_v52 = vsel %vm1199_vm0, %v4937_v46, 0 }
  0x8d   : > { %5235 = vmatmul.mubr.msk.bf16.vlgmr.msra.gmra.mxu1 %vm1195_vm2, %v2941_v59  ;;  %5250 = vmatprep.subr.bf16.mxu0 %v5517_v2  ;;  %v4920_v59 = vld [vmem:[%s6353_s14 + $0x94] sm:$0xf]  ;;  %v3583_v17 = vsel %vm1309_vm3, %v3578_v6, %v3582_v7 }
  0x8e   : > { %5245 = vmatpush3.bf16.msra.mxu1 %v3062_v61  ;;  %5246 = vmatprep.mubr.msk.bf16.mxu1 %vm5518_vm1, %v5517_v2  ;;  %v5459_v61 = vld [vmem:[%s5938_s25] sm:$0xff]   ;;  %v3588_v3 = vsel %vm1199_vm0, %v4920_v59, 0  ;;  %v4027_v57 = vshll.u32 %v4944_v51, 16  ;;  %v5473_v59 = vld [vmem:[%s6010_s16 + $0x8] ss:$0 sps:$4 sm:$0x11]  }
  0x8f   : > { %5256 = vmatprep.subr.bf16.mxu1 %v5517_v2  ;;  %v4025_v63 = vshrl.u32 %v4944_v51, 16  ;;  %v4106_v7 = vshll.u32 %v5473_v59, 16 }
  0x90   : > { %v4029_v0 = vrot.slane %v4027_v57, 1 }
  0x91   : > { %v4108_v13 = vrot.slane %v4106_v7, 1 }
  0x93   : > { %5241 = vmatmul.mubr.msk.bf16.vlgmr.msra.gmra.mxu0 %vm1195_vm2, %v5450_v4  ;;  %v6188_v4 = vld [vmem:[%s5951_s18 + $0x8] ss:$0 sps:$4 sm:$0x11]  }
  0x94   : > { %5251 = vmatpush3.bf16.msra.mxu0 %v3136_v10  ;;  %5252 = vmatprep.mubr.msk.bf16.mxu0 %vm5518_vm1, %v5517_v2  ;;  %v5460_v10 = vld [vmem:[%s5951_s18] sm:$0xff]  }
  0x95   : > { %5247 = vmatmul.mubr.msk.bf16.vlgmr.msra.gmra.mxu1 %vm1195_vm2, %v5451_v9  ;;  %5262 = vmatprep.subr.bf16.mxu0 %v5517_v2  ;;  %v3707_v9 = vld [vmem:[%s5938_s25] sm:$0xe]  ;;  %s6377_s25 = sld [smem:[#allocation2_spill]] }
  0x96   : > { %5257 = vmatpush3.bf16.msra.mxu1 %v3210_v14  ;;  %5258 = vmatprep.mubr.msk.bf16.mxu1 %vm5518_vm1, %v5517_v2  ;;  %v3654_v14 = vshll.u32 %v6188_v4, 16  ;;  %v4929_v16 = vcombine.low %v3707_v9, %v3560_v41  ;;  %v3772_v41 = vrot.slane %v6188_v4, 1  ;;  %v4030_v9 = vor.u32 %v4029_v0, %v4025_v63 }
  0x97   : > { %5268 = vmatprep.subr.bf16.mxu1 %v5517_v2 }
  0x98   : > { %v3656_v21 = vrot.slane %v3654_v14, 1  ;;  %v3713_v22 = vrot.slane %v4929_v16, 1  ;;  %v3773_v49 = vsel %vm1451_vm4, %v3771_v40, %v3772_v41  ;;  %v4951_v14 = vld [vmem:[%s6353_s14 + $0xb8] sm:$0xf] }
  0x9a   : > { %v3657_v30 = vsel %vm1309_vm3, %v3652_v20, %v3656_v21  ;;  %v4172_v20 = vsel %vm1199_vm0, %v4951_v14, 0 }
  0x9b   : > { %5253 = vmatmul.mubr.msk.bf16.vlgmr.msra.gmra.mxu0 %vm1195_vm2, %v3131_v23  ;;  %v3714_v23 = vrot.slane %v5462_v56, 1  ;;  %v5471_v56 = vld [vmem:[%s5994_s29 + $0x8] ss:$0 sps:$4 sm:$0x11]   ;;  %p1175_p13 = scmp.lt.s32.totalorder %s6377_s25, 15 }
  0x9c   : > { %5263 = vmatpush3.bf16.msra.mxu0 %v3268_v26  ;;  %5264 = vmatprep.mubr.msk.bf16.mxu0 %vm5518_vm1, %v5517_v2  ;;  %v3830_v26 = vshrl.u32 %v4929_v16, 16  ;;  %v4032_v1 = vshll.u32 %v5471_v56, 16  ;;  %v4166_v25 = vrot.slane %v5471_v56, 1 }
  0x9d   : > { %5259 = vmatmul.mubr.msk.bf16.vlgmr.msra.gmra.mxu1 %vm1195_vm2, %v3205_v27  ;;  %5274 = vmatprep.subr.bf16.mxu0 %v5517_v2  ;;  %v3833_v27 = vshll.u32 %v4929_v16, 16  ;;  %v3715_v33 = vsel %vm1451_vm4, %v3713_v22, %v3714_v23  ;;  %v4217_v16 = vld [vmem:[%s6010_s16] sm:$0xe]  ;;  %s6407_s25 = smov (!%p1175_p13, %s6377_s25), 15 }
  0x9e   : > { %5269 = vmatpush3.bf16.msra.mxu1 %v3326_v29  ;;  %5270 = vmatprep.mubr.msk.bf16.mxu1 %vm5518_vm1, %v5517_v2  ;;  %v3841_v29 = vshll.u32 %v5467_v18, 16  ;;  %v3832_v35 = vrot.slane %v3830_v26, 1  ;;  %v4954_v18 = vld [vmem:[%s6353_s14 + $0xbc] sm:$0xf]  ;;  %s4797_s23 = sshll.u32 %s6407_s25, 1 }
  0x9f   : > { %5280 = vmatprep.subr.bf16.mxu1 %v5517_v2  ;;  %v3835_v36 = vrot.slane %v3833_v27, 2  ;;  %v4230_v23 = vsel %vm1199_vm0, %v4954_v18, 0  ;;  %s1179_s1 = sadd.s32 %s4798_s30, %s4797_s23 }
  0xa0   : > { %v3843_v38 = vrot.slane %v3841_v29, 2  ;;  %s4799_s0 = sshll.u32 %s1179_s1, 2 }
  0xa1   : > { %v3836_v44 = vor.u32 %v3835_v36, %v3832_v35  ;;  %s1181_s20 = scalar_lea.vmem %s6380_s19, %s4799_s0 }
  0xa2   : > { %v3844_v45 = vor.u32 %v3843_v38, %v3840_v37  ;;  %v4302_v38 = vsel %vm1199_vm0, %v4957_v32, 0 }
  0xa3   : > { %5265 = vmatmul.mubr.msk.bf16.vlgmr.msra.gmra.mxu0 %vm1195_vm2, %v3263_v39  ;;  %v3850_v39 = vsel %vm1199_vm0, %v4934_v31, 0  ;;  %v4224_v31 = vrot.slane %v5473_v59, 1 }
  0xa4   : > { %5275 = vmatpush3.bf16.msra.mxu0 %v3398_v47  ;;  %5276 = vmatprep.mubr.msk.bf16.mxu0 %vm5518_vm1, %v5517_v2  ;;  %v4085_v47 = vld [vmem:[%s6010_s16] sm:$0xf]  ;;  %v3845_v53 = vsel %vm1568_vm5, %v3836_v44, %v3844_v45 }
  0xa5   : > { %5271 = vmatmul.mubr.msk.bf16.vlgmr.msra.gmra.mxu1 %vm1195_vm2, %v3321_v48  ;;  %5286 = vmatprep.subr.bf16.mxu0 %v5517_v2  ;;  %v6244_v48 = vld [vmem:[%s6010_s16 + $0x4] sm:$0xf] }
  0xa6   : > { %5281 = vmatpush3.bf16.msra.mxu1 %v3456_v50  ;;  %5282 = vmatprep.mubr.msk.bf16.mxu1 %vm5518_vm1, %v5517_v2  ;;  %v4940_v50 = vld [vmem:[%s6353_s14 + $0xac] sm:$0xf]  ;;  %v4948_v54 = vcombine.low %v4085_v47, %v6244_v48  ;;  %v4955_v22 = vcombine.low %v4217_v16, %v6244_v48 }
  0xa7   : > { %5292 = vmatprep.subr.bf16.mxu1 %v5517_v2  ;;  %v3966_v55 = vsel %vm1199_vm0, %v4940_v50, 0 }
  0xa8   : > { %v4101_v60 = vshll.u32 %v4948_v54, 16  ;;  %v4099_v5 = vshrl.u32 %v4948_v54, 16 }
  0xaa   : > { %v4103_v6 = vrot.slane %v4101_v60, 1 }
  0xab   : > { %5277 = vmatmul.mubr.msk.bf16.vlgmr.msra.gmra.mxu0 %vm1195_vm2, %v3393_v58  ;;  %v4943_v58 = vld [vmem:[%s6353_s14 + $0xb0] sm:$0xf] }
  0xac   : > { %5287 = vmatpush3.bf16.msra.mxu0 %v3514_v62  ;;  %5288 = vmatprep.mubr.msk.bf16.mxu0 %vm5518_vm1, %v5517_v2  ;;  %v4947_v62 = vld [vmem:[%s6353_s14 + $0xb4] sm:$0xf]  ;;  %v4040_v4 = vsel %vm1199_vm0, %v4943_v58, 0  ;;  %v4104_v12 = vor.u32 %v4103_v6, %v4099_v5 }
  0xad   : > { %5283 = vmatmul.mubr.msk.bf16.vlgmr.msra.gmra.mxu1 %vm1195_vm2, %v5459_v61  ;;  %5298 = vmatprep.subr.bf16.mxu0 %v5517_v2  ;;  %v5468_v61 = vld [vmem:[%s5994_s29] sm:$0xff]   ;;  %v4114_v8 = vsel %vm1199_vm0, %v4947_v62, 0 }
  0xae   : > { %5293 = vmatpush3.bf16.msra.mxu1 %v3588_v3  ;;  %5294 = vmatprep.mubr.msk.bf16.mxu1 %vm5518_vm1, %v5517_v2  ;;  %v5469_v3 = vld [vmem:[%s6010_s16] sm:$0xff]   ;;  %v4109_v21 = vsel %vm1309_vm3, %v4104_v12, %v4108_v13 }
  0xaf   : > { %5304 = vmatprep.subr.bf16.mxu1 %v5517_v2 }
  0xb3   : > { %5289 = vmatmul.mubr.msk.bf16.vlgmr.msra.gmra.mxu0 %vm1195_vm2, %v5460_v10  ;;  %v4034_v10 = vrot.slane %v4032_v1, 1 }
  0xb4   : > { %5299 = vmatpush3.bf16.msra.mxu0 %v3662_v15  ;;  %5300 = vmatprep.mubr.msk.bf16.mxu0 %vm5518_vm1, %v5517_v2  ;;  %v4952_v15 = vcombine.low %v4159_v11, %v4012_v43 }
  0xb5   : > { %5295 = vmatmul.mubr.msk.bf16.vlgmr.msra.gmra.mxu1 %vm1195_vm2, %v3583_v17  ;;  %5310 = vmatprep.subr.bf16.mxu0 %v5517_v2  ;;  %v4035_v17 = vsel %vm1309_vm3, %v4030_v9, %v4034_v10 }
  0xb6   : > { %5305 = vmatpush3.bf16.msra.mxu1 %v3720_v19  ;;  %5306 = vmatprep.mubr.msk.bf16.mxu1 %vm5518_vm1, %v5517_v2  ;;  %v5476_v19 = vld [vmem:[%s5994_s29 + $0x8] ss:$0 sps:$4 sm:$0x33]   ;;  %v4165_v24 = vrot.slane %v4952_v15, 1  ;;  %v4282_v26 = vshrl.u32 %v4952_v15, 16  ;;  %v4285_v27 = vshll.u32 %v4952_v15, 16 }
  0xb7   : > { %5316 = vmatprep.subr.bf16.mxu1 %v5517_v2  ;;  %v4290_v28 = vshrl.u32 %v5476_v19, 16  ;;  %v4293_v29 = vshll.u32 %v5476_v19, 16 }
  0xb8   : > { %v4287_v35 = vrot.slane %v4285_v27, 2 }
  0xb9   : > { %v4292_v36 = vrot.slane %v4290_v28, 1  ;;  %v4295_v37 = vrot.slane %v4293_v29, 2 }
  0xbb   : > { %5301 = vmatmul.mubr.msk.bf16.vlgmr.msra.gmra.mxu0 %vm1195_vm2, %v3657_v30  ;;  %v4223_v30 = vrot.slane %v4955_v22, 1  ;;  %v4296_v41 = vor.u32 %v4295_v37, %v4292_v36 }
  0xbc   : > { %5311 = vmatpush3.bf16.msra.mxu0 %v3778_v34  ;;  %5312 = vmatprep.mubr.msk.bf16.mxu0 %vm5518_vm1, %v5517_v2  ;;  %v4284_v34 = vrot.slane %v4282_v26, 1 }
  0xbd   : > { %5307 = vmatmul.mubr.msk.bf16.vlgmr.msra.gmra.mxu1 %vm1195_vm2, %v3715_v33  ;;  %5322 = vmatprep.subr.bf16.mxu0 %v5517_v2  ;;  %v4167_v33 = vsel %vm1451_vm4, %v4165_v24, %v4166_v25 }
  0xbe   : > { %5317 = vmatpush3.bf16.msra.mxu1 %v3850_v39  ;;  %5318 = vmatprep.mubr.msk.bf16.mxu1 %vm5518_vm1, %v5517_v2  ;;  %v4225_v39 = vsel %vm1451_vm4, %v4223_v30, %v4224_v31  ;;  %v4288_v40 = vor.u32 %v4287_v35, %v4284_v34 }
  0xbf   : > { %5328 = vmatprep.subr.bf16.mxu1 %v5517_v2 }
  0xc0   : > { %v4297_v42 = vsel %vm1568_vm5, %v4288_v40, %v4296_v41 }
  0xc3   : > { %5313 = vmatmul.mubr.msk.bf16.vlgmr.msra.gmra.mxu0 %vm1195_vm2, %v3773_v49 }
  0xc4   : > { %5323 = vmatpush3.bf16.msra.mxu0 %v3908_v52  ;;  %5324 = vmatprep.mubr.msk.bf16.mxu0 %vm5518_vm1, %v5517_v2 }
  0xc5   : > { %5319 = vmatmul.mubr.msk.bf16.vlgmr.msra.gmra.mxu1 %vm1195_vm2, %v3845_v53  ;;  %5334 = vmatprep.subr.bf16.mxu0 %v5517_v2 }
  0xc6   : > { %5329 = vmatpush3.bf16.msra.mxu1 %v3966_v55  ;;  %5330 = vmatprep.mubr.msk.bf16.mxu1 %vm5518_vm1, %v5517_v2 }
  0xc7   : > { %5340 = vmatprep.subr.bf16.mxu1 %v5517_v2 }
  0xcb   : > { %5325 = vmatmul.mubr.msk.bf16.vlgmr.msra.gmra.mxu0 %vm1195_vm2, %v5468_v61 }
  0xcc   : > { %5335 = vmatpush3.bf16.msra.mxu0 %v4040_v4  ;;  %5336 = vmatprep.mubr.msk.bf16.mxu0 %vm5518_vm1, %v5517_v2 }
  0xcd   : > { %5331 = vmatmul.mubr.msk.bf16.vlgmr.msra.gmra.mxu1 %vm1195_vm2, %v5469_v3  ;;  %5346 = vmatprep.subr.bf16.mxu0 %v5517_v2 }
  0xce   : > { %5341 = vmatpush3.bf16.msra.mxu1 %v4114_v8  ;;  %5342 = vmatprep.mubr.msk.bf16.mxu1 %vm5518_vm1, %v5517_v2 }
  0xcf   : > { %5352 = vmatprep.subr.bf16.mxu1 %v5517_v2 }
  0xd3   : > { %5337 = vmatmul.mubr.msk.bf16.vlgmr.msra.gmra.mxu0 %vm1195_vm2, %v4035_v17 }
  0xd4   : > { %5347 = vmatpush3.bf16.msra.mxu0 %v4172_v20  ;;  %5348 = vmatprep.mubr.msk.bf16.mxu0 %vm5518_vm1, %v5517_v2 }
  0xd5   : > { %5343 = vmatmul.mubr.msk.bf16.vlgmr.msra.gmra.mxu1 %vm1195_vm2, %v4109_v21  ;;  %5358 = vmatprep.subr.bf16.mxu0 %v5517_v2 }
  0xd6   : > { %5353 = vmatpush3.bf16.msra.mxu1 %v4230_v23  ;;  %5354 = vmatprep.mubr.msk.bf16.mxu1 %vm5518_vm1, %v5517_v2 }
  0xdb   : > { %5349 = vmatmul.mubr.msk.bf16.vlgmr.msra.gmra.mxu0 %vm1195_vm2, %v4167_v33 }
  0xdc   : > { %5359 = vmatpush3.bf16.msra.mxu0 %v4302_v38  ;;  %5360 = vmatprep.mubr.msk.bf16.mxu0 %vm5518_vm1, %v5517_v2 }
  0xdd   : > { %5355 = vmatmul.mubr.msk.bf16.vlgmr.msra.gmra.mxu1 %vm1195_vm2, %v4225_v39 }
  0xe0   : > { %v1289_v44 = vpop.f32.mrf.mxu1 }
  0xe1   : > { %v1237_v43 = vpop.f32.mrf.mxu0 }
  0xe2   : > { %v1290_v45 = vadd.f32 %v1289_v44, %v1237_v43  ;;  %v5080_v47 = vpop.f32.mrf.mxu1 }
  0xe3   : > { %5361 = vmatmul.mubr.msk.bf16.vlgmr.msra.gmra.mxu0 %vm1195_vm2, %v4297_v42  ;;  %v5074_v46 = vpop.f32.mrf.mxu0 }
  0xe4   : > { %v1292_v49 = vpop.f32.mrf.mxu1 }
  0xe5   : > { %v1240_v48 = vpop.f32.mrf.mxu0 }
  0xe6   : > { %v1293_v50 = vadd.f32 %v1292_v49, %v1240_v48  ;;  %v5081_v52 = vpop.f32.mrf.mxu1 }
  0xe7   : > { %v5075_v51 = vpop.f32.mrf.mxu0 }
  0xeb   : > { %v1362_v53 = vpop.f32.mrf.mxu0 }
  0xec   : > { %v1369_v2 = vadd.f32 %v1362_v53, %v1290_v45 }
  0xed   : > { %v1436_v54 = vpop.f32.mrf.mxu1  ;;  %v5086_v55 = vpop.f32.mrf.mxu0 }
  0xee   : > { %v1443_v56 = vadd.f32 %v1436_v54, %v1369_v2 }
  0xef   : > { %v5092_v57 = vpop.f32.mrf.mxu1  ;;  %v1365_v58 = vpop.f32.mrf.mxu0 }
  0xf0   : > { %v1370_v59 = vadd.f32 %v1365_v58, %v1293_v50 }
  0xf1   : > { %v1439_v60 = vpop.f32.mrf.mxu1  ;;  %v5087_v61 = vpop.f32.mrf.mxu0 }
  0xf2   : > { %v1444_v62 = vadd.f32 %v1439_v60, %v1370_v59 }
  0xf3   : > { %v5093_v63 = vpop.f32.mrf.mxu1  ;;  %v1495_v0 = vpop.f32.mrf.mxu0 }
  0xf4   : > { %v1502_v1 = vadd.f32 %v1495_v0, %v1443_v56 }
  0xf5   : > { %v1553_v3 = vpop.f32.mrf.mxu1  ;;  %v5098_v4 = vpop.f32.mrf.mxu0 }
  0xf6   : > { %v1560_v5 = vadd.f32 %v1553_v3, %v1502_v1 }
  0xf7   : > { %v5104_v6 = vpop.f32.mrf.mxu1  ;;  %v1498_v7 = vpop.f32.mrf.mxu0 }
  0xf8   : > { %v1503_v8 = vadd.f32 %v1498_v7, %v1444_v62 }
  0xf9   : > { %v1556_v9 = vpop.f32.mrf.mxu1  ;;  %v5099_v10 = vpop.f32.mrf.mxu0 }
  0xfa   : > { %v1561_v11 = vadd.f32 %v1556_v9, %v1503_v8 }
  0xfb   : > { %v5105_v12 = vpop.f32.mrf.mxu1  ;;  %v1626_v13 = vpop.f32.mrf.mxu0 }
  0xfc   : > { %v1633_v14 = vadd.f32 %v1626_v13, %v1560_v5 }
  0xfd   : > { %v1684_v15 = vpop.f32.mrf.mxu1  ;;  %v5110_v16 = vpop.f32.mrf.mxu0 }
  0xfe   : > { %v1691_v17 = vadd.f32 %v1684_v15, %v1633_v14 }
  0xff   : > { %v5116_v18 = vpop.f32.mrf.mxu1  ;;  %v1629_v19 = vpop.f32.mrf.mxu0 }
 0x100   : > { %v1634_v20 = vadd.f32 %v1629_v19, %v1561_v11 }
 0x101   : > { %v1687_v21 = vpop.f32.mrf.mxu1  ;;  %v5111_v22 = vpop.f32.mrf.mxu0 }
 0x102   : > { %v1692_v23 = vadd.f32 %v1687_v21, %v1634_v20 }
 0x103   : > { %v5117_v24 = vpop.f32.mrf.mxu1  ;;  %v1742_v25 = vpop.f32.mrf.mxu0 }
 0x104   : > { %v1749_v26 = vadd.f32 %v1742_v25, %v1691_v17 }
 0x105   : > { %v1816_v27 = vpop.f32.mrf.mxu1  ;;  %v5122_v28 = vpop.f32.mrf.mxu0 }
 0x106   : > { %v1823_v29 = vadd.f32 %v1816_v27, %v1749_v26 }
 0x107   : > { %v5128_v30 = vpop.f32.mrf.mxu1  ;;  %v1745_v31 = vpop.f32.mrf.mxu0 }
 0x108   : > { %v1750_v32 = vadd.f32 %v1745_v31, %v1692_v23 }
 0x109   : > { %v1819_v33 = vpop.f32.mrf.mxu1  ;;  %v5123_v34 = vpop.f32.mrf.mxu0 }
 0x10a   : > { %v1824_v35 = vadd.f32 %v1819_v33, %v1750_v32 }
 0x10b   : > { %v5129_v36 = vpop.f32.mrf.mxu1  ;;  %v1890_v37 = vpop.f32.mrf.mxu0 }
 0x10c   : > { %v1897_v38 = vadd.f32 %v1890_v37, %v1823_v29 }
 0x10d   : > { %v1948_v39 = vpop.f32.mrf.mxu1  ;;  %v5134_v40 = vpop.f32.mrf.mxu0 }
 0x10e   : > { %v1955_v41 = vadd.f32 %v1948_v39, %v1897_v38 }
 0x10f   : > { %v5140_v42 = vpop.f32.mrf.mxu1  ;;  %v1893_v43 = vpop.f32.mrf.mxu0 }
 0x110   : > { %v1898_v44 = vadd.f32 %v1893_v43, %v1824_v35 }
 0x111   : > { %v1951_v45 = vpop.f32.mrf.mxu1  ;;  %v5135_v46 = vpop.f32.mrf.mxu0 }
 0x112   : > { %v1956_v47 = vadd.f32 %v1951_v45, %v1898_v44 }
 0x113   : > { %v5141_v48 = vpop.f32.mrf.mxu1  ;;  %v2006_v49 = vpop.f32.mrf.mxu0 }
 0x114   : > { %v2013_v50 = vadd.f32 %v2006_v49, %v1955_v41 }
 0x115   : > { %v2078_v51 = vpop.f32.mrf.mxu1  ;;  %v5146_v52 = vpop.f32.mrf.mxu0 }
 0x116   : > { %v2085_v53 = vadd.f32 %v2078_v51, %v2013_v50 }
 0x117   : > { %v5152_v2 = vpop.f32.mrf.mxu1  ;;  %v2009_v54 = vpop.f32.mrf.mxu0 }
 0x118   : > { %v2014_v55 = vadd.f32 %v2009_v54, %v1956_v47 }
 0x119   : > { %v2081_v56 = vpop.f32.mrf.mxu1  ;;  %v5147_v57 = vpop.f32.mrf.mxu0 }
 0x11a   : > { %v2086_v58 = vadd.f32 %v2081_v56, %v2014_v55 }
 0x11b   : > { %v5153_v59 = vpop.f32.mrf.mxu1  ;;  %v2136_v60 = vpop.f32.mrf.mxu0 }
 0x11c   : > { %v2143_v61 = vadd.f32 %v2136_v60, %v2085_v53 }
 0x11d   : > { %v2194_v62 = vpop.f32.mrf.mxu1  ;;  %v5158_v63 = vpop.f32.mrf.mxu0 }
 0x11e   : > { %v2201_v0 = vadd.f32 %v2194_v62, %v2143_v61 }
 0x11f   : > { %v5164_v1 = vpop.f32.mrf.mxu1  ;;  %v2139_v3 = vpop.f32.mrf.mxu0 }
 0x120   : > { %v2144_v4 = vadd.f32 %v2139_v3, %v2086_v58 }
 0x121   : > { %v2197_v5 = vpop.f32.mrf.mxu1  ;;  %v5159_v6 = vpop.f32.mrf.mxu0 }
 0x122   : > { %v2202_v7 = vadd.f32 %v2197_v5, %v2144_v4 }
 0x123   : > { %v5165_v8 = vpop.f32.mrf.mxu1  ;;  %v2268_v9 = vpop.f32.mrf.mxu0 }
 0x124   : > { %v2275_v10 = vadd.f32 %v2268_v9, %v2201_v0 }
 0x125   : > { %v2342_v11 = vpop.f32.mrf.mxu1  ;;  %v5170_v12 = vpop.f32.mrf.mxu0 }
 0x126   : > { %v2349_v13 = vadd.f32 %v2342_v11, %v2275_v10 }
 0x127   : > { %v5176_v14 = vpop.f32.mrf.mxu1  ;;  %v2271_v15 = vpop.f32.mrf.mxu0 }
 0x128   : > { %v2276_v16 = vadd.f32 %v2271_v15, %v2202_v7 }
 0x129   : > { %v2345_v17 = vpop.f32.mrf.mxu1  ;;  %v5171_v18 = vpop.f32.mrf.mxu0 }
 0x12a   : > { %v2350_v19 = vadd.f32 %v2345_v17, %v2276_v16 }
 0x12b   : > { %v5177_v20 = vpop.f32.mrf.mxu1  ;;  %v2400_v21 = vpop.f32.mrf.mxu0 }
 0x12c   : > { %v2407_v22 = vadd.f32 %v2400_v21, %v2349_v13 }
 0x12d   : > { %v2458_v23 = vpop.f32.mrf.mxu1  ;;  %v5182_v24 = vpop.f32.mrf.mxu0 }
 0x12e   : > { %v2465_v25 = vadd.f32 %v2458_v23, %v2407_v22 }
 0x12f   : > { %v5188_v26 = vpop.f32.mrf.mxu1  ;;  %v2403_v27 = vpop.f32.mrf.mxu0 }
 0x130   : > { %v2408_v57 = vadd.f32 %v2403_v27, %v2350_v19 }
 0x131   : > { %v2461_v28 = vpop.f32.mrf.mxu1  ;;  %v5183_v29 = vpop.f32.mrf.mxu0 }
 0x132   : > { %v2466_v63 = vadd.f32 %v2461_v28, %v2408_v57 }
 0x133   : > { %v5189_v30 = vpop.f32.mrf.mxu1  ;;  %v2530_v31 = vpop.f32.mrf.mxu0 }
 0x134   : > { %v2537_v60 = vadd.f32 %v2530_v31, %v2465_v25 }
 0x135   : > { %v2588_v32 = vpop.f32.mrf.mxu1  ;;  %v5194_v33 = vpop.f32.mrf.mxu0 }
 0x136   : > { %v2595_v3 = vadd.f32 %v2588_v32, %v2537_v60 }
 0x137   : > { %v5200_v34 = vpop.f32.mrf.mxu1  ;;  %v2533_v35 = vpop.f32.mrf.mxu0 }
 0x138   : > { %v2538_v4 = vadd.f32 %v2533_v35, %v2466_v63 }
 0x139   : > { %v2591_v36 = vpop.f32.mrf.mxu1  ;;  %v5195_v37 = vpop.f32.mrf.mxu0 }
 0x13a   : > { %v2596_v10 = vadd.f32 %v2591_v36, %v2538_v4 }
 0x13b   : > { %v5201_v38 = vpop.f32.mrf.mxu1  ;;  %v2646_v39 = vpop.f32.mrf.mxu0 }
 0x13c   : > { %v2653_v7 = vadd.f32 %v2646_v39, %v2595_v3 }
 0x13d   : > { %v2720_v40 = vpop.f32.mrf.mxu1  ;;  %v5206_v41 = vpop.f32.mrf.mxu0 }
 0x13e   : > { %v2727_v13 = vadd.f32 %v2720_v40, %v2653_v7 }
 0x13f   : > { %v5212_v42 = vpop.f32.mrf.mxu1  ;;  %v2649_v43 = vpop.f32.mrf.mxu0 }
 0x140   : > { %v2654_v14 = vadd.f32 %v2649_v43, %v2596_v10 }
 0x141   : > { %v2723_v44 = vpop.f32.mrf.mxu1  ;;  %v5207_v45 = vpop.f32.mrf.mxu0 }
 0x142   : > { %v2728_v20 = vadd.f32 %v2723_v44, %v2654_v14 }
 0x143   : > { %v5213_v46 = vpop.f32.mrf.mxu1  ;;  %v2794_v47 = vpop.f32.mrf.mxu0 }
 0x144   : > { %v2801_v17 = vadd.f32 %v2794_v47, %v2727_v13 }
 0x145   : > { %v2852_v48 = vpop.f32.mrf.mxu1  ;;  %v5218_v49 = vpop.f32.mrf.mxu0 }
 0x146   : > { %v2859_v23 = vadd.f32 %v2852_v48, %v2801_v17 }
 0x147   : > { %v5224_v50 = vpop.f32.mrf.mxu1  ;;  %v2797_v51 = vpop.f32.mrf.mxu0 }
 0x148   : > { %v2802_v24 = vadd.f32 %v2797_v51, %v2728_v20 }
 0x149   : > { %v2855_v52 = vpop.f32.mrf.mxu1  ;;  %v5219_v53 = vpop.f32.mrf.mxu0 }
 0x14a   : > { %v2860_v30 = vadd.f32 %v2855_v52, %v2802_v24 }
 0x14b   : > { %v5225_v2 = vpop.f32.mrf.mxu1  ;;  %v2910_v54 = vpop.f32.mrf.mxu0 }
 0x14c   : > { %v2917_v27 = vadd.f32 %v2910_v54, %v2859_v23 }
 0x14d   : > { %v2982_v55 = vpop.f32.mrf.mxu1  ;;  %v5230_v56 = vpop.f32.mrf.mxu0 }
 0x14e   : > { %v2989_v33 = vadd.f32 %v2982_v55, %v2917_v27 }
 0x14f   : > { %v5236_v58 = vpop.f32.mrf.mxu1  ;;  %v2913_v59 = vpop.f32.mrf.mxu0 }
 0x150   : > { %v2918_v34 = vadd.f32 %v2913_v59, %v2860_v30 }
 0x151   : > { %v2985_v61 = vpop.f32.mrf.mxu1  ;;  %v5231_v62 = vpop.f32.mrf.mxu0 }
 0x152   : > { %v2990_v40 = vadd.f32 %v2985_v61, %v2918_v34 }
 0x153   : > { %v5237_v0 = vpop.f32.mrf.mxu1  ;;  %v3040_v1 = vpop.f32.mrf.mxu0 }
 0x154   : > { %v3047_v37 = vadd.f32 %v3040_v1, %v2989_v33 }
 0x155   : > { %v3098_v5 = vpop.f32.mrf.mxu1  ;;  %v5242_v6 = vpop.f32.mrf.mxu0 }
 0x156   : > { %v3105_v43 = vadd.f32 %v3098_v5, %v3047_v37 }
 0x157   : > { %v5248_v8 = vpop.f32.mrf.mxu1  ;;  %v3043_v9 = vpop.f32.mrf.mxu0 }
 0x158   : > { %v3048_v44 = vadd.f32 %v3043_v9, %v2990_v40 }
 0x159   : > { %v3101_v11 = vpop.f32.mrf.mxu1  ;;  %v5243_v12 = vpop.f32.mrf.mxu0 }
 0x15a   : > { %v3106_v50 = vadd.f32 %v3101_v11, %v3048_v44 }
 0x15b   : > { %v5249_v15 = vpop.f32.mrf.mxu1  ;;  %v3172_v16 = vpop.f32.mrf.mxu0 }
 0x15c   : > { %v3179_v47 = vadd.f32 %v3172_v16, %v3105_v43 }
 0x15d   : > { %v3246_v18 = vpop.f32.mrf.mxu1  ;;  %v5254_v19 = vpop.f32.mrf.mxu0 }
 0x15e   : > { %v3253_v53 = vadd.f32 %v3246_v18, %v3179_v47 }
 0x15f   : > { %v5260_v21 = vpop.f32.mrf.mxu1  ;;  %v3175_v22 = vpop.f32.mrf.mxu0 }
 0x160   : > { %v3180_v2 = vadd.f32 %v3175_v22, %v3106_v50 }
 0x161   : > { %v3249_v25 = vpop.f32.mrf.mxu1  ;;  %v5255_v26 = vpop.f32.mrf.mxu0 }
 0x162   : > { %v3254_v59 = vadd.f32 %v3249_v25, %v3180_v2 }
 0x163   : > { %v5261_v28 = vpop.f32.mrf.mxu1  ;;  %v3304_v29 = vpop.f32.mrf.mxu0 }
 0x164   : > { %v3311_v56 = vadd.f32 %v3304_v29, %v3253_v53 }
 0x165   : > { %v3362_v31 = vpop.f32.mrf.mxu1  ;;  %v5266_v32 = vpop.f32.mrf.mxu0 }
 0x166   : > { %v3369_v62 = vadd.f32 %v3362_v31, %v3311_v56 }
 0x167   : > { %v5272_v35 = vpop.f32.mrf.mxu1  ;;  %v3307_v36 = vpop.f32.mrf.mxu0 }
 0x168   : > { %v3312_v63 = vadd.f32 %v3307_v36, %v3254_v59 }
 0x169   : > { %v3365_v38 = vpop.f32.mrf.mxu1  ;;  %v5267_v39 = vpop.f32.mrf.mxu0 }
 0x16a   : > { %v3370_v6 = vadd.f32 %v3365_v38, %v3312_v63 }
 0x16b   : > { %v5273_v41 = vpop.f32.mrf.mxu1  ;;  %v3434_v42 = vpop.f32.mrf.mxu0 }
 0x16c   : > { %v3441_v3 = vadd.f32 %v3434_v42, %v3369_v62 }
 0x16d   : > { %v3492_v45 = vpop.f32.mrf.mxu1  ;;  %v5278_v46 = vpop.f32.mrf.mxu0 }
 0x16e   : > { %v3499_v9 = vadd.f32 %v3492_v45, %v3441_v3 }
 0x16f   : > { %v5284_v48 = vpop.f32.mrf.mxu1  ;;  %v3437_v49 = vpop.f32.mrf.mxu0 }
 0x170   : > { %v3442_v10 = vadd.f32 %v3437_v49, %v3370_v6 }
 0x171   : > { %v3495_v51 = vpop.f32.mrf.mxu1  ;;  %v5279_v52 = vpop.f32.mrf.mxu0 }
 0x172   : > { %v3500_v16 = vadd.f32 %v3495_v51, %v3442_v10  ;;  %v4960_v10 = vld [vmem:[%s6379_s26] ss:$0 sm:$0xff] }
 0x173   : > { %v5285_v54 = vpop.f32.mrf.mxu1  ;;  %v3550_v55 = vpop.f32.mrf.mxu0 }
 0x174   : > { %v3557_v13 = vadd.f32 %v3550_v55, %v3499_v9 }
 0x175   : > { %v3624_v57 = vpop.f32.mrf.mxu1  ;;  %v5290_v58 = vpop.f32.mrf.mxu0 }
 0x176   : > { %v3631_v19 = vadd.f32 %v3624_v57, %v3557_v13 }
 0x177   : > { %v5296_v60 = vpop.f32.mrf.mxu1  ;;  %v3553_v61 = vpop.f32.mrf.mxu0 }
 0x178   : > { %v3558_v20 = vadd.f32 %v3553_v61, %v3500_v16 }
 0x179   : > { %v3627_v0 = vpop.f32.mrf.mxu1  ;;  %v5291_v1 = vpop.f32.mrf.mxu0 }
 0x17a   : > { %v3632_v26 = vadd.f32 %v3627_v0, %v3558_v20 }
 0x17b   : > { %v5297_v4 = vpop.f32.mrf.mxu1  ;;  %v3698_v5 = vpop.f32.mrf.mxu0 }
 0x17c   : > { %v3705_v23 = vadd.f32 %v3698_v5, %v3631_v19 }
 0x17d   : > { %v3756_v7 = vpop.f32.mrf.mxu1  ;;  %v5302_v8 = vpop.f32.mrf.mxu0 }
 0x17e   : > { %v3763_v29 = vadd.f32 %v3756_v7, %v3705_v23 }
 0x17f   : > { %v5308_v11 = vpop.f32.mrf.mxu1  ;;  %v3701_v12 = vpop.f32.mrf.mxu0 }
 0x180   : > { %v3706_v30 = vadd.f32 %v3701_v12, %v3632_v26 }
 0x181   : > { %v3759_v14 = vpop.f32.mrf.mxu1  ;;  %v5303_v15 = vpop.f32.mrf.mxu0 }
 0x182   : > { %v3764_v36 = vadd.f32 %v3759_v14, %v3706_v30 }
 0x183   : > { %v5309_v17 = vpop.f32.mrf.mxu1  ;;  %v3814_v18 = vpop.f32.mrf.mxu0 }
 0x184   : > { %v3821_v33 = vadd.f32 %v3814_v18, %v3763_v29 }
 0x185   : > { %v3886_v21 = vpop.f32.mrf.mxu1  ;;  %v5314_v22 = vpop.f32.mrf.mxu0 }
 0x186   : > { %v3893_v39 = vadd.f32 %v3886_v21, %v3821_v33 }
 0x187   : > { %v5320_v24 = vpop.f32.mrf.mxu1  ;;  %v3817_v25 = vpop.f32.mrf.mxu0 }
 0x188   : > { %v3822_v40 = vadd.f32 %v3817_v25, %v3764_v36 }
 0x189   : > { %v3889_v27 = vpop.f32.mrf.mxu1  ;;  %v5315_v28 = vpop.f32.mrf.mxu0 }
 0x18a   : > { %v3894_v46 = vadd.f32 %v3889_v27, %v3822_v40 }
 0x18b   : > { %v5321_v31 = vpop.f32.mrf.mxu1  ;;  %v3944_v32 = vpop.f32.mrf.mxu0 }
 0x18c   : > { %v3951_v43 = vadd.f32 %v3944_v32, %v3893_v39 }
 0x18d   : > { %v4002_v34 = vpop.f32.mrf.mxu1  ;;  %v5326_v35 = vpop.f32.mrf.mxu0 }
 0x18e   : > { %v4009_v49 = vadd.f32 %v4002_v34, %v3951_v43 }
 0x18f   : > { %v5332_v37 = vpop.f32.mrf.mxu1  ;;  %v3947_v38 = vpop.f32.mrf.mxu0 }
 0x190   : > { %v3952_v50 = vadd.f32 %v3947_v38, %v3894_v46 }
 0x191   : > { %v4005_v41 = vpop.f32.mrf.mxu1  ;;  %v5327_v42 = vpop.f32.mrf.mxu0 }
 0x192   : > { %v4010_v55 = vadd.f32 %v4005_v41, %v3952_v50 }
 0x193   : > { %v5333_v44 = vpop.f32.mrf.mxu1  ;;  %v4076_v45 = vpop.f32.mrf.mxu0 }
 0x194   : > { %v4083_v53 = vadd.f32 %v4076_v45, %v4009_v49 }
 0x195   : > { %v4150_v47 = vpop.f32.mrf.mxu1  ;;  %v5338_v48 = vpop.f32.mrf.mxu0 }
 0x196   : > { %v4157_v58 = vadd.f32 %v4150_v47, %v4083_v53 }
 0x197   : > { %v5344_v51 = vpop.f32.mrf.mxu1  ;;  %v4079_v52 = vpop.f32.mrf.mxu0 }
 0x198   : > { %v4084_v59 = vadd.f32 %v4079_v52, %v4010_v55 }
 0x199   : > { %v4153_v2 = vpop.f32.mrf.mxu1  ;;  %v5339_v54 = vpop.f32.mrf.mxu0 }
 0x19a   : > { %v4158_v1 = vadd.f32 %v4153_v2, %v4084_v59 }
 0x19b   : > { %v5345_v56 = vpop.f32.mrf.mxu1  ;;  %v4208_v57 = vpop.f32.mrf.mxu0 }
 0x19c   : > { %v4215_v62 = vadd.f32 %v4208_v57, %v4157_v58 }
 0x19d   : > { %v4266_v60 = vpop.f32.mrf.mxu1  ;;  %v5350_v61 = vpop.f32.mrf.mxu0 }
 0x19e   : > { %v4273_v5 = vadd.f32 %v4266_v60, %v4215_v62 }
 0x19f   : > { %v5356_v63 = vpop.f32.mrf.mxu1  ;;  %v4211_v0 = vpop.f32.mrf.mxu0 }
 0x1a0   : > { %v4216_v6 = vadd.f32 %v4211_v0, %v4158_v1 }
 0x1a1   : > { %v4269_v3 = vpop.f32.mrf.mxu1  ;;  %v5351_v4 = vpop.f32.mrf.mxu0 }
 0x1a2   : > { %v4274_v12 = vadd.f32 %v4269_v3, %v4216_v6 }
 0x1a3   : > { %v5357_v7 = vpop.f32.mrf.mxu1  ;;  %v4338_v8 = vpop.f32.mrf.mxu0 }
 0x1a4   : > { %v4345_v9 = vadd.f32 %v4338_v8, %v4273_v5 }
 0x1a5   : > { %v5362_v11 = vpop.f32.mrf.mxu0 }
 0x1a6   : > { %v4354_v14 = vadd.f32 %v4960_v10, %v4345_v9 }
 0x1a7   : > { %v4341_v13 = vpop.f32.mrf.mxu0 }
 0x1a8   : > { %v4346_v15 = vadd.f32 %v4341_v13, %v4274_v12  ;;  %v4356_v18 = vmax.f32 %v4354_v14, 0.0 }
 0x1a9   : > { %v5363_v16 = vpop.f32.mrf.mxu0 }
 0x1aa   : > { %v4355_v17 = vadd.f32 %v4960_v10, %v4346_v15 }
 0x1ac   : > { %v4357_v19 = vmax.f32 %v4355_v17, 0.0 }
 0x1ae   : > { %v4970_v20 = vpack.c.bf16 %v4357_v19, %v4356_v18 }
 0x1b0   : > { %4971 = vst [vmem:[%s1181_s20] sm:$0xff] %v4970_v20  }
 0x1b1 PF: > { %s6381_s27 = sld [smem:[#allocation5_spill]] }
 0x1b2   : > { %s6382_s21 = sld [smem:[#allocation3_spill]] }
 0x1b3   : > { %s6383_s22 = sld [smem:[#allocation4_spill]] }
 0x1b4   : > { %s6384_s23 = sld [smem:[#allocation6_spill]] }
 0x1b5   : > { %s6385_s24 = sld [smem:[#allocation7_spill]] }
 0x1b7   : > { %s26_s25 = sadd.s32 1, %s6381_s27  }
 0x1b8   : > { %p23_p0 = scmp.ge.s32.totalorder %s26_s25, 34  }
 0x1ba   :  { %25 = sbr.rel (!%p23_p0) target bundleno = 5 (0x5), region = 201 }

// kernel: tsn_forward.32
= control target key start
LH: loop header
LB: loop body
LE: loop exit
PB: predicated region body
PF: predicated region fallthrough
CT: control target
= control target key end

     0   :  { %v194_v0 = vmov 0.0   ;;  %vm195_vm0 = vmmov 0   ;;  %s249_s1 = inlined_call_operand.vmem [shape: bf16[128,128], index: 1, kind: input, shape index: {}]   ;;  %s250_s0 = inlined_call_operand.vmem [shape: bf16[8,128], index: 0, kind: input, shape index: {}]   ;;  %s251_s2 = inlined_call_operand.vmem [shape: f32[1,128], index: 2, kind: input, shape index: {}]   ;;  %s252_s3 = inlined_call_operand.vmem [shape: bf16[8,128], index: 3, kind: output, shape index: {}]  }
   0x1   :  { %164 = vmatprep.subr.bf16.mxu0 %v194_v0  ;;  %v186_v1 = vld [vmem:[%s249_s1 + $0x38] sm:$0xff]   ;;  %180 = vmatprep.mubr.msk.bf16.mxu0 %vm195_vm0, %v194_v0  ;;  %v187_v2 = vld [vmem:[%s249_s1 + $0x30] sm:$0xff]   ;;  %v188_v3 = vld [vmem:[%s249_s1 + $0x28] sm:$0xff]  }
   0x2   :  { %165 = vmatpush3.bf16.msra.mxu0 %v186_v1  ;;  %v189_v4 = vld [vmem:[%s249_s1 + $0x20] sm:$0xff]   ;;  %v190_v5 = vld [vmem:[%s249_s1 + $0x18] sm:$0xff]   ;;  %v191_v6 = vld [vmem:[%s249_s1 + $0x10] sm:$0xff]  }
   0x3   :  { %166 = vmatprep.subr.bf16.mxu0 %v194_v0  ;;  %v192_v7 = vld [vmem:[%s249_s1 + $0x8] sm:$0xff]   ;;  %v193_v8 = vld [vmem:[%s249_s1] sm:$0xff]  }
   0x4   :  { %v21_v9 = vld [vmem:[%s250_s0] sm:$0xf] }
   0x5   :  { %v154_v10 = vld [vmem:[%s251_s2] ss:$0 sm:$0xff] }
   0x6   :  { %167 = vmatpush3.bf16.msra.mxu0 %v187_v2 }
   0x7   :  { %168 = vmatprep.subr.bf16.mxu0 %v194_v0 }
   0xa   :  { %169 = vmatpush3.bf16.msra.mxu0 %v188_v3 }
   0xb   :  { %170 = vmatprep.subr.bf16.mxu0 %v194_v0 }
   0xe   :  { %171 = vmatpush3.bf16.msra.mxu0 %v189_v4 }
   0xf   :  { %172 = vmatprep.subr.bf16.mxu0 %v194_v0 }
  0x12   :  { %173 = vmatpush3.bf16.msra.mxu0 %v190_v5 }
  0x13   :  { %174 = vmatprep.subr.bf16.mxu0 %v194_v0 }
  0x16   :  { %175 = vmatpush3.bf16.msra.mxu0 %v191_v6 }
  0x17   :  { %176 = vmatprep.subr.bf16.mxu0 %v194_v0 }
  0x1a   :  { %177 = vmatpush3.bf16.msra.mxu0 %v192_v7 }
  0x1b   :  { %178 = vmatprep.subr.bf16.mxu0 %v194_v0 }
  0x1e   :  { %179 = vmatpush3.bf16.msra.mxu0 %v193_v8 }
  0x21   :  { %181 = vmatmul.mubr.bf16.vlgmr.msra.gmra.mxu0 %v21_v9 }
  0xe1   :  { %v120_v11 = vpop.f32.mrf.mxu0 }
  0xe2   :  { %v139_v12 = vadd.f32 %v154_v10, %v120_v11 }
  0xe3   :  { %v182_v13 = vpop.f32.mrf.mxu0 }
  0xe4   :  { %v140_v14 = vpack.c.bf16 %v139_v12, %v139_v12 }
  0xe5   :  { %v123_v15 = vpop.f32.mrf.mxu0 }
  0xe6   :  { %141 = vst [vmem:[%s252_s3] sm:$0xf] %v140_v14 }
  0xe7   :  { %v183_v16 = vpop.f32.mrf.mxu0 }

// kernel: tsn_forward.29
= control target key start
LH: loop header
LB: loop body
LE: loop exit
PB: predicated region body
PF: predicated region fallthrough
CT: control target
= control target key end

     0   :  { %s374_s1 = inlined_call_operand.vmem [shape: bf16[128,128], index: 1, kind: input, shape index: {}]   ;;  %s375_s0 = inlined_call_operand.vmem [shape: bf16[32,128], index: 0, kind: input, shape index: {}]   ;;  %s376_s2 = inlined_call_operand.vmem [shape: f32[1,128], index: 2, kind: input, shape index: {}]   ;;  %s377_s3 = inlined_call_operand.vmem [shape: bf16[32,128], index: 3, kind: input, shape index: {}]   ;;  %s378_s4 = inlined_call_operand.vmem [shape: bf16[32,128], index: 4, kind: output, shape index: {}]  }
   0x1   :  { %v294_v0 = vld [vmem:[%s374_s1 + $0x38] sm:$0xff]   ;;  %v295_v1 = vld [vmem:[%s374_s1 + $0x30] sm:$0xff]   ;;  %v296_v2 = vld [vmem:[%s374_s1 + $0x28] sm:$0xff]  }
   0x2   :  { %274 = vmatprep.subr.bf16.mxu0 %v294_v0  ;;  %v297_v3 = vld [vmem:[%s374_s1 + $0x20] sm:$0xff]   ;;  %v298_v5 = vld [vmem:[%s374_s1 + $0x18] sm:$0xff]   ;;  %v299_v6 = vld [vmem:[%s374_s1 + $0x10] sm:$0xff]  }
   0x3   :  { %275 = vmatpush3.bf16.msra.mxu0 %v294_v0  ;;  %v302_v4 = vld [vmem:[%s375_s0] sm:$0xff]   ;;  %v300_v7 = vld [vmem:[%s374_s1 + $0x8] sm:$0xff]  }
   0x4   :  { %276 = vmatprep.subr.bf16.mxu0 %v295_v1  ;;  %290 = vmatprep.mubr.bf16.mxu0 %v302_v4  ;;  %v301_v8 = vld [vmem:[%s374_s1] sm:$0xff]   ;;  %v303_v9 = vld [vmem:[%s375_s0 + $0x8] sm:$0xff]  }
   0x5   :  { %v235_v10 = vld [vmem:[%s376_s2] ss:$0 sm:$0xff]  ;;  %v262_v11 = vld [vmem:[%s377_s3 + $0x8] sm:$0xff]  }
   0x6   :  { %v245_v13 = vld [vmem:[%s377_s3] sm:$0xff]   ;;  %v250_v15 = vunpack.c.l.bf16 %v262_v11  ;;  %v251_v19 = vunpack.c.h.bf16 %v262_v11 }
   0x7   :  { %277 = vmatpush3.bf16.msra.mxu0 %v295_v1  ;;  %v246_v18 = vunpack.c.l.bf16 %v245_v13  ;;  %v247_v23 = vunpack.c.h.bf16 %v245_v13 }
   0x8   :  { %278 = vmatprep.subr.bf16.mxu0 %v296_v2 }
   0xb   :  { %279 = vmatpush3.bf16.msra.mxu0 %v296_v2 }
   0xc   :  { %280 = vmatprep.subr.bf16.mxu0 %v297_v3 }
   0xf   :  { %281 = vmatpush3.bf16.msra.mxu0 %v297_v3 }
  0x10   :  { %282 = vmatprep.subr.bf16.mxu0 %v298_v5 }
  0x13   :  { %283 = vmatpush3.bf16.msra.mxu0 %v298_v5 }
  0x14   :  { %284 = vmatprep.subr.bf16.mxu0 %v299_v6 }
  0x17   :  { %285 = vmatpush3.bf16.msra.mxu0 %v299_v6 }
  0x18   :  { %286 = vmatprep.subr.bf16.mxu0 %v300_v7 }
  0x1b   :  { %287 = vmatpush3.bf16.msra.mxu0 %v300_v7 }
  0x1c   :  { %288 = vmatprep.subr.bf16.mxu0 %v301_v8 }
  0x1f   :  { %289 = vmatpush3.bf16.msra.mxu0 %v301_v8 }
  0x22   :  { %291 = vmatmul.mubr.bf16.vlgmr.msra.gmra.mxu0 %v303_v9 }
  0xe2   :  { %v292_v12 = vpop.f32.mrf.mxu0 }
  0xe3   :  { %v183_v14 = vadd.f32 %v292_v12, %v235_v10 }
  0xe4   :  { %v144_v16 = vpop.f32.mrf.mxu0 }
  0xe5   :  { %v181_v17 = vadd.f32 %v235_v10, %v144_v16  ;;  %v195_v21 = vadd.f32 %v250_v15, %v183_v14 }
  0xe6   :  { %v293_v20 = vpop.f32.mrf.mxu0 }
  0xe7   :  { %v184_v22 = vadd.f32 %v293_v20, %v235_v10  ;;  %v193_v25 = vadd.f32 %v246_v18, %v181_v17  ;;  %v199_v28 = vmax.f32 %v195_v21, 0.0 }
  0xe8   :  { %v147_v24 = vpop.f32.mrf.mxu0 }
  0xe9   :  { %v196_v26 = vadd.f32 %v251_v19, %v184_v22  ;;  %v182_v27 = vadd.f32 %v235_v10, %v147_v24  ;;  %v197_v31 = vmax.f32 %v193_v25, 0.0 }
  0xeb   :  { %v200_v29 = vmax.f32 %v196_v26, 0.0  ;;  %v194_v30 = vadd.f32 %v247_v23, %v182_v27 }
  0xed   :  { %v260_v32 = vpack.c.bf16 %v200_v29, %v199_v28  ;;  %v198_v33 = vmax.f32 %v194_v30, 0.0 }
  0xef   :  { %263 = vst [vmem:[%s378_s4 + $0x8] sm:$0xff] %v260_v32   ;;  %v255_v34 = vpack.c.bf16 %v198_v33, %v197_v31 }
  0xf1   :  { %256 = vst [vmem:[%s378_s4] sm:$0xff] %v255_v34  }

// kernel: tsn_forward.30
= control target key start
LH: loop header
LB: loop body
LE: loop exit
PB: predicated region body
PF: predicated region fallthrough
CT: control target
= control target key end

     0   :  { %s339_s1 = inlined_call_operand.vmem [shape: bf16[128,128], index: 1, kind: input, shape index: {}]   ;;  %s340_s0 = inlined_call_operand.vmem [shape: bf16[32,128], index: 0, kind: input, shape index: {}]   ;;  %s341_s2 = inlined_call_operand.vmem [shape: f32[1,128], index: 2, kind: input, shape index: {}]   ;;  %s342_s3 = inlined_call_operand.vmem [shape: bf16[32,128], index: 3, kind: output, shape index: {}]  }
   0x1   :  { %v270_v0 = vld [vmem:[%s339_s1 + $0x38] sm:$0xff]   ;;  %v271_v1 = vld [vmem:[%s339_s1 + $0x30] sm:$0xff]   ;;  %v272_v2 = vld [vmem:[%s339_s1 + $0x28] sm:$0xff]  }
   0x2   :  { %250 = vmatprep.subr.bf16.mxu0 %v270_v0  ;;  %v273_v3 = vld [vmem:[%s339_s1 + $0x20] sm:$0xff]   ;;  %v274_v5 = vld [vmem:[%s339_s1 + $0x18] sm:$0xff]   ;;  %v275_v6 = vld [vmem:[%s339_s1 + $0x10] sm:$0xff]  }
   0x3   :  { %251 = vmatpush3.bf16.msra.mxu0 %v270_v0  ;;  %v278_v4 = vld [vmem:[%s340_s0] sm:$0xff]   ;;  %v276_v7 = vld [vmem:[%s339_s1 + $0x8] sm:$0xff]  }
   0x4   :  { %252 = vmatprep.subr.bf16.mxu0 %v271_v1  ;;  %266 = vmatprep.mubr.bf16.mxu0 %v278_v4  ;;  %v277_v8 = vld [vmem:[%s339_s1] sm:$0xff]   ;;  %v279_v9 = vld [vmem:[%s340_s0 + $0x8] sm:$0xff]  }
   0x5   :  { %v220_v11 = vld [vmem:[%s341_s2] ss:$0 sm:$0xff] }
   0x7   :  { %253 = vmatpush3.bf16.msra.mxu0 %v271_v1 }
   0x8   :  { %254 = vmatprep.subr.bf16.mxu0 %v272_v2 }
   0xb   :  { %255 = vmatpush3.bf16.msra.mxu0 %v272_v2 }
   0xc   :  { %256 = vmatprep.subr.bf16.mxu0 %v273_v3 }
   0xf   :  { %257 = vmatpush3.bf16.msra.mxu0 %v273_v3 }
  0x10   :  { %258 = vmatprep.subr.bf16.mxu0 %v274_v5 }
  0x13   :  { %259 = vmatpush3.bf16.msra.mxu0 %v274_v5 }
  0x14   :  { %260 = vmatprep.subr.bf16.mxu0 %v275_v6 }
  0x17   :  { %261 = vmatpush3.bf16.msra.mxu0 %v275_v6 }
  0x18   :  { %262 = vmatprep.subr.bf16.mxu0 %v276_v7 }
  0x1b   :  { %263 = vmatpush3.bf16.msra.mxu0 %v276_v7 }
  0x1c   :  { %264 = vmatprep.subr.bf16.mxu0 %v277_v8 }
  0x1f   :  { %265 = vmatpush3.bf16.msra.mxu0 %v277_v8 }
  0x22   :  { %267 = vmatmul.mubr.bf16.vlgmr.msra.gmra.mxu0 %v279_v9 }
  0xe2   :  { %v268_v10 = vpop.f32.mrf.mxu0 }
  0xe3   :  { %v180_v13 = vadd.f32 %v268_v10, %v220_v11 }
  0xe4   :  { %v141_v12 = vpop.f32.mrf.mxu0 }
  0xe5   :  { %v178_v15 = vadd.f32 %v220_v11, %v141_v12  ;;  %v184_v18 = vmax.f32 %v180_v13, 0.0 }
  0xe6   :  { %v269_v14 = vpop.f32.mrf.mxu0 }
  0xe7   :  { %v181_v16 = vadd.f32 %v269_v14, %v220_v11  ;;  %v182_v21 = vmax.f32 %v178_v15, 0.0 }
  0xe8   :  { %v144_v17 = vpop.f32.mrf.mxu0 }
  0xe9   :  { %v185_v19 = vmax.f32 %v181_v16, 0.0  ;;  %v179_v20 = vadd.f32 %v220_v11, %v144_v17 }
  0xeb   :  { %v237_v22 = vpack.c.bf16 %v185_v19, %v184_v18  ;;  %v183_v23 = vmax.f32 %v179_v20, 0.0 }
  0xed   :  { %239 = vst [vmem:[%s342_s3 + $0x8] sm:$0xff] %v237_v22   ;;  %v232_v24 = vpack.c.bf16 %v183_v23, %v182_v21 }
  0xef   :  { %233 = vst [vmem:[%s342_s3] sm:$0xff] %v232_v24  }

// kernel: tsn_forward.27
= control target key start
LH: loop header
LB: loop body
LE: loop exit
PB: predicated region body
PF: predicated region fallthrough
CT: control target
= control target key end

     0   :  { %s2446_s27 = smov 0   ;;  %s2448_s28 = smov 0   ;;  %s2869_s0 = inlined_call_operand.vmem [shape: bf16[2,10,5,128], index: 0, kind: input, shape index: {}, may-alias: {0,2,4}]   ;;  %s2870_s1 = inlined_call_operand.vmem [shape: bf16[2,10,5,128], index: 1, kind: input, shape index: {}, may-alias: {1,3,5}]   ;;  %s2871_s2 = inlined_call_operand.vmem [shape: bf16[2,10,5,128], index: 2, kind: input, shape index: {}, may-alias: {0,2,4}]   ;;  %s2872_s3 = inlined_call_operand.vmem [shape: bf16[2,10,5,128], index: 3, kind: input, shape index: {}, may-alias: {1,3,5}]   ;;  %s2873_s4 = inlined_call_operand.vmem [shape: bf16[2,10,5,128], index: 4, kind: input, shape index: {}, may-alias: {0,2,4}]   ;;  %s2874_s5 = inlined_call_operand.vmem [shape: bf16[2,10,5,128], index: 5, kind: input, shape index: {}, may-alias: {1,3,5}]   ;;  %s2875_s6 = inlined_call_operand.vmem [shape: bf16[3,3,128,128], index: 6, kind: input, shape index: {}]   ;;  %s2876_s7 = inlined_call_operand.vmem [shape: f32[1,128], index: 7, kind: input, shape index: {}]   ;;  %s2877_s8 = inlined_call_operand.vmem [shape: bf16[2,4,4,128], index: 8, kind: output, shape index: {}]  }
   0x1   :  { %s2450_s29 = smov 0   ;;  %s2452_s30 = smov 0  }
   0x2   :  { %s2454_s9 = smov 0  }
   0x3 LB: > { %s27_s10 = sadd.s32 1, %s2389_s29  ;;  %s30_s11 = sadd.s32 1, %s2393_s30  ;;  %s2397_s9 = sphi %s2454_s9, %s18_s9   ;;  %s2393_s30 = sphi %s2452_s30, %s2881_s30   ;;  %s2389_s29 = sphi %s2450_s29, %s2880_s29   ;;  %s2385_s28 = sphi %s2448_s28, %s2879_s28   ;;  %s2381_s27 = sphi %s2446_s27, %s2878_s27  }
   0x4   : > { %p28_p0 = scmp.ge.s32.totalorder %s27_s10, 4  ;;  %p1759_p1 = scmp.ge.s32.totalorder %s2397_s9, 1 }
   0x5   : > { %p396_p2 = scmp.lt.s32.totalorder %s2397_s9, 9 }
   0x6   : > { %s2883_s10 = smov (%p28_p0, %s27_s10), 0  ;;  %s2885_s11 = smov (!%p28_p0, %s30_s11), %s2393_s30 }
   0x7   : > { %p397_p3 = pnand %p1759_p1, %p396_p2  ;;  %p32_p4 = scmp.ge.s32.totalorder %s2885_s11, 2 }
   0x8   : > { %s2494_s18 = sshll.u32 (!%p397_p3), %s2381_s27, 1  ;;  %p487_p5 = scmp.lt.s32.totalorder (!%p397_p3), %s2385_s28, 1 }
   0x9   : > { %s2887_s11 = smov (%p32_p4, %s2885_s11), 0  ;;  %400 = sbr.rel (%p397_p3) target bundleno = 377 (0x179), region = 52 }
   0xa   : > { %p489_p6 = scmp.lt.s32.totalorder (!%p397_p3), %s2494_s18, 9  ;;  %p556_p9 = scmp.lt.s32.totalorder (!%p397_p3), %s2381_s27, 3 }
   0xe   : > { %v2284_v0 = vld [vmem:[%s2875_s6 + $0x78] sm:$0xff]   ;;  %v2399_v1 = vmov 0.0   ;;  %v2286_v3 = vld [vmem:[%s2875_s6 + $0x70] sm:$0xff]   ;;  %vm2400_vm0 = vmmov 0   ;;  %s2889_s28 = smov (!%p487_p5, %s2385_s28), 1  ;;  %v2288_v5 = vld [vmem:[%s2875_s6 + $0x68] sm:$0xff]  }
   0xf   : > { %2061 = vmatprep.subr.bf16.mxu0 %v2399_v1  ;;  %2081 = vmatprep.subr.bf16.mxu1 %v2399_v1  ;;  %v2285_v2 = vld [vmem:[%s2875_s6 + $0x38] sm:$0xff]   ;;  %v2287_v4 = vld [vmem:[%s2875_s6 + $0x30] sm:$0xff]   ;;  %s490_s23 = scalar_select %p489_p6, %s2494_s18, 9  ;;  %v2289_v6 = vld [vmem:[%s2875_s6 + $0x28] sm:$0xff]  }
  0x10   : > { %2062 = vmatpush3.bf16.msra.mxu0 %v2284_v0  ;;  %2077 = vmatprep.mubr.msk.bf16.mxu0 %vm2400_vm0, %v2399_v1  ;;  %s2517_s26 = smul.u32 10, %s2889_s28  ;;  %v2290_v7 = vld [vmem:[%s2875_s6 + $0x60] sm:$0xff]   ;;  %v2292_v9 = vld [vmem:[%s2875_s6 + $0x58] sm:$0xff]   ;;  %v2294_v11 = vld [vmem:[%s2875_s6 + $0x50] sm:$0xff]   ;;  %s2895_s27 = smov (!%p556_p9, %s2381_s27), 3 }
  0x11   : > { %2082 = vmatpush3.bf16.msra.mxu1 %v2285_v2  ;;  %2063 = vmatprep.subr.bf16.mxu0 %v2399_v1  ;;  %v2291_v8 = vld [vmem:[%s2875_s6 + $0x20] sm:$0xff]   ;;  %v2293_v10 = vld [vmem:[%s2875_s6 + $0x18] sm:$0xff]   ;;  %v2295_v12 = vld [vmem:[%s2875_s6 + $0x10] sm:$0xff]  }
  0x12   : > { %2083 = vmatprep.subr.bf16.mxu1 %v2399_v1  ;;  %2097 = vmatprep.mubr.msk.bf16.mxu1 %vm2400_vm0, %v2399_v1  ;;  %s492_s12 = sadd.s32 %s2517_s26, %s490_s23  ;;  %v2296_v13 = vld [vmem:[%s2875_s6 + $0x48] sm:$0xff]   ;;  %v2298_v15 = vld [vmem:[%s2875_s6 + $0x40] sm:$0xff]   ;;  %v2301_v19 = vld [vmem:[%s2875_s6 + $0xb8] sm:$0xff]   ;;  %s531_s23 = sadd.s32 2, %s2494_s18 }
  0x13   : > { %s2529_s17 = sshll.u32 %s492_s12, 2  ;;  %s507_s12 = sadd.s32 1, %s2494_s18  ;;  %v2297_v14 = vld [vmem:[%s2875_s6 + $0x8] sm:$0xff]   ;;  %v2299_v16 = vld [vmem:[%s2875_s6] sm:$0xff]   ;;  %v2302_v20 = vld [vmem:[%s2875_s6 + $0xf8] sm:$0xff]  }
  0x14   : > { %2064 = vmatpush3.bf16.msra.mxu0 %v2286_v3  ;;  %s2542_s25 = scalar_lea.vmem %s2869_s0, %s2529_s17  ;;  %p510_p7 = scmp.lt.s32.totalorder %s507_s12, 9  ;;  %v2303_v21 = vld [vmem:[%s2875_s6 + $0xb0] sm:$0xff]   ;;  %v2305_v23 = vld [vmem:[%s2875_s6 + $0xa8] sm:$0xff]   ;;  %v2307_v25 = vld [vmem:[%s2875_s6 + $0xa0] sm:$0xff]  }
  0x15   : > { %2084 = vmatpush3.bf16.msra.mxu1 %v2287_v4  ;;  %2065 = vmatprep.subr.bf16.mxu0 %v2399_v1  ;;  %s504_s13 = scalar_lea.vmem %s2870_s1, %s2529_s17  ;;  %v563_v18 = vld [vmem:[%s2542_s25] sm:$0x3]  ;;  %v2304_v22 = vld [vmem:[%s2875_s6 + $0xf0] sm:$0xff]   ;;  %v2306_v24 = vld [vmem:[%s2875_s6 + $0xe8] sm:$0xff]   ;;  %p534_p8 = scmp.lt.s32.totalorder %s531_s23, 9 }
  0x16   : > { %2085 = vmatprep.subr.bf16.mxu1 %v2399_v1  ;;  %s2891_s12 = smov (!%p510_p7, %s507_s12), 9  ;;  %v580_v17 = vld [vmem:[%s504_s13] sm:$0x3]  ;;  %v2309_v27 = vld [vmem:[%s2875_s6 + $0x98] sm:$0xff]   ;;  %v2311_v30 = vld [vmem:[%s2875_s6 + $0x90] sm:$0xff]   ;;  %s1772_s13 = sshll.u32 %s2889_s28, 2 }
  0x17   : > { %s513_s20 = sadd.s32 %s2517_s26, %s2891_s12  ;;  %v2308_v26 = vld [vmem:[%s2875_s6 + $0xe0] sm:$0xff]   ;;  %v2310_v29 = vld [vmem:[%s2875_s6 + $0xd8] sm:$0xff]   ;;  %v2312_v31 = vld [vmem:[%s2875_s6 + $0xd0] sm:$0xff]   ;;  %s2893_s23 = smov (!%p534_p8, %s531_s23), 9 }
  0x18   : > { %2066 = vmatpush3.bf16.msra.mxu0 %v2288_v5  ;;  %s2579_s22 = sshll.u32 %s513_s20, 2  ;;  %v2300_v28 = vld [vmem:[%s2542_s25] ss:$0 sps:$4 sm:$0x77]   ;;  %v2313_v33 = vld [vmem:[%s2875_s6 + $0x88] sm:$0xff]   ;;  %s537_s12 = sadd.s32 %s2517_s26, %s2893_s23  ;;  %v2317_v40 = vld [vmem:[%s2875_s6 + $0x138] sm:$0xff]  }
  0x19   : > { %2086 = vmatpush3.bf16.msra.mxu1 %v2289_v6  ;;  %2067 = vmatprep.subr.bf16.mxu0 %v2399_v1  ;;  %s2590_s14 = scalar_lea.vmem %s2871_s2, %s2579_s22  ;;  %v798_v32 = vshll.u32 %v2300_v28, 16  ;;  %v2314_v34 = vld [vmem:[%s2875_s6 + $0xc8] sm:$0xff]   ;;  %v796_v35 = vshrl.u32 %v2300_v28, 16  ;;  %v2315_v37 = vld [vmem:[%s2875_s6 + $0x80] sm:$0xff]   ;;  %v2319_v42 = vld [vmem:[%s2875_s6 + $0x178] sm:$0xff]   ;;  %s2663_s16 = sshll.u32 %s537_s12, 2 }
  0x1a   : > { %2087 = vmatprep.subr.bf16.mxu1 %v2399_v1  ;;  %v2316_v38 = vld [vmem:[%s2875_s6 + $0xc0] sm:$0xff]   ;;  %v2320_v43 = vld [vmem:[%s2875_s6 + $0x130] sm:$0xff]   ;;  %s2673_s21 = scalar_lea.vmem %s2873_s4, %s2663_s16  ;;  %v2322_v45 = vld [vmem:[%s2875_s6 + $0x128] sm:$0xff]   ;;  %s527_s15 = scalar_lea.vmem %s2872_s3, %s2579_s22 }
  0x1b   : > { %v800_v36 = vrot.slane %v798_v32, 1  ;;  %v892_v41 = vld [vmem:[%s2590_s14] sm:$0x3]  ;;  %v2321_v44 = vld [vmem:[%s2875_s6 + $0x170] sm:$0xff]   ;;  %v2323_v46 = vld [vmem:[%s2875_s6 + $0x168] sm:$0xff]   ;;  %s551_s24 = scalar_lea.vmem %s2874_s5, %s2663_s16  ;;  %s559_s25 = sadd.s32 %s1772_s13, %s2895_s27 }
  0x1c   : > { %2068 = vmatpush3.bf16.msra.mxu0 %v2290_v7  ;;  %v2324_v47 = vld [vmem:[%s2875_s6 + $0x120] sm:$0xff]   ;;  %v2326_v49 = vld [vmem:[%s2875_s6 + $0x118] sm:$0xff]   ;;  %v2328_v52 = vld [vmem:[%s2875_s6 + $0x110] sm:$0xff]   ;;  %s1773_s18 = sshll.u32 %s559_s25, 1 }
  0x1d   : > { %2088 = vmatpush3.bf16.msra.mxu1 %v2291_v8  ;;  %2069 = vmatprep.subr.bf16.mxu0 %v2399_v1  ;;  %v801_v39 = vor.u32 %v800_v36, %v796_v35  ;;  %v2325_v48 = vld [vmem:[%s2875_s6 + $0x160] sm:$0xff]   ;;  %v2327_v50 = vld [vmem:[%s2875_s6 + $0x158] sm:$0xff]   ;;  %v2329_v53 = vld [vmem:[%s2875_s6 + $0x150] sm:$0xff]  }
  0x1e   : > { %2089 = vmatprep.subr.bf16.mxu1 %v2399_v1  ;;  %v2318_v51 = vld [vmem:[%s2590_s14] ss:$0 sps:$4 sm:$0x77]   ;;  %v2330_v55 = vld [vmem:[%s2875_s6 + $0x108] sm:$0xff]   ;;  %v2334_v62 = vld [vmem:[%s2875_s6 + $0x1b8] sm:$0xff]   ;;  %s561_s14 = scalar_lea.vmem %s2877_s8, %s1773_s18 }
  0x1f   : > { %v1130_v54 = vshll.u32 %v2318_v51, 16  ;;  %v2331_v56 = vld [vmem:[%s2875_s6 + $0x148] sm:$0xff]   ;;  %v1128_v57 = vshrl.u32 %v2318_v51, 16  ;;  %v2332_v59 = vld [vmem:[%s2875_s6 + $0x100] sm:$0xff]   ;;  %v2335_v0 = vld [vmem:[%s2875_s6 + $0x1f8] sm:$0xff]  }
  0x20   : > { %2070 = vmatpush3.bf16.msra.mxu0 %v2292_v9  ;;  %v2333_v60 = vld [vmem:[%s2875_s6 + $0x140] sm:$0xff]   ;;  %v2336_v2 = vld [vmem:[%s2875_s6 + $0x1b0] sm:$0xff]   ;;  %v2338_v4 = vld [vmem:[%s2875_s6 + $0x1a8] sm:$0xff]  }
  0x21   : > { %2090 = vmatpush3.bf16.msra.mxu1 %v2293_v10  ;;  %2071 = vmatprep.subr.bf16.mxu0 %v2399_v1  ;;  %v1132_v58 = vrot.slane %v1130_v54, 1  ;;  %v999_v61 = vld [vmem:[%s527_s15] sm:$0x3]  ;;  %v2337_v3 = vld [vmem:[%s2875_s6 + $0x1f0] sm:$0xff]   ;;  %v2339_v5 = vld [vmem:[%s2875_s6 + $0x1e8] sm:$0xff]  }
  0x22   : > { %2091 = vmatprep.subr.bf16.mxu1 %v2399_v1  ;;  %v2340_v6 = vld [vmem:[%s2875_s6 + $0x1a0] sm:$0xff]   ;;  %v2342_v8 = vld [vmem:[%s2875_s6 + $0x198] sm:$0xff]   ;;  %v2344_v10 = vld [vmem:[%s2875_s6 + $0x190] sm:$0xff]  }
  0x23   : > { %v1133_v63 = vor.u32 %v1132_v58, %v1128_v57  ;;  %v2341_v7 = vld [vmem:[%s2875_s6 + $0x1e0] sm:$0xff]   ;;  %v2343_v9 = vld [vmem:[%s2875_s6 + $0x1d8] sm:$0xff]  }
  0x24   : > { %2072 = vmatpush3.bf16.msra.mxu0 %v2294_v11  ;;  %v2345_v11 = vld [vmem:[%s2875_s6 + $0x1d0] sm:$0xff]  }
  0x25   : > { %2092 = vmatpush3.bf16.msra.mxu1 %v2295_v12  ;;  %2073 = vmatprep.subr.bf16.mxu0 %v2399_v1  ;;  %v2346_v12 = vld [vmem:[%s2875_s6 + $0x188] sm:$0xff]  }
  0x26   : > { %2093 = vmatprep.subr.bf16.mxu1 %v2399_v1 }
  0x28   : > { %2074 = vmatpush3.bf16.msra.mxu0 %v2296_v13  ;;  %v2347_v13 = vld [vmem:[%s2875_s6 + $0x1c8] sm:$0xff]  }
  0x29   : > { %2094 = vmatpush3.bf16.msra.mxu1 %v2297_v14  ;;  %2075 = vmatprep.subr.bf16.mxu0 %v2399_v1  ;;  %v2348_v14 = vld [vmem:[%s2875_s6 + $0x180] sm:$0xff]  }
  0x2a   : > { %2095 = vmatprep.subr.bf16.mxu1 %v2399_v1 }
  0x2c   : > { %2076 = vmatpush3.bf16.msra.mxu0 %v2298_v15  ;;  %v2349_v15 = vld [vmem:[%s2875_s6 + $0x1c0] sm:$0xff]  }
  0x2d   : > { %2096 = vmatpush3.bf16.msra.mxu1 %v2299_v16  ;;  %2101 = vmatprep.subr.bf16.mxu0 %v2399_v1  ;;  %v1224_v16 = vld [vmem:[%s2673_s21] sm:$0x3] }
  0x2e   : > { %2121 = vmatprep.subr.bf16.mxu1 %v2399_v1 }
  0x2f   : > { %2078 = vmatmul.mubr.bf16.vlgmr.msra.gmra.mxu0 %v580_v17  ;;  %v2351_v17 = vld [vmem:[%s2875_s6 + $0x238] sm:$0xff]  }
  0x30   : > { %2098 = vmatmul.mubr.bf16.vlgmr.msra.gmra.mxu1 %v563_v18  ;;  %2102 = vmatpush3.bf16.msra.mxu0 %v2301_v19  ;;  %v1331_v18 = vld [vmem:[%s551_s24] sm:$0x3]  ;;  %v2352_v19 = vld [vmem:[%s2875_s6 + $0x230] sm:$0xff]  }
  0x31   : > { %2122 = vmatpush3.bf16.msra.mxu1 %v2302_v20  ;;  %2103 = vmatprep.subr.bf16.mxu0 %v2399_v1  ;;  %v2353_v20 = vld [vmem:[%s2875_s6 + $0x228] sm:$0xff]  }
  0x32   : > { %2123 = vmatprep.subr.bf16.mxu1 %v2399_v1  ;;  %2117 = vmatprep.mubr.msk.bf16.mxu0 %vm2400_vm0, %v2399_v1 }
  0x33   : > { %2137 = vmatprep.mubr.msk.bf16.mxu1 %vm2400_vm0, %v2399_v1 }
  0x34   : > { %2104 = vmatpush3.bf16.msra.mxu0 %v2303_v21  ;;  %v2354_v21 = vld [vmem:[%s2875_s6 + $0x220] sm:$0xff]  }
  0x35   : > { %2124 = vmatpush3.bf16.msra.mxu1 %v2304_v22  ;;  %2105 = vmatprep.subr.bf16.mxu0 %v2399_v1  ;;  %v2355_v22 = vld [vmem:[%s2875_s6 + $0x218] sm:$0xff]  }
  0x36   : > { %2125 = vmatprep.subr.bf16.mxu1 %v2399_v1 }
  0x38   : > { %2106 = vmatpush3.bf16.msra.mxu0 %v2305_v23  ;;  %v2350_v23 = vld [vmem:[%s2673_s21] ss:$0 sps:$4 sm:$0x77]  }
  0x39   : > { %2126 = vmatpush3.bf16.msra.mxu1 %v2306_v24  ;;  %2107 = vmatprep.subr.bf16.mxu0 %v2399_v1  ;;  %v2356_v24 = vld [vmem:[%s2875_s6 + $0x210] sm:$0xff]  }
  0x3a   : > { %2127 = vmatprep.subr.bf16.mxu1 %v2399_v1 }
  0x3c   : > { %2108 = vmatpush3.bf16.msra.mxu0 %v2307_v25  ;;  %v1462_v25 = vshll.u32 %v2350_v23, 16 }
  0x3d   : > { %2128 = vmatpush3.bf16.msra.mxu1 %v2308_v26  ;;  %2109 = vmatprep.subr.bf16.mxu0 %v2399_v1  ;;  %v2357_v26 = vld [vmem:[%s2875_s6 + $0x208] sm:$0xff]  }
  0x3e   : > { %2129 = vmatprep.subr.bf16.mxu1 %v2399_v1  ;;  %v1464_v28 = vrot.slane %v1462_v25, 1 }
  0x40   : > { %2110 = vmatpush3.bf16.msra.mxu0 %v2309_v27  ;;  %v1460_v27 = vshrl.u32 %v2350_v23, 16 }
  0x41   : > { %2130 = vmatpush3.bf16.msra.mxu1 %v2310_v29  ;;  %2111 = vmatprep.subr.bf16.mxu0 %v2399_v1  ;;  %v2358_v29 = vld [vmem:[%s2875_s6 + $0x200] sm:$0xff]  }
  0x42   : > { %2131 = vmatprep.subr.bf16.mxu1 %v2399_v1 }
  0x44   : > { %2112 = vmatpush3.bf16.msra.mxu0 %v2311_v30  ;;  %v1465_v30 = vor.u32 %v1464_v28, %v1460_v27 }
  0x45   : > { %2132 = vmatpush3.bf16.msra.mxu1 %v2312_v31  ;;  %2113 = vmatprep.subr.bf16.mxu0 %v2399_v1 }
  0x46   : > { %2133 = vmatprep.subr.bf16.mxu1 %v2399_v1 }
  0x48   : > { %2114 = vmatpush3.bf16.msra.mxu0 %v2313_v33 }
  0x49   : > { %2134 = vmatpush3.bf16.msra.mxu1 %v2314_v34  ;;  %2115 = vmatprep.subr.bf16.mxu0 %v2399_v1 }
  0x4a   : > { %2135 = vmatprep.subr.bf16.mxu1 %v2399_v1 }
  0x4c   : > { %2116 = vmatpush3.bf16.msra.mxu0 %v2315_v37 }
  0x4d   : > { %2136 = vmatpush3.bf16.msra.mxu1 %v2316_v38  ;;  %2141 = vmatprep.subr.bf16.mxu0 %v2399_v1 }
  0x4e   : > { %2161 = vmatprep.subr.bf16.mxu1 %v2399_v1 }
  0x4f   : > { %2118 = vmatmul.mubr.bf16.vlgmr.msra.gmra.mxu0 %v801_v39 }
  0x50   : > { %2142 = vmatpush3.bf16.msra.mxu0 %v2317_v40  ;;  %2138 = vmatmul.mubr.bf16.vlgmr.msra.gmra.mxu1 %v892_v41 }
  0x51   : > { %2162 = vmatpush3.bf16.msra.mxu1 %v2319_v42  ;;  %2143 = vmatprep.subr.bf16.mxu0 %v2399_v1 }
  0x52   : > { %2163 = vmatprep.subr.bf16.mxu1 %v2399_v1  ;;  %2157 = vmatprep.mubr.msk.bf16.mxu0 %vm2400_vm0, %v2399_v1 }
  0x53   : > { %2177 = vmatprep.mubr.msk.bf16.mxu1 %vm2400_vm0, %v2399_v1 }
  0x54   : > { %2144 = vmatpush3.bf16.msra.mxu0 %v2320_v43 }
  0x55   : > { %2164 = vmatpush3.bf16.msra.mxu1 %v2321_v44  ;;  %2145 = vmatprep.subr.bf16.mxu0 %v2399_v1 }
  0x56   : > { %2165 = vmatprep.subr.bf16.mxu1 %v2399_v1 }
  0x58   : > { %2146 = vmatpush3.bf16.msra.mxu0 %v2322_v45 }
  0x59   : > { %2166 = vmatpush3.bf16.msra.mxu1 %v2323_v46  ;;  %2147 = vmatprep.subr.bf16.mxu0 %v2399_v1 }
  0x5a   : > { %2167 = vmatprep.subr.bf16.mxu1 %v2399_v1 }
  0x5c   : > { %2148 = vmatpush3.bf16.msra.mxu0 %v2324_v47 }
  0x5d   : > { %2168 = vmatpush3.bf16.msra.mxu1 %v2325_v48  ;;  %2149 = vmatprep.subr.bf16.mxu0 %v2399_v1 }
  0x5e   : > { %2169 = vmatprep.subr.bf16.mxu1 %v2399_v1 }
  0x60   : > { %2150 = vmatpush3.bf16.msra.mxu0 %v2326_v49 }
  0x61   : > { %2170 = vmatpush3.bf16.msra.mxu1 %v2327_v50  ;;  %2151 = vmatprep.subr.bf16.mxu0 %v2399_v1 }
  0x62   : > { %2171 = vmatprep.subr.bf16.mxu1 %v2399_v1 }
  0x64   : > { %2152 = vmatpush3.bf16.msra.mxu0 %v2328_v52 }
  0x65   : > { %2172 = vmatpush3.bf16.msra.mxu1 %v2329_v53  ;;  %2153 = vmatprep.subr.bf16.mxu0 %v2399_v1 }
  0x66   : > { %2173 = vmatprep.subr.bf16.mxu1 %v2399_v1 }
  0x68   : > { %2154 = vmatpush3.bf16.msra.mxu0 %v2330_v55 }
  0x69   : > { %2174 = vmatpush3.bf16.msra.mxu1 %v2331_v56  ;;  %2155 = vmatprep.subr.bf16.mxu0 %v2399_v1 }
  0x6a   : > { %2175 = vmatprep.subr.bf16.mxu1 %v2399_v1 }
  0x6c   : > { %2156 = vmatpush3.bf16.msra.mxu0 %v2332_v59 }
  0x6d   : > { %2176 = vmatpush3.bf16.msra.mxu1 %v2333_v60  ;;  %2181 = vmatprep.subr.bf16.mxu0 %v2399_v1 }
  0x6e   : > { %2201 = vmatprep.subr.bf16.mxu1 %v2399_v1 }
  0x6f   : > { %2158 = vmatmul.mubr.bf16.vlgmr.msra.gmra.mxu0 %v999_v61 }
  0x70   : > { %2182 = vmatpush3.bf16.msra.mxu0 %v2334_v62  ;;  %2178 = vmatmul.mubr.bf16.vlgmr.msra.gmra.mxu1 %v1133_v63 }
  0x71   : > { %2202 = vmatpush3.bf16.msra.mxu1 %v2335_v0  ;;  %2183 = vmatprep.subr.bf16.mxu0 %v2399_v1 }
  0x72   : > { %2203 = vmatprep.subr.bf16.mxu1 %v2399_v1  ;;  %2197 = vmatprep.mubr.msk.bf16.mxu0 %vm2400_vm0, %v2399_v1 }
  0x73   : > { %2217 = vmatprep.mubr.msk.bf16.mxu1 %vm2400_vm0, %v2399_v1 }
  0x74   : > { %2184 = vmatpush3.bf16.msra.mxu0 %v2336_v2 }
  0x75   : > { %2204 = vmatpush3.bf16.msra.mxu1 %v2337_v3  ;;  %2185 = vmatprep.subr.bf16.mxu0 %v2399_v1 }
  0x76   : > { %2205 = vmatprep.subr.bf16.mxu1 %v2399_v1 }
  0x78   : > { %2186 = vmatpush3.bf16.msra.mxu0 %v2338_v4 }
  0x79   : > { %2206 = vmatpush3.bf16.msra.mxu1 %v2339_v5  ;;  %2187 = vmatprep.subr.bf16.mxu0 %v2399_v1 }
  0x7a   : > { %2207 = vmatprep.subr.bf16.mxu1 %v2399_v1 }
  0x7c   : > { %2188 = vmatpush3.bf16.msra.mxu0 %v2340_v6 }
  0x7d   : > { %2208 = vmatpush3.bf16.msra.mxu1 %v2341_v7  ;;  %2189 = vmatprep.subr.bf16.mxu0 %v2399_v1  ;;  %v1977_v7 = vld [vmem:[%s2876_s7] ss:$0 sm:$0xff] }
  0x7e   : > { %2209 = vmatprep.subr.bf16.mxu1 %v2399_v1 }
  0x80   : > { %2190 = vmatpush3.bf16.msra.mxu0 %v2342_v8 }
  0x81   : > { %2210 = vmatpush3.bf16.msra.mxu1 %v2343_v9  ;;  %2191 = vmatprep.subr.bf16.mxu0 %v2399_v1 }
  0x82   : > { %2211 = vmatprep.subr.bf16.mxu1 %v2399_v1 }
  0x84   : > { %2192 = vmatpush3.bf16.msra.mxu0 %v2344_v10 }
  0x85   : > { %2212 = vmatpush3.bf16.msra.mxu1 %v2345_v11  ;;  %2193 = vmatprep.subr.bf16.mxu0 %v2399_v1 }
  0x86   : > { %2213 = vmatprep.subr.bf16.mxu1 %v2399_v1 }
  0x88   : > { %2194 = vmatpush3.bf16.msra.mxu0 %v2346_v12 }
  0x89   : > { %2214 = vmatpush3.bf16.msra.mxu1 %v2347_v13  ;;  %2195 = vmatprep.subr.bf16.mxu0 %v2399_v1 }
  0x8a   : > { %2215 = vmatprep.subr.bf16.mxu1 %v2399_v1 }
  0x8c   : > { %2196 = vmatpush3.bf16.msra.mxu0 %v2348_v14 }
  0x8d   : > { %2216 = vmatpush3.bf16.msra.mxu1 %v2349_v15  ;;  %2221 = vmatprep.subr.bf16.mxu0 %v2399_v1 }
  0x8f   : > { %2198 = vmatmul.mubr.bf16.vlgmr.msra.gmra.mxu0 %v1224_v16 }
  0x90   : > { %2222 = vmatpush3.bf16.msra.mxu0 %v2351_v17  ;;  %2218 = vmatmul.mubr.bf16.vlgmr.msra.gmra.mxu1 %v1331_v18 }
  0x91   : > { %2223 = vmatprep.subr.bf16.mxu0 %v2399_v1  ;;  %2237 = vmatprep.mubr.msk.bf16.mxu0 %vm2400_vm0, %v2399_v1 }
  0x94   : > { %2224 = vmatpush3.bf16.msra.mxu0 %v2352_v19 }
  0x95   : > { %2225 = vmatprep.subr.bf16.mxu0 %v2399_v1 }
  0x98   : > { %2226 = vmatpush3.bf16.msra.mxu0 %v2353_v20 }
  0x99   : > { %2227 = vmatprep.subr.bf16.mxu0 %v2399_v1 }
  0x9c   : > { %2228 = vmatpush3.bf16.msra.mxu0 %v2354_v21 }
  0x9d   : > { %2229 = vmatprep.subr.bf16.mxu0 %v2399_v1 }
  0xa0   : > { %2230 = vmatpush3.bf16.msra.mxu0 %v2355_v22 }
  0xa1   : > { %2231 = vmatprep.subr.bf16.mxu0 %v2399_v1 }
  0xa4   : > { %2232 = vmatpush3.bf16.msra.mxu0 %v2356_v24 }
  0xa5   : > { %2233 = vmatprep.subr.bf16.mxu0 %v2399_v1 }
  0xa8   : > { %2234 = vmatpush3.bf16.msra.mxu0 %v2357_v26 }
  0xa9   : > { %2235 = vmatprep.subr.bf16.mxu0 %v2399_v1 }
  0xac   : > { %2236 = vmatpush3.bf16.msra.mxu0 %v2358_v29 }
  0xaf   : > { %2238 = vmatmul.mubr.bf16.vlgmr.msra.gmra.mxu0 %v1465_v30 }
  0xef   : > { %v680_v31 = vpop.f32.mrf.mxu0 }
  0xf0   : > { %v768_v32 = vpop.f32.mrf.mxu1 }
  0xf1   : > { %v769_v33 = vadd.f32 %v768_v32, %v680_v31  ;;  %v2079_v34 = vpop.f32.mrf.mxu0 }
  0xf2   : > { %v2099_v35 = vpop.f32.mrf.mxu1 }
  0xf3   : > { %v683_v36 = vpop.f32.mrf.mxu0 }
  0xf4   : > { %v771_v37 = vpop.f32.mrf.mxu1 }
  0xf5   : > { %v2080_v38 = vpop.f32.mrf.mxu0 }
  0xf6   : > { %v2100_v39 = vpop.f32.mrf.mxu1 }
 0x10f   : > { %v885_v40 = vpop.f32.mrf.mxu0 }
 0x110   : > { %v891_v41 = vadd.f32 %v885_v40, %v769_v33  ;;  %v992_v42 = vpop.f32.mrf.mxu1 }
 0x111   : > { %v2119_v43 = vpop.f32.mrf.mxu0 }
 0x112   : > { %v998_v44 = vadd.f32 %v992_v42, %v891_v41  ;;  %v2139_v45 = vpop.f32.mrf.mxu1 }
 0x113   : > { %v888_v46 = vpop.f32.mrf.mxu0 }
 0x114   : > { %v995_v1 = vpop.f32.mrf.mxu1 }
 0x115   : > { %v2120_v47 = vpop.f32.mrf.mxu0 }
 0x116   : > { %v2140_v48 = vpop.f32.mrf.mxu1 }
 0x12f   : > { %v1099_v49 = vpop.f32.mrf.mxu0 }
 0x130   : > { %v1217_v50 = vpop.f32.mrf.mxu1  ;;  %v1105_v2 = vadd.f32 %v1099_v49, %v998_v44 }
 0x131   : > { %v2159_v51 = vpop.f32.mrf.mxu0 }
 0x132   : > { %v2179_v52 = vpop.f32.mrf.mxu1  ;;  %v1223_v3 = vadd.f32 %v1217_v50, %v1105_v2 }
 0x133   : > { %v1102_v53 = vpop.f32.mrf.mxu0 }
 0x134   : > { %v1220_v54 = vpop.f32.mrf.mxu1 }
 0x135   : > { %v2160_v55 = vpop.f32.mrf.mxu0 }
 0x136   : > { %v2180_v56 = vpop.f32.mrf.mxu1 }
 0x14f   : > { %v1324_v57 = vpop.f32.mrf.mxu0 }
 0x150   : > { %v1431_v58 = vpop.f32.mrf.mxu1  ;;  %v1330_v4 = vadd.f32 %v1324_v57, %v1223_v3 }
 0x151   : > { %v2199_v59 = vpop.f32.mrf.mxu0 }
 0x152   : > { %v2219_v60 = vpop.f32.mrf.mxu1  ;;  %v1437_v5 = vadd.f32 %v1431_v58, %v1330_v4 }
 0x153   : > { %v1327_v61 = vpop.f32.mrf.mxu0 }
 0x154   : > { %v1434_v62 = vpop.f32.mrf.mxu1 }
 0x155   : > { %v2200_v63 = vpop.f32.mrf.mxu0 }
 0x156   : > { %v2220_v0 = vpop.f32.mrf.mxu1 }
 0x16f   : > { %v1549_v6 = vpop.f32.mrf.mxu0 }
 0x170   : > { %v1555_v8 = vadd.f32 %v1549_v6, %v1437_v5 }
 0x171   : > { %v2239_v9 = vpop.f32.mrf.mxu0 }
 0x172   : > { %v1563_v10 = vadd.f32 %v1977_v7, %v1555_v8 }
 0x173   : > { %v1552_v11 = vpop.f32.mrf.mxu0 }
 0x174   : > { %v1564_v12 = vmax.f32 %v1563_v10, 0.0 }
 0x175   : > { %v2240_v13 = vpop.f32.mrf.mxu0 }
 0x176   : > { %v1565_v14 = vpack.c.bf16 %v1564_v12, %v1564_v12 }
 0x178   : > { %1566 = vst [vmem:[%s561_s14] sm:$0x3] %v1565_v14 }
 0x179 PF: > { %s18_s9 = sadd.s32 1, %s2397_s9   ;;  %s2878_s27 = smov %s2389_s29 }
 0x17a   : > { %p15_p10 = scmp.ge.s32.totalorder %s18_s9, 10   ;;  %s2879_s28 = smov %s2393_s30 }
 0x17b   : > { %s2880_s29 = smov %s2883_s10  ;;  %s2881_s30 = smov %s2887_s11 }
 0x17c   :  { %17 = sbr.rel (!%p15_p10) target bundleno = 3 (0x3), region = 105 }

// kernel: tsn_forward.33
= control target key start
LH: loop header
LB: loop body
LE: loop exit
PB: predicated region body
PF: predicated region fallthrough
CT: control target
= control target key end

     0   :  { %v201_v0 = vmov 0.0   ;;  %vm202_vm0 = vmmov 0   ;;  %s264_s1 = inlined_call_operand.vmem [shape: bf16[128,128], index: 1, kind: input, shape index: {}]   ;;  %s265_s0 = inlined_call_operand.vmem [shape: bf16[8,128], index: 0, kind: input, shape index: {}]   ;;  %s266_s3 = inlined_call_operand.vmem [shape: bf16[8,128], index: 3, kind: input, shape index: {}]   ;;  %s267_s2 = inlined_call_operand.vmem [shape: f32[1,128], index: 2, kind: input, shape index: {}]   ;;  %s268_s4 = inlined_call_operand.vmem [shape: bf16[8,128], index: 4, kind: output, shape index: {}]  }
   0x1   :  { %171 = vmatprep.subr.bf16.mxu0 %v201_v0  ;;  %v193_v1 = vld [vmem:[%s264_s1 + $0x38] sm:$0xff]   ;;  %187 = vmatprep.mubr.msk.bf16.mxu0 %vm202_vm0, %v201_v0  ;;  %v194_v2 = vld [vmem:[%s264_s1 + $0x30] sm:$0xff]   ;;  %v195_v3 = vld [vmem:[%s264_s1 + $0x28] sm:$0xff]  }
   0x2   :  { %172 = vmatpush3.bf16.msra.mxu0 %v193_v1  ;;  %v196_v4 = vld [vmem:[%s264_s1 + $0x20] sm:$0xff]   ;;  %v197_v5 = vld [vmem:[%s264_s1 + $0x18] sm:$0xff]   ;;  %v198_v6 = vld [vmem:[%s264_s1 + $0x10] sm:$0xff]  }
   0x3   :  { %173 = vmatprep.subr.bf16.mxu0 %v201_v0  ;;  %v199_v7 = vld [vmem:[%s264_s1 + $0x8] sm:$0xff]   ;;  %v200_v8 = vld [vmem:[%s264_s1] sm:$0xff]  }
   0x4   :  { %v24_v9 = vld [vmem:[%s265_s0] sm:$0xf] }
   0x5   :  { %v143_v10 = vld [vmem:[%s266_s3] sm:$0xf] }
   0x6   :  { %174 = vmatpush3.bf16.msra.mxu0 %v194_v2  ;;  %v161_v11 = vld [vmem:[%s267_s2] ss:$0 sm:$0xff]  ;;  %v144_v12 = vunpack.c.l.bf16 %v143_v10 }
   0x7   :  { %175 = vmatprep.subr.bf16.mxu0 %v201_v0 }
   0xa   :  { %176 = vmatpush3.bf16.msra.mxu0 %v195_v3 }
   0xb   :  { %177 = vmatprep.subr.bf16.mxu0 %v201_v0 }
   0xe   :  { %178 = vmatpush3.bf16.msra.mxu0 %v196_v4 }
   0xf   :  { %179 = vmatprep.subr.bf16.mxu0 %v201_v0 }
  0x12   :  { %180 = vmatpush3.bf16.msra.mxu0 %v197_v5 }
  0x13   :  { %181 = vmatprep.subr.bf16.mxu0 %v201_v0 }
  0x16   :  { %182 = vmatpush3.bf16.msra.mxu0 %v198_v6 }
  0x17   :  { %183 = vmatprep.subr.bf16.mxu0 %v201_v0 }
  0x1a   :  { %184 = vmatpush3.bf16.msra.mxu0 %v199_v7 }
  0x1b   :  { %185 = vmatprep.subr.bf16.mxu0 %v201_v0 }
  0x1e   :  { %186 = vmatpush3.bf16.msra.mxu0 %v200_v8 }
  0x21   :  { %188 = vmatmul.mubr.bf16.vlgmr.msra.gmra.mxu0 %v24_v9 }
  0xe1   :  { %v123_v13 = vpop.f32.mrf.mxu0 }
  0xe2   :  { %v142_v14 = vadd.f32 %v161_v11, %v123_v13 }
  0xe3   :  { %v189_v15 = vpop.f32.mrf.mxu0 }
  0xe4   :  { %v145_v16 = vadd.f32 %v144_v12, %v142_v14 }
  0xe5   :  { %v126_v17 = vpop.f32.mrf.mxu0 }
  0xe6   :  { %v146_v18 = vmax.f32 %v145_v16, 0.0 }
  0xe7   :  { %v190_v19 = vpop.f32.mrf.mxu0 }
  0xe8   :  { %v147_v20 = vpack.c.bf16 %v146_v18, %v146_v18 }
  0xea   :  { %148 = vst [vmem:[%s268_s4] sm:$0xf] %v147_v20 }

// kernel: tsn_forward.36
= control target key start
LH: loop header
LB: loop body
LE: loop exit
PB: predicated region body
PF: predicated region fallthrough
CT: control target
= control target key end

     0   :  { %v240_v1 = vmov 0   ;;  %v172_v18 = vlaneseq  ;;  %s318_s1 = inlined_call_operand.vmem [shape: bf16[128,256], index: 1, kind: input, shape index: {}]   ;;  %s319_s0 = inlined_call_operand.vmem [shape: bf16[8,128], index: 0, kind: input, shape index: {}]   ;;  %s320_s2 = inlined_call_operand.vmem [shape: f32[1,256], index: 2, kind: input, shape index: {}]   ;;  %s321_s3 = inlined_call_operand.vmem [shape: bf16[8,256], index: 3, kind: output, shape index: {}]  }
   0x1   :  { %v216_v0 = vld [vmem:[%s318_s1 + $0x74] ss:$8 sps:$4 sm:$0xff]   ;;  %152 = vmatprep.mubr.bf16.mxu0 %v240_v1  ;;  %v218_v2 = vld [vmem:[%s318_s1 + $0x70] ss:$8 sps:$4 sm:$0xff]   ;;  %v219_v3 = vld [vmem:[%s318_s1 + $0x64] ss:$8 sps:$4 sm:$0xff]  }
   0x2   :  { %120 = vmatprep.subr.bf16.mxu0 %v216_v0  ;;  %v221_v4 = vld [vmem:[%s318_s1 + $0x60] ss:$8 sps:$4 sm:$0xff]   ;;  %v222_v5 = vld [vmem:[%s318_s1 + $0x54] ss:$8 sps:$4 sm:$0xff]   ;;  %v224_v6 = vld [vmem:[%s318_s1 + $0x50] ss:$8 sps:$4 sm:$0xff]  }
   0x3   :  { %121 = vmatpush1.bf16.msra.mxu0 %v218_v2  ;;  %v225_v7 = vld [vmem:[%s318_s1 + $0x44] ss:$8 sps:$4 sm:$0xff]   ;;  %v227_v8 = vld [vmem:[%s318_s1 + $0x40] ss:$8 sps:$4 sm:$0xff]   ;;  %v228_v9 = vld [vmem:[%s318_s1 + $0x34] ss:$8 sps:$4 sm:$0xff]  }
   0x4   :  { %122 = vmatprep.subr.bf16.mxu0 %v219_v3  ;;  %v230_v10 = vld [vmem:[%s318_s1 + $0x30] ss:$8 sps:$4 sm:$0xff]   ;;  %v231_v11 = vld [vmem:[%s318_s1 + $0x24] ss:$8 sps:$4 sm:$0xff]   ;;  %v233_v12 = vld [vmem:[%s318_s1 + $0x20] ss:$8 sps:$4 sm:$0xff]  }
   0x5   :  { %v234_v13 = vld [vmem:[%s318_s1 + $0x14] ss:$8 sps:$4 sm:$0xff]   ;;  %v236_v14 = vld [vmem:[%s318_s1 + $0x10] ss:$8 sps:$4 sm:$0xff]   ;;  %v237_v15 = vld [vmem:[%s318_s1 + $0x4] ss:$8 sps:$4 sm:$0xff]  }
   0x6   :  { %v239_v16 = vld [vmem:[%s318_s1] ss:$8 sps:$4 sm:$0xff]   ;;  %v173_v19 = vshrl.u32 %v172_v18, 7 }
   0x7   :  { %123 = vmatpush1.bf16.msra.mxu0 %v221_v4  ;;  %v23_v17 = vld [vmem:[%s319_s0] sm:$0xf] }
   0x8   :  { %124 = vmatprep.subr.bf16.mxu0 %v222_v5  ;;  %v174_v20 = vsub.s32 0, %v173_v19  ;;  %v178_v21 = vsub.s32 1, %v173_v19  ;;  %v170_v22 = vld [vmem:[%s320_s2] sm:$0x3] }
   0xa   :  { %v175_v23 = vrot.slane %v170_v22, %v174_v20  ;;  %v179_v24 = vrot.slane %v170_v22, %v178_v21 }
   0xb   :  { %125 = vmatpush1.bf16.msra.mxu0 %v224_v6 }
   0xc   :  { %126 = vmatprep.subr.bf16.mxu0 %v225_v7 }
   0xf   :  { %127 = vmatpush1.bf16.msra.mxu0 %v227_v8 }
  0x10   :  { %128 = vmatprep.subr.bf16.mxu0 %v228_v9 }
  0x13   :  { %129 = vmatpush1.bf16.msra.mxu0 %v230_v10 }
  0x14   :  { %130 = vmatprep.subr.bf16.mxu0 %v231_v11 }
  0x17   :  { %131 = vmatpush1.bf16.msra.mxu0 %v233_v12 }
  0x18   :  { %132 = vmatprep.subr.bf16.mxu0 %v234_v13 }
  0x1b   :  { %133 = vmatpush1.bf16.msra.mxu0 %v236_v14 }
  0x1c   :  { %134 = vmatprep.subr.bf16.mxu0 %v237_v15 }
  0x1f   :  { %135 = vmatpush1.bf16.msra.mxu0 %v239_v16 }
  0x22   :  { %153 = vmatmul.mubr.bf16.vlgmr.msra.gmra.mxu0 %v23_v17 }
  0xe2   :  { %v154_v25 = vpop.f32.mrf.mxu0 }
  0xe3   :  { %v182_v27 = vadd.f32 %v175_v23, %v154_v25 }
  0xe4   :  { %v156_v26 = vpop.f32.mrf.mxu0 }
  0xe5   :  { %v183_v28 = vadd.f32 %v179_v24, %v156_v26 }
  0xe6   :  { %v158_v29 = vpop.f32.mrf.mxu0 }
  0xe7   :  { %v214_v30 = vpack.c.bf16 %v183_v28, %v182_v27 }
  0xe8   :  { %v159_v31 = vpop.f32.mrf.mxu0 }
  0xe9   :  { %192 = vst [vmem:[%s321_s3] sm:$0xff] %v214_v30 }

// kernel: tsn_forward.34
= control target key start
LH: loop header
LB: loop body
LE: loop exit
PB: predicated region body
PF: predicated region fallthrough
CT: control target
= control target key end

     0   :  { %v195_v0 = vmov 0.0   ;;  %vm196_vm0 = vmmov 0   ;;  %s250_s1 = inlined_call_operand.vmem [shape: bf16[128,128], index: 1, kind: input, shape index: {}]   ;;  %s251_s0 = inlined_call_operand.vmem [shape: bf16[8,128], index: 0, kind: input, shape index: {}]   ;;  %s252_s2 = inlined_call_operand.vmem [shape: f32[1,128], index: 2, kind: input, shape index: {}]   ;;  %s253_s3 = inlined_call_operand.vmem [shape: bf16[8,128], index: 3, kind: output, shape index: {}]  }
   0x1   :  { %165 = vmatprep.subr.bf16.mxu0 %v195_v0  ;;  %v187_v1 = vld [vmem:[%s250_s1 + $0x38] sm:$0xff]   ;;  %181 = vmatprep.mubr.msk.bf16.mxu0 %vm196_vm0, %v195_v0  ;;  %v188_v2 = vld [vmem:[%s250_s1 + $0x30] sm:$0xff]   ;;  %v189_v3 = vld [vmem:[%s250_s1 + $0x28] sm:$0xff]  }
   0x2   :  { %166 = vmatpush3.bf16.msra.mxu0 %v187_v1  ;;  %v190_v4 = vld [vmem:[%s250_s1 + $0x20] sm:$0xff]   ;;  %v191_v5 = vld [vmem:[%s250_s1 + $0x18] sm:$0xff]   ;;  %v192_v6 = vld [vmem:[%s250_s1 + $0x10] sm:$0xff]  }
   0x3   :  { %167 = vmatprep.subr.bf16.mxu0 %v195_v0  ;;  %v193_v7 = vld [vmem:[%s250_s1 + $0x8] sm:$0xff]   ;;  %v194_v8 = vld [vmem:[%s250_s1] sm:$0xff]  }
   0x4   :  { %v21_v9 = vld [vmem:[%s251_s0] sm:$0xf] }
   0x5   :  { %v155_v10 = vld [vmem:[%s252_s2] ss:$0 sm:$0xff] }
   0x6   :  { %168 = vmatpush3.bf16.msra.mxu0 %v188_v2 }
   0x7   :  { %169 = vmatprep.subr.bf16.mxu0 %v195_v0 }
   0xa   :  { %170 = vmatpush3.bf16.msra.mxu0 %v189_v3 }
   0xb   :  { %171 = vmatprep.subr.bf16.mxu0 %v195_v0 }
   0xe   :  { %172 = vmatpush3.bf16.msra.mxu0 %v190_v4 }
   0xf   :  { %173 = vmatprep.subr.bf16.mxu0 %v195_v0 }
  0x12   :  { %174 = vmatpush3.bf16.msra.mxu0 %v191_v5 }
  0x13   :  { %175 = vmatprep.subr.bf16.mxu0 %v195_v0 }
  0x16   :  { %176 = vmatpush3.bf16.msra.mxu0 %v192_v6 }
  0x17   :  { %177 = vmatprep.subr.bf16.mxu0 %v195_v0 }
  0x1a   :  { %178 = vmatpush3.bf16.msra.mxu0 %v193_v7 }
  0x1b   :  { %179 = vmatprep.subr.bf16.mxu0 %v195_v0 }
  0x1e   :  { %180 = vmatpush3.bf16.msra.mxu0 %v194_v8 }
  0x21   :  { %182 = vmatmul.mubr.bf16.vlgmr.msra.gmra.mxu0 %v21_v9 }
  0xe1   :  { %v120_v11 = vpop.f32.mrf.mxu0 }
  0xe2   :  { %v139_v12 = vadd.f32 %v155_v10, %v120_v11 }
  0xe3   :  { %v183_v13 = vpop.f32.mrf.mxu0 }
  0xe4   :  { %v140_v14 = vmax.f32 %v139_v12, 0.0 }
  0xe5   :  { %v123_v15 = vpop.f32.mrf.mxu0 }
  0xe6   :  { %v141_v16 = vpack.c.bf16 %v140_v14, %v140_v14 }
  0xe7   :  { %v184_v17 = vpop.f32.mrf.mxu0 }
  0xe8   :  { %142 = vst [vmem:[%s253_s3] sm:$0xf] %v141_v16 }

// kernel: tsn_forward.31
= control target key start
LH: loop header
LB: loop body
LE: loop exit
PB: predicated region body
PF: predicated region fallthrough
CT: control target
= control target key end

     0   :  { %s2449_s27 = smov 0   ;;  %s2451_s28 = smov 0   ;;  %s2866_s0 = inlined_call_operand.vmem [shape: bf16[2,6,3,128], index: 0, kind: input, shape index: {}, may-alias: {0,2,4}]   ;;  %s2867_s1 = inlined_call_operand.vmem [shape: bf16[2,6,3,128], index: 1, kind: input, shape index: {}, may-alias: {1,3,5}]   ;;  %s2868_s2 = inlined_call_operand.vmem [shape: bf16[2,6,3,128], index: 2, kind: input, shape index: {}, may-alias: {0,2,4}]   ;;  %s2869_s3 = inlined_call_operand.vmem [shape: bf16[2,6,3,128], index: 3, kind: input, shape index: {}, may-alias: {1,3,5}]   ;;  %s2870_s4 = inlined_call_operand.vmem [shape: bf16[2,6,3,128], index: 4, kind: input, shape index: {}, may-alias: {0,2,4}]   ;;  %s2871_s5 = inlined_call_operand.vmem [shape: bf16[2,6,3,128], index: 5, kind: input, shape index: {}, may-alias: {1,3,5}]   ;;  %s2872_s6 = inlined_call_operand.vmem [shape: bf16[3,3,128,128], index: 6, kind: input, shape index: {}]   ;;  %s2873_s7 = inlined_call_operand.vmem [shape: f32[1,128], index: 7, kind: input, shape index: {}]   ;;  %s2874_s8 = inlined_call_operand.vmem [shape: bf16[2,2,2,128], index: 8, kind: output, shape index: {}]  }
   0x1   :  { %s2453_s29 = smov 0   ;;  %s2455_s30 = smov 0  }
   0x2   :  { %s2457_s9 = smov 0  }
   0x3 LB: > { %s27_s10 = sadd.s32 1, %s2392_s29  ;;  %s30_s11 = sadd.s32 1, %s2396_s30  ;;  %s2400_s9 = sphi %s2457_s9, %s18_s9   ;;  %s2396_s30 = sphi %s2455_s30, %s2878_s30   ;;  %s2392_s29 = sphi %s2453_s29, %s2877_s29   ;;  %s2388_s28 = sphi %s2451_s28, %s2876_s28   ;;  %s2384_s27 = sphi %s2449_s27, %s2875_s27  }
   0x4   : > { %p28_p0 = scmp.ge.s32.totalorder %s27_s10, 2  ;;  %p1766_p1 = scmp.ge.s32.totalorder %s2400_s9, 1 }
   0x5   : > { %p396_p2 = scmp.lt.s32.totalorder %s2400_s9, 5 }
   0x6   : > { %s2880_s10 = smov (%p28_p0, %s27_s10), 0  ;;  %s2882_s11 = smov (!%p28_p0, %s30_s11), %s2396_s30 }
   0x7   : > { %p397_p3 = pnand %p1766_p1, %p396_p2  ;;  %p32_p4 = scmp.ge.s32.totalorder %s2882_s11, 2 }
   0x8   : > { %s2507_s22 = sshll.u32 (!%p397_p3), %s2384_s27, 1  ;;  %p486_p5 = scmp.lt.s32.totalorder (!%p397_p3), %s2388_s28, 1 }
   0x9   : > { %s2884_s11 = smov (%p32_p4, %s2882_s11), 0  ;;  %400 = sbr.rel (%p397_p3) target bundleno = 377 (0x179), region = 52 }
   0xa   : > { %p488_p6 = scmp.lt.s32.totalorder (!%p397_p3), %s2507_s22, 5  ;;  %s530_s17 = sadd.s32 (!%p397_p3), 2, %s2507_s22 }
   0xb   : > { %p533_p7 = scmp.lt.s32.totalorder (!%p397_p3), %s530_s17, 5  ;;  %s506_s25 = sadd.s32 (!%p397_p3), 1, %s2507_s22 }
   0xc   : > { %p509_p8 = scmp.lt.s32.totalorder (!%p397_p3), %s506_s25, 5  ;;  %p555_p9 = scmp.lt.s32.totalorder (!%p397_p3), %s2384_s27, 1 }
   0xe   : > { %v2290_v0 = vld [vmem:[%s2872_s6 + $0x78] sm:$0xff]   ;;  %v2402_v1 = vmov 0.0   ;;  %v2292_v3 = vld [vmem:[%s2872_s6 + $0x70] sm:$0xff]   ;;  %vm2403_vm0 = vmmov 0   ;;  %v2294_v5 = vld [vmem:[%s2872_s6 + $0x68] sm:$0xff]   ;;  %s2886_s28 = smov (!%p486_p5, %s2388_s28), 1 }
   0xf   : > { %2067 = vmatprep.subr.bf16.mxu0 %v2402_v1  ;;  %2087 = vmatprep.subr.bf16.mxu1 %v2402_v1  ;;  %v2291_v2 = vld [vmem:[%s2872_s6 + $0x38] sm:$0xff]   ;;  %v2293_v4 = vld [vmem:[%s2872_s6 + $0x30] sm:$0xff]   ;;  %v2295_v6 = vld [vmem:[%s2872_s6 + $0x28] sm:$0xff]   ;;  %s489_s14 = scalar_select %p488_p6, %s2507_s22, 5 }
  0x10   : > { %2068 = vmatpush3.bf16.msra.mxu0 %v2290_v0  ;;  %2083 = vmatprep.mubr.msk.bf16.mxu0 %vm2403_vm0, %v2402_v1  ;;  %v2296_v7 = vld [vmem:[%s2872_s6 + $0x60] sm:$0xff]   ;;  %v2298_v9 = vld [vmem:[%s2872_s6 + $0x58] sm:$0xff]   ;;  %s2537_s20 = smul.u32 6, %s2886_s28  ;;  %v2300_v11 = vld [vmem:[%s2872_s6 + $0x50] sm:$0xff]   ;;  %s2888_s17 = smov (!%p533_p7, %s530_s17), 5 }
  0x11   : > { %2088 = vmatpush3.bf16.msra.mxu1 %v2291_v2  ;;  %2069 = vmatprep.subr.bf16.mxu0 %v2402_v1  ;;  %v2297_v8 = vld [vmem:[%s2872_s6 + $0x20] sm:$0xff]   ;;  %v2299_v10 = vld [vmem:[%s2872_s6 + $0x18] sm:$0xff]   ;;  %v2301_v12 = vld [vmem:[%s2872_s6 + $0x10] sm:$0xff]   ;;  %s2890_s25 = smov (!%p509_p8, %s506_s25), 5  ;;  %s2892_s27 = smov (!%p555_p9, %s2384_s27), 1 }
  0x12   : > { %2089 = vmatprep.subr.bf16.mxu1 %v2402_v1  ;;  %2103 = vmatprep.mubr.msk.bf16.mxu1 %vm2403_vm0, %v2402_v1  ;;  %s491_s26 = sadd.s32 %s2537_s20, %s489_s14  ;;  %v2302_v13 = vld [vmem:[%s2872_s6 + $0x48] sm:$0xff]   ;;  %s536_s19 = sadd.s32 %s2537_s20, %s2888_s17  ;;  %v2304_v15 = vld [vmem:[%s2872_s6 + $0x40] sm:$0xff]   ;;  %v2306_v19 = vld [vmem:[%s2872_s6 + $0xb8] sm:$0xff]  }
  0x13   : > { %s1768_s15 = sshll.u32 %s491_s26, 1  ;;  %v2303_v14 = vld [vmem:[%s2872_s6 + $0x8] sm:$0xff]   ;;  %v2305_v16 = vld [vmem:[%s2872_s6] sm:$0xff]   ;;  %v2307_v20 = vld [vmem:[%s2872_s6 + $0xf8] sm:$0xff]   ;;  %s1779_s18 = sshll.u32 %s2886_s28, 1 }
  0x14   : > { %2070 = vmatpush3.bf16.msra.mxu0 %v2292_v3  ;;  %s503_s23 = scalar_lea.vmem %s2867_s1, %s1768_s15  ;;  %s2570_s13 = scalar_lea.vmem %s2866_s0, %s1768_s15  ;;  %v2308_v21 = vld [vmem:[%s2872_s6 + $0xb0] sm:$0xff]   ;;  %v2310_v23 = vld [vmem:[%s2872_s6 + $0xa8] sm:$0xff]   ;;  %v2312_v25 = vld [vmem:[%s2872_s6 + $0xa0] sm:$0xff]  }
  0x15   : > { %2090 = vmatpush3.bf16.msra.mxu1 %v2293_v4  ;;  %2071 = vmatprep.subr.bf16.mxu0 %v2402_v1  ;;  %v578_v17 = vld [vmem:[%s503_s23] sm:$0x1]  ;;  %v2309_v22 = vld [vmem:[%s2872_s6 + $0xf0] sm:$0xff]   ;;  %v2311_v24 = vld [vmem:[%s2872_s6 + $0xe8] sm:$0xff]   ;;  %s512_s23 = sadd.s32 %s2537_s20, %s2890_s25 }
  0x16   : > { %2091 = vmatprep.subr.bf16.mxu1 %v2402_v1  ;;  %v561_v18 = vld [vmem:[%s2570_s13] sm:$0x1]  ;;  %v2314_v27 = vld [vmem:[%s2872_s6 + $0x98] sm:$0xff]   ;;  %v2316_v30 = vld [vmem:[%s2872_s6 + $0x90] sm:$0xff]   ;;  %s2641_s22 = sshll.u32 %s512_s23, 1 }
  0x17   : > { %v2313_v26 = vld [vmem:[%s2872_s6 + $0xe0] sm:$0xff]   ;;  %v2315_v28 = vld [vmem:[%s2872_s6 + $0xd8] sm:$0xff]   ;;  %v2317_v31 = vld [vmem:[%s2872_s6 + $0xd0] sm:$0xff]   ;;  %s2654_s23 = scalar_lea.vmem %s2868_s2, %s2641_s22  ;;  %s526_s16 = scalar_lea.vmem %s2869_s3, %s2641_s22 }
  0x18   : > { %2072 = vmatpush3.bf16.msra.mxu0 %v2294_v5  ;;  %v1828_v29 = vld.sshfl [vmem:[%s2570_s13] sm:$0x3 pattern:$0x76325410]  ;;  %v2318_v33 = vld [vmem:[%s2872_s6 + $0x88] sm:$0xff]   ;;  %v2322_v40 = vld [vmem:[%s2872_s6 + $0x138] sm:$0xff]  }
  0x19   : > { %2092 = vmatpush3.bf16.msra.mxu1 %v2295_v6  ;;  %2073 = vmatprep.subr.bf16.mxu0 %v2402_v1  ;;  %v801_v32 = vshll.u32 %v1828_v29, 16  ;;  %v2319_v34 = vld [vmem:[%s2872_s6 + $0xc8] sm:$0xff]   ;;  %v799_v35 = vshrl.u32 %v1828_v29, 16  ;;  %v2320_v37 = vld [vmem:[%s2872_s6 + $0x80] sm:$0xff]   ;;  %v2323_v42 = vld [vmem:[%s2872_s6 + $0x178] sm:$0xff]   ;;  %s1776_s22 = sshll.u32 %s536_s19, 1 }
  0x1a   : > { %2093 = vmatprep.subr.bf16.mxu1 %v2402_v1  ;;  %v2321_v38 = vld [vmem:[%s2872_s6 + $0xc0] sm:$0xff]   ;;  %v2324_v43 = vld [vmem:[%s2872_s6 + $0x130] sm:$0xff]   ;;  %v2326_v45 = vld [vmem:[%s2872_s6 + $0x128] sm:$0xff]   ;;  %s550_s19 = scalar_lea.vmem %s2871_s5, %s1776_s22 }
  0x1b   : > { %v803_v36 = vrot.slane %v801_v32, 1  ;;  %v895_v41 = vld [vmem:[%s2654_s23] sm:$0x1]  ;;  %v2325_v44 = vld [vmem:[%s2872_s6 + $0x170] sm:$0xff]   ;;  %v2327_v46 = vld [vmem:[%s2872_s6 + $0x168] sm:$0xff]  }
  0x1c   : > { %2074 = vmatpush3.bf16.msra.mxu0 %v2296_v7  ;;  %v2328_v47 = vld [vmem:[%s2872_s6 + $0x120] sm:$0xff]   ;;  %v2330_v49 = vld [vmem:[%s2872_s6 + $0x118] sm:$0xff]   ;;  %v2332_v51 = vld [vmem:[%s2872_s6 + $0x110] sm:$0xff]  }
  0x1d   : > { %2094 = vmatpush3.bf16.msra.mxu1 %v2297_v8  ;;  %2075 = vmatprep.subr.bf16.mxu0 %v2402_v1  ;;  %v804_v39 = vor.u32 %v803_v36, %v799_v35  ;;  %v2329_v48 = vld [vmem:[%s2872_s6 + $0x160] sm:$0xff]   ;;  %v2331_v50 = vld [vmem:[%s2872_s6 + $0x158] sm:$0xff]   ;;  %v2333_v53 = vld [vmem:[%s2872_s6 + $0x150] sm:$0xff]  }
  0x1e   : > { %2095 = vmatprep.subr.bf16.mxu1 %v2402_v1  ;;  %v1901_v52 = vld.sshfl [vmem:[%s2654_s23] sm:$0x3 pattern:$0x76325410]  ;;  %v2334_v55 = vld [vmem:[%s2872_s6 + $0x108] sm:$0xff]   ;;  %v2338_v62 = vld [vmem:[%s2872_s6 + $0x1b8] sm:$0xff]  }
  0x1f   : > { %v1138_v54 = vshll.u32 %v1901_v52, 16  ;;  %v2335_v56 = vld [vmem:[%s2872_s6 + $0x148] sm:$0xff]   ;;  %v1136_v57 = vshrl.u32 %v1901_v52, 16  ;;  %v2336_v59 = vld [vmem:[%s2872_s6 + $0x100] sm:$0xff]   ;;  %v2339_v0 = vld [vmem:[%s2872_s6 + $0x1f8] sm:$0xff]  }
  0x20   : > { %2076 = vmatpush3.bf16.msra.mxu0 %v2298_v9  ;;  %v2337_v60 = vld [vmem:[%s2872_s6 + $0x140] sm:$0xff]   ;;  %v2340_v2 = vld [vmem:[%s2872_s6 + $0x1b0] sm:$0xff]   ;;  %v2342_v4 = vld [vmem:[%s2872_s6 + $0x1a8] sm:$0xff]  }
  0x21   : > { %2096 = vmatpush3.bf16.msra.mxu1 %v2299_v10  ;;  %2077 = vmatprep.subr.bf16.mxu0 %v2402_v1  ;;  %v1140_v58 = vrot.slane %v1138_v54, 1  ;;  %v1002_v61 = vld [vmem:[%s526_s16] sm:$0x1]  ;;  %v2341_v3 = vld [vmem:[%s2872_s6 + $0x1f0] sm:$0xff]   ;;  %v2343_v5 = vld [vmem:[%s2872_s6 + $0x1e8] sm:$0xff]   ;;  %s538_s16 = scalar_lea.vmem %s2870_s4, %s1776_s22  ;;  %s558_s22 = sadd.s32 %s1779_s18, %s2892_s27 }
  0x22   : > { %2097 = vmatprep.subr.bf16.mxu1 %v2402_v1  ;;  %v2344_v6 = vld [vmem:[%s2872_s6 + $0x1a0] sm:$0xff]   ;;  %v2346_v8 = vld [vmem:[%s2872_s6 + $0x198] sm:$0xff]   ;;  %v2348_v10 = vld [vmem:[%s2872_s6 + $0x190] sm:$0xff]   ;;  %s559_s24 = scalar_lea.vmem %s2874_s8, %s558_s22 }
  0x23   : > { %v1141_v63 = vor.u32 %v1140_v58, %v1136_v57  ;;  %v2345_v7 = vld [vmem:[%s2872_s6 + $0x1e0] sm:$0xff]   ;;  %v2347_v9 = vld [vmem:[%s2872_s6 + $0x1d8] sm:$0xff]  }
  0x24   : > { %2078 = vmatpush3.bf16.msra.mxu0 %v2300_v11  ;;  %v2349_v11 = vld [vmem:[%s2872_s6 + $0x1d0] sm:$0xff]   ;;  %v2361_v29 = vld [vmem:[%s2872_s6 + $0x200] sm:$0xff]  }
  0x25   : > { %2098 = vmatpush3.bf16.msra.mxu1 %v2301_v12  ;;  %2079 = vmatprep.subr.bf16.mxu0 %v2402_v1  ;;  %v2350_v12 = vld [vmem:[%s2872_s6 + $0x188] sm:$0xff]  }
  0x26   : > { %2099 = vmatprep.subr.bf16.mxu1 %v2402_v1 }
  0x28   : > { %2080 = vmatpush3.bf16.msra.mxu0 %v2302_v13  ;;  %v2351_v13 = vld [vmem:[%s2872_s6 + $0x1c8] sm:$0xff]  }
  0x29   : > { %2100 = vmatpush3.bf16.msra.mxu1 %v2303_v14  ;;  %2081 = vmatprep.subr.bf16.mxu0 %v2402_v1  ;;  %v2352_v14 = vld [vmem:[%s2872_s6 + $0x180] sm:$0xff]  }
  0x2a   : > { %2101 = vmatprep.subr.bf16.mxu1 %v2402_v1 }
  0x2c   : > { %2082 = vmatpush3.bf16.msra.mxu0 %v2304_v15  ;;  %v2353_v15 = vld [vmem:[%s2872_s6 + $0x1c0] sm:$0xff]  }
  0x2d   : > { %2102 = vmatpush3.bf16.msra.mxu1 %v2305_v16  ;;  %2107 = vmatprep.subr.bf16.mxu0 %v2402_v1  ;;  %v1232_v16 = vld [vmem:[%s538_s16] sm:$0x1] }
  0x2e   : > { %2127 = vmatprep.subr.bf16.mxu1 %v2402_v1 }
  0x2f   : > { %2084 = vmatmul.mubr.bf16.vlgmr.msra.gmra.mxu0 %v578_v17  ;;  %v2354_v17 = vld [vmem:[%s2872_s6 + $0x238] sm:$0xff]  }
  0x30   : > { %2104 = vmatmul.mubr.bf16.vlgmr.msra.gmra.mxu1 %v561_v18  ;;  %2108 = vmatpush3.bf16.msra.mxu0 %v2306_v19  ;;  %v1339_v18 = vld [vmem:[%s550_s19] sm:$0x1]  ;;  %v2355_v19 = vld [vmem:[%s2872_s6 + $0x230] sm:$0xff]  }
  0x31   : > { %2128 = vmatpush3.bf16.msra.mxu1 %v2307_v20  ;;  %2109 = vmatprep.subr.bf16.mxu0 %v2402_v1  ;;  %v2356_v20 = vld [vmem:[%s2872_s6 + $0x228] sm:$0xff]  }
  0x32   : > { %2129 = vmatprep.subr.bf16.mxu1 %v2402_v1  ;;  %2123 = vmatprep.mubr.msk.bf16.mxu0 %vm2403_vm0, %v2402_v1 }
  0x33   : > { %2143 = vmatprep.mubr.msk.bf16.mxu1 %vm2403_vm0, %v2402_v1 }
  0x34   : > { %2110 = vmatpush3.bf16.msra.mxu0 %v2308_v21  ;;  %v2357_v21 = vld [vmem:[%s2872_s6 + $0x220] sm:$0xff]  }
  0x35   : > { %2130 = vmatpush3.bf16.msra.mxu1 %v2309_v22  ;;  %2111 = vmatprep.subr.bf16.mxu0 %v2402_v1  ;;  %v2358_v22 = vld [vmem:[%s2872_s6 + $0x218] sm:$0xff]  }
  0x36   : > { %2131 = vmatprep.subr.bf16.mxu1 %v2402_v1 }
  0x38   : > { %2112 = vmatpush3.bf16.msra.mxu0 %v2310_v23  ;;  %v1974_v23 = vld.sshfl [vmem:[%s538_s16] sm:$0x3 pattern:$0x76325410] }
  0x39   : > { %2132 = vmatpush3.bf16.msra.mxu1 %v2311_v24  ;;  %2113 = vmatprep.subr.bf16.mxu0 %v2402_v1  ;;  %v2359_v24 = vld [vmem:[%s2872_s6 + $0x210] sm:$0xff]  }
  0x3a   : > { %2133 = vmatprep.subr.bf16.mxu1 %v2402_v1 }
  0x3c   : > { %2114 = vmatpush3.bf16.msra.mxu0 %v2312_v25  ;;  %v1475_v25 = vshll.u32 %v1974_v23, 16 }
  0x3d   : > { %2134 = vmatpush3.bf16.msra.mxu1 %v2313_v26  ;;  %2115 = vmatprep.subr.bf16.mxu0 %v2402_v1  ;;  %v2360_v26 = vld [vmem:[%s2872_s6 + $0x208] sm:$0xff]  }
  0x3e   : > { %2135 = vmatprep.subr.bf16.mxu1 %v2402_v1 }
  0x40   : > { %2116 = vmatpush3.bf16.msra.mxu0 %v2314_v27  ;;  %v1473_v27 = vshrl.u32 %v1974_v23, 16 }
  0x41   : > { %2136 = vmatpush3.bf16.msra.mxu1 %v2315_v28  ;;  %2117 = vmatprep.subr.bf16.mxu0 %v2402_v1  ;;  %v1477_v28 = vrot.slane %v1475_v25, 1 }
  0x42   : > { %2137 = vmatprep.subr.bf16.mxu1 %v2402_v1 }
  0x44   : > { %2118 = vmatpush3.bf16.msra.mxu0 %v2316_v30  ;;  %v1478_v30 = vor.u32 %v1477_v28, %v1473_v27 }
  0x45   : > { %2138 = vmatpush3.bf16.msra.mxu1 %v2317_v31  ;;  %2119 = vmatprep.subr.bf16.mxu0 %v2402_v1 }
  0x46   : > { %2139 = vmatprep.subr.bf16.mxu1 %v2402_v1 }
  0x48   : > { %2120 = vmatpush3.bf16.msra.mxu0 %v2318_v33 }
  0x49   : > { %2140 = vmatpush3.bf16.msra.mxu1 %v2319_v34  ;;  %2121 = vmatprep.subr.bf16.mxu0 %v2402_v1 }
  0x4a   : > { %2141 = vmatprep.subr.bf16.mxu1 %v2402_v1 }
  0x4c   : > { %2122 = vmatpush3.bf16.msra.mxu0 %v2320_v37 }
  0x4d   : > { %2142 = vmatpush3.bf16.msra.mxu1 %v2321_v38  ;;  %2147 = vmatprep.subr.bf16.mxu0 %v2402_v1 }
  0x4e   : > { %2167 = vmatprep.subr.bf16.mxu1 %v2402_v1 }
  0x4f   : > { %2124 = vmatmul.mubr.bf16.vlgmr.msra.gmra.mxu0 %v804_v39 }
  0x50   : > { %2148 = vmatpush3.bf16.msra.mxu0 %v2322_v40  ;;  %2144 = vmatmul.mubr.bf16.vlgmr.msra.gmra.mxu1 %v895_v41 }
  0x51   : > { %2168 = vmatpush3.bf16.msra.mxu1 %v2323_v42  ;;  %2149 = vmatprep.subr.bf16.mxu0 %v2402_v1 }
  0x52   : > { %2169 = vmatprep.subr.bf16.mxu1 %v2402_v1  ;;  %2163 = vmatprep.mubr.msk.bf16.mxu0 %vm2403_vm0, %v2402_v1 }
  0x53   : > { %2183 = vmatprep.mubr.msk.bf16.mxu1 %vm2403_vm0, %v2402_v1 }
  0x54   : > { %2150 = vmatpush3.bf16.msra.mxu0 %v2324_v43 }
  0x55   : > { %2170 = vmatpush3.bf16.msra.mxu1 %v2325_v44  ;;  %2151 = vmatprep.subr.bf16.mxu0 %v2402_v1 }
  0x56   : > { %2171 = vmatprep.subr.bf16.mxu1 %v2402_v1 }
  0x58   : > { %2152 = vmatpush3.bf16.msra.mxu0 %v2326_v45 }
  0x59   : > { %2172 = vmatpush3.bf16.msra.mxu1 %v2327_v46  ;;  %2153 = vmatprep.subr.bf16.mxu0 %v2402_v1 }
  0x5a   : > { %2173 = vmatprep.subr.bf16.mxu1 %v2402_v1 }
  0x5c   : > { %2154 = vmatpush3.bf16.msra.mxu0 %v2328_v47 }
  0x5d   : > { %2174 = vmatpush3.bf16.msra.mxu1 %v2329_v48  ;;  %2155 = vmatprep.subr.bf16.mxu0 %v2402_v1 }
  0x5e   : > { %2175 = vmatprep.subr.bf16.mxu1 %v2402_v1 }
  0x60   : > { %2156 = vmatpush3.bf16.msra.mxu0 %v2330_v49 }
  0x61   : > { %2176 = vmatpush3.bf16.msra.mxu1 %v2331_v50  ;;  %2157 = vmatprep.subr.bf16.mxu0 %v2402_v1 }
  0x62   : > { %2177 = vmatprep.subr.bf16.mxu1 %v2402_v1 }
  0x64   : > { %2158 = vmatpush3.bf16.msra.mxu0 %v2332_v51 }
  0x65   : > { %2178 = vmatpush3.bf16.msra.mxu1 %v2333_v53  ;;  %2159 = vmatprep.subr.bf16.mxu0 %v2402_v1 }
  0x66   : > { %2179 = vmatprep.subr.bf16.mxu1 %v2402_v1 }
  0x68   : > { %2160 = vmatpush3.bf16.msra.mxu0 %v2334_v55 }
  0x69   : > { %2180 = vmatpush3.bf16.msra.mxu1 %v2335_v56  ;;  %2161 = vmatprep.subr.bf16.mxu0 %v2402_v1 }
  0x6a   : > { %2181 = vmatprep.subr.bf16.mxu1 %v2402_v1 }
  0x6c   : > { %2162 = vmatpush3.bf16.msra.mxu0 %v2336_v59 }
  0x6d   : > { %2182 = vmatpush3.bf16.msra.mxu1 %v2337_v60  ;;  %2187 = vmatprep.subr.bf16.mxu0 %v2402_v1 }
  0x6e   : > { %2207 = vmatprep.subr.bf16.mxu1 %v2402_v1 }
  0x6f   : > { %2164 = vmatmul.mubr.bf16.vlgmr.msra.gmra.mxu0 %v1002_v61 }
  0x70   : > { %2188 = vmatpush3.bf16.msra.mxu0 %v2338_v62  ;;  %2184 = vmatmul.mubr.bf16.vlgmr.msra.gmra.mxu1 %v1141_v63 }
  0x71   : > { %2208 = vmatpush3.bf16.msra.mxu1 %v2339_v0  ;;  %2189 = vmatprep.subr.bf16.mxu0 %v2402_v1 }
  0x72   : > { %2209 = vmatprep.subr.bf16.mxu1 %v2402_v1  ;;  %2203 = vmatprep.mubr.msk.bf16.mxu0 %vm2403_vm0, %v2402_v1 }
  0x73   : > { %2223 = vmatprep.mubr.msk.bf16.mxu1 %vm2403_vm0, %v2402_v1 }
  0x74   : > { %2190 = vmatpush3.bf16.msra.mxu0 %v2340_v2 }
  0x75   : > { %2210 = vmatpush3.bf16.msra.mxu1 %v2341_v3  ;;  %2191 = vmatprep.subr.bf16.mxu0 %v2402_v1 }
  0x76   : > { %2211 = vmatprep.subr.bf16.mxu1 %v2402_v1 }
  0x78   : > { %2192 = vmatpush3.bf16.msra.mxu0 %v2342_v4 }
  0x79   : > { %2212 = vmatpush3.bf16.msra.mxu1 %v2343_v5  ;;  %2193 = vmatprep.subr.bf16.mxu0 %v2402_v1 }
  0x7a   : > { %2213 = vmatprep.subr.bf16.mxu1 %v2402_v1 }
  0x7c   : > { %2194 = vmatpush3.bf16.msra.mxu0 %v2344_v6 }
  0x7d   : > { %2214 = vmatpush3.bf16.msra.mxu1 %v2345_v7  ;;  %2195 = vmatprep.subr.bf16.mxu0 %v2402_v1  ;;  %v1983_v7 = vld [vmem:[%s2873_s7] ss:$0 sm:$0xff] }
  0x7e   : > { %2215 = vmatprep.subr.bf16.mxu1 %v2402_v1 }
  0x80   : > { %2196 = vmatpush3.bf16.msra.mxu0 %v2346_v8 }
  0x81   : > { %2216 = vmatpush3.bf16.msra.mxu1 %v2347_v9  ;;  %2197 = vmatprep.subr.bf16.mxu0 %v2402_v1 }
  0x82   : > { %2217 = vmatprep.subr.bf16.mxu1 %v2402_v1 }
  0x84   : > { %2198 = vmatpush3.bf16.msra.mxu0 %v2348_v10 }
  0x85   : > { %2218 = vmatpush3.bf16.msra.mxu1 %v2349_v11  ;;  %2199 = vmatprep.subr.bf16.mxu0 %v2402_v1 }
  0x86   : > { %2219 = vmatprep.subr.bf16.mxu1 %v2402_v1 }
  0x88   : > { %2200 = vmatpush3.bf16.msra.mxu0 %v2350_v12 }
  0x89   : > { %2220 = vmatpush3.bf16.msra.mxu1 %v2351_v13  ;;  %2201 = vmatprep.subr.bf16.mxu0 %v2402_v1 }
  0x8a   : > { %2221 = vmatprep.subr.bf16.mxu1 %v2402_v1 }
  0x8c   : > { %2202 = vmatpush3.bf16.msra.mxu0 %v2352_v14 }
  0x8d   : > { %2222 = vmatpush3.bf16.msra.mxu1 %v2353_v15  ;;  %2227 = vmatprep.subr.bf16.mxu0 %v2402_v1 }
  0x8f   : > { %2204 = vmatmul.mubr.bf16.vlgmr.msra.gmra.mxu0 %v1232_v16 }
  0x90   : > { %2228 = vmatpush3.bf16.msra.mxu0 %v2354_v17  ;;  %2224 = vmatmul.mubr.bf16.vlgmr.msra.gmra.mxu1 %v1339_v18 }
  0x91   : > { %2229 = vmatprep.subr.bf16.mxu0 %v2402_v1  ;;  %2243 = vmatprep.mubr.msk.bf16.mxu0 %vm2403_vm0, %v2402_v1 }
  0x94   : > { %2230 = vmatpush3.bf16.msra.mxu0 %v2355_v19 }
  0x95   : > { %2231 = vmatprep.subr.bf16.mxu0 %v2402_v1 }
  0x98   : > { %2232 = vmatpush3.bf16.msra.mxu0 %v2356_v20 }
  0x99   : > { %2233 = vmatprep.subr.bf16.mxu0 %v2402_v1 }
  0x9c   : > { %2234 = vmatpush3.bf16.msra.mxu0 %v2357_v21 }
  0x9d   : > { %2235 = vmatprep.subr.bf16.mxu0 %v2402_v1 }
  0xa0   : > { %2236 = vmatpush3.bf16.msra.mxu0 %v2358_v22 }
  0xa1   : > { %2237 = vmatprep.subr.bf16.mxu0 %v2402_v1 }
  0xa4   : > { %2238 = vmatpush3.bf16.msra.mxu0 %v2359_v24 }
  0xa5   : > { %2239 = vmatprep.subr.bf16.mxu0 %v2402_v1 }
  0xa8   : > { %2240 = vmatpush3.bf16.msra.mxu0 %v2360_v26 }
  0xa9   : > { %2241 = vmatprep.subr.bf16.mxu0 %v2402_v1 }
  0xac   : > { %2242 = vmatpush3.bf16.msra.mxu0 %v2361_v29 }
  0xaf   : > { %2244 = vmatmul.mubr.bf16.vlgmr.msra.gmra.mxu0 %v1478_v30 }
  0xef   : > { %v678_v31 = vpop.f32.mrf.mxu0 }
  0xf0   : > { %v766_v32 = vpop.f32.mrf.mxu1 }
  0xf1   : > { %v767_v33 = vadd.f32 %v766_v32, %v678_v31  ;;  %v2085_v34 = vpop.f32.mrf.mxu0 }
  0xf2   : > { %v2105_v35 = vpop.f32.mrf.mxu1 }
  0xf3   : > { %v681_v36 = vpop.f32.mrf.mxu0 }
  0xf4   : > { %v769_v37 = vpop.f32.mrf.mxu1 }
  0xf5   : > { %v2086_v38 = vpop.f32.mrf.mxu0 }
  0xf6   : > { %v2106_v39 = vpop.f32.mrf.mxu1 }
 0x10f   : > { %v888_v40 = vpop.f32.mrf.mxu0 }
 0x110   : > { %v894_v41 = vadd.f32 %v888_v40, %v767_v33  ;;  %v995_v42 = vpop.f32.mrf.mxu1 }
 0x111   : > { %v2125_v43 = vpop.f32.mrf.mxu0 }
 0x112   : > { %v1001_v44 = vadd.f32 %v995_v42, %v894_v41  ;;  %v2145_v45 = vpop.f32.mrf.mxu1 }
 0x113   : > { %v891_v46 = vpop.f32.mrf.mxu0 }
 0x114   : > { %v998_v1 = vpop.f32.mrf.mxu1 }
 0x115   : > { %v2126_v47 = vpop.f32.mrf.mxu0 }
 0x116   : > { %v2146_v48 = vpop.f32.mrf.mxu1 }
 0x12f   : > { %v1102_v49 = vpop.f32.mrf.mxu0 }
 0x130   : > { %v1225_v50 = vpop.f32.mrf.mxu1  ;;  %v1108_v2 = vadd.f32 %v1102_v49, %v1001_v44 }
 0x131   : > { %v2165_v51 = vpop.f32.mrf.mxu0 }
 0x132   : > { %v2185_v52 = vpop.f32.mrf.mxu1  ;;  %v1231_v3 = vadd.f32 %v1225_v50, %v1108_v2 }
 0x133   : > { %v1105_v53 = vpop.f32.mrf.mxu0 }
 0x134   : > { %v1228_v54 = vpop.f32.mrf.mxu1 }
 0x135   : > { %v2166_v55 = vpop.f32.mrf.mxu0 }
 0x136   : > { %v2186_v56 = vpop.f32.mrf.mxu1 }
 0x14f   : > { %v1332_v57 = vpop.f32.mrf.mxu0 }
 0x150   : > { %v1439_v58 = vpop.f32.mrf.mxu1  ;;  %v1338_v4 = vadd.f32 %v1332_v57, %v1231_v3 }
 0x151   : > { %v2205_v59 = vpop.f32.mrf.mxu0 }
 0x152   : > { %v2225_v60 = vpop.f32.mrf.mxu1  ;;  %v1445_v5 = vadd.f32 %v1439_v58, %v1338_v4 }
 0x153   : > { %v1335_v61 = vpop.f32.mrf.mxu0 }
 0x154   : > { %v1442_v62 = vpop.f32.mrf.mxu1 }
 0x155   : > { %v2206_v63 = vpop.f32.mrf.mxu0 }
 0x156   : > { %v2226_v0 = vpop.f32.mrf.mxu1 }
 0x16f   : > { %v1562_v6 = vpop.f32.mrf.mxu0 }
 0x170   : > { %v1568_v8 = vadd.f32 %v1562_v6, %v1445_v5 }
 0x171   : > { %v2245_v9 = vpop.f32.mrf.mxu0 }
 0x172   : > { %v1576_v10 = vadd.f32 %v1983_v7, %v1568_v8 }
 0x173   : > { %v1565_v11 = vpop.f32.mrf.mxu0 }
 0x174   : > { %v1577_v12 = vmax.f32 %v1576_v10, 0.0 }
 0x175   : > { %v2246_v13 = vpop.f32.mrf.mxu0 }
 0x176   : > { %v1578_v14 = vpack.c.bf16 %v1577_v12, %v1577_v12 }
 0x178   : > { %1579 = vst [vmem:[%s559_s24] sm:$0x1] %v1578_v14 }
 0x179 PF: > { %s18_s9 = sadd.s32 1, %s2400_s9   ;;  %s2875_s27 = smov %s2392_s29 }
 0x17a   : > { %p15_p10 = scmp.ge.s32.totalorder %s18_s9, 6   ;;  %s2876_s28 = smov %s2396_s30 }
 0x17b   : > { %s2877_s29 = smov %s2880_s10  ;;  %s2878_s30 = smov %s2884_s11 }
 0x17c   :  { %17 = sbr.rel (!%p15_p10) target bundleno = 3 (0x3), region = 105 }

// kernel: tsn_forward.38
= control target key start
LH: loop header
LB: loop body
LE: loop exit
PB: predicated region body
PF: predicated region fallthrough
CT: control target
= control target key end

     0   :  { %v91_v0 = vmov 0.0   ;;  %v92_v11 = vmov 1983009808   ;;  %v52_v13 = vlaneseq  ;;  %vm69_vm0 = vcmask 1041409   ;;  %s112_s0 = inlined_call_operand.vmem [shape: bf16[2,8,256], index: 0, kind: input, shape index: {}]   ;;  %s113_s1 = inlined_call_operand.vmem [shape: f32[2,256], index: 1, kind: output, shape index: {}]  }
   0x1   :  { %12 = vst [vmem:[#allocation2] sm:$0xf] %v91_v0  ;;  %v14_v1 = vld [vmem:[%s112_s0] sm:$0xff]  ;;  %v15_v2 = vld [vmem:[%s112_s0 + $0x8] sm:$0xff]  ;;  %v50_v12 = vunpack.c.l.s4 %v92_v11  ;;  %vm71_vm1 = vcmask 1043459   ;;  %vm73_vm2 = vcmask 1045509  }
   0x2   :  { %v16_v3 = vunpack.c.l.bf16 %v14_v1  ;;  %v17_v4 = vunpack.c.h.bf16 %v14_v1  ;;  %v18_v5 = vunpack.c.l.bf16 %v15_v2  ;;  %v19_v6 = vunpack.c.h.bf16 %v15_v2 }
   0x3   :  { %v51_v22 = vunpack.c.0.s8 %v50_v12  ;;  %v53_v23 = vshrl.u32 %v52_v13, 7  ;;  %vm75_vm3 = vcmask 1047559  }
   0x4   :  { %v20_v7 = vrot.slane %v16_v3, 4  ;;  %v26_v8 = vrot.slane %v17_v4, 4  ;;  %v32_v9 = vrot.slane %v18_v5, 4  ;;  %v38_v10 = vrot.slane %v19_v6, 4 }
   0x5   :  { %v54_v32 = vsub.s32 %v51_v22, %v53_v23 }
   0x6   :  { %v21_v14 = vadd.f32 %v20_v7, %v16_v3  ;;  %v27_v15 = vadd.f32 %v26_v8, %v17_v4  ;;  %v33_v16 = vadd.f32 %v32_v9, %v18_v5  ;;  %v39_v17 = vadd.f32 %v38_v10, %v19_v6 }
   0x8   :  { %v22_v18 = vrot.slane %v21_v14, 2  ;;  %v28_v19 = vrot.slane %v27_v15, 2  ;;  %v34_v20 = vrot.slane %v33_v16, 2  ;;  %v40_v21 = vrot.slane %v39_v17, 2  ;;  %v13_v43 = vld [vmem:[#allocation2] sm:$0xf] }
   0xa   :  { %v23_v24 = vadd.f32 %v22_v18, %v21_v14  ;;  %v29_v25 = vadd.f32 %v28_v19, %v27_v15  ;;  %v35_v26 = vadd.f32 %v34_v20, %v33_v16  ;;  %v41_v27 = vadd.f32 %v40_v21, %v39_v17 }
   0xc   :  { %v24_v28 = vrot.slane %v23_v24, 1  ;;  %v30_v29 = vrot.slane %v29_v25, 1  ;;  %v36_v30 = vrot.slane %v35_v26, 1  ;;  %v42_v31 = vrot.slane %v41_v27, 1 }
   0xe   :  { %v25_v33 = vadd.f32 %v24_v28, %v23_v24  ;;  %v31_v34 = vadd.f32 %v30_v29, %v29_v25  ;;  %v37_v35 = vadd.f32 %v36_v30, %v35_v26  ;;  %v43_v36 = vadd.f32 %v42_v31, %v41_v27 }
  0x10   :  { %v48_v37 = vcombine.low %v25_v33, %v31_v34  ;;  %v56_v38 = vcombine.low %v37_v35, %v43_v36 }
  0x12   :  { %v55_v39 = vrot.slane %v48_v37, %v54_v32  ;;  %v63_v40 = vrot.slane %v56_v38, %v54_v32 }
  0x14   :  { %v68_v41 = vrot.slane %v63_v40, 7 }
  0x16   :  { %v70_v42 = vsel %vm69_vm0, %v68_v41, %v55_v39 }
  0x17   :  { %v72_v44 = vsel %vm71_vm1, %v68_v41, %v70_v42 }
  0x18   :  { %v74_v45 = vsel %vm73_vm2, %v68_v41, %v72_v44 }
  0x19   :  { %v76_v46 = vsel %vm75_vm3, %v68_v41, %v74_v45 }
  0x1a   :  { %v78_v47 = vadd.f32 %v76_v46, %v13_v43 }
  0x1c   :  { %79 = vst [vmem:[#allocation2] sm:$0xf] %v78_v47 }
  0x23   :  { %v83_v48 = vld [vmem:[#allocation2] sm:$0xf] }
  0x24   :  { %84 = vst [vmem:[%s113_s1] sm:$0xf] %v83_v48 }

// kernel: tsn_forward.37
= control target key start
LH: loop header
LB: loop body
LE: loop exit
PB: predicated region body
PF: predicated region fallthrough
CT: control target
= control target key end

     0   :  { %v250_v1 = vmov 0   ;;  %v175_v18 = vlaneseq  ;;  %s336_s1 = inlined_call_operand.vmem [shape: bf16[128,256], index: 1, kind: input, shape index: {}]   ;;  %s337_s0 = inlined_call_operand.vmem [shape: bf16[8,128], index: 0, kind: input, shape index: {}]   ;;  %s338_s2 = inlined_call_operand.vmem [shape: f32[1,256], index: 2, kind: input, shape index: {}]   ;;  %s339_s3 = inlined_call_operand.vmem [shape: bf16[8,256], index: 3, kind: input, shape index: {}]   ;;  %s340_s4 = inlined_call_operand.vmem [shape: bf16[8,256], index: 4, kind: output, shape index: {}]  }
   0x1   :  { %v226_v0 = vld [vmem:[%s336_s1 + $0x74] ss:$8 sps:$4 sm:$0xff]   ;;  %155 = vmatprep.mubr.bf16.mxu0 %v250_v1  ;;  %v228_v2 = vld [vmem:[%s336_s1 + $0x70] ss:$8 sps:$4 sm:$0xff]   ;;  %v229_v3 = vld [vmem:[%s336_s1 + $0x64] ss:$8 sps:$4 sm:$0xff]  }
   0x2   :  { %123 = vmatprep.subr.bf16.mxu0 %v226_v0  ;;  %v231_v4 = vld [vmem:[%s336_s1 + $0x60] ss:$8 sps:$4 sm:$0xff]   ;;  %v232_v5 = vld [vmem:[%s336_s1 + $0x54] ss:$8 sps:$4 sm:$0xff]   ;;  %v234_v6 = vld [vmem:[%s336_s1 + $0x50] ss:$8 sps:$4 sm:$0xff]  }
   0x3   :  { %124 = vmatpush1.bf16.msra.mxu0 %v228_v2  ;;  %v235_v7 = vld [vmem:[%s336_s1 + $0x44] ss:$8 sps:$4 sm:$0xff]   ;;  %v237_v8 = vld [vmem:[%s336_s1 + $0x40] ss:$8 sps:$4 sm:$0xff]   ;;  %v238_v9 = vld [vmem:[%s336_s1 + $0x34] ss:$8 sps:$4 sm:$0xff]  }
   0x4   :  { %125 = vmatprep.subr.bf16.mxu0 %v229_v3  ;;  %v240_v10 = vld [vmem:[%s336_s1 + $0x30] ss:$8 sps:$4 sm:$0xff]   ;;  %v241_v11 = vld [vmem:[%s336_s1 + $0x24] ss:$8 sps:$4 sm:$0xff]   ;;  %v243_v12 = vld [vmem:[%s336_s1 + $0x20] ss:$8 sps:$4 sm:$0xff]  }
   0x5   :  { %v244_v13 = vld [vmem:[%s336_s1 + $0x14] ss:$8 sps:$4 sm:$0xff]   ;;  %v246_v14 = vld [vmem:[%s336_s1 + $0x10] ss:$8 sps:$4 sm:$0xff]   ;;  %v247_v15 = vld [vmem:[%s336_s1 + $0x4] ss:$8 sps:$4 sm:$0xff]  }
   0x6   :  { %v249_v16 = vld [vmem:[%s336_s1] ss:$8 sps:$4 sm:$0xff]   ;;  %v176_v19 = vshrl.u32 %v175_v18, 7 }
   0x7   :  { %126 = vmatpush1.bf16.msra.mxu0 %v231_v4  ;;  %v26_v17 = vld [vmem:[%s337_s0] sm:$0xf] }
   0x8   :  { %127 = vmatprep.subr.bf16.mxu0 %v232_v5  ;;  %v177_v20 = vsub.s32 0, %v176_v19  ;;  %v173_v21 = vld [vmem:[%s338_s2] sm:$0x3]  ;;  %v181_v22 = vsub.s32 1, %v176_v19 }
   0x9   :  { %v187_v23 = vld [vmem:[%s339_s3] sm:$0xff] }
   0xa   :  { %v178_v24 = vrot.slane %v173_v21, %v177_v20  ;;  %v188_v25 = vunpack.c.l.bf16 %v187_v23  ;;  %v182_v26 = vrot.slane %v173_v21, %v181_v22  ;;  %v189_v29 = vunpack.c.h.bf16 %v187_v23 }
   0xb   :  { %128 = vmatpush1.bf16.msra.mxu0 %v234_v6 }
   0xc   :  { %129 = vmatprep.subr.bf16.mxu0 %v235_v7 }
   0xf   :  { %130 = vmatpush1.bf16.msra.mxu0 %v237_v8 }
  0x10   :  { %131 = vmatprep.subr.bf16.mxu0 %v238_v9 }
  0x13   :  { %132 = vmatpush1.bf16.msra.mxu0 %v240_v10 }
  0x14   :  { %133 = vmatprep.subr.bf16.mxu0 %v241_v11 }
  0x17   :  { %134 = vmatpush1.bf16.msra.mxu0 %v243_v12 }
  0x18   :  { %135 = vmatprep.subr.bf16.mxu0 %v244_v13 }
  0x1b   :  { %136 = vmatpush1.bf16.msra.mxu0 %v246_v14 }
  0x1c   :  { %137 = vmatprep.subr.bf16.mxu0 %v247_v15 }
  0x1f   :  { %138 = vmatpush1.bf16.msra.mxu0 %v249_v16 }
  0x22   :  { %156 = vmatmul.mubr.bf16.vlgmr.msra.gmra.mxu0 %v26_v17 }
  0xe2   :  { %v157_v27 = vpop.f32.mrf.mxu0 }
  0xe3   :  { %v185_v28 = vadd.f32 %v178_v24, %v157_v27 }
  0xe4   :  { %v159_v30 = vpop.f32.mrf.mxu0 }
  0xe5   :  { %v190_v31 = vadd.f32 %v188_v25, %v185_v28  ;;  %v186_v32 = vadd.f32 %v182_v26, %v159_v30 }
  0xe6   :  { %v161_v33 = vpop.f32.mrf.mxu0 }
  0xe7   :  { %v191_v34 = vadd.f32 %v189_v29, %v186_v32  ;;  %v192_v36 = vmax.f32 %v190_v31, 0.0 }
  0xe8   :  { %v162_v35 = vpop.f32.mrf.mxu0 }
  0xe9   :  { %v193_v37 = vmax.f32 %v191_v34, 0.0 }
  0xeb   :  { %v224_v38 = vpack.c.bf16 %v193_v37, %v192_v36 }
  0xed   :  { %202 = vst [vmem:[%s340_s4] sm:$0xff] %v224_v38 }

// kernel: tsn_forward.35
= control target key start
LH: loop header
LB: loop body
LE: loop exit
PB: predicated region body
PF: predicated region fallthrough
CT: control target
= control target key end

     0   :  { %s2353_s27 = smov 0   ;;  %s2355_s28 = smov 0   ;;  %s2747_s0 = inlined_call_operand.vmem [shape: bf16[2,4,2,128], index: 0, kind: input, shape index: {}, may-alias: {0,2,4}]   ;;  %s2748_s1 = inlined_call_operand.vmem [shape: bf16[2,4,2,128], index: 1, kind: input, shape index: {}, may-alias: {1,3,5}]   ;;  %s2749_s2 = inlined_call_operand.vmem [shape: bf16[2,4,2,128], index: 2, kind: input, shape index: {}, may-alias: {0,2,4}]   ;;  %s2750_s3 = inlined_call_operand.vmem [shape: bf16[2,4,2,128], index: 3, kind: input, shape index: {}, may-alias: {1,3,5}]   ;;  %s2751_s4 = inlined_call_operand.vmem [shape: bf16[2,4,2,128], index: 4, kind: input, shape index: {}, may-alias: {0,2,4}]   ;;  %s2752_s5 = inlined_call_operand.vmem [shape: bf16[2,4,2,128], index: 5, kind: input, shape index: {}, may-alias: {1,3,5}]   ;;  %s2753_s6 = inlined_call_operand.vmem [shape: bf16[3,3,128,128], index: 6, kind: input, shape index: {}]   ;;  %s2754_s7 = inlined_call_operand.vmem [shape: f32[1,128], index: 7, kind: input, shape index: {}]   ;;  %s2755_s8 = inlined_call_operand.vmem [shape: bf16[2,1,1,128], index: 8, kind: output, shape index: {}]  }
   0x1   :  { %s2357_s29 = smov 0  }
   0x2 LB: > { %s30_s30 = sadd.s32 1, %s2299_s28  ;;  %p1712_p0 = scmp.ge.s32.totalorder %s2303_s29, 1  ;;  %s2303_s29 = sphi %s2357_s29, %s18_s29   ;;  %s2299_s28 = sphi %s2355_s28, %s2757_s28   ;;  %s2295_s27 = sphi %s2353_s27, %s2756_s27  }
   0x3   : > { %p32_p1 = scmp.ge.s32.totalorder %s30_s30, 2  ;;  %p390_p2 = scmp.lt.s32.totalorder %s2303_s29, 3 }
   0x5   : > { %s2759_s30 = smov (%p32_p1, %s30_s30), 0  ;;  %p391_p3 = pnand %p1712_p0, %p390_p2 }
   0x6   : > { %p473_p4 = scmp.lt.s32.totalorder (!%p391_p3), %s2295_s27, 1 }
   0x7   : > { %394 = sbr.rel (%p391_p3) target bundleno = 376 (0x178), region = 52 }
   0xc   : > { %v2209_v0 = vld [vmem:[%s2753_s6 + $0x78] sm:$0xff]   ;;  %v2305_v1 = vmov 0.0   ;;  %v2211_v3 = vld [vmem:[%s2753_s6 + $0x70] sm:$0xff]   ;;  %vm2306_vm0 = vmmov 0   ;;  %v2213_v5 = vld [vmem:[%s2753_s6 + $0x68] sm:$0xff]   ;;  %s2761_s27 = smov (!%p473_p4, %s2295_s27), 1  ;;  %v773_v27 = vlaneseq }
   0xd   : > { %2002 = vmatprep.subr.bf16.mxu0 %v2305_v1  ;;  %2022 = vmatprep.subr.bf16.mxu1 %v2305_v1  ;;  %v2210_v2 = vld [vmem:[%s2753_s6 + $0x38] sm:$0xff]   ;;  %v2212_v4 = vld [vmem:[%s2753_s6 + $0x30] sm:$0xff]   ;;  %v2214_v6 = vld [vmem:[%s2753_s6 + $0x28] sm:$0xff]   ;;  %s2433_s17 = sshll.u32 %s2761_s27, 2  ;;  %v2307_v25 = vmov 1966171168   ;;  %s539_s11 = scalar_lea.vmem %s2755_s8, %s2761_s27 }
   0xe   : > { %2003 = vmatpush3.bf16.msra.mxu0 %v2209_v0  ;;  %2018 = vmatprep.mubr.msk.bf16.mxu0 %vm2306_vm0, %v2305_v1  ;;  %v2215_v7 = vld [vmem:[%s2753_s6 + $0x60] sm:$0xff]   ;;  %v2217_v9 = vld [vmem:[%s2753_s6 + $0x58] sm:$0xff]   ;;  %v2219_v11 = vld [vmem:[%s2753_s6 + $0x50] sm:$0xff]   ;;  %s488_s22 = scalar_lea.vmem %s2748_s1, %s2433_s17  ;;  %s479_s9 = scalar_lea.vmem %s2747_s0, %s2433_s17  ;;  %v771_v26 = vunpack.c.l.s4 %v2307_v25  ;;  %v774_v31 = vshrl.u32 %v773_v27, 7  ;;  %vm1559_vm1 = vcmask 1040384  }
   0xf   : > { %2023 = vmatpush3.bf16.msra.mxu1 %v2210_v2  ;;  %2004 = vmatprep.subr.bf16.mxu0 %v2305_v1  ;;  %v2216_v8 = vld [vmem:[%s2753_s6 + $0x20] sm:$0xff]   ;;  %v2218_v10 = vld [vmem:[%s2753_s6 + $0x18] sm:$0xff]   ;;  %v2220_v12 = vld [vmem:[%s2753_s6 + $0x10] sm:$0xff]   ;;  %s497_s24 = sadd.s32 1, %s2433_s17  ;;  %s519_s14 = sadd.s32 2, %s2433_s17 }
  0x10   : > { %2024 = vmatprep.subr.bf16.mxu1 %v2305_v1  ;;  %2038 = vmatprep.mubr.msk.bf16.mxu1 %vm2306_vm0, %v2305_v1  ;;  %v2221_v13 = vld [vmem:[%s2753_s6 + $0x48] sm:$0xff]   ;;  %v2223_v15 = vld [vmem:[%s2753_s6 + $0x40] sm:$0xff]   ;;  %v2225_v19 = vld [vmem:[%s2753_s6 + $0xb8] sm:$0xff]   ;;  %v772_v30 = vunpack.c.0.s8 %v771_v26  ;;  %s498_s13 = scalar_lea.vmem %s2749_s2, %s497_s24  ;;  %s520_s20 = scalar_lea.vmem %s2751_s4, %s519_s14  ;;  %vm1560_vm2 = vsmask.f32 256 }
  0x11   : > { %v2222_v14 = vld [vmem:[%s2753_s6 + $0x8] sm:$0xff]   ;;  %v2224_v16 = vld [vmem:[%s2753_s6] sm:$0xff]   ;;  %v2226_v20 = vld [vmem:[%s2753_s6 + $0xf8] sm:$0xff]   ;;  %s509_s23 = scalar_lea.vmem %s2750_s3, %s497_s24 }
  0x12   : > { %2005 = vmatpush3.bf16.msra.mxu0 %v2211_v3  ;;  %v558_v17 = vld [vmem:[%s488_s22] sm:$0x1]  ;;  %v2227_v21 = vld [vmem:[%s2753_s6 + $0xb0] sm:$0xff]   ;;  %v2229_v23 = vld [vmem:[%s2753_s6 + $0xa8] sm:$0xff]   ;;  %v2500_v34 = vsub.s32 %v772_v30, %v774_v31 }
  0x13   : > { %2025 = vmatpush3.bf16.msra.mxu1 %v2212_v4  ;;  %2006 = vmatprep.subr.bf16.mxu0 %v2305_v1  ;;  %v541_v18 = vld [vmem:[%s479_s9] sm:$0x1]  ;;  %v2228_v22 = vld [vmem:[%s2753_s6 + $0xf0] sm:$0xff]   ;;  %v2230_v24 = vld [vmem:[%s2753_s6 + $0xe8] sm:$0xff]   ;;  %s531_s9 = scalar_lea.vmem %s2752_s5, %s519_s14 }
  0x14   : > { %2026 = vmatprep.subr.bf16.mxu1 %v2305_v1  ;;  %v2231_v28 = vld [vmem:[%s2753_s6 + $0xa0] sm:$0xff]   ;;  %v2233_v32 = vld [vmem:[%s2753_s6 + $0x98] sm:$0xff]   ;;  %v2235_v35 = vld [vmem:[%s2753_s6 + $0x90] sm:$0xff]   ;;  %v776_v37 = vrot.slane %v541_v18, %v2500_v34 }
  0x15   : > { %v2232_v29 = vld [vmem:[%s2753_s6 + $0xe0] sm:$0xff]   ;;  %v2234_v33 = vld [vmem:[%s2753_s6 + $0xd8] sm:$0xff]   ;;  %v2236_v36 = vld [vmem:[%s2753_s6 + $0xd0] sm:$0xff]  }
  0x16   : > { %2007 = vmatpush3.bf16.msra.mxu0 %v2213_v5  ;;  %v2237_v38 = vld [vmem:[%s2753_s6 + $0x88] sm:$0xff]   ;;  %v783_v40 = vrot.slane %v776_v37, %v2500_v34  ;;  %v2239_v41 = vld [vmem:[%s2753_s6 + $0x80] sm:$0xff]   ;;  %v2241_v44 = vld [vmem:[%s2753_s6 + $0x138] sm:$0xff]  }
  0x17   : > { %2027 = vmatpush3.bf16.msra.mxu1 %v2214_v6  ;;  %2008 = vmatprep.subr.bf16.mxu0 %v2305_v1  ;;  %v2238_v39 = vld [vmem:[%s2753_s6 + $0xc8] sm:$0xff]   ;;  %v2240_v42 = vld [vmem:[%s2753_s6 + $0xc0] sm:$0xff]   ;;  %v2242_v46 = vld [vmem:[%s2753_s6 + $0x178] sm:$0xff]  }
  0x18   : > { %2028 = vmatprep.subr.bf16.mxu1 %v2305_v1  ;;  %v785_v43 = vshrl.u32 %v783_v40, 16  ;;  %v877_v45 = vld [vmem:[%s498_s13] sm:$0x1]  ;;  %v2243_v48 = vld [vmem:[%s2753_s6 + $0x130] sm:$0xff]   ;;  %v2245_v52 = vld [vmem:[%s2753_s6 + $0x128] sm:$0xff]  }
  0x19   : > { %v2548_v47 = vld [vmem:[%s520_s20] sm:$0x1]  ;;  %v2244_v50 = vld [vmem:[%s2753_s6 + $0x170] sm:$0xff]   ;;  %v2246_v53 = vld [vmem:[%s2753_s6 + $0x168] sm:$0xff]   ;;  %v1115_v60 = vrot.slane %v877_v45, %v2500_v34 }
  0x1a   : > { %2009 = vmatpush3.bf16.msra.mxu0 %v2215_v7  ;;  %v1454_v49 = vrot.slane %v2548_v47, %v2500_v34  ;;  %v2247_v54 = vld [vmem:[%s2753_s6 + $0x120] sm:$0xff]   ;;  %v2249_v56 = vld [vmem:[%s2753_s6 + $0x118] sm:$0xff]   ;;  %v2251_v58 = vld [vmem:[%s2753_s6 + $0x110] sm:$0xff]  }
  0x1b   : > { %2029 = vmatpush3.bf16.msra.mxu1 %v2216_v8  ;;  %2010 = vmatprep.subr.bf16.mxu0 %v2305_v1  ;;  %v2248_v55 = vld [vmem:[%s2753_s6 + $0x160] sm:$0xff]   ;;  %v2250_v57 = vld [vmem:[%s2753_s6 + $0x158] sm:$0xff]   ;;  %v2252_v59 = vld [vmem:[%s2753_s6 + $0x150] sm:$0xff]   ;;  %v1122_v63 = vrot.slane %v1115_v60, %v2500_v34 }
  0x1c   : > { %2030 = vmatprep.subr.bf16.mxu1 %v2305_v1  ;;  %v2563_v51 = vrot.slane %v1454_v49, %v2500_v34  ;;  %v2253_v61 = vld [vmem:[%s2753_s6 + $0x108] sm:$0xff]   ;;  %v2255_v0 = vld [vmem:[%s2753_s6 + $0x100] sm:$0xff]   ;;  %v2257_v5 = vld [vmem:[%s2753_s6 + $0x1b8] sm:$0xff]  }
  0x1d   : > { %v2254_v62 = vld [vmem:[%s2753_s6 + $0x148] sm:$0xff]   ;;  %v2256_v2 = vld [vmem:[%s2753_s6 + $0x140] sm:$0xff]   ;;  %v1124_v3 = vshrl.u32 %v1122_v63, 16  ;;  %v2258_v6 = vld [vmem:[%s2753_s6 + $0x1f8] sm:$0xff]  }
  0x1e   : > { %2011 = vmatpush3.bf16.msra.mxu0 %v2217_v9  ;;  %v984_v4 = vld [vmem:[%s509_s23] sm:$0x1]  ;;  %v2259_v7 = vld [vmem:[%s2753_s6 + $0x1b0] sm:$0xff]   ;;  %v2261_v9 = vld [vmem:[%s2753_s6 + $0x1a8] sm:$0xff]   ;;  %v1463_v30 = vshrl.u32 %v2563_v51, 16 }
  0x1f   : > { %2031 = vmatpush3.bf16.msra.mxu1 %v2218_v10  ;;  %2012 = vmatprep.subr.bf16.mxu0 %v2305_v1  ;;  %v2260_v8 = vld [vmem:[%s2753_s6 + $0x1f0] sm:$0xff]   ;;  %v2262_v10 = vld [vmem:[%s2753_s6 + $0x1e8] sm:$0xff]   ;;  %v2276_v25 = vld [vmem:[%s2753_s6 + $0x220] sm:$0xff]  }
  0x20   : > { %2032 = vmatprep.subr.bf16.mxu1 %v2305_v1  ;;  %v2277_v26 = vld [vmem:[%s2753_s6 + $0x218] sm:$0xff]   ;;  %v2278_v27 = vld [vmem:[%s2753_s6 + $0x210] sm:$0xff]   ;;  %vm1561_vm3 = vmand %vm1559_vm1, %vm1560_vm2 }
  0x22   : > { %2013 = vmatpush3.bf16.msra.mxu0 %v2219_v11  ;;  %v2263_v11 = vld [vmem:[%s2753_s6 + $0x1a0] sm:$0xff]  }
  0x23   : > { %2033 = vmatpush3.bf16.msra.mxu1 %v2220_v12  ;;  %2014 = vmatprep.subr.bf16.mxu0 %v2305_v1  ;;  %v2264_v12 = vld [vmem:[%s2753_s6 + $0x1e0] sm:$0xff]  }
  0x24   : > { %2034 = vmatprep.subr.bf16.mxu1 %v2305_v1 }
  0x26   : > { %2015 = vmatpush3.bf16.msra.mxu0 %v2221_v13  ;;  %v2265_v13 = vld [vmem:[%s2753_s6 + $0x198] sm:$0xff]  }
  0x27   : > { %2035 = vmatpush3.bf16.msra.mxu1 %v2222_v14  ;;  %2016 = vmatprep.subr.bf16.mxu0 %v2305_v1  ;;  %v2266_v14 = vld [vmem:[%s2753_s6 + $0x1d8] sm:$0xff]  }
  0x28   : > { %2036 = vmatprep.subr.bf16.mxu1 %v2305_v1 }
  0x2a   : > { %2017 = vmatpush3.bf16.msra.mxu0 %v2223_v15  ;;  %v2267_v15 = vld [vmem:[%s2753_s6 + $0x190] sm:$0xff]  }
  0x2b   : > { %2037 = vmatpush3.bf16.msra.mxu1 %v2224_v16  ;;  %2042 = vmatprep.subr.bf16.mxu0 %v2305_v1  ;;  %v2268_v16 = vld [vmem:[%s2753_s6 + $0x1d0] sm:$0xff]  }
  0x2c   : > { %2062 = vmatprep.subr.bf16.mxu1 %v2305_v1 }
  0x2d   : > { %2019 = vmatmul.mubr.bf16.vlgmr.msra.gmra.mxu0 %v558_v17  ;;  %v2269_v17 = vld [vmem:[%s2753_s6 + $0x188] sm:$0xff]  }
  0x2e   : > { %2039 = vmatmul.mubr.bf16.vlgmr.msra.gmra.mxu1 %v541_v18  ;;  %2043 = vmatpush3.bf16.msra.mxu0 %v2225_v19  ;;  %v2270_v18 = vld [vmem:[%s2753_s6 + $0x1c8] sm:$0xff]   ;;  %v2271_v19 = vld [vmem:[%s2753_s6 + $0x180] sm:$0xff]  }
  0x2f   : > { %2063 = vmatpush3.bf16.msra.mxu1 %v2226_v20  ;;  %2044 = vmatprep.subr.bf16.mxu0 %v2305_v1  ;;  %v2272_v20 = vld [vmem:[%s2753_s6 + $0x1c0] sm:$0xff]  }
  0x30   : > { %2064 = vmatprep.subr.bf16.mxu1 %v2305_v1  ;;  %2058 = vmatprep.mubr.msk.bf16.mxu0 %vm2306_vm0, %v2305_v1 }
  0x31   : > { %2078 = vmatprep.mubr.msk.bf16.mxu1 %vm2306_vm0, %v2305_v1 }
  0x32   : > { %2045 = vmatpush3.bf16.msra.mxu0 %v2227_v21  ;;  %v2273_v21 = vld [vmem:[%s2753_s6 + $0x238] sm:$0xff]  }
  0x33   : > { %2065 = vmatpush3.bf16.msra.mxu1 %v2228_v22  ;;  %2046 = vmatprep.subr.bf16.mxu0 %v2305_v1  ;;  %v1323_v22 = vld [vmem:[%s531_s9] sm:$0x1] }
  0x34   : > { %2066 = vmatprep.subr.bf16.mxu1 %v2305_v1 }
  0x36   : > { %2047 = vmatpush3.bf16.msra.mxu0 %v2229_v23  ;;  %v2274_v23 = vld [vmem:[%s2753_s6 + $0x230] sm:$0xff]  }
  0x37   : > { %2067 = vmatpush3.bf16.msra.mxu1 %v2230_v24  ;;  %2048 = vmatprep.subr.bf16.mxu0 %v2305_v1  ;;  %v2275_v24 = vld [vmem:[%s2753_s6 + $0x228] sm:$0xff]  }
  0x38   : > { %2068 = vmatprep.subr.bf16.mxu1 %v2305_v1 }
  0x3a   : > { %2049 = vmatpush3.bf16.msra.mxu0 %v2231_v28  ;;  %v2279_v28 = vld [vmem:[%s2753_s6 + $0x208] sm:$0xff]  }
  0x3b   : > { %2069 = vmatpush3.bf16.msra.mxu1 %v2232_v29  ;;  %2050 = vmatprep.subr.bf16.mxu0 %v2305_v1  ;;  %v2280_v29 = vld [vmem:[%s2753_s6 + $0x200] sm:$0xff]  }
  0x3c   : > { %2070 = vmatprep.subr.bf16.mxu1 %v2305_v1 }
  0x3e   : > { %2051 = vmatpush3.bf16.msra.mxu0 %v2233_v32 }
  0x3f   : > { %2071 = vmatpush3.bf16.msra.mxu1 %v2234_v33  ;;  %2052 = vmatprep.subr.bf16.mxu0 %v2305_v1 }
  0x40   : > { %2072 = vmatprep.subr.bf16.mxu1 %v2305_v1 }
  0x42   : > { %2053 = vmatpush3.bf16.msra.mxu0 %v2235_v35 }
  0x43   : > { %2073 = vmatpush3.bf16.msra.mxu1 %v2236_v36  ;;  %2054 = vmatprep.subr.bf16.mxu0 %v2305_v1 }
  0x44   : > { %2074 = vmatprep.subr.bf16.mxu1 %v2305_v1 }
  0x46   : > { %2055 = vmatpush3.bf16.msra.mxu0 %v2237_v38 }
  0x47   : > { %2075 = vmatpush3.bf16.msra.mxu1 %v2238_v39  ;;  %2056 = vmatprep.subr.bf16.mxu0 %v2305_v1 }
  0x48   : > { %2076 = vmatprep.subr.bf16.mxu1 %v2305_v1 }
  0x4a   : > { %2057 = vmatpush3.bf16.msra.mxu0 %v2239_v41 }
  0x4b   : > { %2077 = vmatpush3.bf16.msra.mxu1 %v2240_v42  ;;  %2082 = vmatprep.subr.bf16.mxu0 %v2305_v1 }
  0x4c   : > { %2102 = vmatprep.subr.bf16.mxu1 %v2305_v1 }
  0x4d   : > { %2059 = vmatmul.mubr.bf16.vlgmr.msra.gmra.mxu0 %v785_v43 }
  0x4e   : > { %2083 = vmatpush3.bf16.msra.mxu0 %v2241_v44  ;;  %2079 = vmatmul.mubr.bf16.vlgmr.msra.gmra.mxu1 %v877_v45 }
  0x4f   : > { %2103 = vmatpush3.bf16.msra.mxu1 %v2242_v46  ;;  %2084 = vmatprep.subr.bf16.mxu0 %v2305_v1 }
  0x50   : > { %2104 = vmatprep.subr.bf16.mxu1 %v2305_v1  ;;  %2098 = vmatprep.mubr.msk.bf16.mxu0 %vm2306_vm0, %v2305_v1 }
  0x51   : > { %2118 = vmatprep.mubr.msk.bf16.mxu1 %vm2306_vm0, %v2305_v1 }
  0x52   : > { %2085 = vmatpush3.bf16.msra.mxu0 %v2243_v48 }
  0x53   : > { %2105 = vmatpush3.bf16.msra.mxu1 %v2244_v50  ;;  %2086 = vmatprep.subr.bf16.mxu0 %v2305_v1 }
  0x54   : > { %2106 = vmatprep.subr.bf16.mxu1 %v2305_v1 }
  0x56   : > { %2087 = vmatpush3.bf16.msra.mxu0 %v2245_v52 }
  0x57   : > { %2107 = vmatpush3.bf16.msra.mxu1 %v2246_v53  ;;  %2088 = vmatprep.subr.bf16.mxu0 %v2305_v1 }
  0x58   : > { %2108 = vmatprep.subr.bf16.mxu1 %v2305_v1 }
  0x5a   : > { %2089 = vmatpush3.bf16.msra.mxu0 %v2247_v54 }
  0x5b   : > { %2109 = vmatpush3.bf16.msra.mxu1 %v2248_v55  ;;  %2090 = vmatprep.subr.bf16.mxu0 %v2305_v1 }
  0x5c   : > { %2110 = vmatprep.subr.bf16.mxu1 %v2305_v1 }
  0x5e   : > { %2091 = vmatpush3.bf16.msra.mxu0 %v2249_v56 }
  0x5f   : > { %2111 = vmatpush3.bf16.msra.mxu1 %v2250_v57  ;;  %2092 = vmatprep.subr.bf16.mxu0 %v2305_v1 }
  0x60   : > { %2112 = vmatprep.subr.bf16.mxu1 %v2305_v1 }
  0x62   : > { %2093 = vmatpush3.bf16.msra.mxu0 %v2251_v58 }
  0x63   : > { %2113 = vmatpush3.bf16.msra.mxu1 %v2252_v59  ;;  %2094 = vmatprep.subr.bf16.mxu0 %v2305_v1 }
  0x64   : > { %2114 = vmatprep.subr.bf16.mxu1 %v2305_v1 }
  0x66   : > { %2095 = vmatpush3.bf16.msra.mxu0 %v2253_v61 }
  0x67   : > { %2115 = vmatpush3.bf16.msra.mxu1 %v2254_v62  ;;  %2096 = vmatprep.subr.bf16.mxu0 %v2305_v1 }
  0x68   : > { %2116 = vmatprep.subr.bf16.mxu1 %v2305_v1 }
  0x6a   : > { %2097 = vmatpush3.bf16.msra.mxu0 %v2255_v0 }
  0x6b   : > { %2117 = vmatpush3.bf16.msra.mxu1 %v2256_v2  ;;  %2122 = vmatprep.subr.bf16.mxu0 %v2305_v1 }
  0x6c   : > { %2142 = vmatprep.subr.bf16.mxu1 %v2305_v1 }
  0x6d   : > { %2099 = vmatmul.mubr.bf16.vlgmr.msra.gmra.mxu0 %v984_v4 }
  0x6e   : > { %2123 = vmatpush3.bf16.msra.mxu0 %v2257_v5  ;;  %2119 = vmatmul.mubr.bf16.vlgmr.msra.gmra.mxu1 %v1124_v3 }
  0x6f   : > { %2143 = vmatpush3.bf16.msra.mxu1 %v2258_v6  ;;  %2124 = vmatprep.subr.bf16.mxu0 %v2305_v1 }
  0x70   : > { %2144 = vmatprep.subr.bf16.mxu1 %v2305_v1  ;;  %2138 = vmatprep.mubr.msk.bf16.mxu0 %vm2306_vm0, %v2305_v1 }
  0x71   : > { %2158 = vmatprep.mubr.msk.bf16.mxu1 %vm2306_vm0, %v2305_v1 }
  0x72   : > { %2125 = vmatpush3.bf16.msra.mxu0 %v2259_v7  ;;  %v1555_v7 = vld [vmem:[%s2754_s7] sm:$0x1] }
  0x73   : > { %2145 = vmatpush3.bf16.msra.mxu1 %v2260_v8  ;;  %2126 = vmatprep.subr.bf16.mxu0 %v2305_v1 }
  0x74   : > { %2146 = vmatprep.subr.bf16.mxu1 %v2305_v1 }
  0x76   : > { %2127 = vmatpush3.bf16.msra.mxu0 %v2261_v9 }
  0x77   : > { %2147 = vmatpush3.bf16.msra.mxu1 %v2262_v10  ;;  %2128 = vmatprep.subr.bf16.mxu0 %v2305_v1 }
  0x78   : > { %2148 = vmatprep.subr.bf16.mxu1 %v2305_v1 }
  0x7a   : > { %2129 = vmatpush3.bf16.msra.mxu0 %v2263_v11 }
  0x7b   : > { %2149 = vmatpush3.bf16.msra.mxu1 %v2264_v12  ;;  %2130 = vmatprep.subr.bf16.mxu0 %v2305_v1 }
  0x7c   : > { %2150 = vmatprep.subr.bf16.mxu1 %v2305_v1 }
  0x7e   : > { %2131 = vmatpush3.bf16.msra.mxu0 %v2265_v13  ;;  %v1562_v13 = vld [vmem:[%s539_s11] sm:$0x1] }
  0x7f   : > { %2151 = vmatpush3.bf16.msra.mxu1 %v2266_v14  ;;  %2132 = vmatprep.subr.bf16.mxu0 %v2305_v1 }
  0x80   : > { %2152 = vmatprep.subr.bf16.mxu1 %v2305_v1 }
  0x82   : > { %2133 = vmatpush3.bf16.msra.mxu0 %v2267_v15 }
  0x83   : > { %2153 = vmatpush3.bf16.msra.mxu1 %v2268_v16  ;;  %2134 = vmatprep.subr.bf16.mxu0 %v2305_v1 }
  0x84   : > { %2154 = vmatprep.subr.bf16.mxu1 %v2305_v1 }
  0x86   : > { %2135 = vmatpush3.bf16.msra.mxu0 %v2269_v17 }
  0x87   : > { %2155 = vmatpush3.bf16.msra.mxu1 %v2270_v18  ;;  %2136 = vmatprep.subr.bf16.mxu0 %v2305_v1 }
  0x88   : > { %2156 = vmatprep.subr.bf16.mxu1 %v2305_v1 }
  0x8a   : > { %2137 = vmatpush3.bf16.msra.mxu0 %v2271_v19 }
  0x8b   : > { %2157 = vmatpush3.bf16.msra.mxu1 %v2272_v20  ;;  %2162 = vmatprep.subr.bf16.mxu0 %v2305_v1 }
  0x8d   : > { %2139 = vmatmul.mubr.bf16.vlgmr.msra.gmra.mxu0 %v2548_v47 }
  0x8e   : > { %2163 = vmatpush3.bf16.msra.mxu0 %v2273_v21  ;;  %2159 = vmatmul.mubr.bf16.vlgmr.msra.gmra.mxu1 %v1323_v22 }
  0x8f   : > { %2164 = vmatprep.subr.bf16.mxu0 %v2305_v1  ;;  %2178 = vmatprep.mubr.msk.bf16.mxu0 %vm2306_vm0, %v2305_v1 }
  0x92   : > { %2165 = vmatpush3.bf16.msra.mxu0 %v2274_v23 }
  0x93   : > { %2166 = vmatprep.subr.bf16.mxu0 %v2305_v1 }
  0x96   : > { %2167 = vmatpush3.bf16.msra.mxu0 %v2275_v24 }
  0x97   : > { %2168 = vmatprep.subr.bf16.mxu0 %v2305_v1 }
  0x9a   : > { %2169 = vmatpush3.bf16.msra.mxu0 %v2276_v25 }
  0x9b   : > { %2170 = vmatprep.subr.bf16.mxu0 %v2305_v1 }
  0x9e   : > { %2171 = vmatpush3.bf16.msra.mxu0 %v2277_v26 }
  0x9f   : > { %2172 = vmatprep.subr.bf16.mxu0 %v2305_v1 }
  0xa2   : > { %2173 = vmatpush3.bf16.msra.mxu0 %v2278_v27 }
  0xa3   : > { %2174 = vmatprep.subr.bf16.mxu0 %v2305_v1 }
  0xa6   : > { %2175 = vmatpush3.bf16.msra.mxu0 %v2279_v28 }
  0xa7   : > { %2176 = vmatprep.subr.bf16.mxu0 %v2305_v1 }
  0xaa   : > { %2177 = vmatpush3.bf16.msra.mxu0 %v2280_v29 }
  0xad   : > { %2179 = vmatmul.mubr.bf16.vlgmr.msra.gmra.mxu0 %v1463_v30 }
  0xed   : > { %v658_v31 = vpop.f32.mrf.mxu0 }
  0xee   : > { %v746_v32 = vpop.f32.mrf.mxu1 }
  0xef   : > { %v747_v33 = vadd.f32 %v746_v32, %v658_v31  ;;  %v2020_v34 = vpop.f32.mrf.mxu0 }
  0xf0   : > { %v2040_v35 = vpop.f32.mrf.mxu1 }
  0xf1   : > { %v661_v36 = vpop.f32.mrf.mxu0 }
  0xf2   : > { %v749_v37 = vpop.f32.mrf.mxu1 }
  0xf3   : > { %v2021_v38 = vpop.f32.mrf.mxu0 }
  0xf4   : > { %v2041_v39 = vpop.f32.mrf.mxu1 }
 0x10d   : > { %v870_v40 = vpop.f32.mrf.mxu0 }
 0x10e   : > { %v876_v41 = vadd.f32 %v870_v40, %v747_v33  ;;  %v977_v42 = vpop.f32.mrf.mxu1 }
 0x10f   : > { %v2060_v43 = vpop.f32.mrf.mxu0 }
 0x110   : > { %v983_v44 = vadd.f32 %v977_v42, %v876_v41  ;;  %v2080_v45 = vpop.f32.mrf.mxu1 }
 0x111   : > { %v873_v1 = vpop.f32.mrf.mxu0 }
 0x112   : > { %v980_v46 = vpop.f32.mrf.mxu1 }
 0x113   : > { %v2061_v47 = vpop.f32.mrf.mxu0 }
 0x114   : > { %v2081_v48 = vpop.f32.mrf.mxu1 }
 0x12d   : > { %v1084_v49 = vpop.f32.mrf.mxu0 }
 0x12e   : > { %v1209_v50 = vpop.f32.mrf.mxu1  ;;  %v1090_v2 = vadd.f32 %v1084_v49, %v983_v44 }
 0x12f   : > { %v2100_v51 = vpop.f32.mrf.mxu0 }
 0x130   : > { %v2120_v52 = vpop.f32.mrf.mxu1  ;;  %v1215_v3 = vadd.f32 %v1209_v50, %v1090_v2 }
 0x131   : > { %v1087_v53 = vpop.f32.mrf.mxu0 }
 0x132   : > { %v1212_v54 = vpop.f32.mrf.mxu1 }
 0x133   : > { %v2101_v55 = vpop.f32.mrf.mxu0 }
 0x134   : > { %v2121_v56 = vpop.f32.mrf.mxu1 }
 0x14d   : > { %v1316_v57 = vpop.f32.mrf.mxu0 }
 0x14e   : > { %v1423_v58 = vpop.f32.mrf.mxu1  ;;  %v1322_v4 = vadd.f32 %v1316_v57, %v1215_v3 }
 0x14f   : > { %v2140_v59 = vpop.f32.mrf.mxu0 }
 0x150   : > { %v2160_v60 = vpop.f32.mrf.mxu1  ;;  %v1429_v5 = vadd.f32 %v1423_v58, %v1322_v4 }
 0x151   : > { %v1319_v61 = vpop.f32.mrf.mxu0 }
 0x152   : > { %v1426_v62 = vpop.f32.mrf.mxu1 }
 0x153   : > { %v2141_v63 = vpop.f32.mrf.mxu0 }
 0x154   : > { %v2161_v0 = vpop.f32.mrf.mxu1 }
 0x16d   : > { %v1548_v6 = vpop.f32.mrf.mxu0 }
 0x16e   : > { %v1554_v8 = vadd.f32 %v1548_v6, %v1429_v5 }
 0x16f   : > { %v2180_v9 = vpop.f32.mrf.mxu0 }
 0x170   : > { %v1556_v10 = vadd.f32 %v1555_v7, %v1554_v8 }
 0x171   : > { %v1551_v11 = vpop.f32.mrf.mxu0 }
 0x172   : > { %v1557_v12 = vmax.f32 %v1556_v10, 0.0 }
 0x173   : > { %v2181_v14 = vpop.f32.mrf.mxu0 }
 0x174   : > { %v1558_v15 = vpack.c.bf16 %v1557_v12, %v1557_v12 }
 0x176   : > { %v1563_v16 = vsel %vm1561_vm3, %v1558_v15, %v1562_v13 }
 0x177   : > { %1564 = vst [vmem:[%s539_s11] sm:$0x1] %v1563_v16 }
 0x178 PF: > { %s18_s29 = sadd.s32 1, %s2303_s29   ;;  %s2756_s27 = smov %s2299_s28 }
 0x179   : > { %p15_p5 = scmp.ge.s32.totalorder %s18_s29, 4   ;;  %s2757_s28 = smov %s2759_s30 }
 0x17b   :  { %17 = sbr.rel (!%p15_p5) target bundleno = 2 (0x2), region = 105 }

// kernel: tsn_forward.39
= control target key start
LH: loop header
LB: loop body
LE: loop exit
PB: predicated region body
PF: predicated region fallthrough
CT: control target
= control target key end

     0   :  { %s352_s1 = inlined_call_operand.vmem [shape: bf16[256,128], index: 1, kind: input, shape index: {}]   ;;  %s353_s0 = inlined_call_operand.vmem [shape: bf16[8,256], index: 0, kind: input, shape index: {}]   ;;  %s354_s2 = inlined_call_operand.vmem [shape: f32[1,128], index: 2, kind: input, shape index: {}]   ;;  %s355_s3 = inlined_call_operand.vmem [shape: f32[8,128], index: 3, kind: output, shape index: {}]  }
   0x1   :  { %v257_v0 = vld [vmem:[%s352_s1 + $0x78] sm:$0xff]   ;;  %v259_v2 = vld [vmem:[%s352_s1 + $0x70] sm:$0xff]   ;;  %v261_v4 = vld [vmem:[%s352_s1 + $0x68] sm:$0xff]  }
   0x2   :  { %v258_v1 = vld [vmem:[%s352_s1 + $0x38] sm:$0xff]   ;;  %235 = vmatprep.subr.bf16.mxu0 %v257_v0  ;;  %v260_v3 = vld [vmem:[%s352_s1 + $0x30] sm:$0xff]   ;;  %v262_v5 = vld [vmem:[%s352_s1 + $0x28] sm:$0xff]  }
   0x3   :  { %236 = vmatpush3.bf16.msra.mxu0 %v258_v1  ;;  %v263_v6 = vld [vmem:[%s352_s1 + $0x60] sm:$0xff]   ;;  %v265_v8 = vld [vmem:[%s352_s1 + $0x58] sm:$0xff]   ;;  %v267_v10 = vld [vmem:[%s352_s1 + $0x50] sm:$0xff]  }
   0x4   :  { %237 = vmatprep.subr.bf16.mxu0 %v259_v2  ;;  %v264_v7 = vld [vmem:[%s352_s1 + $0x20] sm:$0xff]   ;;  %v266_v9 = vld [vmem:[%s352_s1 + $0x18] sm:$0xff]   ;;  %v268_v13 = vld [vmem:[%s352_s1 + $0x10] sm:$0xff]  }
   0x5   :  { %v21_v11 = vld [vmem:[%s353_s0] sm:$0xff]  ;;  %v269_v14 = vld [vmem:[%s352_s1 + $0x48] sm:$0xff]  }
   0x6   :  { %v217_v12 = vcombine.high %v21_v11, %v21_v11  ;;  %v270_v15 = vld [vmem:[%s352_s1 + $0x8] sm:$0xff]   ;;  %v271_v16 = vld [vmem:[%s352_s1 + $0x40] sm:$0xff]   ;;  %v216_v18 = vcombine.low %v21_v11, %v21_v11 }
   0x7   :  { %238 = vmatpush3.bf16.msra.mxu0 %v260_v3  ;;  %v272_v17 = vld [vmem:[%s352_s1] sm:$0xff]  }
   0x8   :  { %239 = vmatprep.subr.bf16.mxu0 %v261_v4  ;;  %189 = vmatprep.mubr.bf16.mxu0 %v217_v12  ;;  %v234_v21 = vld [vmem:[%s354_s2] ss:$0 sm:$0xff] }
   0xb   :  { %240 = vmatpush3.bf16.msra.mxu0 %v262_v5 }
   0xc   :  { %241 = vmatprep.subr.bf16.mxu0 %v263_v6 }
   0xf   :  { %242 = vmatpush3.bf16.msra.mxu0 %v264_v7 }
  0x10   :  { %243 = vmatprep.subr.bf16.mxu0 %v265_v8 }
  0x13   :  { %244 = vmatpush3.bf16.msra.mxu0 %v266_v9 }
  0x14   :  { %245 = vmatprep.subr.bf16.mxu0 %v267_v10 }
  0x17   :  { %246 = vmatpush3.bf16.msra.mxu0 %v268_v13 }
  0x18   :  { %247 = vmatprep.subr.bf16.mxu0 %v269_v14 }
  0x1b   :  { %248 = vmatpush3.bf16.msra.mxu0 %v270_v15 }
  0x1c   :  { %249 = vmatprep.subr.bf16.mxu0 %v271_v16 }
  0x1f   :  { %250 = vmatpush3.bf16.msra.mxu0 %v272_v17 }
  0x22   :  { %190 = vmatmul.mubr.bf16.vlgmr.msra.gmra.mxu0 %v216_v18 }
  0xe2   :  { %v251_v19 = vpop.f32.mrf.mxu0 }
  0xe4   :  { %v252_v20 = vpop.f32.mrf.mxu0 }
  0xe5   :  { %v253_v22 = vadd.f32 %v252_v20, %v251_v19 }
  0xe6   :  { %v254_v23 = vpop.f32.mrf.mxu0 }
  0xe7   :  { %v210_v24 = vadd.f32 %v253_v22, %v234_v21 }
  0xe8   :  { %v255_v25 = vpop.f32.mrf.mxu0 }
  0xe9   :  { %211 = vst [vmem:[%s355_s3] sm:$0xff] %v210_v24 }

</bundles_post_ra>
